<compile_context>
chip_gen: v7x
topology: tpu7x:2x2x1
jax: 0.10.0
libtpu: 0.0.40
codegen_flags: <defaults>
</compile_context>

<pallas_src>
import functools

import numpy as np
import jax
import jax.numpy as jnp
from jax.experimental import pallas as pl
from jax.experimental.pallas import tpu as pltpu

BN_EPS = 1e-5
# (kernel_size, stride) of the four MaxPool1d layers.
POOL_CFG = [(2, 2), (2, 2), (4, 4), (16, 1)]
_HI = jax.lax.Precision.HIGHEST


# ---------------------------------------------------------------------------
# Fused Pallas kernel: 4 x (Conv1d + BN(eval) + ReLU + MaxPool1d) + Linear
# ---------------------------------------------------------------------------
def fused_cnn_kernel(x_ref,
                     w1_ref, s1_ref, w2_ref, s2_ref,
                     w3_ref, s3_ref, w4_ref, s4_ref,
                     sel1_ref, sel2_ref, sel3_ref,
                     wfc_ref, bfc_ref,
                     o_ref,
                     xp1, cols1, xp2, cols2, xp3, cols3, xp4, cols4,
                     *, layer_cfg):
    w_refs = (w1_ref, w2_ref, w3_ref, w4_ref)
    s_refs = (s1_ref, s2_ref, s3_ref, s4_ref)
    sel_refs = (sel1_ref, sel2_ref, sel3_ref, None)
    xp_refs = (xp1, xp2, xp3, xp4)
    cols_refs = (cols1, cols2, cols3, cols4)

    y = x_ref[0]                                  # (256, 1) channels-last sample

    for li, (L, Cin, K, pool, stride) in enumerate(layer_cfg):
        pad = (K - 1) // 2
        xp_ref = xp_refs[li]
        cols_ref = cols_refs[li]

        # --- Conv1d('same') + folded BatchNorm + ReLU ---------------------
        # Stage the zero-padded input and the im2col matrix in VMEM scratch,
        # then do ONE MXU matmul with contraction depth K*Cin.
        xp_ref[0:pad, :] = jnp.zeros((pad, Cin), jnp.float32)
        xp_ref[pad:pad + L, :] = y
        xp_ref[pad + L:pad + L + pad, :] = jnp.zeros((pad, Cin), jnp.float32)
        for k in range(K):
            cols_ref[:, k * Cin:(k + 1) * Cin] = xp_ref[k:k + L, :]
        y = jnp.maximum(
            jnp.dot(cols_ref[...], w_refs[li][...], precision=_HI,
                    preferred_element_type=jnp.float32) + s_refs[li][...],
            0.0)

        # --- MaxPool1d(pool, stride), in registers ------------------------
        if sel_refs[li] is None:
            # Last pool: window == length -> full cross-sublane reduction.
            y = jnp.max(y, axis=0, keepdims=True)
        else:
            zlen = L - pool + 1
            z = y[0:zlen, :]
            for j in range(1, pool):              # running max over the window
                z = jnp.maximum(z, y[j:j + zlen, :])
            # Strided row pick (every `stride`-th row) as one 0/1 MXU matmul.
            # Exact because z >= 0 (post-ReLU) and 0 * x == 0.
            y = jnp.dot(sel_refs[li][...], z, precision=_HI,
                        preferred_element_type=jnp.float32)

    # --- classifier --------------------------------------------------------
    logits = jnp.dot(y, wfc_ref[...], precision=_HI,
                     preferred_element_type=jnp.float32) + bfc_ref[...]
    o_ref[0] = logits.astype(o_ref.dtype)


# ---------------------------------------------------------------------------
# Wrapper: BN folding, pool-selection constants, pallas_call plumbing
# ---------------------------------------------------------------------------
def _const_map(ndim):
    return lambda b: (0,) * ndim


@jax.jit
def forward(x_ncl, conv_params, w_fc, b_fc):
    """PyTorch-equivalent forward; x_ncl is (B, 1, L) with L == 256."""
    B, Cin0, L = x_ncl.shape
    num_classes = w_fc.shape[1]
    x = jnp.transpose(x_ncl, (0, 2, 1)).astype(jnp.float32)      # (B, L, 1)

    # Static per-layer config: (input_length, Cin, K, pool, pool_stride).
    layer_cfg = []
    l = L
    for p, (pool, stride) in zip(conv_params, POOL_CFG):
        K, Cin, _ = p["w"].shape
        layer_cfg.append((l, Cin, K, pool, stride))
        l = (l - pool) // stride + 1
    layer_cfg = tuple(layer_cfg)

    # Fold eval-mode BatchNorm: scale into the conv weights, shift into a
    # per-channel add (done once, outside the kernel).
    flat_ws, shifts = [], []
    for p in conv_params:
        K, Cin, Cout = p["w"].shape
        inv = p["gamma"] / jnp.sqrt(p["var"] + BN_EPS)
        flat_ws.append((p["w"] * inv).reshape(K * Cin, Cout).astype(jnp.float32))
        shifts.append((p["beta"] + (p["b"] - p["mean"]) * inv)
                      .reshape(1, Cout).astype(jnp.float32))

    # 0/1 row-selection matrices for the strided part of max-pools 1..3
    # (compile-time constants).
    sels = []
    for (L_i, _, _, pool_i, stride_i) in layer_cfg[:3]:
        n_out = (L_i - pool_i) // stride_i + 1
        zlen = L_i - pool_i + 1
        S = np.zeros((n_out, zlen), np.float32)
        S[np.arange(n_out), np.arange(n_out) * stride_i] = 1.0
        sels.append(jnp.asarray(S))

    wfc = w_fc.astype(jnp.float32)
    bfc = b_fc.reshape(1, num_classes).astype(jnp.float32)

    args = [x,
            flat_ws[0], shifts[0], flat_ws[1], shifts[1],
            flat_ws[2], shifts[2], flat_ws[3], shifts[3],
            sels[0], sels[1], sels[2], wfc, bfc]

    in_specs = [pl.BlockSpec((1, L, Cin0), lambda b: (b, 0, 0))]
    in_specs += [pl.BlockSpec(a.shape, _const_map(a.ndim)) for a in args[1:]]

    # Tiny VMEM staging buffers: padded input + im2col matrix per layer.
    scratch_shapes = []
    for (L_i, Cin_i, K_i, _, _) in layer_cfg:
        scratch_shapes.append(pltpu.VMEM((L_i + K_i - 1, Cin_i), jnp.float32))
        scratch_shapes.append(pltpu.VMEM((L_i, K_i * Cin_i), jnp.float32))

    out = pl.pallas_call(
        functools.partial(fused_cnn_kernel, layer_cfg=layer_cfg),
        out_shape=jax.ShapeDtypeStruct((B, 1, num_classes), jnp.float32),
        grid=(B,),                                   # one sample per grid step
        in_specs=in_specs,
        out_specs=pl.BlockSpec((1, 1, num_classes), lambda b: (b, 0, 0)),
        scratch_shapes=scratch_shapes,
        compiler_params=pltpu.CompilerParams(
            # Samples are independent -> sharded across TensorCores on v7x;
            # on v5e/v6e this is a cheap 2-step serial grid.
            dimension_semantics=("parallel",)),
    )(*args)
    return out[:, 0, :]


# ---------------------------------------------------------------------------
# Deterministic parameter init + pure-JAX reference
# ---------------------------------------------------------------------------
def init_conv_layer(key, K, Cin, Cout):
    kw, kb, kg, kbe, km, kv = jax.random.split(key, 6)
    bound = 1.0 / (Cin * K) ** 0.5
    return dict(
        w=jax.random.uniform(kw, (K, Cin, Cout), jnp.float32, -bound, bound),
        b=jax.random.uniform(kb, (Cout,), jnp.float32, -bound, bound),
        gamma=1.0 + 0.1 * jax.random.normal(kg, (Cout,), jnp.float32),
        beta=0.1 * jax.random.normal(kbe, (Cout,), jnp.float32),
        mean=0.1 * jax.random.normal(km, (Cout,), jnp.float32),
        var=jax.random.uniform(kv, (Cout,), jnp.float32, 0.5, 1.5),
    )


def ref_forward(x_ncl, conv_params, w_fc, b_fc):
    """Plain-JAX reference with identical semantics (verification only)."""
    x = jnp.transpose(x_ncl, (0, 2, 1)).astype(jnp.float32)
    for p, (pool, stride) in zip(conv_params, POOL_CFG):
        K = p["w"].shape[0]
        pad = (K - 1) // 2
        L = x.shape[1]
        xp = jnp.pad(x, ((0, 0), (pad, pad), (0, 0)))
        y = sum(jnp.einsum("bli,io->blo", xp[:, k:k + L, :], p["w"][k],
                           precision=_HI)
                for k in range(K)) + p["b"]
        inv = p["gamma"] / jnp.sqrt(p["var"] + BN_EPS)
        y = jnp.maximum((y - p["mean"]) * inv + p["beta"], 0.0)
        n_out = (L - pool) // stride + 1
        end = (n_out - 1) * stride + 1
        y = jnp.max(jnp.stack([y[:, s:s + end:stride, :] for s in range(pool)],
                              axis=0), axis=0)
        x = y
    x = x.reshape(x.shape[0], -1)
    return jnp.dot(x, w_fc, precision=_HI) + b_fc


# ---------------------------------------------------------------------------
if __name__ == "__main__":
    key = jax.random.PRNGKey(0)
    k_in, k1, k2, k3, k4, kfw, kfb = jax.random.split(key, 7)

    # Input consistent with the module: (batch=2, channels=1, length=256).
    x = jax.random.normal(k_in, (2, 1, 256), jnp.float32)

    conv_params = [
        init_conv_layer(k1, 5, 1, 16),
        init_conv_layer(k2, 5, 16, 32),
        init_conv_layer(k3, 5, 32, 64),
        init_conv_layer(k4, 3, 64, 96),
    ]
    num_classes = 10
    bound = 1.0 / 96 ** 0.5
    w_fc = jax.random.uniform(kfw, (96, num_classes), jnp.float32, -bound, bound)
    b_fc = jax.random.uniform(kfb, (num_classes,), jnp.float32, -bound, bound)

    logits = jax.block_until_ready(forward(x, conv_params, w_fc, b_fc))

    ref = ref_forward(x, conv_params, w_fc, b_fc)
    assert logits.shape == (2, num_classes)
    assert bool(jnp.allclose(logits, ref, rtol=2e-3, atol=2e-3)), \
        "Pallas output does not match reference"

    print("KERNEL_OK")
</pallas_src>

<mosaic_0001>
module attributes {stable_mosaic.version = 11 : i64} {
  func.func @fused_cnn_kernel(%arg0: i32, %arg1: memref<1x256x1xf32, #tpu.memory_space<vmem>>, %arg2: memref<5x16xf32, #tpu.memory_space<vmem>>, %arg3: memref<1x16xf32, #tpu.memory_space<vmem>>, %arg4: memref<80x32xf32, #tpu.memory_space<vmem>>, %arg5: memref<1x32xf32, #tpu.memory_space<vmem>>, %arg6: memref<160x64xf32, #tpu.memory_space<vmem>>, %arg7: memref<1x64xf32, #tpu.memory_space<vmem>>, %arg8: memref<192x96xf32, #tpu.memory_space<vmem>>, %arg9: memref<1x96xf32, #tpu.memory_space<vmem>>, %arg10: memref<128x255xf32, #tpu.memory_space<vmem>>, %arg11: memref<64x127xf32, #tpu.memory_space<vmem>>, %arg12: memref<16x61xf32, #tpu.memory_space<vmem>>, %arg13: memref<96x10xf32, #tpu.memory_space<vmem>>, %arg14: memref<1x10xf32, #tpu.memory_space<vmem>>, %arg15: memref<1x1x10xf32, #tpu.memory_space<vmem>>, %arg16: memref<260x1xf32, #tpu.memory_space<vmem>>, %arg17: memref<256x5xf32, #tpu.memory_space<vmem>>, %arg18: memref<132x16xf32, #tpu.memory_space<vmem>>, %arg19: memref<128x80xf32, #tpu.memory_space<vmem>>, %arg20: memref<68x32xf32, #tpu.memory_space<vmem>>, %arg21: memref<64x160xf32, #tpu.memory_space<vmem>>, %arg22: memref<18x64xf32, #tpu.memory_space<vmem>>, %arg23: memref<16x192xf32, #tpu.memory_space<vmem>>) attributes {dimension_semantics = [#tpu.dimension_semantics<parallel>], iteration_bounds = array<i64: 2>, scalar_prefetch = 0 : i64, scratch_operands = 8 : i64, tpu.core_type = #tpu.core_type<tc>, window_params = [{transform_indices = @transform_0, window_bounds = array<i64: 1, 256, 1>}, {pipeline_mode = #tpu.pipeline_mode<synchronous>, transform_indices = @transform_1, window_bounds = array<i64: 5, 16>}, {pipeline_mode = #tpu.pipeline_mode<synchronous>, transform_indices = @transform_2, window_bounds = array<i64: 1, 16>}, {pipeline_mode = #tpu.pipeline_mode<synchronous>, transform_indices = @transform_3, window_bounds = array<i64: 80, 32>}, {pipeline_mode = #tpu.pipeline_mode<synchronous>, transform_indices = @transform_4, window_bounds = array<i64: 1, 32>}, {pipeline_mode = #tpu.pipeline_mode<synchronous>, transform_indices = @transform_5, window_bounds = array<i64: 160, 64>}, {pipeline_mode = #tpu.pipeline_mode<synchronous>, transform_indices = @transform_6, window_bounds = array<i64: 1, 64>}, {pipeline_mode = #tpu.pipeline_mode<synchronous>, transform_indices = @transform_7, window_bounds = array<i64: 192, 96>}, {pipeline_mode = #tpu.pipeline_mode<synchronous>, transform_indices = @transform_8, window_bounds = array<i64: 1, 96>}, {pipeline_mode = #tpu.pipeline_mode<synchronous>, transform_indices = @transform_9, window_bounds = array<i64: 128, 255>}, {pipeline_mode = #tpu.pipeline_mode<synchronous>, transform_indices = @transform_10, window_bounds = array<i64: 64, 127>}, {pipeline_mode = #tpu.pipeline_mode<synchronous>, transform_indices = @transform_11, window_bounds = array<i64: 16, 61>}, {pipeline_mode = #tpu.pipeline_mode<synchronous>, transform_indices = @transform_12, window_bounds = array<i64: 96, 10>}, {pipeline_mode = #tpu.pipeline_mode<synchronous>, transform_indices = @transform_13, window_bounds = array<i64: 1, 10>}, {transform_indices = @transform_14, window_bounds = array<i64: 1, 1, 10>}]} {
    %c0 = arith.constant 0 : index
    %c0_0 = arith.constant 0 : index
    %c0_1 = arith.constant 0 : index
    %0 = vector.load %arg1[%c0, %c0_0, %c0_1] : memref<1x256x1xf32, #tpu.memory_space<vmem>>, vector<1x256x1xf32>
    %1 = vector.shape_cast %0 : vector<1x256x1xf32> to vector<256x1xf32>
    %cst = arith.constant 0.000000e+00 : f32
    %2 = vector.broadcast %cst : f32 to vector<2x1xf32>
    %c0_2 = arith.constant 0 : index
    %c0_3 = arith.constant 0 : index
    %3 = vector.load %arg16[%c0_2, %c0_3] : memref<260x1xf32, #tpu.memory_space<vmem>>, vector<2x1xf32>
    tpu.vector_store %arg16[%c0_2, %c0_3], %2 {strides = array<i32>} : memref<260x1xf32, #tpu.memory_space<vmem>>, vector<2x1xf32>,
    %c2 = arith.constant 2 : index
    %c0_4 = arith.constant 0 : index
    %4 = vector.load %arg16[%c2, %c0_4] : memref<260x1xf32, #tpu.memory_space<vmem>>, vector<256x1xf32>
    tpu.vector_store %arg16[%c2, %c0_4], %1 {strides = array<i32>} : memref<260x1xf32, #tpu.memory_space<vmem>>, vector<256x1xf32>,
    %cst_5 = arith.constant 0.000000e+00 : f32
    %5 = vector.broadcast %cst_5 : f32 to vector<2x1xf32>
    %c258 = arith.constant 258 : index
    %c0_6 = arith.constant 0 : index
    %6 = vector.load %arg16[%c258, %c0_6] : memref<260x1xf32, #tpu.memory_space<vmem>>, vector<2x1xf32>
    tpu.vector_store %arg16[%c258, %c0_6], %5 {strides = array<i32>} : memref<260x1xf32, #tpu.memory_space<vmem>>, vector<2x1xf32>,
    %c0_7 = arith.constant 0 : index
    %c0_8 = arith.constant 0 : index
    %7 = vector.load %arg16[%c0_7, %c0_8] : memref<260x1xf32, #tpu.memory_space<vmem>>, vector<256x1xf32>
    %c0_9 = arith.constant 0 : index
    %c0_10 = arith.constant 0 : index
    %8 = vector.load %arg17[%c0_9, %c0_10] : memref<256x5xf32, #tpu.memory_space<vmem>>, vector<256x1xf32>
    tpu.vector_store %arg17[%c0_9, %c0_10], %7 {strides = array<i32>} : memref<256x5xf32, #tpu.memory_space<vmem>>, vector<256x1xf32>,
    %c1 = arith.constant 1 : index
    %c0_11 = arith.constant 0 : index
    %9 = vector.load %arg16[%c1, %c0_11] : memref<260x1xf32, #tpu.memory_space<vmem>>, vector<256x1xf32>
    %c0_12 = arith.constant 0 : index
    %c1_13 = arith.constant 1 : index
    %10 = vector.load %arg17[%c0_12, %c1_13] : memref<256x5xf32, #tpu.memory_space<vmem>>, vector<256x1xf32>
    tpu.vector_store %arg17[%c0_12, %c1_13], %9 {strides = array<i32>} : memref<256x5xf32, #tpu.memory_space<vmem>>, vector<256x1xf32>,
    %c2_14 = arith.constant 2 : index
    %c0_15 = arith.constant 0 : index
    %11 = vector.load %arg16[%c2_14, %c0_15] : memref<260x1xf32, #tpu.memory_space<vmem>>, vector<256x1xf32>
    %c0_16 = arith.constant 0 : index
    %c2_17 = arith.constant 2 : index
    %12 = vector.load %arg17[%c0_16, %c2_17] : memref<256x5xf32, #tpu.memory_space<vmem>>, vector<256x1xf32>
    tpu.vector_store %arg17[%c0_16, %c2_17], %11 {strides = array<i32>} : memref<256x5xf32, #tpu.memory_space<vmem>>, vector<256x1xf32>,
    %c3 = arith.constant 3 : index
    %c0_18 = arith.constant 0 : index
    %13 = vector.load %arg16[%c3, %c0_18] : memref<260x1xf32, #tpu.memory_space<vmem>>, vector<256x1xf32>
    %c0_19 = arith.constant 0 : index
    %c3_20 = arith.constant 3 : index
    %14 = vector.load %arg17[%c0_19, %c3_20] : memref<256x5xf32, #tpu.memory_space<vmem>>, vector<256x1xf32>
    tpu.vector_store %arg17[%c0_19, %c3_20], %13 {strides = array<i32>} : memref<256x5xf32, #tpu.memory_space<vmem>>, vector<256x1xf32>,
    %c4 = arith.constant 4 : index
    %c0_21 = arith.constant 0 : index
    %15 = vector.load %arg16[%c4, %c0_21] : memref<260x1xf32, #tpu.memory_space<vmem>>, vector<256x1xf32>
    %c0_22 = arith.constant 0 : index
    %c4_23 = arith.constant 4 : index
    %16 = vector.load %arg17[%c0_22, %c4_23] : memref<256x5xf32, #tpu.memory_space<vmem>>, vector<256x1xf32>
    tpu.vector_store %arg17[%c0_22, %c4_23], %15 {strides = array<i32>} : memref<256x5xf32, #tpu.memory_space<vmem>>, vector<256x1xf32>,
    %c0_24 = arith.constant 0 : index
    %c0_25 = arith.constant 0 : index
    %17 = vector.load %arg17[%c0_24, %c0_25] : memref<256x5xf32, #tpu.memory_space<vmem>>, vector<256x5xf32>
    %c0_26 = arith.constant 0 : index
    %c0_27 = arith.constant 0 : index
    %18 = vector.load %arg2[%c0_26, %c0_27] : memref<5x16xf32, #tpu.memory_space<vmem>>, vector<5x16xf32>
    %cst_28 = arith.constant dense<0.000000e+00> : vector<256x16xf32>
    %19 = tpu.matmul %17, %18, %cst_28 {dimension_numbers = #tpu.dot_dimension_numbers<[1], [0], [0], [1], [0, 0, 1, 1], [], []>, precision = #tpu.contract_precision<fp32>} : vector<256x5xf32>, vector<5x16xf32>, vector<256x16xf32> -> vector<256x16xf32>
    %c0_29 = arith.constant 0 : index
    %c0_30 = arith.constant 0 : index
    %20 = vector.load %arg3[%c0_29, %c0_30] : memref<1x16xf32, #tpu.memory_space<vmem>>, vector<1x16xf32>
    %21 = vector.broadcast %20 : vector<1x16xf32> to vector<256x16xf32>
    %22 = arith.addf %19, %21 : vector<256x16xf32>
    %cst_31 = arith.constant 0.000000e+00 : f32
    %23 = vector.broadcast %cst_31 : f32 to vector<256x16xf32>
    %24 = arith.maximumf %22, %23 : vector<256x16xf32>
    %25 = vector.extract_strided_slice %24 {offsets = [0, 0], sizes = [255, 16], strides = [1, 1]} : vector<256x16xf32> to vector<255x16xf32>
    %26 = vector.extract_strided_slice %24 {offsets = [1, 0], sizes = [255, 16], strides = [1, 1]} : vector<256x16xf32> to vector<255x16xf32>
    %27 = arith.maximumf %25, %26 : vector<255x16xf32>
    %c0_32 = arith.constant 0 : index
    %c0_33 = arith.constant 0 : index
    %28 = vector.load %arg10[%c0_32, %c0_33] : memref<128x255xf32, #tpu.memory_space<vmem>>, vector<128x255xf32>
    %cst_34 = arith.constant dense<0.000000e+00> : vector<128x16xf32>
    %29 = tpu.matmul %28, %27, %cst_34 {dimension_numbers = #tpu.dot_dimension_numbers<[1], [0], [0], [1], [0, 0, 1, 1], [], []>, precision = #tpu.contract_precision<fp32>} : vector<128x255xf32>, vector<255x16xf32>, vector<128x16xf32> -> vector<128x16xf32>
    %cst_35 = arith.constant 0.000000e+00 : f32
    %30 = vector.broadcast %cst_35 : f32 to vector<2x16xf32>
    %c0_36 = arith.constant 0 : index
    %c0_37 = arith.constant 0 : index
    %31 = vector.load %arg18[%c0_36, %c0_37] : memref<132x16xf32, #tpu.memory_space<vmem>>, vector<2x16xf32>
    tpu.vector_store %arg18[%c0_36, %c0_37], %30 {strides = array<i32>} : memref<132x16xf32, #tpu.memory_space<vmem>>, vector<2x16xf32>,
    %c2_38 = arith.constant 2 : index
    %c0_39 = arith.constant 0 : index
    %32 = vector.load %arg18[%c2_38, %c0_39] : memref<132x16xf32, #tpu.memory_space<vmem>>, vector<128x16xf32>
    tpu.vector_store %arg18[%c2_38, %c0_39], %29 {strides = array<i32>} : memref<132x16xf32, #tpu.memory_space<vmem>>, vector<128x16xf32>,
    %cst_40 = arith.constant 0.000000e+00 : f32
    %33 = vector.broadcast %cst_40 : f32 to vector<2x16xf32>
    %c130 = arith.constant 130 : index
    %c0_41 = arith.constant 0 : index
    %34 = vector.load %arg18[%c130, %c0_41] : memref<132x16xf32, #tpu.memory_space<vmem>>, vector<2x16xf32>
    tpu.vector_store %arg18[%c130, %c0_41], %33 {strides = array<i32>} : memref<132x16xf32, #tpu.memory_space<vmem>>, vector<2x16xf32>,
    %c0_42 = arith.constant 0 : index
    %c0_43 = arith.constant 0 : index
    %35 = vector.load %arg18[%c0_42, %c0_43] : memref<132x16xf32, #tpu.memory_space<vmem>>, vector<128x16xf32>
    %c0_44 = arith.constant 0 : index
    %c0_45 = arith.constant 0 : index
    %36 = vector.load %arg19[%c0_44, %c0_45] : memref<128x80xf32, #tpu.memory_space<vmem>>, vector<128x16xf32>
    tpu.vector_store %arg19[%c0_44, %c0_45], %35 {strides = array<i32>} : memref<128x80xf32, #tpu.memory_space<vmem>>, vector<128x16xf32>,
    %c1_46 = arith.constant 1 : index
    %c0_47 = arith.constant 0 : index
    %37 = vector.load %arg18[%c1_46, %c0_47] : memref<132x16xf32, #tpu.memory_space<vmem>>, vector<128x16xf32>
    %c0_48 = arith.constant 0 : index
    %c16 = arith.constant 16 : index
    %38 = vector.load %arg19[%c0_48, %c16] : memref<128x80xf32, #tpu.memory_space<vmem>>, vector<128x16xf32>
    tpu.vector_store %arg19[%c0_48, %c16], %37 {strides = array<i32>} : memref<128x80xf32, #tpu.memory_space<vmem>>, vector<128x16xf32>,
    %c2_49 = arith.constant 2 : index
    %c0_50 = arith.constant 0 : index
    %39 = vector.load %arg18[%c2_49, %c0_50] : memref<132x16xf32, #tpu.memory_space<vmem>>, vector<128x16xf32>
    %c0_51 = arith.constant 0 : index
    %c32 = arith.constant 32 : index
    %40 = vector.load %arg19[%c0_51, %c32] : memref<128x80xf32, #tpu.memory_space<vmem>>, vector<128x16xf32>
    tpu.vector_store %arg19[%c0_51, %c32], %39 {strides = array<i32>} : memref<128x80xf32, #tpu.memory_space<vmem>>, vector<128x16xf32>,
    %c3_52 = arith.constant 3 : index
    %c0_53 = arith.constant 0 : index
    %41 = vector.load %arg18[%c3_52, %c0_53] : memref<132x16xf32, #tpu.memory_space<vmem>>, vector<128x16xf32>
    %c0_54 = arith.constant 0 : index
    %c48 = arith.constant 48 : index
    %42 = vector.load %arg19[%c0_54, %c48] : memref<128x80xf32, #tpu.memory_space<vmem>>, vector<128x16xf32>
    tpu.vector_store %arg19[%c0_54, %c48], %41 {strides = array<i32>} : memref<128x80xf32, #tpu.memory_space<vmem>>, vector<128x16xf32>,
    %c4_55 = arith.constant 4 : index
    %c0_56 = arith.constant 0 : index
    %43 = vector.load %arg18[%c4_55, %c0_56] : memref<132x16xf32, #tpu.memory_space<vmem>>, vector<128x16xf32>
    %c0_57 = arith.constant 0 : index
    %c64 = arith.constant 64 : index
    %44 = vector.load %arg19[%c0_57, %c64] : memref<128x80xf32, #tpu.memory_space<vmem>>, vector<128x16xf32>
    tpu.vector_store %arg19[%c0_57, %c64], %43 {strides = array<i32>} : memref<128x80xf32, #tpu.memory_space<vmem>>, vector<128x16xf32>,
    %c0_58 = arith.constant 0 : index
    %c0_59 = arith.constant 0 : index
    %45 = vector.load %arg19[%c0_58, %c0_59] : memref<128x80xf32, #tpu.memory_space<vmem>>, vector<128x80xf32>
    %c0_60 = arith.constant 0 : index
    %c0_61 = arith.constant 0 : index
    %46 = vector.load %arg4[%c0_60, %c0_61] : memref<80x32xf32, #tpu.memory_space<vmem>>, vector<80x32xf32>
    %cst_62 = arith.constant dense<0.000000e+00> : vector<128x32xf32>
    %47 = tpu.matmul %45, %46, %cst_62 {dimension_numbers = #tpu.dot_dimension_numbers<[1], [0], [0], [1], [0, 0, 1, 1], [], []>, precision = #tpu.contract_precision<fp32>} : vector<128x80xf32>, vector<80x32xf32>, vector<128x32xf32> -> vector<128x32xf32>
    %c0_63 = arith.constant 0 : index
    %c0_64 = arith.constant 0 : index
    %48 = vector.load %arg5[%c0_63, %c0_64] : memref<1x32xf32, #tpu.memory_space<vmem>>, vector<1x32xf32>
    %49 = vector.broadcast %48 : vector<1x32xf32> to vector<128x32xf32>
    %50 = arith.addf %47, %49 : vector<128x32xf32>
    %cst_65 = arith.constant 0.000000e+00 : f32
    %51 = vector.broadcast %cst_65 : f32 to vector<128x32xf32>
    %52 = arith.maximumf %50, %51 : vector<128x32xf32>
    %53 = vector.extract_strided_slice %52 {offsets = [0, 0], sizes = [127, 32], strides = [1, 1]} : vector<128x32xf32> to vector<127x32xf32>
    %54 = vector.extract_strided_slice %52 {offsets = [1, 0], sizes = [127, 32], strides = [1, 1]} : vector<128x32xf32> to vector<127x32xf32>
    %55 = arith.maximumf %53, %54 : vector<127x32xf32>
    %c0_66 = arith.constant 0 : index
    %c0_67 = arith.constant 0 : index
    %56 = vector.load %arg11[%c0_66, %c0_67] : memref<64x127xf32, #tpu.memory_space<vmem>>, vector<64x127xf32>
    %cst_68 = arith.constant dense<0.000000e+00> : vector<64x32xf32>
    %57 = tpu.matmul %56, %55, %cst_68 {dimension_numbers = #tpu.dot_dimension_numbers<[1], [0], [0], [1], [0, 0, 1, 1], [], []>, precision = #tpu.contract_precision<fp32>} : vector<64x127xf32>, vector<127x32xf32>, vector<64x32xf32> -> vector<64x32xf32>
    %cst_69 = arith.constant 0.000000e+00 : f32
    %58 = vector.broadcast %cst_69 : f32 to vector<2x32xf32>
    %c0_70 = arith.constant 0 : index
    %c0_71 = arith.constant 0 : index
    %59 = vector.load %arg20[%c0_70, %c0_71] : memref<68x32xf32, #tpu.memory_space<vmem>>, vector<2x32xf32>
    tpu.vector_store %arg20[%c0_70, %c0_71], %58 {strides = array<i32>} : memref<68x32xf32, #tpu.memory_space<vmem>>, vector<2x32xf32>,
    %c2_72 = arith.constant 2 : index
    %c0_73 = arith.constant 0 : index
    %60 = vector.load %arg20[%c2_72, %c0_73] : memref<68x32xf32, #tpu.memory_space<vmem>>, vector<64x32xf32>
    tpu.vector_store %arg20[%c2_72, %c0_73], %57 {strides = array<i32>} : memref<68x32xf32, #tpu.memory_space<vmem>>, vector<64x32xf32>,
    %cst_74 = arith.constant 0.000000e+00 : f32
    %61 = vector.broadcast %cst_74 : f32 to vector<2x32xf32>
    %c66 = arith.constant 66 : index
    %c0_75 = arith.constant 0 : index
    %62 = vector.load %arg20[%c66, %c0_75] : memref<68x32xf32, #tpu.memory_space<vmem>>, vector<2x32xf32>
    tpu.vector_store %arg20[%c66, %c0_75], %61 {strides = array<i32>} : memref<68x32xf32, #tpu.memory_space<vmem>>, vector<2x32xf32>,
    %c0_76 = arith.constant 0 : index
    %c0_77 = arith.constant 0 : index
    %63 = vector.load %arg20[%c0_76, %c0_77] : memref<68x32xf32, #tpu.memory_space<vmem>>, vector<64x32xf32>
    %c0_78 = arith.constant 0 : index
    %c0_79 = arith.constant 0 : index
    %64 = vector.load %arg21[%c0_78, %c0_79] : memref<64x160xf32, #tpu.memory_space<vmem>>, vector<64x32xf32>
    tpu.vector_store %arg21[%c0_78, %c0_79], %63 {strides = array<i32>} : memref<64x160xf32, #tpu.memory_space<vmem>>, vector<64x32xf32>,
    %c1_80 = arith.constant 1 : index
    %c0_81 = arith.constant 0 : index
    %65 = vector.load %arg20[%c1_80, %c0_81] : memref<68x32xf32, #tpu.memory_space<vmem>>, vector<64x32xf32>
    %c0_82 = arith.constant 0 : index
    %c32_83 = arith.constant 32 : index
    %66 = vector.load %arg21[%c0_82, %c32_83] : memref<64x160xf32, #tpu.memory_space<vmem>>, vector<64x32xf32>
    tpu.vector_store %arg21[%c0_82, %c32_83], %65 {strides = array<i32>} : memref<64x160xf32, #tpu.memory_space<vmem>>, vector<64x32xf32>,
    %c2_84 = arith.constant 2 : index
    %c0_85 = arith.constant 0 : index
    %67 = vector.load %arg20[%c2_84, %c0_85] : memref<68x32xf32, #tpu.memory_space<vmem>>, vector<64x32xf32>
    %c0_86 = arith.constant 0 : index
    %c64_87 = arith.constant 64 : index
    %68 = vector.load %arg21[%c0_86, %c64_87] : memref<64x160xf32, #tpu.memory_space<vmem>>, vector<64x32xf32>
    tpu.vector_store %arg21[%c0_86, %c64_87], %67 {strides = array<i32>} : memref<64x160xf32, #tpu.memory_space<vmem>>, vector<64x32xf32>,
    %c3_88 = arith.constant 3 : index
    %c0_89 = arith.constant 0 : index
    %69 = vector.load %arg20[%c3_88, %c0_89] : memref<68x32xf32, #tpu.memory_space<vmem>>, vector<64x32xf32>
    %c0_90 = arith.constant 0 : index
    %c96 = arith.constant 96 : index
    %70 = vector.load %arg21[%c0_90, %c96] : memref<64x160xf32, #tpu.memory_space<vmem>>, vector<64x32xf32>
    tpu.vector_store %arg21[%c0_90, %c96], %69 {strides = array<i32>} : memref<64x160xf32, #tpu.memory_space<vmem>>, vector<64x32xf32>,
    %c4_91 = arith.constant 4 : index
    %c0_92 = arith.constant 0 : index
    %71 = vector.load %arg20[%c4_91, %c0_92] : memref<68x32xf32, #tpu.memory_space<vmem>>, vector<64x32xf32>
    %c0_93 = arith.constant 0 : index
    %c128 = arith.constant 128 : index
    %72 = vector.load %arg21[%c0_93, %c128] : memref<64x160xf32, #tpu.memory_space<vmem>>, vector<64x32xf32>
    tpu.vector_store %arg21[%c0_93, %c128], %71 {strides = array<i32>} : memref<64x160xf32, #tpu.memory_space<vmem>>, vector<64x32xf32>,
    %c0_94 = arith.constant 0 : index
    %c0_95 = arith.constant 0 : index
    %73 = vector.load %arg21[%c0_94, %c0_95] : memref<64x160xf32, #tpu.memory_space<vmem>>, vector<64x160xf32>
    %c0_96 = arith.constant 0 : index
    %c0_97 = arith.constant 0 : index
    %74 = vector.load %arg6[%c0_96, %c0_97] : memref<160x64xf32, #tpu.memory_space<vmem>>, vector<160x64xf32>
    %cst_98 = arith.constant dense<0.000000e+00> : vector<64x64xf32>
    %75 = tpu.matmul %73, %74, %cst_98 {dimension_numbers = #tpu.dot_dimension_numbers<[1], [0], [0], [1], [0, 0, 1, 1], [], []>, precision = #tpu.contract_precision<fp32>} : vector<64x160xf32>, vector<160x64xf32>, vector<64x64xf32> -> vector<64x64xf32>
    %c0_99 = arith.constant 0 : index
    %c0_100 = arith.constant 0 : index
    %76 = vector.load %arg7[%c0_99, %c0_100] : memref<1x64xf32, #tpu.memory_space<vmem>>, vector<1x64xf32>
    %77 = vector.broadcast %76 : vector<1x64xf32> to vector<64x64xf32>
    %78 = arith.addf %75, %77 : vector<64x64xf32>
    %cst_101 = arith.constant 0.000000e+00 : f32
    %79 = vector.broadcast %cst_101 : f32 to vector<64x64xf32>
    %80 = arith.maximumf %78, %79 : vector<64x64xf32>
    %81 = vector.extract_strided_slice %80 {offsets = [0, 0], sizes = [61, 64], strides = [1, 1]} : vector<64x64xf32> to vector<61x64xf32>
    %82 = vector.extract_strided_slice %80 {offsets = [1, 0], sizes = [61, 64], strides = [1, 1]} : vector<64x64xf32> to vector<61x64xf32>
    %83 = arith.maximumf %81, %82 : vector<61x64xf32>
    %84 = vector.extract_strided_slice %80 {offsets = [2, 0], sizes = [61, 64], strides = [1, 1]} : vector<64x64xf32> to vector<61x64xf32>
    %85 = arith.maximumf %83, %84 : vector<61x64xf32>
    %86 = vector.extract_strided_slice %80 {offsets = [3, 0], sizes = [61, 64], strides = [1, 1]} : vector<64x64xf32> to vector<61x64xf32>
    %87 = arith.maximumf %85, %86 : vector<61x64xf32>
    %c0_102 = arith.constant 0 : index
    %c0_103 = arith.constant 0 : index
    %88 = vector.load %arg12[%c0_102, %c0_103] : memref<16x61xf32, #tpu.memory_space<vmem>>, vector<16x61xf32>
    %cst_104 = arith.constant dense<0.000000e+00> : vector<16x64xf32>
    %89 = tpu.matmul %88, %87, %cst_104 {dimension_numbers = #tpu.dot_dimension_numbers<[1], [0], [0], [1], [0, 0, 1, 1], [], []>, precision = #tpu.contract_precision<fp32>} : vector<16x61xf32>, vector<61x64xf32>, vector<16x64xf32> -> vector<16x64xf32>
    %cst_105 = arith.constant 0.000000e+00 : f32
    %90 = vector.broadcast %cst_105 : f32 to vector<1x64xf32>
    %c0_106 = arith.constant 0 : index
    %c0_107 = arith.constant 0 : index
    %91 = vector.load %arg22[%c0_106, %c0_107] : memref<18x64xf32, #tpu.memory_space<vmem>>, vector<1x64xf32>
    tpu.vector_store %arg22[%c0_106, %c0_107], %90 {strides = array<i32>} : memref<18x64xf32, #tpu.memory_space<vmem>>, vector<1x64xf32>,
    %c1_108 = arith.constant 1 : index
    %c0_109 = arith.constant 0 : index
    %92 = vector.load %arg22[%c1_108, %c0_109] : memref<18x64xf32, #tpu.memory_space<vmem>>, vector<16x64xf32>
    tpu.vector_store %arg22[%c1_108, %c0_109], %89 {strides = array<i32>} : memref<18x64xf32, #tpu.memory_space<vmem>>, vector<16x64xf32>,
    %cst_110 = arith.constant 0.000000e+00 : f32
    %93 = vector.broadcast %cst_110 : f32 to vector<1x64xf32>
    %c17 = arith.constant 17 : index
    %c0_111 = arith.constant 0 : index
    %94 = vector.load %arg22[%c17, %c0_111] : memref<18x64xf32, #tpu.memory_space<vmem>>, vector<1x64xf32>
    tpu.vector_store %arg22[%c17, %c0_111], %93 {strides = array<i32>} : memref<18x64xf32, #tpu.memory_space<vmem>>, vector<1x64xf32>,
    %c0_112 = arith.constant 0 : index
    %c0_113 = arith.constant 0 : index
    %95 = vector.load %arg22[%c0_112, %c0_113] : memref<18x64xf32, #tpu.memory_space<vmem>>, vector<16x64xf32>
    %c0_114 = arith.constant 0 : index
    %c0_115 = arith.constant 0 : index
    %96 = vector.load %arg23[%c0_114, %c0_115] : memref<16x192xf32, #tpu.memory_space<vmem>>, vector<16x64xf32>
    tpu.vector_store %arg23[%c0_114, %c0_115], %95 {strides = array<i32>} : memref<16x192xf32, #tpu.memory_space<vmem>>, vector<16x64xf32>,
    %c1_116 = arith.constant 1 : index
    %c0_117 = arith.constant 0 : index
    %97 = vector.load %arg22[%c1_116, %c0_117] : memref<18x64xf32, #tpu.memory_space<vmem>>, vector<16x64xf32>
    %c0_118 = arith.constant 0 : index
    %c64_119 = arith.constant 64 : index
    %98 = vector.load %arg23[%c0_118, %c64_119] : memref<16x192xf32, #tpu.memory_space<vmem>>, vector<16x64xf32>
    tpu.vector_store %arg23[%c0_118, %c64_119], %97 {strides = array<i32>} : memref<16x192xf32, #tpu.memory_space<vmem>>, vector<16x64xf32>,
    %c2_120 = arith.constant 2 : index
    %c0_121 = arith.constant 0 : index
    %99 = vector.load %arg22[%c2_120, %c0_121] : memref<18x64xf32, #tpu.memory_space<vmem>>, vector<16x64xf32>
    %c0_122 = arith.constant 0 : index
    %c128_123 = arith.constant 128 : index
    %100 = vector.load %arg23[%c0_122, %c128_123] : memref<16x192xf32, #tpu.memory_space<vmem>>, vector<16x64xf32>
    tpu.vector_store %arg23[%c0_122, %c128_123], %99 {strides = array<i32>} : memref<16x192xf32, #tpu.memory_space<vmem>>, vector<16x64xf32>,
    %c0_124 = arith.constant 0 : index
    %c0_125 = arith.constant 0 : index
    %101 = vector.load %arg23[%c0_124, %c0_125] : memref<16x192xf32, #tpu.memory_space<vmem>>, vector<16x192xf32>
    %c0_126 = arith.constant 0 : index
    %c0_127 = arith.constant 0 : index
    %102 = vector.load %arg8[%c0_126, %c0_127] : memref<192x96xf32, #tpu.memory_space<vmem>>, vector<192x96xf32>
    %cst_128 = arith.constant dense<0.000000e+00> : vector<16x96xf32>
    %103 = tpu.matmul %101, %102, %cst_128 {dimension_numbers = #tpu.dot_dimension_numbers<[1], [0], [0], [1], [0, 0, 1, 1], [], []>, precision = #tpu.contract_precision<fp32>} : vector<16x192xf32>, vector<192x96xf32>, vector<16x96xf32> -> vector<16x96xf32>
    %c0_129 = arith.constant 0 : index
    %c0_130 = arith.constant 0 : index
    %104 = vector.load %arg9[%c0_129, %c0_130] : memref<1x96xf32, #tpu.memory_space<vmem>>, vector<1x96xf32>
    %105 = vector.broadcast %104 : vector<1x96xf32> to vector<16x96xf32>
    %106 = arith.addf %103, %105 : vector<16x96xf32>
    %cst_131 = arith.constant 0.000000e+00 : f32
    %107 = vector.broadcast %cst_131 : f32 to vector<16x96xf32>
    %108 = arith.maximumf %106, %107 : vector<16x96xf32>
    %cst_132 = arith.constant dense<0xFF800000> : vector<96xf32>
    %109 = vector.multi_reduction <maximumf>, %108, %cst_132 [0] : vector<16x96xf32> to vector<96xf32>
    %110 = vector.shape_cast %109 : vector<96xf32> to vector<1x96xf32>
    %c0_133 = arith.constant 0 : index
    %c0_134 = arith.constant 0 : index
    %111 = vector.load %arg13[%c0_133, %c0_134] : memref<96x10xf32, #tpu.memory_space<vmem>>, vector<96x10xf32>
    %cst_135 = arith.constant dense<0.000000e+00> : vector<1x10xf32>
    %112 = tpu.matmul %110, %111, %cst_135 {dimension_numbers = #tpu.dot_dimension_numbers<[1], [0], [0], [1], [0, 0, 1, 1], [], []>, precision = #tpu.contract_precision<fp32>} : vector<1x96xf32>, vector<96x10xf32>, vector<1x10xf32> -> vector<1x10xf32>
    %c0_136 = arith.constant 0 : index
    %c0_137 = arith.constant 0 : index
    %113 = vector.load %arg14[%c0_136, %c0_137] : memref<1x10xf32, #tpu.memory_space<vmem>>, vector<1x10xf32>
    %114 = arith.addf %112, %113 : vector<1x10xf32>
    %c0_138 = arith.constant 0 : index
    %c0_139 = arith.constant 0 : index
    %c0_140 = arith.constant 0 : index
    %115 = vector.load %arg15[%c0_138, %c0_139, %c0_140] : memref<1x1x10xf32, #tpu.memory_space<vmem>>, vector<1x1x10xf32>
    %116 = vector.shape_cast %115 : vector<1x1x10xf32> to vector<1x10xf32>
    %117 = vector.shape_cast %114 : vector<1x10xf32> to vector<1x1x10xf32>
    tpu.vector_store %arg15[%c0_138, %c0_139, %c0_140], %117 {strides = array<i32>} : memref<1x1x10xf32, #tpu.memory_space<vmem>>, vector<1x1x10xf32>,
    return
  }
  func.func @transform_0(%arg0: i32) -> (i32, i32, i32) {
    %c0_i32 = arith.constant 0 : i32
    %c0_i32_0 = arith.constant 0 : i32
    %c0_i32_1 = arith.constant 0 : i32
    return %arg0, %c0_i32, %c0_i32_0 : i32, i32, i32
  }
  func.func @transform_1(%arg0: i32) -> (i32, i32) {
    %c0_i32 = arith.constant 0 : i32
    %c0_i32_0 = arith.constant 0 : i32
    %c0_i32_1 = arith.constant 0 : i32
    return %c0_i32, %c0_i32_0 : i32, i32
  }
  func.func @transform_2(%arg0: i32) -> (i32, i32) {
    %c0_i32 = arith.constant 0 : i32
    %c0_i32_0 = arith.constant 0 : i32
    %c0_i32_1 = arith.constant 0 : i32
    return %c0_i32, %c0_i32_0 : i32, i32
  }
  func.func @transform_3(%arg0: i32) -> (i32, i32) {
    %c0_i32 = arith.constant 0 : i32
    %c0_i32_0 = arith.constant 0 : i32
    %c0_i32_1 = arith.constant 0 : i32
    return %c0_i32, %c0_i32_0 : i32, i32
  }
  func.func @transform_4(%arg0: i32) -> (i32, i32) {
    %c0_i32 = arith.constant 0 : i32
    %c0_i32_0 = arith.constant 0 : i32
    %c0_i32_1 = arith.constant 0 : i32
    return %c0_i32, %c0_i32_0 : i32, i32
  }
  func.func @transform_5(%arg0: i32) -> (i32, i32) {
    %c0_i32 = arith.constant 0 : i32
    %c0_i32_0 = arith.constant 0 : i32
    %c0_i32_1 = arith.constant 0 : i32
    return %c0_i32, %c0_i32_0 : i32, i32
  }
  func.func @transform_6(%arg0: i32) -> (i32, i32) {
    %c0_i32 = arith.constant 0 : i32
    %c0_i32_0 = arith.constant 0 : i32
    %c0_i32_1 = arith.constant 0 : i32
    return %c0_i32, %c0_i32_0 : i32, i32
  }
  func.func @transform_7(%arg0: i32) -> (i32, i32) {
    %c0_i32 = arith.constant 0 : i32
    %c0_i32_0 = arith.constant 0 : i32
    %c0_i32_1 = arith.constant 0 : i32
    return %c0_i32, %c0_i32_0 : i32, i32
  }
  func.func @transform_8(%arg0: i32) -> (i32, i32) {
    %c0_i32 = arith.constant 0 : i32
    %c0_i32_0 = arith.constant 0 : i32
    %c0_i32_1 = arith.constant 0 : i32
    return %c0_i32, %c0_i32_0 : i32, i32
  }
  func.func @transform_9(%arg0: i32) -> (i32, i32) {
    %c0_i32 = arith.constant 0 : i32
    %c0_i32_0 = arith.constant 0 : i32
    %c0_i32_1 = arith.constant 0 : i32
    return %c0_i32, %c0_i32_0 : i32, i32
  }
  func.func @transform_10(%arg0: i32) -> (i32, i32) {
    %c0_i32 = arith.constant 0 : i32
    %c0_i32_0 = arith.constant 0 : i32
    %c0_i32_1 = arith.constant 0 : i32
    return %c0_i32, %c0_i32_0 : i32, i32
  }
  func.func @transform_11(%arg0: i32) -> (i32, i32) {
    %c0_i32 = arith.constant 0 : i32
    %c0_i32_0 = arith.constant 0 : i32
    %c0_i32_1 = arith.constant 0 : i32
    return %c0_i32, %c0_i32_0 : i32, i32
  }
  func.func @transform_12(%arg0: i32) -> (i32, i32) {
    %c0_i32 = arith.constant 0 : i32
    %c0_i32_0 = arith.constant 0 : i32
    %c0_i32_1 = arith.constant 0 : i32
    return %c0_i32, %c0_i32_0 : i32, i32
  }
  func.func @transform_13(%arg0: i32) -> (i32, i32) {
    %c0_i32 = arith.constant 0 : i32
    %c0_i32_0 = arith.constant 0 : i32
    %c0_i32_1 = arith.constant 0 : i32
    return %c0_i32, %c0_i32_0 : i32, i32
  }
  func.func @transform_14(%arg0: i32) -> (i32, i32, i32) {
    %c0_i32 = arith.constant 0 : i32
    %c0_i32_0 = arith.constant 0 : i32
    %c0_i32_1 = arith.constant 0 : i32
    return %arg0, %c0_i32, %c0_i32_0 : i32, i32, i32
  }
}

</mosaic_0001>

<bundles_post_ra>
// kernel: forward.1
= control target key start
LH: loop header
LB: loop body
LE: loop exit
PB: predicated region body
PF: predicated region fallthrough
CT: control target
= control target key end

     0   :  { %s21128_s0 = inlined_call_operand.vmem [shape: f32[2,256,1], index: 0, kind: input, shape index: {}]   ;;  %s21129_s1 = inlined_call_operand.vmem [shape: f32[5,16], index: 1, kind: input, shape index: {}]   ;;  %s21130_s2 = inlined_call_operand.vmem [shape: f32[1,16], index: 2, kind: input, shape index: {}]   ;;  %s21131_s3 = inlined_call_operand.vmem [shape: f32[80,32], index: 3, kind: input, shape index: {}]   ;;  %s21132_s4 = inlined_call_operand.vmem [shape: f32[1,32], index: 4, kind: input, shape index: {}]   ;;  %s21133_s5 = inlined_call_operand.vmem [shape: f32[160,64], index: 5, kind: input, shape index: {}]   ;;  %s21134_s6 = inlined_call_operand.vmem [shape: f32[1,64], index: 6, kind: input, shape index: {}]   ;;  %s21135_s7 = inlined_call_operand.vmem [shape: f32[192,96], index: 7, kind: input, shape index: {}]   ;;  %s21136_s8 = inlined_call_operand.vmem [shape: f32[1,96], index: 8, kind: input, shape index: {}]   ;;  %s21137_s9 = inlined_call_operand.vmem [shape: f32[128,255], index: 9, kind: input, shape index: {}]   ;;  %s21138_s10 = inlined_call_operand.vmem [shape: f32[64,127], index: 10, kind: input, shape index: {}]   ;;  %s21139_s11 = inlined_call_operand.vmem [shape: f32[16,61], index: 11, kind: input, shape index: {}]   ;;  %s21140_s12 = inlined_call_operand.vmem [shape: f32[96,10], index: 12, kind: input, shape index: {}]   ;;  %s21141_s13 = inlined_call_operand.vmem [shape: f32[1,10], index: 13, kind: input, shape index: {}]   ;;  %s21142_s14 = inlined_call_operand.hbm [shape: f32[2,1,10], index: 14, kind: output, shape index: {}]  }
   0x1   :  { %21590 = sst [smem:[#allocation98_spill]] %s21128_s0 }
   0x2   :  { %21591 = sst [smem:[#allocation99_spill]] %s21129_s1 }
   0x3   :  { %21592 = sst [smem:[#allocation100_spill]] %s21130_s2 }
   0x4   :  { %19 = vsyncpa [#allocation11], 0 }
   0x5   :  { %21 = vsyncpa [#allocation11 + $0x1], 0  ;;  %s15696_s29 = smov 0   ;;  %s15698_s30 = smov 0  }
   0x6   :  { %s15700_s15 = smov 0   ;;  %s15702_s16 = smov 0  }
   0x7 LB: > { %s15717_s17 = sadd.s32 4294967295, %s15606_s16   ;;  %s11696_s18 = sadd.s32 4294967294, %s15606_s16   ;;  %s15606_s16 = sphi %s15702_s16, %s22239_s16   ;;  %s15602_s15 = sphi %s15700_s15, %s22238_s15   ;;  %s15598_s30 = sphi %s15698_s30, %s22237_s30   ;;  %s15594_s29 = sphi %s15696_s29, %s22236_s29  }
   0x8   : > { %s15721_s19 = sadd.s32 1, %s15606_s16   ;;  %s333_s20 = sadd.s32 1, %s15602_s15 }
   0x9   : > { %s330_s21 = ssub.s32 %s15606_s16, %s15721_s19  ;;  %p343_p0 = scmp.ne.s32.totalorder %s15602_s15, %s15598_s30 }
   0xa   : > { %p331_p1 = scmp.eq.s32.totalorder %s330_s21, 0  ;;  %p344_p2 = scmp.eq.s32.totalorder %s15717_s17, 1 }
   0xb   : > { %p349_p3 = scmp.ne.s32.totalorder %s15598_s30, %s15594_s29  ;;  %p350_p4 = scmp.eq.s32.totalorder %s11696_s18, 1 }
   0xc   : > { %s15732_s22 = scalar_select %p331_p1, %s15602_s15, %s333_s20  }
   0xd   : > { %p15734_p5 = por %p344_p2, %p343_p0  ;;  %p15738_p6 = por %p350_p4, %p349_p3 }
   0xe   : > { %21593 = sst [smem:[#allocation13_spill]] %s15732_s22  ;;  %p11699_p7 = scmp.ge.s32.totalorder %s15606_s16, 1 }
   0xf   : > { %p415_p8 = scmp.lt.s32.totalorder %s15606_s16, 3 }
  0x11   : > { %p416_p9 = pnand %p11699_p7, %p415_p8 }
  0x13   : > { %419 = sbr.rel (%p416_p9) target bundleno = 4455 (0x1167), region = 76 }
  0x1a   : > { %p460_p10 = scmp.lt.s32.totalorder %s15717_s17, 1  ;;  %vm497_vm0 = vcmask 1024   ;;  %v21143_v0 = vmov 0.0   ;;  %vm499_vm1 = vcmask 7168   ;;  %s21596_s0 = sld [smem:[#allocation98_spill]]  ;;  %vm1506_vm2 = vcmask 1044480  }
  0x1b   : > { %498 = vst.msk [vmem:[#allocation2] sm:$0x3] %vm497_vm0, %v21143_v0  ;;  %532 = vst.msk [vmem:[#allocation2 + $0x102] sm:$0x3] %vm497_vm0, %v21143_v0  ;;  %s15609_s20 = smov 2   ;;  %s15610_s21 = smov 1  }
  0x1c   : > { %s461_s25 = scalar_select %p460_p10, %s15717_s17, 1  ;;  %vm757_vm3 = vcmask 15368   ;;  %vm950_vm4 = vcmask 23568   ;;  %vm1143_vm5 = vcmask 31768   ;;  %vm1336_vm6 = vcmask 39968  }
  0x1d   : > { %s21597_s1 = sld [smem:[#allocation99_spill]]  ;;  %vm1409_vm7 = vcmask 39936   ;;  %vm3513_vm8 = vcmask 1039360   ;;  %s21685_s2 = sld [smem:[#allocation100_spill]]  ;;  %vm3353_vm9 = vcmask 1046528   ;;  %vm5267_vm10 = vcmask 123904  }
  0x1e   : > { %s11709_s26 = sshll.u32 %s461_s25, 8  ;;  %s15611_s25 = smov 3   ;;  %vm5269_vm11 = vcmask 130048   ;;  %vm5399_vm12 = vcmask 261248   ;;  %vm5496_vm13 = vcmask 392448   ;;  %vm5593_vm14 = vcmask 523648  }
  0x1f   : > { %vm5690_vm15 = vcmask 654848   ;;  %vm5740_vm0 = vcmask 654336   ;;  %s458_s28 = sand.u32 1, %s15598_s30   ;;  %s11706_s27 = sshll.u32 %s15717_s17, 4 }
  0x20   : > { %s15751_s18 = scalar_lea.vmem %s21596_s0, %s11709_s26  ;;  %s15612_s26 = smov 4  }
  0x21   : > { %v465_v1 = vld [vmem:[%s15751_s18] sm:$0xff]  ;;  %v466_v2 = vld [vmem:[%s15751_s18 + $0x8] sm:$0xff]  ;;  %v467_v3 = vld [vmem:[%s15751_s18 + $0x10] sm:$0xff]  ;;  %s15613_s0 = smov 16   ;;  %s15620_s17 = smov [#allocation10]  }
  0x22   : > { %500 = vst.msk [vmem:[#allocation2 + $0x2] sm:$0xff] %vm499_vm1, %v465_v1  ;;  %501 = vst.msk [vmem:[#allocation2 + $0xa] sm:$0xff] %vm499_vm1, %v466_v2  ;;  %v468_v4 = vld [vmem:[%s15751_s18 + $0x18] sm:$0xff]  ;;  %v469_v5 = vld [vmem:[%s15751_s18 + $0x20] sm:$0xff] }
  0x23   : > { %502 = vst.msk [vmem:[#allocation2 + $0x12] sm:$0xff] %vm499_vm1, %v467_v3  ;;  %v470_v6 = vld [vmem:[%s15751_s18 + $0x28] sm:$0xff]  ;;  %503 = vst.msk [vmem:[#allocation2 + $0x1a] sm:$0xff] %vm499_vm1, %v468_v4  ;;  %v471_v7 = vld [vmem:[%s15751_s18 + $0x30] sm:$0xff] }
  0x24   : > { %504 = vst.msk [vmem:[#allocation2 + $0x22] sm:$0xff] %vm499_vm1, %v469_v5  ;;  %505 = vst.msk [vmem:[#allocation2 + $0x2a] sm:$0xff] %vm499_vm1, %v470_v6  ;;  %v472_v8 = vld [vmem:[%s15751_s18 + $0x38] sm:$0xff]  ;;  %v473_v9 = vld [vmem:[%s15751_s18 + $0x40] sm:$0xff] }
  0x25   : > { %506 = vst.msk [vmem:[#allocation2 + $0x32] sm:$0xff] %vm499_vm1, %v471_v7  ;;  %507 = vst.msk [vmem:[#allocation2 + $0x3a] sm:$0xff] %vm499_vm1, %v472_v8  ;;  %v474_v10 = vld [vmem:[%s15751_s18 + $0x48] sm:$0xff]  ;;  %v475_v11 = vld [vmem:[%s15751_s18 + $0x50] sm:$0xff] }
  0x26   : > { %508 = vst.msk [vmem:[#allocation2 + $0x42] sm:$0xff] %vm499_vm1, %v473_v9  ;;  %v476_v12 = vld [vmem:[%s15751_s18 + $0x58] sm:$0xff]  ;;  %509 = vst.msk [vmem:[#allocation2 + $0x4a] sm:$0xff] %vm499_vm1, %v474_v10  ;;  %v477_v13 = vld [vmem:[%s15751_s18 + $0x60] sm:$0xff] }
  0x27   : > { %510 = vst.msk [vmem:[#allocation2 + $0x52] sm:$0xff] %vm499_vm1, %v475_v11  ;;  %511 = vst.msk [vmem:[#allocation2 + $0x5a] sm:$0xff] %vm499_vm1, %v476_v12  ;;  %v478_v14 = vld [vmem:[%s15751_s18 + $0x68] sm:$0xff]  ;;  %v479_v15 = vld [vmem:[%s15751_s18 + $0x70] sm:$0xff] }
  0x28   : > { %512 = vst.msk [vmem:[#allocation2 + $0x62] sm:$0xff] %vm499_vm1, %v477_v13  ;;  %513 = vst.msk [vmem:[#allocation2 + $0x6a] sm:$0xff] %vm499_vm1, %v478_v14  ;;  %v480_v16 = vld [vmem:[%s15751_s18 + $0x78] sm:$0xff]  ;;  %v481_v17 = vld [vmem:[%s15751_s18 + $0x80] sm:$0xff] }
  0x29   : > { %514 = vst.msk [vmem:[#allocation2 + $0x72] sm:$0xff] %vm499_vm1, %v479_v15  ;;  %v482_v18 = vld [vmem:[%s15751_s18 + $0x88] sm:$0xff]  ;;  %515 = vst.msk [vmem:[#allocation2 + $0x7a] sm:$0xff] %vm499_vm1, %v480_v16  ;;  %v533_v31 = vld [vmem:[#allocation2] sm:$0xff] }
  0x2a   : > { %516 = vst.msk [vmem:[#allocation2 + $0x82] sm:$0xff] %vm499_vm1, %v481_v17  ;;  %517 = vst.msk [vmem:[#allocation2 + $0x8a] sm:$0xff] %vm499_vm1, %v482_v18  ;;  %v790_v19 = vld [vmem:[#allocation2 + $0x2] sm:$0xff]  ;;  %v791_v21 = vld [vmem:[#allocation2 + $0xa] sm:$0xff] }
  0x2b   : > { %v597_v20 = vld [vmem:[#allocation2 + $0x1] sm:$0xff]  ;;  %854 = vrot.lane.b32.xlu1 %v790_v19, %s15609_s20  ;;  %v598_v22 = vld [vmem:[#allocation2 + $0x9] sm:$0xff]  ;;  %v599_v25 = vld [vmem:[#allocation2 + $0x11] sm:$0xff]  ;;  %565 = vst.msk [vmem:[#allocation3] sm:$0xff] %vm499_vm1, %v533_v31 }
  0x2c   : > { %661 = vrot.lane.b32.xlu0 %v597_v20, %s15610_s21  ;;  %v984_v23 = vld [vmem:[#allocation2 + $0xb] sm:$0xff]  ;;  %v983_v24 = vld [vmem:[#allocation2 + $0x3] sm:$0xff]  ;;  %v600_v27 = vld [vmem:[#allocation2 + $0x19] sm:$0xff] }
  0x2d   : > { %v1176_v26 = vld [vmem:[#allocation2 + $0x4] sm:$0xff]  ;;  %v1177_v28 = vld [vmem:[#allocation2 + $0xc] sm:$0xff]  ;;  %v793_v29 = vld [vmem:[#allocation2 + $0x1a] sm:$0xff] }
  0x2e   : > { %v792_v30 = vld [vmem:[#allocation2 + $0x12] sm:$0xff]  ;;  %v534_v32 = vld [vmem:[#allocation2 + $0x8] sm:$0xff]  ;;  %v986_v33 = vld [vmem:[#allocation2 + $0x1b] sm:$0xff] }
  0x2f   : > { %856 = vrot.lane.b32.xlu1 %v791_v21, %s15609_s20  ;;  %566 = vst.msk [vmem:[#allocation3 + $0x8] sm:$0xff] %vm499_vm1, %v534_v32  ;;  %v985_v34 = vld [vmem:[#allocation2 + $0x13] sm:$0xff]  ;;  %v601_v37 = vld [vmem:[#allocation2 + $0x21] sm:$0xff]  ;;  %v602_v49 = vld [vmem:[#allocation2 + $0x29] sm:$0xff] }
  0x30   : > { %663 = vrot.lane.b32.xlu0 %v598_v22, %s15610_s21  ;;  %v535_v35 = vld [vmem:[#allocation2 + $0x10] sm:$0xff]  ;;  %v536_v36 = vld [vmem:[#allocation2 + $0x18] sm:$0xff]  ;;  %v537_v40 = vld [vmem:[#allocation2 + $0x20] sm:$0xff] }
  0x31   : > { %567 = vst.msk [vmem:[#allocation3 + $0x10] sm:$0xff] %vm499_vm1, %v535_v35  ;;  %v1178_v38 = vld [vmem:[#allocation2 + $0x14] sm:$0xff]  ;;  %568 = vst.msk [vmem:[#allocation3 + $0x18] sm:$0xff] %vm499_vm1, %v536_v36  ;;  %v538_v42 = vld [vmem:[#allocation2 + $0x28] sm:$0xff] }
  0x32   : > { %v483_v39 = vld [vmem:[%s15751_s18 + $0x90] sm:$0xff]  ;;  %v484_v41 = vld [vmem:[%s15751_s18 + $0x98] sm:$0xff]  ;;  %569 = vst.msk [vmem:[#allocation3 + $0x20] sm:$0xff] %vm499_vm1, %v537_v40  ;;  %570 = vst.msk [vmem:[#allocation3 + $0x28] sm:$0xff] %vm499_vm1, %v538_v42 }
  0x33   : > { %1049 = vrot.lane.b32.xlu1 %v984_v23, %s15611_s25  ;;  %518 = vst.msk [vmem:[#allocation2 + $0x92] sm:$0xff] %vm499_vm1, %v483_v39  ;;  %519 = vst.msk [vmem:[#allocation2 + $0x9a] sm:$0xff] %vm499_vm1, %v484_v41  ;;  %v1401_v43 = vld [vmem:[%s21597_s1] sm:$0x1f]  ;;  %v486_v45 = vld [vmem:[%s15751_s18 + $0xa8] sm:$0xff]  ;;  %s15615_s1 = smov 48  }
  0x34   : > { %1047 = vrot.lane.b32.xlu0 %v983_v24, %s15611_s25  ;;  %v485_v44 = vld [vmem:[%s15751_s18 + $0xa0] sm:$0xff]  ;;  %v15819_v46 = vsel %vm1506_vm2, %v1401_v43, 0  ;;  %521 = vst.msk [vmem:[#allocation2 + $0xaa] sm:$0xff] %vm499_vm1, %v486_v45  ;;  %v539_v48 = vld [vmem:[#allocation2 + $0x30] sm:$0xff]  ;;  %v540_v53 = vld [vmem:[#allocation2 + $0x38] sm:$0xff] }
  0x35   : > { %520 = vst.msk [vmem:[#allocation2 + $0xa2] sm:$0xff] %vm499_vm1, %v485_v44  ;;  %v15824_v47 = vand.u32 4294901760, %v15819_v46  ;;  %v1179_v50 = vld [vmem:[#allocation2 + $0x1c] sm:$0xff]  ;;  %571 = vst.msk [vmem:[#allocation3 + $0x30] sm:$0xff] %vm499_vm1, %v539_v48  ;;  %v795_v51 = vld [vmem:[#allocation2 + $0x2a] sm:$0xff] }
  0x36   : > { %v794_v52 = vld [vmem:[#allocation2 + $0x22] sm:$0xff]  ;;  %572 = vst.msk [vmem:[#allocation3 + $0x38] sm:$0xff] %vm499_vm1, %v540_v53  ;;  %v487_v54 = vld [vmem:[%s15751_s18 + $0xb0] sm:$0xff]  ;;  %v488_v57 = vld [vmem:[%s15751_s18 + $0xb8] sm:$0xff] }
  0x37   : > { %665 = vrot.lane.b32.xlu1 %v599_v25, %s15610_s21  ;;  %12826 = vmatprep.subr.mxu0 %v15824_v47  ;;  %v988_v55 = vld [vmem:[#allocation2 + $0x2b] sm:$0xff]  ;;  %v987_v56 = vld [vmem:[#allocation2 + $0x23] sm:$0xff]  ;;  %522 = vst.msk [vmem:[#allocation2 + $0xb2] sm:$0xff] %vm499_vm1, %v487_v54  ;;  %523 = vst.msk [vmem:[#allocation2 + $0xba] sm:$0xff] %vm499_vm1, %v488_v57 }
  0x38   : > { %1240 = vrot.lane.b32.xlu0 %v1176_v26, %s15612_s26  ;;  %12827 = vmatpush3.msra.mxu0 %v15824_v47  ;;  %v603_v58 = vld [vmem:[#allocation2 + $0x31] sm:$0xff]  ;;  %v1180_v59 = vld [vmem:[#allocation2 + $0x24] sm:$0xff]  ;;  %v604_v61 = vld [vmem:[#allocation2 + $0x39] sm:$0xff] }
  0x39   : > { %v541_v60 = vld [vmem:[#allocation2 + $0x40] sm:$0xff]  ;;  %v1181_v62 = vld [vmem:[#allocation2 + $0x2c] sm:$0xff]  ;;  %v1182_v8 = vld [vmem:[#allocation2 + $0x34] sm:$0xff] }
  0x3a   : > { %573 = vst.msk [vmem:[#allocation3 + $0x40] sm:$0xff] %vm499_vm1, %v541_v60  ;;  %v489_v63 = vld [vmem:[%s15751_s18 + $0xc0] sm:$0xff]  ;;  %v542_v1 = vld [vmem:[#allocation2 + $0x48] sm:$0xff]  ;;  %v796_v3 = vld [vmem:[#allocation2 + $0x32] sm:$0xff] }
  0x3b   : > { %667 = vrot.lane.b32.xlu1 %v600_v27, %s15610_s21  ;;  %524 = vst.msk [vmem:[#allocation2 + $0xc2] sm:$0xff] %vm499_vm1, %v489_v63  ;;  %v797_v2 = vld [vmem:[#allocation2 + $0x3a] sm:$0xff]  ;;  %574 = vst.msk [vmem:[#allocation3 + $0x48] sm:$0xff] %vm499_vm1, %v542_v1  ;;  %v490_v6 = vld [vmem:[%s15751_s18 + $0xc8] sm:$0xff] }
  0x3c   : > { %1242 = vrot.lane.b32.xlu0 %v1177_v28, %s15612_s26  ;;  %v990_v4 = vld [vmem:[#allocation2 + $0x3b] sm:$0xff]  ;;  %v989_v5 = vld [vmem:[#allocation2 + $0x33] sm:$0xff]  ;;  %525 = vst.msk [vmem:[#allocation2 + $0xca] sm:$0xff] %vm499_vm1, %v490_v6  ;;  %v606_v10 = vld [vmem:[#allocation2 + $0x49] sm:$0xff] }
  0x3d   : > { %v605_v7 = vld [vmem:[#allocation2 + $0x41] sm:$0xff]  ;;  %v543_v9 = vld [vmem:[#allocation2 + $0x50] sm:$0xff]  ;;  %v544_v13 = vld [vmem:[#allocation2 + $0x58] sm:$0xff] }
  0x3e   : > { %v1183_v11 = vld [vmem:[#allocation2 + $0x3c] sm:$0xff]  ;;  %575 = vst.msk [vmem:[#allocation3 + $0x50] sm:$0xff] %vm499_vm1, %v543_v9  ;;  %v491_v12 = vld [vmem:[%s15751_s18 + $0xd0] sm:$0xff]  ;;  %576 = vst.msk [vmem:[#allocation3 + $0x58] sm:$0xff] %vm499_vm1, %v544_v13 }
  0x3f   : > { %860 = vrot.lane.b32.xlu1 %v793_v29, %s15609_s20  ;;  %526 = vst.msk [vmem:[#allocation2 + $0xd2] sm:$0xff] %vm499_vm1, %v491_v12  ;;  %v799_v14 = vld [vmem:[#allocation2 + $0x4a] sm:$0xff]  ;;  %v798_v15 = vld [vmem:[#allocation2 + $0x42] sm:$0xff]  ;;  %v492_v18 = vld [vmem:[%s15751_s18 + $0xd8] sm:$0xff] }
  0x40   : > { %858 = vrot.lane.b32.xlu0 %v792_v30, %s15609_s20  ;;  %v992_v16 = vld [vmem:[#allocation2 + $0x4b] sm:$0xff]  ;;  %v991_v17 = vld [vmem:[#allocation2 + $0x43] sm:$0xff]  ;;  %527 = vst.msk [vmem:[#allocation2 + $0xda] sm:$0xff] %vm499_vm1, %v492_v18  ;;  %v608_v22 = vld [vmem:[#allocation2 + $0x59] sm:$0xff] }
  0x41   : > { %v607_v19 = vld [vmem:[#allocation2 + $0x51] sm:$0xff]  ;;  %v1184_v20 = vld [vmem:[#allocation2 + $0x44] sm:$0xff]  ;;  %v801_v26 = vld [vmem:[#allocation2 + $0x5a] sm:$0xff] }
  0x42   : > { %v545_v21 = vld [vmem:[#allocation2 + $0x60] sm:$0xff]  ;;  %v1185_v23 = vld [vmem:[#allocation2 + $0x4c] sm:$0xff]  ;;  %v1186_v32 = vld [vmem:[#allocation2 + $0x54] sm:$0xff] }
  0x43   : > { %1053 = vrot.lane.b32.xlu1 %v986_v33, %s15611_s25  ;;  %577 = vst.msk [vmem:[#allocation3 + $0x60] sm:$0xff] %vm499_vm1, %v545_v21  ;;  %v493_v24 = vld [vmem:[%s15751_s18 + $0xe0] sm:$0xff]  ;;  %v546_v25 = vld [vmem:[#allocation2 + $0x68] sm:$0xff]  ;;  %v800_v27 = vld [vmem:[#allocation2 + $0x52] sm:$0xff] }
  0x44   : > { %1051 = vrot.lane.b32.xlu0 %v985_v34, %s15611_s25  ;;  %528 = vst.msk [vmem:[#allocation2 + $0xe2] sm:$0xff] %vm499_vm1, %v493_v24  ;;  %578 = vst.msk [vmem:[#allocation3 + $0x68] sm:$0xff] %vm499_vm1, %v546_v25  ;;  %v994_v28 = vld [vmem:[#allocation2 + $0x5b] sm:$0xff]  ;;  %v993_v29 = vld [vmem:[#allocation2 + $0x53] sm:$0xff] }
  0x45   : > { %v494_v30 = vld [vmem:[%s15751_s18 + $0xe8] sm:$0xff]  ;;  %v547_v33 = vld [vmem:[#allocation2 + $0x70] sm:$0xff]  ;;  %v1187_v35 = vld [vmem:[#allocation2 + $0x5c] sm:$0xff] }
  0x46   : > { %529 = vst.msk [vmem:[#allocation2 + $0xea] sm:$0xff] %vm499_vm1, %v494_v30  ;;  %v609_v31 = vld [vmem:[#allocation2 + $0x61] sm:$0xff]  ;;  %v610_v34 = vld [vmem:[#allocation2 + $0x69] sm:$0xff]  ;;  %579 = vst.msk [vmem:[#allocation3 + $0x70] sm:$0xff] %vm499_vm1, %v547_v33 }
  0x47   : > { %669 = vrot.lane.b32.xlu1 %v601_v37, %s15610_s21  ;;  %v495_v36 = vld [vmem:[%s15751_s18 + $0xf0] sm:$0xff]  ;;  %v548_v37 = vld [vmem:[#allocation2 + $0x78] sm:$0xff]  ;;  %v802_v39 = vld [vmem:[#allocation2 + $0x62] sm:$0xff] }
  0x48   : > { %1244 = vrot.lane.b32.xlu0 %v1178_v38, %s15612_s26  ;;  %530 = vst.msk [vmem:[#allocation2 + $0xf2] sm:$0xff] %vm499_vm1, %v495_v36  ;;  %v803_v38 = vld [vmem:[#allocation2 + $0x6a] sm:$0xff]  ;;  %580 = vst.msk [vmem:[#allocation3 + $0x78] sm:$0xff] %vm499_vm1, %v548_v37  ;;  %v496_v42 = vld [vmem:[%s15751_s18 + $0xf8] sm:$0xff]  ;;  %s22111_s18 = smov 64  }
  0x49   : > { %v996_v40 = vld [vmem:[#allocation2 + $0x6b] sm:$0xff]  ;;  %v995_v41 = vld [vmem:[#allocation2 + $0x63] sm:$0xff]  ;;  %531 = vst.msk [vmem:[#allocation2 + $0xfa] sm:$0xff] %vm499_vm1, %v496_v42  ;;  %v612_v48 = vld [vmem:[#allocation2 + $0x79] sm:$0xff] }
  0x4a   : > { %v611_v43 = vld [vmem:[#allocation2 + $0x71] sm:$0xff]  ;;  %v1188_v44 = vld [vmem:[#allocation2 + $0x64] sm:$0xff]  ;;  %v809_v36 = vld [vmem:[#allocation2 + $0x9a] sm:$0xff] }
  0x4b   : > { %671 = vrot.lane.b32.xlu1 %v602_v49, %s15610_s21  ;;  %v549_v45 = vld [vmem:[#allocation2 + $0x80] sm:$0xff]  ;;  %v1189_v49 = vld [vmem:[#allocation2 + $0x6c] sm:$0xff]  ;;  %v1190_v60 = vld [vmem:[#allocation2 + $0x74] sm:$0xff] }
  0x4c   : > { %1246 = vrot.lane.b32.xlu0 %v1179_v50, %s15612_s26  ;;  %581 = vst.msk [vmem:[#allocation3 + $0x80] sm:$0xff] %vm499_vm1, %v549_v45  ;;  %v550_v50 = vld [vmem:[#allocation2 + $0x88] sm:$0xff]  ;;  %v551_v63 = vld [vmem:[#allocation2 + $0x90] sm:$0xff]  ;;  %v553_v24 = vld [vmem:[#allocation2 + $0xa0] sm:$0xff] }
  0x4d   : > { %582 = vst.msk [vmem:[#allocation3 + $0x88] sm:$0xff] %vm499_vm1, %v550_v50  ;;  %v614_v1 = vld [vmem:[#allocation2 + $0x89] sm:$0xff]  ;;  %583 = vst.msk [vmem:[#allocation3 + $0x90] sm:$0xff] %vm499_vm1, %v551_v63  ;;  %v808_v37 = vld [vmem:[#allocation2 + $0x92] sm:$0xff] }
  0x4e   : > { %v807_v6 = vld [vmem:[#allocation2 + $0x8a] sm:$0xff]  ;;  %585 = vst.msk [vmem:[#allocation3 + $0xa0] sm:$0xff] %vm499_vm1, %v553_v24  ;;  %v1002_v42 = vld [vmem:[#allocation2 + $0x9b] sm:$0xff] }
  0x4f   : > { %864 = vrot.lane.b32.xlu1 %v795_v51, %s15609_s20  ;;  %v805_v51 = vld [vmem:[#allocation2 + $0x7a] sm:$0xff]  ;;  %v1192_v18 = vld [vmem:[#allocation2 + $0x84] sm:$0xff] }
  0x50   : > { %862 = vrot.lane.b32.xlu0 %v794_v52, %s15609_s20  ;;  %v804_v52 = vld [vmem:[#allocation2 + $0x72] sm:$0xff]  ;;  %v554_v33 = vld [vmem:[#allocation2 + $0xa8] sm:$0xff] }
  0x51   : > { %586 = vst.msk [vmem:[#allocation3 + $0xa8] sm:$0xff] %vm499_vm1, %v554_v33 }
  0x53   : > { %1057 = vrot.lane.b32.xlu1 %v988_v55, %s15611_s25  ;;  %v998_v55 = vld [vmem:[#allocation2 + $0x7b] sm:$0xff] }
  0x54   : > { %1055 = vrot.lane.b32.xlu0 %v987_v56, %s15611_s25  ;;  %v997_v56 = vld [vmem:[#allocation2 + $0x73] sm:$0xff] }
  0x57   : > { %673 = vrot.lane.b32.xlu1 %v603_v58, %s15610_s21 }
  0x58   : > { %1248 = vrot.lane.b32.xlu0 %v1180_v59, %s15612_s26  ;;  %v613_v59 = vld [vmem:[#allocation2 + $0x81] sm:$0xff] }
  0x5b   : > { %675 = vrot.lane.b32.xlu1 %v604_v61, %s15610_s21 }
  0x5c   : > { %1250 = vrot.lane.b32.xlu0 %v1181_v62, %s15612_s26 }
  0x5f   : > { %868 = vrot.lane.b32.xlu1 %v797_v2, %s15609_s20  ;;  %v1191_v2 = vld [vmem:[#allocation2 + $0x7c] sm:$0xff] }
  0x60   : > { %866 = vrot.lane.b32.xlu0 %v796_v3, %s15609_s20 }
  0x63   : > { %1061 = vrot.lane.b32.xlu1 %v990_v4, %s15611_s25 }
  0x64   : > { %1059 = vrot.lane.b32.xlu0 %v989_v5, %s15611_s25  ;;  %v552_v5 = vld [vmem:[#allocation2 + $0x98] sm:$0xff] }
  0x65   : > { %584 = vst.msk [vmem:[#allocation3 + $0x98] sm:$0xff] %vm499_vm1, %v552_v5 }
  0x67   : > { %677 = vrot.lane.b32.xlu1 %v605_v7, %s15610_s21  ;;  %v806_v7 = vld [vmem:[#allocation2 + $0x82] sm:$0xff] }
  0x68   : > { %1252 = vrot.lane.b32.xlu0 %v1182_v8, %s15612_s26 }
  0x6b   : > { %679 = vrot.lane.b32.xlu1 %v606_v10, %s15610_s21  ;;  %v1000_v10 = vld [vmem:[#allocation2 + $0x8b] sm:$0xff] }
  0x6c   : > { %1254 = vrot.lane.b32.xlu0 %v1183_v11, %s15612_s26  ;;  %v999_v11 = vld [vmem:[#allocation2 + $0x83] sm:$0xff] }
  0x6f   : > { %872 = vrot.lane.b32.xlu1 %v799_v14, %s15609_s20 }
  0x70   : > { %870 = vrot.lane.b32.xlu0 %v798_v15, %s15609_s20 }
  0x73   : > { %1065 = vrot.lane.b32.xlu1 %v992_v16, %s15611_s25 }
  0x74   : > { %1063 = vrot.lane.b32.xlu0 %v991_v17, %s15611_s25  ;;  %v615_v17 = vld [vmem:[#allocation2 + $0x91] sm:$0xff] }
  0x77   : > { %681 = vrot.lane.b32.xlu1 %v607_v19, %s15610_s21 }
  0x78   : > { %1256 = vrot.lane.b32.xlu0 %v1184_v20, %s15612_s26 }
  0x7b   : > { %683 = vrot.lane.b32.xlu1 %v608_v22, %s15610_s21 }
  0x7c   : > { %1258 = vrot.lane.b32.xlu0 %v1185_v23, %s15612_s26 }
  0x7f   : > { %876 = vrot.lane.b32.xlu1 %v801_v26, %s15609_s20 }
  0x80   : > { %874 = vrot.lane.b32.xlu0 %v800_v27, %s15609_s20  ;;  %v616_v27 = vld [vmem:[#allocation2 + $0x99] sm:$0xff] }
  0x83   : > { %1069 = vrot.lane.b32.xlu1 %v994_v28, %s15611_s25  ;;  %v1193_v28 = vld [vmem:[#allocation2 + $0x8c] sm:$0xff] }
  0x84   : > { %1067 = vrot.lane.b32.xlu0 %v993_v29, %s15611_s25 }
  0x87   : > { %685 = vrot.lane.b32.xlu1 %v609_v31, %s15610_s21 }
  0x88   : > { %1260 = vrot.lane.b32.xlu0 %v1186_v32, %s15612_s26 }
  0x8b   : > { %687 = vrot.lane.b32.xlu1 %v610_v34, %s15610_s21 }
  0x8c   : > { %1262 = vrot.lane.b32.xlu0 %v1187_v35, %s15612_s26 }
  0x8f   : > { %880 = vrot.lane.b32.xlu1 %v803_v38, %s15609_s20 }
  0x90   : > { %878 = vrot.lane.b32.xlu0 %v802_v39, %s15609_s20 }
  0x93   : > { %1073 = vrot.lane.b32.xlu1 %v996_v40, %s15611_s25 }
  0x94   : > { %1071 = vrot.lane.b32.xlu0 %v995_v41, %s15611_s25 }
  0x97   : > { %689 = vrot.lane.b32.xlu1 %v611_v43, %s15610_s21  ;;  %v1001_v43 = vld [vmem:[#allocation2 + $0x93] sm:$0xff] }
  0x98   : > { %1264 = vrot.lane.b32.xlu0 %v1188_v44, %s15612_s26 }
  0x9b   : > { %691 = vrot.lane.b32.xlu1 %v612_v48, %s15610_s21 }
  0x9c   : > { %1266 = vrot.lane.b32.xlu0 %v1189_v49, %s15612_s26 }
  0x9d   : > { %v855_v53 = vpop.permute.xlu1 %854 }
  0x9e   : > { %v662_v54 = vpop.permute.xlu0 %661 }
  0x9f   : > { %758 = vst.msk [vmem:[#allocation3] sm:$0xff] %vm757_vm3, %v662_v54  ;;  %884 = vrot.lane.b32.xlu1 %v805_v51, %s15609_s20  ;;  %v617_v51 = vld [vmem:[#allocation2 + $0xa1] sm:$0xff] }
  0xa0   : > { %882 = vrot.lane.b32.xlu0 %v804_v52, %s15609_s20  ;;  %951 = vst.msk [vmem:[#allocation3] sm:$0xff] %vm950_vm4, %v855_v53  ;;  %v1194_v52 = vld [vmem:[#allocation2 + $0x94] sm:$0xff] }
  0xa1   : > { %v857_v57 = vpop.permute.xlu1 %856 }
  0xa2   : > { %v664_v58 = vpop.permute.xlu0 %663 }
  0xa3   : > { %759 = vst.msk [vmem:[#allocation3 + $0x8] sm:$0xff] %vm757_vm3, %v664_v58  ;;  %1077 = vrot.lane.b32.xlu1 %v998_v55, %s15611_s25  ;;  %v555_v58 = vld [vmem:[#allocation2 + $0xb0] sm:$0xff] }
  0xa4   : > { %1075 = vrot.lane.b32.xlu0 %v997_v56, %s15611_s25  ;;  %952 = vst.msk [vmem:[#allocation3 + $0x8] sm:$0xff] %vm950_vm4, %v857_v57 }
  0xa5   : > { %v1050_v61 = vpop.permute.xlu1 %1049  ;;  %587 = vst.msk [vmem:[#allocation3 + $0xb0] sm:$0xff] %vm499_vm1, %v555_v58 }
  0xa6   : > { %v1048_v62 = vpop.permute.xlu0 %1047  ;;  %1145 = vst.msk [vmem:[#allocation3 + $0x8] sm:$0xff] %vm1143_vm5, %v1050_v61  ;;  %v618_v61 = vld [vmem:[#allocation2 + $0xa9] sm:$0xff] }
  0xa7   : > { %1144 = vst.msk [vmem:[#allocation3] sm:$0xff] %vm1143_vm5, %v1048_v62  ;;  %693 = vrot.lane.b32.xlu1 %v613_v59, %s15610_s21  ;;  %v1195_v62 = vld [vmem:[#allocation2 + $0x9c] sm:$0xff] }
  0xa8   : > { %1268 = vrot.lane.b32.xlu0 %v1190_v60, %s15612_s26 }
  0xa9   : > { %v666_v3 = vpop.permute.xlu1 %665 }
  0xaa   : > { %v1241_v4 = vpop.permute.xlu0 %1240  ;;  %760 = vst.msk [vmem:[#allocation3 + $0x10] sm:$0xff] %vm757_vm3, %v666_v3 }
  0xab   : > { %1337 = vst.msk [vmem:[#allocation3] sm:$0xff] %vm1336_vm6, %v1241_v4  ;;  %695 = vrot.lane.b32.xlu1 %v614_v1, %s15610_s21  ;;  %v556_v4 = vld [vmem:[#allocation2 + $0xb8] sm:$0xff] }
  0xac   : > { %1270 = vrot.lane.b32.xlu0 %v1191_v2, %s15612_s26  ;;  %588 = vst.msk [vmem:[#allocation3 + $0xb8] sm:$0xff] %vm499_vm1, %v556_v4 }
  0xad   : > { %v668_v8 = vpop.permute.xlu1 %667 }
  0xae   : > { %v1243_v9 = vpop.permute.xlu0 %1242  ;;  %761 = vst.msk [vmem:[#allocation3 + $0x18] sm:$0xff] %vm757_vm3, %v668_v8  ;;  %v810_v8 = vld [vmem:[#allocation2 + $0xa2] sm:$0xff] }
  0xaf   : > { %1338 = vst.msk [vmem:[#allocation3 + $0x8] sm:$0xff] %vm1336_vm6, %v1243_v9  ;;  %888 = vrot.lane.b32.xlu1 %v807_v6, %s15609_s20 }
  0xb0   : > { %886 = vrot.lane.b32.xlu0 %v806_v7, %s15609_s20  ;;  %v811_v7 = vld [vmem:[#allocation2 + $0xaa] sm:$0xff] }
  0xb1   : > { %v861_v12 = vpop.permute.xlu1 %860 }
  0xb2   : > { %v859_v13 = vpop.permute.xlu0 %858  ;;  %v1369_v14 = vld [vmem:[#allocation3] sm:$0xff]  ;;  %954 = vst.msk [vmem:[#allocation3 + $0x18] sm:$0xff] %vm950_vm4, %v861_v12 }
  0xb3   : > { %953 = vst.msk [vmem:[#allocation3 + $0x10] sm:$0xff] %vm950_vm4, %v859_v13  ;;  %v1411_v15 = vsel %vm1409_vm7, %v1369_v14, 0  ;;  %1081 = vrot.lane.b32.xlu1 %v1000_v10, %s15611_s25  ;;  %v1004_v13 = vld [vmem:[#allocation2 + $0xab] sm:$0xff]  ;;  %v1003_v14 = vld [vmem:[#allocation2 + $0xa3] sm:$0xff] }
  0xb4   : > { %1079 = vrot.lane.b32.xlu0 %v999_v11, %s15611_s25  ;;  %v15931_v16 = vand.u32 4294901760, %v1411_v15 }
  0xb5   : > { %v1054_v19 = vpop.permute.xlu1 %1053 }
  0xb6   : > { %v1052_v20 = vpop.permute.xlu0 %1051  ;;  %v15934_v21 = vsub.f32 %v1411_v15, %v15931_v16  ;;  %v1370_v22 = vld [vmem:[#allocation3 + $0x8] sm:$0xff]  ;;  %1147 = vst.msk [vmem:[#allocation3 + $0x18] sm:$0xff] %vm1143_vm5, %v1054_v19 }
  0xb7   : > { %1146 = vst.msk [vmem:[#allocation3 + $0x10] sm:$0xff] %vm1143_vm5, %v1052_v20  ;;  %v1414_v23 = vsel %vm1409_vm7, %v1370_v22, 0  ;;  %697 = vrot.lane.b32.xlu1 %v615_v17, %s15610_s21  ;;  %v619_v22 = vld [vmem:[#allocation2 + $0xb1] sm:$0xff] }
  0xb8   : > { %1272 = vrot.lane.b32.xlu0 %v1192_v18, %s15612_s26  ;;  %v21168_v25 = vand.u32 4294901760, %v15934_v21  ;;  %v15942_v26 = vand.u32 4294901760, %v1414_v23 }
  0xb9   : > { %v670_v29 = vpop.permute.xlu1 %669 }
  0xba   : > { %v1245_v30 = vpop.permute.xlu0 %1244  ;;  %v1579_v31 = vsub.f32 %v15934_v21, %v21168_v25  ;;  %v15949_v32 = vsub.f32 %v1414_v23, %v15942_v26  ;;  %762 = vst.msk [vmem:[#allocation3 + $0x20] sm:$0xff] %vm757_vm3, %v670_v29  ;;  %v1196_v23 = vld [vmem:[#allocation2 + $0xa4] sm:$0xff] }
  0xbb   : > { %1339 = vst.msk [vmem:[#allocation3 + $0x10] sm:$0xff] %vm1336_vm6, %v1245_v30  ;;  %699 = vrot.lane.b32.xlu1 %v616_v27, %s15610_s21 }
  0xbc   : > { %1274 = vrot.lane.b32.xlu0 %v1193_v28, %s15612_s26  ;;  %v1580_v34 = vand.u32 4294901760, %v1579_v31  ;;  %v21166_v35 = vand.u32 4294901760, %v15949_v32  ;;  %v557_v31 = vld [vmem:[#allocation2 + $0xc0] sm:$0xff] }
  0xbd   : > { %v672_v38 = vpop.permute.xlu1 %671  ;;  %589 = vst.msk [vmem:[#allocation3 + $0xc0] sm:$0xff] %vm499_vm1, %v557_v31 }
  0xbe   : > { %v1247_v39 = vpop.permute.xlu0 %1246  ;;  %12828 = vmatprep.mubr.f32.mxu0 %v1580_v34  ;;  %v1589_v40 = vsub.f32 %v15949_v32, %v21166_v35  ;;  %763 = vst.msk [vmem:[#allocation3 + $0x28] sm:$0xff] %vm757_vm3, %v672_v38 }
  0xbf   : > { %1340 = vst.msk [vmem:[#allocation3 + $0x18] sm:$0xff] %vm1336_vm6, %v1247_v39  ;;  %892 = vrot.lane.b32.xlu1 %v809_v36, %s15609_s20  ;;  %v620_v36 = vld [vmem:[#allocation2 + $0xb9] sm:$0xff] }
  0xc0   : > { %890 = vrot.lane.b32.xlu0 %v808_v37, %s15609_s20  ;;  %v1590_v41 = vand.u32 4294901760, %v1589_v40  ;;  %v1197_v37 = vld [vmem:[#allocation2 + $0xac] sm:$0xff] }
  0xc1   : > { %v865_v44 = vpop.permute.xlu1 %864 }
  0xc2   : > { %v863_v45 = vpop.permute.xlu0 %862  ;;  %12829 = vmatmul.mubr.f32.vlgmr.msra.gmra.mrb[0].mxu0 %v1590_v41  ;;  %v1371_v48 = vld [vmem:[#allocation3 + $0x10] sm:$0xff]  ;;  %956 = vst.msk [vmem:[#allocation3 + $0x28] sm:$0xff] %vm950_vm4, %v865_v44 }
  0xc3   : > { %955 = vst.msk [vmem:[#allocation3 + $0x20] sm:$0xff] %vm950_vm4, %v863_v45  ;;  %v1417_v49 = vsel %vm1409_vm7, %v1371_v48, 0  ;;  %1085 = vrot.lane.b32.xlu1 %v1002_v42, %s15611_s25  ;;  %v558_v42 = vld [vmem:[#allocation2 + $0xc8] sm:$0xff]  ;;  %v813_v45 = vld [vmem:[#allocation2 + $0xba] sm:$0xff]  ;;  %v812_v48 = vld [vmem:[#allocation2 + $0xb2] sm:$0xff] }
  0xc4   : > { %1083 = vrot.lane.b32.xlu0 %v1001_v43, %s15611_s25  ;;  %v15969_v50 = vand.u32 4294901760, %v1417_v49  ;;  %590 = vst.msk [vmem:[#allocation3 + $0xc8] sm:$0xff] %vm499_vm1, %v558_v42 }
  0xc5   : > { %v1058_v53 = vpop.permute.xlu1 %1057 }
  0xc6   : > { %v1056_v54 = vpop.permute.xlu0 %1055  ;;  %v15972_v55 = vsub.f32 %v1417_v49, %v15969_v50  ;;  %v1372_v56 = vld [vmem:[#allocation3 + $0x18] sm:$0xff]  ;;  %1149 = vst.msk [vmem:[#allocation3 + $0x28] sm:$0xff] %vm1143_vm5, %v1058_v53 }
  0xc7   : > { %1148 = vst.msk [vmem:[#allocation3 + $0x20] sm:$0xff] %vm1143_vm5, %v1056_v54  ;;  %v1420_v57 = vsel %vm1409_vm7, %v1372_v56, 0  ;;  %701 = vrot.lane.b32.xlu1 %v617_v51, %s15610_s21  ;;  %v1006_v54 = vld [vmem:[#allocation2 + $0xbb] sm:$0xff]  ;;  %v1005_v56 = vld [vmem:[#allocation2 + $0xb3] sm:$0xff] }
  0xc8   : > { %1276 = vrot.lane.b32.xlu0 %v1194_v52, %s15612_s26  ;;  %v21165_v59 = vand.u32 4294901760, %v15972_v55  ;;  %v15980_v60 = vand.u32 4294901760, %v1420_v57 }
  0xc9   : > { %v674_v63 = vpop.permute.xlu1 %673 }
  0xca   : > { %v1249_v1 = vpop.permute.xlu0 %1248  ;;  %v1599_v2 = vsub.f32 %v15972_v55, %v21165_v59  ;;  %v15987_v3 = vsub.f32 %v1420_v57, %v15980_v60  ;;  %764 = vst.msk [vmem:[#allocation3 + $0x30] sm:$0xff] %vm757_vm3, %v674_v63 }
  0xcb   : > { %1341 = vst.msk [vmem:[#allocation3 + $0x20] sm:$0xff] %vm1336_vm6, %v1249_v1  ;;  %703 = vrot.lane.b32.xlu1 %v618_v61, %s15610_s21  ;;  %v621_v1 = vld [vmem:[#allocation2 + $0xc1] sm:$0xff] }
  0xcc   : > { %1278 = vrot.lane.b32.xlu0 %v1195_v62, %s15612_s26  ;;  %v1600_v5 = vand.u32 4294901760, %v1599_v2  ;;  %v21163_v6 = vand.u32 4294901760, %v15987_v3  ;;  %v1198_v2 = vld [vmem:[#allocation2 + $0xb4] sm:$0xff] }
  0xcd   : > { %v676_v9 = vpop.permute.xlu1 %675 }
  0xce   : > { %v1251_v10 = vpop.permute.xlu0 %1250  ;;  %12831 = vmatprep.mubr.f32.mxu0 %v1600_v5  ;;  %v1609_v11 = vsub.f32 %v15987_v3, %v21163_v6  ;;  %765 = vst.msk [vmem:[#allocation3 + $0x38] sm:$0xff] %vm757_vm3, %v676_v9 }
  0xcf   : > { %1342 = vst.msk [vmem:[#allocation3 + $0x28] sm:$0xff] %vm1336_vm6, %v1251_v10  ;;  %896 = vrot.lane.b32.xlu1 %v811_v7, %s15609_s20  ;;  %v559_v10 = vld [vmem:[#allocation2 + $0xd0] sm:$0xff] }
  0xd0   : > { %894 = vrot.lane.b32.xlu0 %v810_v8, %s15609_s20  ;;  %v1610_v12 = vand.u32 4294901760, %v1609_v11  ;;  %591 = vst.msk [vmem:[#allocation3 + $0xd0] sm:$0xff] %vm499_vm1, %v559_v10  ;;  %v562_v10 = vld [vmem:[#allocation2 + $0xe8] sm:$0xff] }
  0xd1   : > { %v869_v15 = vpop.permute.xlu1 %868  ;;  %594 = vst.msk [vmem:[#allocation3 + $0xe8] sm:$0xff] %vm499_vm1, %v562_v10  ;;  %v564_v10 = vld [vmem:[#allocation2 + $0xf8] sm:$0xff] }
  0xd2   : > { %v867_v17 = vpop.permute.xlu0 %866  ;;  %12832 = vmatmul.mubr.f32.gmra.mrb[2].mxu0 %v1610_v12  ;;  %v1373_v18 = vld [vmem:[#allocation3 + $0x20] sm:$0xff]  ;;  %958 = vst.msk [vmem:[#allocation3 + $0x38] sm:$0xff] %vm950_vm4, %v869_v15 }
  0xd3   : > { %957 = vst.msk [vmem:[#allocation3 + $0x30] sm:$0xff] %vm950_vm4, %v867_v17  ;;  %v1423_v19 = vsel %vm1409_vm7, %v1373_v18, 0  ;;  %1089 = vrot.lane.b32.xlu1 %v1004_v13, %s15611_s25  ;;  %v622_v13 = vld [vmem:[#allocation2 + $0xc9] sm:$0xff] }
  0xd4   : > { %1087 = vrot.lane.b32.xlu0 %v1003_v14, %s15611_s25  ;;  %v16007_v20 = vand.u32 4294901760, %v1423_v19  ;;  %v1199_v14 = vld [vmem:[#allocation2 + $0xbc] sm:$0xff]  ;;  %596 = vst.msk [vmem:[#allocation3 + $0xf8] sm:$0xff] %vm499_vm1, %v564_v10 }
  0xd5   : > { %v1062_v24 = vpop.permute.xlu1 %1061 }
  0xd6   : > { %v1060_v27 = vpop.permute.xlu0 %1059  ;;  %v16010_v28 = vsub.f32 %v1423_v19, %v16007_v20  ;;  %v1374_v29 = vld [vmem:[#allocation3 + $0x28] sm:$0xff]  ;;  %1151 = vst.msk [vmem:[#allocation3 + $0x38] sm:$0xff] %vm1143_vm5, %v1062_v24 }
  0xd7   : > { %1150 = vst.msk [vmem:[#allocation3 + $0x30] sm:$0xff] %vm1143_vm5, %v1060_v27  ;;  %v1426_v30 = vsel %vm1409_vm7, %v1374_v29, 0  ;;  %705 = vrot.lane.b32.xlu1 %v619_v22, %s15610_s21  ;;  %v560_v22 = vld [vmem:[#allocation2 + $0xd8] sm:$0xff]  ;;  %v815_v27 = vld [vmem:[#allocation2 + $0xca] sm:$0xff]  ;;  %v814_v29 = vld [vmem:[#allocation2 + $0xc2] sm:$0xff] }
  0xd8   : > { %1280 = vrot.lane.b32.xlu0 %v1196_v23, %s15612_s26  ;;  %v21162_v33 = vand.u32 4294901760, %v16010_v28  ;;  %v16018_v34 = vand.u32 4294901760, %v1426_v30  ;;  %592 = vst.msk [vmem:[#allocation3 + $0xd8] sm:$0xff] %vm499_vm1, %v560_v22 }
  0xd9   : > { %v678_v38 = vpop.permute.xlu1 %677 }
  0xda   : > { %v1253_v39 = vpop.permute.xlu0 %1252  ;;  %v1619_v40 = vsub.f32 %v16010_v28, %v21162_v33  ;;  %v16025_v41 = vsub.f32 %v1426_v30, %v16018_v34  ;;  %766 = vst.msk [vmem:[#allocation3 + $0x40] sm:$0xff] %vm757_vm3, %v678_v38  ;;  %v1008_v38 = vld [vmem:[#allocation2 + $0xcb] sm:$0xff] }
  0xdb   : > { %1343 = vst.msk [vmem:[#allocation3 + $0x30] sm:$0xff] %vm1336_vm6, %v1253_v39  ;;  %707 = vrot.lane.b32.xlu1 %v620_v36, %s15610_s21  ;;  %v1007_v39 = vld [vmem:[#allocation2 + $0xc3] sm:$0xff] }
  0xdc   : > { %1282 = vrot.lane.b32.xlu0 %v1197_v37, %s15612_s26  ;;  %v1620_v43 = vand.u32 4294901760, %v1619_v40  ;;  %v21160_v44 = vand.u32 4294901760, %v16025_v41 }
  0xdd   : > { %v680_v49 = vpop.permute.xlu1 %679 }
  0xde   : > { %v1255_v51 = vpop.permute.xlu0 %1254  ;;  %12834 = vmatprep.mubr.f32.mxu0 %v1620_v43  ;;  %v1629_v52 = vsub.f32 %v16025_v41, %v21160_v44  ;;  %767 = vst.msk [vmem:[#allocation3 + $0x48] sm:$0xff] %vm757_vm3, %v680_v49  ;;  %v623_v49 = vld [vmem:[#allocation2 + $0xd1] sm:$0xff] }
  0xdf   : > { %1344 = vst.msk [vmem:[#allocation3 + $0x38] sm:$0xff] %vm1336_vm6, %v1255_v51  ;;  %900 = vrot.lane.b32.xlu1 %v813_v45, %s15609_s20  ;;  %v1200_v51 = vld [vmem:[#allocation2 + $0xc4] sm:$0xff] }
  0xe0   : > { %898 = vrot.lane.b32.xlu0 %v812_v48, %s15609_s20  ;;  %v1630_v53 = vand.u32 4294901760, %v1629_v52 }
  0xe1   : > { %v873_v57 = vpop.permute.xlu1 %872 }
  0xe2   : > { %v871_v58 = vpop.permute.xlu0 %870  ;;  %12835 = vmatmul.mubr.f32.gmra.mrb[4].mxu0 %v1630_v53  ;;  %v1375_v61 = vld [vmem:[#allocation3 + $0x30] sm:$0xff]  ;;  %960 = vst.msk [vmem:[#allocation3 + $0x48] sm:$0xff] %vm950_vm4, %v873_v57 }
  0xe3   : > { %959 = vst.msk [vmem:[#allocation3 + $0x40] sm:$0xff] %vm950_vm4, %v871_v58  ;;  %v1429_v62 = vsel %vm1409_vm7, %v1375_v61, 0  ;;  %1093 = vrot.lane.b32.xlu1 %v1006_v54, %s15611_s25  ;;  %v561_v58 = vld [vmem:[#allocation2 + $0xe0] sm:$0xff] }
  0xe4   : > { %1091 = vrot.lane.b32.xlu0 %v1005_v56, %s15611_s25  ;;  %v16045_v63 = vand.u32 4294901760, %v1429_v62  ;;  %593 = vst.msk [vmem:[#allocation3 + $0xe0] sm:$0xff] %vm499_vm1, %v561_v58  ;;  %v626_v58 = vld [vmem:[#allocation2 + $0xe9] sm:$0xff] }
  0xe5   : > { %v1066_v4 = vpop.permute.xlu1 %1065 }
  0xe6   : > { %v1064_v5 = vpop.permute.xlu0 %1063  ;;  %v16048_v7 = vsub.f32 %v1429_v62, %v16045_v63  ;;  %v1376_v8 = vld [vmem:[#allocation3 + $0x38] sm:$0xff]  ;;  %1153 = vst.msk [vmem:[#allocation3 + $0x48] sm:$0xff] %vm1143_vm5, %v1066_v4 }
  0xe7   : > { %1152 = vst.msk [vmem:[#allocation3 + $0x40] sm:$0xff] %vm1143_vm5, %v1064_v5  ;;  %v1432_v9 = vsel %vm1409_vm7, %v1376_v8, 0  ;;  %709 = vrot.lane.b32.xlu1 %v621_v1, %s15610_s21  ;;  %v624_v1 = vld [vmem:[#allocation2 + $0xd9] sm:$0xff] }
  0xe8   : > { %1284 = vrot.lane.b32.xlu0 %v1198_v2, %s15612_s26  ;;  %v21159_v11 = vand.u32 4294901760, %v16048_v7  ;;  %v16056_v12 = vand.u32 4294901760, %v1432_v9  ;;  %v1201_v2 = vld [vmem:[#allocation2 + $0xcc] sm:$0xff] }
  0xe9   : > { %v682_v15 = vpop.permute.xlu1 %681 }
  0xea   : > { %v1257_v17 = vpop.permute.xlu0 %1256  ;;  %v1639_v18 = vsub.f32 %v16048_v7, %v21159_v11  ;;  %v16063_v19 = vsub.f32 %v1432_v9, %v16056_v12  ;;  %768 = vst.msk [vmem:[#allocation3 + $0x50] sm:$0xff] %vm757_vm3, %v682_v15  ;;  %v817_v15 = vld [vmem:[#allocation2 + $0xda] sm:$0xff] }
  0xeb   : > { %1345 = vst.msk [vmem:[#allocation3 + $0x40] sm:$0xff] %vm1336_vm6, %v1257_v17  ;;  %711 = vrot.lane.b32.xlu1 %v622_v13, %s15610_s21  ;;  %v816_v17 = vld [vmem:[#allocation2 + $0xd2] sm:$0xff] }
  0xec   : > { %1286 = vrot.lane.b32.xlu0 %v1199_v14, %s15612_s26  ;;  %v1640_v23 = vand.u32 4294901760, %v1639_v18  ;;  %v21157_v24 = vand.u32 4294901760, %v16063_v19 }
  0xed   : > { %v684_v30 = vpop.permute.xlu1 %683 }
  0xee   : > { %v1259_v31 = vpop.permute.xlu0 %1258  ;;  %12837 = vmatprep.mubr.f32.mxu0 %v1640_v23  ;;  %v1649_v36 = vsub.f32 %v16063_v19, %v21157_v24  ;;  %769 = vst.msk [vmem:[#allocation3 + $0x58] sm:$0xff] %vm757_vm3, %v684_v30  ;;  %v1009_v30 = vld [vmem:[#allocation2 + $0xd3] sm:$0xff] }
  0xef   : > { %1346 = vst.msk [vmem:[#allocation3 + $0x48] sm:$0xff] %vm1336_vm6, %v1259_v31  ;;  %904 = vrot.lane.b32.xlu1 %v815_v27, %s15609_s20 }
  0xf0   : > { %902 = vrot.lane.b32.xlu0 %v814_v29, %s15609_s20  ;;  %v1650_v37 = vand.u32 4294901760, %v1649_v36  ;;  %v1010_v29 = vld [vmem:[#allocation2 + $0xdb] sm:$0xff] }
  0xf1   : > { %v877_v40 = vpop.permute.xlu1 %876 }
  0xf2   : > { %v875_v42 = vpop.permute.xlu0 %874  ;;  %12838 = vmatmul.mubr.f32.gmra.mrb[6].mxu0 %v1650_v37  ;;  %v1377_v43 = vld [vmem:[#allocation3 + $0x40] sm:$0xff]  ;;  %962 = vst.msk [vmem:[#allocation3 + $0x58] sm:$0xff] %vm950_vm4, %v877_v40 }
  0xf3   : > { %961 = vst.msk [vmem:[#allocation3 + $0x50] sm:$0xff] %vm950_vm4, %v875_v42  ;;  %v1435_v45 = vsel %vm1409_vm7, %v1377_v43, 0  ;;  %1097 = vrot.lane.b32.xlu1 %v1008_v38, %s15611_s25  ;;  %v625_v40 = vld [vmem:[#allocation2 + $0xe1] sm:$0xff]  ;;  %v1202_v42 = vld [vmem:[#allocation2 + $0xd4] sm:$0xff] }
  0xf4   : > { %1095 = vrot.lane.b32.xlu0 %v1007_v39, %s15611_s25  ;;  %v16083_v48 = vand.u32 4294901760, %v1435_v45 }
  0xf5   : > { %v1070_v52 = vpop.permute.xlu1 %1069 }
  0xf6   : > { %v1068_v53 = vpop.permute.xlu0 %1067  ;;  %v16086_v54 = vsub.f32 %v1435_v45, %v16083_v48  ;;  %v1378_v56 = vld [vmem:[#allocation3 + $0x48] sm:$0xff]  ;;  %1155 = vst.msk [vmem:[#allocation3 + $0x58] sm:$0xff] %vm1143_vm5, %v1070_v52 }
  0xf7   : > { %1154 = vst.msk [vmem:[#allocation3 + $0x50] sm:$0xff] %vm1143_vm5, %v1068_v53  ;;  %v1438_v57 = vsel %vm1409_vm7, %v1378_v56, 0  ;;  %713 = vrot.lane.b32.xlu1 %v623_v49, %s15610_s21  ;;  %v563_v53 = vld [vmem:[#allocation2 + $0xf0] sm:$0xff] }
  0xf8   : > { %1288 = vrot.lane.b32.xlu0 %v1200_v51, %s15612_s26  ;;  %v21156_v61 = vand.u32 4294901760, %v16086_v54  ;;  %v16094_v62 = vand.u32 4294901760, %v1438_v57  ;;  %595 = vst.msk [vmem:[#allocation3 + $0xf0] sm:$0xff] %vm499_vm1, %v563_v53  ;;  %vm8069_vm1 = vcmask 254976  }
  0xf9   : > { %v686_v4 = vpop.permute.xlu1 %685 }
  0xfa   : > { %v1261_v5 = vpop.permute.xlu0 %1260  ;;  %v1659_v8 = vsub.f32 %v16086_v54, %v21156_v61  ;;  %v16101_v9 = vsub.f32 %v1438_v57, %v16094_v62  ;;  %770 = vst.msk [vmem:[#allocation3 + $0x60] sm:$0xff] %vm757_vm3, %v686_v4 }
  0xfb   : > { %1347 = vst.msk [vmem:[#allocation3 + $0x50] sm:$0xff] %vm1336_vm6, %v1261_v5  ;;  %715 = vrot.lane.b32.xlu1 %v624_v1, %s15610_s21  ;;  %v1203_v1 = vld [vmem:[#allocation2 + $0xdc] sm:$0xff] }
  0xfc   : > { %1290 = vrot.lane.b32.xlu0 %v1201_v2, %s15612_s26  ;;  %v1660_v13 = vand.u32 4294901760, %v1659_v8  ;;  %v21154_v14 = vand.u32 4294901760, %v16101_v9 }
  0xfd   : > { %v688_v18 = vpop.permute.xlu1 %687 }
  0xfe   : > { %v1263_v22 = vpop.permute.xlu0 %1262  ;;  %12840 = vmatprep.mubr.f32.mxu0 %v1660_v13  ;;  %v1669_v23 = vsub.f32 %v16101_v9, %v21154_v14  ;;  %771 = vst.msk [vmem:[#allocation3 + $0x68] sm:$0xff] %vm757_vm3, %v688_v18  ;;  %v818_v18 = vld [vmem:[#allocation2 + $0xe2] sm:$0xff] }
  0xff   : > { %1348 = vst.msk [vmem:[#allocation3 + $0x58] sm:$0xff] %vm1336_vm6, %v1263_v22  ;;  %908 = vrot.lane.b32.xlu1 %v817_v15, %s15609_s20 }
 0x100   : > { %906 = vrot.lane.b32.xlu0 %v816_v17, %s15609_s20  ;;  %v1670_v27 = vand.u32 4294901760, %v1669_v23  ;;  %v819_v17 = vld [vmem:[#allocation2 + $0xea] sm:$0xff] }
 0x101   : > { %v881_v31 = vpop.permute.xlu1 %880 }
 0x102   : > { %v879_v36 = vpop.permute.xlu0 %878  ;;  %12841 = vmatmul.mubr.f32.gmra.mrb[8].mxu0 %v1670_v27  ;;  %v1379_v37 = vld [vmem:[#allocation3 + $0x50] sm:$0xff]  ;;  %964 = vst.msk [vmem:[#allocation3 + $0x68] sm:$0xff] %vm950_vm4, %v881_v31  ;;  %v1012_v31 = vld [vmem:[#allocation2 + $0xeb] sm:$0xff] }
 0x103   : > { %963 = vst.msk [vmem:[#allocation3 + $0x60] sm:$0xff] %vm950_vm4, %v879_v36  ;;  %v1441_v38 = vsel %vm1409_vm7, %v1379_v37, 0  ;;  %1101 = vrot.lane.b32.xlu1 %v1010_v29, %s15611_s25  ;;  %v16154_v29 = vsub.f32 %v15819_v46, %v15824_v47  ;;  %v1011_v36 = vld [vmem:[#allocation2 + $0xe3] sm:$0xff] }
 0x104   : > { %1099 = vrot.lane.b32.xlu0 %v1009_v30, %s15611_s25  ;;  %v16121_v39 = vand.u32 4294901760, %v1441_v38 }
 0x105   : > { %v1074_v43 = vpop.permute.xlu1 %1073  ;;  %v16159_v37 = vand.u32 4294901760, %v16154_v29 }
 0x106   : > { %v1072_v45 = vpop.permute.xlu0 %1071  ;;  %v16124_v49 = vsub.f32 %v1441_v38, %v16121_v39  ;;  %v1380_v51 = vld [vmem:[#allocation3 + $0x58] sm:$0xff]  ;;  %1157 = vst.msk [vmem:[#allocation3 + $0x68] sm:$0xff] %vm1143_vm5, %v1074_v43 }
 0x107   : > { %1156 = vst.msk [vmem:[#allocation3 + $0x60] sm:$0xff] %vm1143_vm5, %v1072_v45  ;;  %v1444_v52 = vsel %vm1409_vm7, %v1380_v51, 0  ;;  %717 = vrot.lane.b32.xlu1 %v625_v40, %s15610_s21  ;;  %v1900_v43 = vsub.f32 %v16154_v29, %v16159_v37  ;;  %v627_v51 = vld [vmem:[#allocation2 + $0xf1] sm:$0xff] }
 0x108   : > { %1292 = vrot.lane.b32.xlu0 %v1202_v42, %s15612_s26  ;;  %v21153_v56 = vand.u32 4294901760, %v16124_v49  ;;  %v16132_v57 = vand.u32 4294901760, %v1444_v52 }
 0x109   : > { %v690_v2 = vpop.permute.xlu1 %689  ;;  %v1901_v53 = vand.u32 4294901760, %v1900_v43 }
 0x10a   : > { %v1265_v4 = vpop.permute.xlu0 %1264  ;;  %v1679_v5 = vsub.f32 %v16124_v49, %v21153_v56  ;;  %v16139_v8 = vsub.f32 %v1444_v52, %v16132_v57  ;;  %772 = vst.msk [vmem:[#allocation3 + $0x70] sm:$0xff] %vm757_vm3, %v690_v2  ;;  %v1204_v52 = vld [vmem:[#allocation2 + $0xe4] sm:$0xff] }
 0x10b   : > { %1349 = vst.msk [vmem:[#allocation3 + $0x60] sm:$0xff] %vm1336_vm6, %v1265_v4  ;;  %719 = vrot.lane.b32.xlu1 %v626_v58, %s15610_s21  ;;  %12876 = vmatprep.subr.mxu0 %v1901_v53 }
 0x10c   : > { %1294 = vrot.lane.b32.xlu0 %v1203_v1, %s15612_s26  ;;  %v1680_v13 = vand.u32 4294901760, %v1679_v5  ;;  %v21151_v15 = vand.u32 4294901760, %v16139_v8  ;;  %12877 = vmatpush3.msra.mxu0 %v1901_v53  ;;  %v1013_v53 = vld [vmem:[#allocation2 + $0xf3] sm:$0xff] }
 0x10d   : > { %v692_v22 = vpop.permute.xlu1 %691  ;;  %12926 = vmatprep.subr.mxu0 %v16154_v29 }
 0x10e   : > { %v1267_v23 = vpop.permute.xlu0 %1266  ;;  %12843 = vmatprep.mubr.f32.mxu0 %v1680_v13  ;;  %v1689_v27 = vsub.f32 %v16139_v8, %v21151_v15  ;;  %773 = vst.msk [vmem:[#allocation3 + $0x78] sm:$0xff] %vm757_vm3, %v692_v22 }
 0x10f   : > { %1350 = vst.msk [vmem:[#allocation3 + $0x68] sm:$0xff] %vm1336_vm6, %v1267_v23  ;;  %912 = vrot.lane.b32.xlu1 %v819_v17, %s15609_s20  ;;  %v628_v17 = vld [vmem:[#allocation2 + $0xf9] sm:$0xff] }
 0x110   : > { %910 = vrot.lane.b32.xlu0 %v818_v18, %s15609_s20  ;;  %v1690_v30 = vand.u32 4294901760, %v1689_v27  ;;  %v1205_v18 = vld [vmem:[#allocation2 + $0xec] sm:$0xff] }
 0x111   : > { %v885_v38 = vpop.permute.xlu1 %884 }
 0x112   : > { %v883_v40 = vpop.permute.xlu0 %882  ;;  %12844 = vmatmul.mubr.f32.gmra.mrb[10].mxu0 %v1690_v30  ;;  %v1381_v42 = vld [vmem:[#allocation3 + $0x60] sm:$0xff]  ;;  %966 = vst.msk [vmem:[#allocation3 + $0x78] sm:$0xff] %vm950_vm4, %v885_v38  ;;  %v821_v38 = vld [vmem:[#allocation2 + $0xfa] sm:$0xff] }
 0x113   : > { %965 = vst.msk [vmem:[#allocation3 + $0x70] sm:$0xff] %vm950_vm4, %v883_v40  ;;  %v1447_v46 = vsel %vm1409_vm7, %v1381_v42, 0  ;;  %1105 = vrot.lane.b32.xlu1 %v1012_v31, %s15611_s25  ;;  %v820_v40 = vld [vmem:[#allocation2 + $0xf2] sm:$0xff] }
 0x114   : > { %1103 = vrot.lane.b32.xlu0 %v1011_v36, %s15611_s25  ;;  %v16168_v45 = vand.u32 4294901760, %v1447_v46 }
 0x115   : > { %v1078_v58 = vpop.permute.xlu1 %1077 }
 0x116   : > { %v1076_v1 = vpop.permute.xlu0 %1075  ;;  %v16171_v2 = vsub.f32 %v1447_v46, %v16168_v45  ;;  %v1382_v4 = vld [vmem:[#allocation3 + $0x68] sm:$0xff]  ;;  %1159 = vst.msk [vmem:[#allocation3 + $0x78] sm:$0xff] %vm1143_vm5, %v1078_v58 }
 0x117   : > { %1158 = vst.msk [vmem:[#allocation3 + $0x70] sm:$0xff] %vm1143_vm5, %v1076_v1  ;;  %v1450_v5 = vsel %vm1409_vm7, %v1382_v4, 0  ;;  %721 = vrot.lane.b32.xlu1 %v627_v51, %s15610_s21 }
 0x118   : > { %1296 = vrot.lane.b32.xlu0 %v1204_v52, %s15612_s26  ;;  %v21150_v10 = vand.u32 4294901760, %v16171_v2  ;;  %v16179_v13 = vand.u32 4294901760, %v1450_v5  ;;  %v1014_v52 = vld [vmem:[#allocation2 + $0xfb] sm:$0xff] }
 0x119   : > { %v694_v22 = vpop.permute.xlu1 %693 }
 0x11a   : > { %v1269_v23 = vpop.permute.xlu0 %1268  ;;  %v1699_v27 = vsub.f32 %v16171_v2, %v21150_v10  ;;  %v16185_v30 = vsub.f32 %v1450_v5, %v16179_v13  ;;  %774 = vst.msk [vmem:[#allocation3 + $0x80] sm:$0xff] %vm757_vm3, %v694_v22  ;;  %v1206_v22 = vld [vmem:[#allocation2 + $0xf4] sm:$0xff] }
 0x11b   : > { %1351 = vst.msk [vmem:[#allocation3 + $0x70] sm:$0xff] %vm1336_vm6, %v1269_v23  ;;  %723 = vrot.lane.b32.xlu1 %v628_v17, %s15610_s21  ;;  %s22113_s21 = smov 32  }
 0x11c   : > { %1298 = vrot.lane.b32.xlu0 %v1205_v18, %s15612_s26  ;;  %v1700_v31 = vand.u32 4294901760, %v1699_v27  ;;  %v21148_v36 = vand.u32 4294901760, %v16185_v30  ;;  %v1207_v18 = vld [vmem:[#allocation2 + $0xfc] sm:$0xff] }
 0x11d   : > { %v696_v42 = vpop.permute.xlu1 %695 }
 0x11e   : > { %v1271_v46 = vpop.permute.xlu0 %1270  ;;  %12846 = vmatprep.mubr.f32.mxu0 %v1700_v31  ;;  %v1709_v43 = vsub.f32 %v16185_v30, %v21148_v36  ;;  %775 = vst.msk [vmem:[#allocation3 + $0x88] sm:$0xff] %vm757_vm3, %v696_v42 }
 0x11f   : > { %1352 = vst.msk [vmem:[#allocation3 + $0x78] sm:$0xff] %vm1336_vm6, %v1271_v46  ;;  %916 = vrot.lane.b32.xlu1 %v821_v38, %s15609_s20 }
 0x120   : > { %914 = vrot.lane.b32.xlu0 %v820_v40, %s15609_s20  ;;  %v1710_v51 = vand.u32 4294901760, %v1709_v43  ;;  %s21487_s20 = smov 32  }
 0x121   : > { %v889_v58 = vpop.permute.xlu1 %888 }
 0x122   : > { %v887_v1 = vpop.permute.xlu0 %886  ;;  %12847 = vmatmul.mubr.f32.gmra.mrb[12].mxu0 %v1710_v51  ;;  %v1383_v4 = vld [vmem:[#allocation3 + $0x70] sm:$0xff]  ;;  %968 = vst.msk [vmem:[#allocation3 + $0x88] sm:$0xff] %vm950_vm4, %v889_v58 }
 0x123   : > { %967 = vst.msk [vmem:[#allocation3 + $0x80] sm:$0xff] %vm950_vm4, %v887_v1  ;;  %v1453_v5 = vsel %vm1409_vm7, %v1383_v4, 0  ;;  %1109 = vrot.lane.b32.xlu1 %v1014_v52, %s15611_s25 }
 0x124   : > { %1107 = vrot.lane.b32.xlu0 %v1013_v53, %s15611_s25  ;;  %v16205_v17 = vand.u32 4294901760, %v1453_v5  ;;  %s21489_s25 = smov 64  }
 0x125   : > { %v1082_v23 = vpop.permute.xlu1 %1081 }
 0x126   : > { %v1080_v27 = vpop.permute.xlu0 %1079  ;;  %v16208_v31 = vsub.f32 %v1453_v5, %v16205_v17  ;;  %v1384_v38 = vld [vmem:[#allocation3 + $0x78] sm:$0xff]  ;;  %1161 = vst.msk [vmem:[#allocation3 + $0x88] sm:$0xff] %vm1143_vm5, %v1082_v23 }
 0x127   : > { %1160 = vst.msk [vmem:[#allocation3 + $0x80] sm:$0xff] %vm1143_vm5, %v1080_v27  ;;  %v1456_v40 = vsel %vm1409_vm7, %v1384_v38, 0  ;;  %1302 = vrot.lane.b32.xlu1 %v1207_v18, %s15612_s26 }
 0x128   : > { %1300 = vrot.lane.b32.xlu0 %v1206_v22, %s15612_s26  ;;  %v21147_v42 = vand.u32 4294901760, %v16208_v31  ;;  %v16216_v46 = vand.u32 4294901760, %v1456_v40  ;;  %s15548_s26 = sshll.u32 %s15620_s17, 4  ;;  %s15549_s26 = int_to_ptr.vmem [resolvable:$false] %s15548_s26 }
 0x129   : > { %v698_v43 = vpop.permute.xlu1 %697 }
 0x12a   : > { %v1273_v51 = vpop.permute.xlu0 %1272  ;;  %v1719_v52 = vsub.f32 %v16208_v31, %v21147_v42  ;;  %v16222_v53 = vsub.f32 %v1456_v40, %v16216_v46  ;;  %776 = vst.msk [vmem:[#allocation3 + $0x90] sm:$0xff] %vm757_vm3, %v698_v43 }
 0x12b   : > { %1353 = vst.msk [vmem:[#allocation3 + $0x80] sm:$0xff] %vm1336_vm6, %v1273_v51 }
 0x12c   : > { %v1720_v58 = vand.u32 4294901760, %v1719_v52  ;;  %v21145_v1 = vand.u32 4294901760, %v16222_v53 }
 0x12d   : > { %v700_v4 = vpop.permute.xlu1 %699 }
 0x12e   : > { %v1275_v5 = vpop.permute.xlu0 %1274  ;;  %12849 = vmatprep.mubr.f32.mxu0 %v1720_v58  ;;  %v1729_v18 = vsub.f32 %v16222_v53, %v21145_v1  ;;  %777 = vst.msk [vmem:[#allocation3 + $0x98] sm:$0xff] %vm757_vm3, %v700_v4 }
 0x12f   : > { %1354 = vst.msk [vmem:[#allocation3 + $0x88] sm:$0xff] %vm1336_vm6, %v1275_v5 }
 0x130   : > { %v1730_v22 = vand.u32 4294901760, %v1729_v18 }
 0x131   : > { %v893_v23 = vpop.permute.xlu1 %892 }
 0x132   : > { %v891_v27 = vpop.permute.xlu0 %890  ;;  %12850 = vmatmul.mubr.f32.gmra.mrb[14].mxu0 %v1730_v22  ;;  %v1385_v38 = vld [vmem:[#allocation3 + $0x80] sm:$0xff]  ;;  %970 = vst.msk [vmem:[#allocation3 + $0x98] sm:$0xff] %vm950_vm4, %v893_v23 }
 0x133   : > { %969 = vst.msk [vmem:[#allocation3 + $0x90] sm:$0xff] %vm950_vm4, %v891_v27  ;;  %v1459_v40 = vsel %vm1409_vm7, %v1385_v38, 0 }
 0x134   : > { %v16235_v43 = vand.u32 4294901760, %v1459_v40 }
 0x135   : > { %v1086_v51 = vpop.permute.xlu1 %1085 }
 0x136   : > { %v1084_v52 = vpop.permute.xlu0 %1083  ;;  %v16238_v58 = vsub.f32 %v1459_v40, %v16235_v43  ;;  %v1386_v4 = vld [vmem:[#allocation3 + $0x88] sm:$0xff]  ;;  %1163 = vst.msk [vmem:[#allocation3 + $0x98] sm:$0xff] %vm1143_vm5, %v1086_v51 }
 0x137   : > { %1162 = vst.msk [vmem:[#allocation3 + $0x90] sm:$0xff] %vm1143_vm5, %v1084_v52  ;;  %v1462_v5 = vsel %vm1409_vm7, %v1386_v4, 0 }
 0x138   : > { %v21146_v18 = vand.u32 4294901760, %v16238_v58  ;;  %v16244_v22 = vand.u32 4294901760, %v1462_v5 }
 0x139   : > { %v702_v23 = vpop.permute.xlu1 %701 }
 0x13a   : > { %v1277_v27 = vpop.permute.xlu0 %1276  ;;  %v1739_v38 = vsub.f32 %v16238_v58, %v21146_v18  ;;  %v16250_v40 = vsub.f32 %v1462_v5, %v16244_v22  ;;  %778 = vst.msk [vmem:[#allocation3 + $0xa0] sm:$0xff] %vm757_vm3, %v702_v23 }
 0x13b   : > { %1355 = vst.msk [vmem:[#allocation3 + $0x90] sm:$0xff] %vm1336_vm6, %v1277_v27 }
 0x13c   : > { %v1740_v51 = vand.u32 4294901760, %v1739_v38  ;;  %v21149_v52 = vand.u32 4294901760, %v16250_v40 }
 0x13d   : > { %v704_v4 = vpop.permute.xlu1 %703 }
 0x13e   : > { %v1279_v0 = vpop.permute.xlu0 %1278  ;;  %12852 = vmatprep.mubr.f32.mxu0 %v1740_v51  ;;  %v1749_v1 = vsub.f32 %v16250_v40, %v21149_v52  ;;  %779 = vst.msk [vmem:[#allocation3 + $0xa8] sm:$0xff] %vm757_vm3, %v704_v4 }
 0x13f   : > { %1356 = vst.msk [vmem:[#allocation3 + $0x98] sm:$0xff] %vm1336_vm6, %v1279_v0 }
 0x140   : > { %v1750_v5 = vand.u32 4294901760, %v1749_v1 }
 0x141   : > { %v897_v18 = vpop.permute.xlu1 %896 }
 0x142   : > { %v895_v42 = vpop.permute.xlu0 %894  ;;  %12853 = vmatmul.mubr.f32.gmra.mrb[16].mxu0 %v1750_v5  ;;  %v1387_v23 = vld [vmem:[#allocation3 + $0x90] sm:$0xff]  ;;  %972 = vst.msk [vmem:[#allocation3 + $0xa8] sm:$0xff] %vm950_vm4, %v897_v18 }
 0x143   : > { %971 = vst.msk [vmem:[#allocation3 + $0xa0] sm:$0xff] %vm950_vm4, %v895_v42  ;;  %v1465_v27 = vsel %vm1409_vm7, %v1387_v23, 0 }
 0x144   : > { %v16263_v38 = vand.u32 4294901760, %v1465_v27 }
 0x145   : > { %v1090_v51 = vpop.permute.xlu1 %1089 }
 0x146   : > { %v1088_v36 = vpop.permute.xlu0 %1087  ;;  %v16266_v52 = vsub.f32 %v1465_v27, %v16263_v38  ;;  %v1388_v4 = vld [vmem:[#allocation3 + $0x98] sm:$0xff]  ;;  %1165 = vst.msk [vmem:[#allocation3 + $0xa8] sm:$0xff] %vm1143_vm5, %v1090_v51 }
 0x147   : > { %1164 = vst.msk [vmem:[#allocation3 + $0xa0] sm:$0xff] %vm1143_vm5, %v1088_v36  ;;  %v1468_v0 = vsel %vm1409_vm7, %v1388_v4, 0 }
 0x148   : > { %21598 = vst [vmem:[#allocation14_spill] sm:$0xff] %v16266_v52  ;;  %v21152_v1 = vand.u32 4294901760, %v16266_v52  ;;  %v16272_v18 = vand.u32 4294901760, %v1468_v0 }
 0x149   : > { %v706_v42 = vpop.permute.xlu1 %705 }
 0x14a   : > { %v1281_v5 = vpop.permute.xlu0 %1280  ;;  %v1759_v23 = vsub.f32 %v16266_v52, %v21152_v1  ;;  %v16278_v27 = vsub.f32 %v1468_v0, %v16272_v18  ;;  %780 = vst.msk [vmem:[#allocation3 + $0xb0] sm:$0xff] %vm757_vm3, %v706_v42 }
 0x14b   : > { %1357 = vst.msk [vmem:[#allocation3 + $0xa0] sm:$0xff] %vm1336_vm6, %v1281_v5 }
 0x14c   : > { %21599 = vst [vmem:[#allocation15_spill] sm:$0xff] %v16278_v27  ;;  %v1760_v36 = vand.u32 4294901760, %v1759_v23  ;;  %v21155_v51 = vand.u32 4294901760, %v16278_v27 }
 0x14d   : > { %v708_v4 = vpop.permute.xlu1 %707 }
 0x14e   : > { %v1283_v10 = vpop.permute.xlu0 %1282  ;;  %12855 = vmatprep.mubr.f32.mxu0 %v1760_v36  ;;  %v1769_v15 = vsub.f32 %v16278_v27, %v21155_v51  ;;  %781 = vst.msk [vmem:[#allocation3 + $0xb8] sm:$0xff] %vm757_vm3, %v708_v4 }
 0x14f   : > { %1358 = vst.msk [vmem:[#allocation3 + $0xa8] sm:$0xff] %vm1336_vm6, %v1283_v10 }
 0x150   : > { %v1770_v0 = vand.u32 4294901760, %v1769_v15 }
 0x151   : > { %v901_v1 = vpop.permute.xlu1 %900 }
 0x152   : > { %v899_v56 = vpop.permute.xlu0 %898  ;;  %12856 = vmatmul.mubr.f32.gmra.mrb[18].mxu0 %v1770_v0  ;;  %v1389_v42 = vld [vmem:[#allocation3 + $0xa0] sm:$0xff]  ;;  %974 = vst.msk [vmem:[#allocation3 + $0xb8] sm:$0xff] %vm950_vm4, %v901_v1 }
 0x153   : > { %973 = vst.msk [vmem:[#allocation3 + $0xb0] sm:$0xff] %vm950_vm4, %v899_v56  ;;  %v1471_v5 = vsel %vm1409_vm7, %v1389_v42, 0 }
 0x154   : > { %v16291_v23 = vand.u32 4294901760, %v1471_v5 }
 0x155   : > { %v1094_v36 = vpop.permute.xlu1 %1093 }
 0x156   : > { %v1092_v14 = vpop.permute.xlu0 %1091  ;;  %v16294_v51 = vsub.f32 %v1471_v5, %v16291_v23  ;;  %v1390_v4 = vld [vmem:[#allocation3 + $0xa8] sm:$0xff]  ;;  %1167 = vst.msk [vmem:[#allocation3 + $0xb8] sm:$0xff] %vm1143_vm5, %v1094_v36 }
 0x157   : > { %1166 = vst.msk [vmem:[#allocation3 + $0xb0] sm:$0xff] %vm1143_vm5, %v1092_v14  ;;  %v1474_v15 = vsel %vm1409_vm7, %v1390_v4, 0 }
 0x158   : > { %21600 = vst [vmem:[#allocation16_spill] sm:$0xff] %v16294_v51  ;;  %v21158_v10 = vand.u32 4294901760, %v16294_v51  ;;  %v16300_v1 = vand.u32 4294901760, %v1474_v15 }
 0x159   : > { %v710_v56 = vpop.permute.xlu1 %709 }
 0x15a   : > { %v1285_v0 = vpop.permute.xlu0 %1284  ;;  %v1779_v42 = vsub.f32 %v16294_v51, %v21158_v10  ;;  %v16306_v5 = vsub.f32 %v1474_v15, %v16300_v1  ;;  %782 = vst.msk [vmem:[#allocation3 + $0xc0] sm:$0xff] %vm757_vm3, %v710_v56 }
 0x15b   : > { %1359 = vst.msk [vmem:[#allocation3 + $0xb0] sm:$0xff] %vm1336_vm6, %v1285_v0 }
 0x15c   : > { %21601 = vst [vmem:[#allocation17_spill] sm:$0xff] %v16306_v5  ;;  %v1780_v14 = vand.u32 4294901760, %v1779_v42  ;;  %v21161_v36 = vand.u32 4294901760, %v16306_v5 }
 0x15d   : > { %v712_v4 = vpop.permute.xlu1 %711 }
 0x15e   : > { %v1287_v61 = vpop.permute.xlu0 %1286  ;;  %12858 = vmatprep.mubr.f32.mxu0 %v1780_v14  ;;  %v1789_v24 = vsub.f32 %v16306_v5, %v21161_v36  ;;  %783 = vst.msk [vmem:[#allocation3 + $0xc8] sm:$0xff] %vm757_vm3, %v712_v4 }
 0x15f   : > { %1360 = vst.msk [vmem:[#allocation3 + $0xb8] sm:$0xff] %vm1336_vm6, %v1287_v61 }
 0x160   : > { %v1790_v15 = vand.u32 4294901760, %v1789_v24 }
 0x161   : > { %v905_v10 = vpop.permute.xlu1 %904 }
 0x162   : > { %v903_v11 = vpop.permute.xlu0 %902  ;;  %12859 = vmatmul.mubr.f32.gmra.mrb[20].mxu0 %v1790_v15  ;;  %v1391_v56 = vld [vmem:[#allocation3 + $0xb0] sm:$0xff]  ;;  %976 = vst.msk [vmem:[#allocation3 + $0xc8] sm:$0xff] %vm950_vm4, %v905_v10 }
 0x163   : > { %975 = vst.msk [vmem:[#allocation3 + $0xc0] sm:$0xff] %vm950_vm4, %v903_v11  ;;  %v1477_v0 = vsel %vm1409_vm7, %v1391_v56, 0 }
 0x164   : > { %v16319_v42 = vand.u32 4294901760, %v1477_v0 }
 0x165   : > { %v1098_v14 = vpop.permute.xlu1 %1097 }
 0x166   : > { %v1096_v44 = vpop.permute.xlu0 %1095  ;;  %v16322_v36 = vsub.f32 %v1477_v0, %v16319_v42  ;;  %v1392_v4 = vld [vmem:[#allocation3 + $0xb8] sm:$0xff]  ;;  %1169 = vst.msk [vmem:[#allocation3 + $0xc8] sm:$0xff] %vm1143_vm5, %v1098_v14 }
 0x167   : > { %1168 = vst.msk [vmem:[#allocation3 + $0xc0] sm:$0xff] %vm1143_vm5, %v1096_v44  ;;  %v1480_v24 = vsel %vm1409_vm7, %v1392_v4, 0 }
 0x168   : > { %21602 = vst [vmem:[#allocation18_spill] sm:$0xff] %v16322_v36  ;;  %v21164_v61 = vand.u32 4294901760, %v16322_v36  ;;  %v16328_v10 = vand.u32 4294901760, %v1480_v24 }
 0x169   : > { %v714_v11 = vpop.permute.xlu1 %713 }
 0x16a   : > { %v1289_v15 = vpop.permute.xlu0 %1288  ;;  %v1799_v56 = vsub.f32 %v16322_v36, %v21164_v61  ;;  %v16334_v0 = vsub.f32 %v1480_v24, %v16328_v10  ;;  %784 = vst.msk [vmem:[#allocation3 + $0xd0] sm:$0xff] %vm757_vm3, %v714_v11 }
 0x16b   : > { %1361 = vst.msk [vmem:[#allocation3 + $0xc0] sm:$0xff] %vm1336_vm6, %v1289_v15 }
 0x16c   : > { %21603 = vst [vmem:[#allocation19_spill] sm:$0xff] %v16334_v0  ;;  %v1800_v44 = vand.u32 4294901760, %v1799_v56  ;;  %v21167_v14 = vand.u32 4294901760, %v16334_v0 }
 0x16d   : > { %v716_v4 = vpop.permute.xlu1 %715 }
 0x16e   : > { %v1291_v33 = vpop.permute.xlu0 %1290  ;;  %12861 = vmatprep.mubr.f32.mxu0 %v1800_v44  ;;  %v1809_v6 = vsub.f32 %v16334_v0, %v21167_v14  ;;  %785 = vst.msk [vmem:[#allocation3 + $0xd8] sm:$0xff] %vm757_vm3, %v716_v4 }
 0x16f   : > { %1362 = vst.msk [vmem:[#allocation3 + $0xc8] sm:$0xff] %vm1336_vm6, %v1291_v33 }
 0x170   : > { %v1810_v24 = vand.u32 4294901760, %v1809_v6 }
 0x171   : > { %v909_v61 = vpop.permute.xlu1 %908 }
 0x172   : > { %v907_v59 = vpop.permute.xlu0 %906  ;;  %12862 = vmatmul.mubr.f32.gmra.mrb[22].mxu0 %v1810_v24  ;;  %v1393_v11 = vld [vmem:[#allocation3 + $0xc0] sm:$0xff]  ;;  %978 = vst.msk [vmem:[#allocation3 + $0xd8] sm:$0xff] %vm950_vm4, %v909_v61 }
 0x173   : > { %977 = vst.msk [vmem:[#allocation3 + $0xd0] sm:$0xff] %vm950_vm4, %v907_v59  ;;  %v1483_v15 = vsel %vm1409_vm7, %v1393_v11, 0 }
 0x174   : > { %v16347_v56 = vand.u32 4294901760, %v1483_v15 }
 0x175   : > { %v1102_v44 = vpop.permute.xlu1 %1101 }
 0x176   : > { %21604 = vst [vmem:[#allocation20_spill] sm:$0xff] %v16347_v56  ;;  %v1100_v35 = vpop.permute.xlu0 %1099  ;;  %v16350_v14 = vsub.f32 %v1483_v15, %v16347_v56  ;;  %v1394_v4 = vld [vmem:[#allocation3 + $0xc8] sm:$0xff]  ;;  %1171 = vst.msk [vmem:[#allocation3 + $0xd8] sm:$0xff] %vm1143_vm5, %v1102_v44 }
 0x177   : > { %1170 = vst.msk [vmem:[#allocation3 + $0xd0] sm:$0xff] %vm1143_vm5, %v1100_v35  ;;  %v1486_v6 = vsel %vm1409_vm7, %v1394_v4, 0 }
 0x178   : > { %21605 = vst [vmem:[#allocation21_spill] sm:$0xff] %v16350_v14  ;;  %v21171_v33 = vand.u32 4294901760, %v16350_v14  ;;  %v16356_v61 = vand.u32 4294901760, %v1486_v6 }
 0x179   : > { %v718_v59 = vpop.permute.xlu1 %717 }
 0x17a   : > { %21606 = vst [vmem:[#allocation22_spill] sm:$0xff] %v16356_v61  ;;  %v1293_v24 = vpop.permute.xlu0 %1292  ;;  %v1819_v11 = vsub.f32 %v16350_v14, %v21171_v33  ;;  %v16362_v15 = vsub.f32 %v1486_v6, %v16356_v61  ;;  %786 = vst.msk [vmem:[#allocation3 + $0xe0] sm:$0xff] %vm757_vm3, %v718_v59 }
 0x17b   : > { %1363 = vst.msk [vmem:[#allocation3 + $0xd0] sm:$0xff] %vm1336_vm6, %v1293_v24 }
 0x17c   : > { %21607 = vst [vmem:[#allocation23_spill] sm:$0xff] %v16362_v15  ;;  %v1820_v35 = vand.u32 4294901760, %v1819_v11  ;;  %v21176_v44 = vand.u32 4294901760, %v16362_v15 }
 0x17d   : > { %v720_v4 = vpop.permute.xlu1 %719 }
 0x17e   : > { %v1295_v25 = vpop.permute.xlu0 %1294  ;;  %12864 = vmatprep.mubr.f32.mxu0 %v1820_v35  ;;  %v1829_v0 = vsub.f32 %v16362_v15, %v21176_v44  ;;  %787 = vst.msk [vmem:[#allocation3 + $0xe8] sm:$0xff] %vm757_vm3, %v720_v4 }
 0x17f   : > { %1364 = vst.msk [vmem:[#allocation3 + $0xd8] sm:$0xff] %vm1336_vm6, %v1295_v25 }
 0x180   : > { %v1830_v6 = vand.u32 4294901760, %v1829_v0 }
 0x181   : > { %v913_v33 = vpop.permute.xlu1 %912 }
 0x182   : > { %v911_v14 = vpop.permute.xlu0 %910  ;;  %12865 = vmatmul.mubr.f32.gmra.mrb[24].mxu0 %v1830_v6  ;;  %v1395_v59 = vld [vmem:[#allocation3 + $0xd0] sm:$0xff]  ;;  %980 = vst.msk [vmem:[#allocation3 + $0xe8] sm:$0xff] %vm950_vm4, %v913_v33 }
 0x183   : > { %979 = vst.msk [vmem:[#allocation3 + $0xe0] sm:$0xff] %vm950_vm4, %v911_v14  ;;  %v1489_v24 = vsel %vm1409_vm7, %v1395_v59, 0 }
 0x184   : > { %v16375_v11 = vand.u32 4294901760, %v1489_v24 }
 0x185   : > { %v1106_v35 = vpop.permute.xlu1 %1105 }
 0x186   : > { %21608 = vst [vmem:[#allocation24_spill] sm:$0xff] %v16375_v11  ;;  %v1104_v36 = vpop.permute.xlu0 %1103  ;;  %v16378_v44 = vsub.f32 %v1489_v24, %v16375_v11  ;;  %v1396_v4 = vld [vmem:[#allocation3 + $0xd8] sm:$0xff]  ;;  %1173 = vst.msk [vmem:[#allocation3 + $0xe8] sm:$0xff] %vm1143_vm5, %v1106_v35 }
 0x187   : > { %1172 = vst.msk [vmem:[#allocation3 + $0xe0] sm:$0xff] %vm1143_vm5, %v1104_v36  ;;  %v1492_v25 = vsel %vm1409_vm7, %v1396_v4, 0 }
 0x188   : > { %21609 = vst [vmem:[#allocation25_spill] sm:$0xff] %v16378_v44  ;;  %v21181_v0 = vand.u32 4294901760, %v16378_v44  ;;  %v16384_v33 = vand.u32 4294901760, %v1492_v25 }
 0x189   : > { %v722_v14 = vpop.permute.xlu1 %721 }
 0x18a   : > { %21610 = vst [vmem:[#allocation26_spill] sm:$0xff] %v16384_v33  ;;  %v1297_v6 = vpop.permute.xlu0 %1296  ;;  %v1839_v59 = vsub.f32 %v16378_v44, %v21181_v0  ;;  %v16390_v24 = vsub.f32 %v1492_v25, %v16384_v33  ;;  %788 = vst.msk [vmem:[#allocation3 + $0xf0] sm:$0xff] %vm757_vm3, %v722_v14 }
 0x18b   : > { %1365 = vst.msk [vmem:[#allocation3 + $0xe0] sm:$0xff] %vm1336_vm6, %v1297_v6 }
 0x18c   : > { %21611 = vst [vmem:[#allocation27_spill] sm:$0xff] %v16390_v24  ;;  %v1840_v36 = vand.u32 4294901760, %v1839_v59  ;;  %v21186_v35 = vand.u32 4294901760, %v16390_v24 }
 0x18d   : > { %v724_v4 = vpop.permute.xlu1 %723 }
 0x18e   : > { %v1299_v15 = vpop.permute.xlu0 %1298  ;;  %12867 = vmatprep.mubr.f32.mxu0 %v1840_v36  ;;  %v1849_v5 = vsub.f32 %v16390_v24, %v21186_v35  ;;  %789 = vst.msk [vmem:[#allocation3 + $0xf8] sm:$0xff] %vm757_vm3, %v724_v4  ;;  %vm8071_vm3 = vcmask 261120  }
 0x18f   : > { %1366 = vst.msk [vmem:[#allocation3 + $0xe8] sm:$0xff] %vm1336_vm6, %v1299_v15 }
 0x190   : > { %v1850_v25 = vand.u32 4294901760, %v1849_v5 }
 0x191   : > { %v917_v0 = vpop.permute.xlu1 %916 }
 0x192   : > { %v915_v44 = vpop.permute.xlu0 %914  ;;  %12868 = vmatmul.mubr.f32.gmra.mrb[26].mxu0 %v1850_v25  ;;  %v1397_v14 = vld [vmem:[#allocation3 + $0xe0] sm:$0xff]  ;;  %982 = vst.msk [vmem:[#allocation3 + $0xf8] sm:$0xff] %vm950_vm4, %v917_v0 }
 0x193   : > { %981 = vst.msk [vmem:[#allocation3 + $0xf0] sm:$0xff] %vm950_vm4, %v915_v44  ;;  %v1495_v6 = vsel %vm1409_vm7, %v1397_v14, 0  ;;  %vm8137_vm4 = vcmask 523520  }
 0x194   : > { %v16403_v59 = vand.u32 4294901760, %v1495_v6 }
 0x195   : > { %v1110_v36 = vpop.permute.xlu1 %1109 }
 0x196   : > { %21612 = vst [vmem:[#allocation28_spill] sm:$0xff] %v16403_v59  ;;  %v1108_v51 = vpop.permute.xlu0 %1107  ;;  %v16406_v35 = vsub.f32 %v1495_v6, %v16403_v59  ;;  %v1398_v4 = vld [vmem:[#allocation3 + $0xe8] sm:$0xff]  ;;  %1175 = vst.msk [vmem:[#allocation3 + $0xf8] sm:$0xff] %vm1143_vm5, %v1110_v36 }
 0x197   : > { %1174 = vst.msk [vmem:[#allocation3 + $0xf0] sm:$0xff] %vm1143_vm5, %v1108_v51  ;;  %v1498_v5 = vsel %vm1409_vm7, %v1398_v4, 0  ;;  %vm8186_vm5 = vcmask 785920  }
 0x198   : > { %21613 = vst [vmem:[#allocation29_spill] sm:$0xff] %v16406_v35  ;;  %v21193_v15 = vand.u32 4294901760, %v16406_v35  ;;  %v16412_v0 = vand.u32 4294901760, %v1498_v5 }
 0x199   : > { %v1303_v44 = vpop.permute.xlu1 %1302 }
 0x19a   : > { %21614 = vst [vmem:[#allocation30_spill] sm:$0xff] %v16412_v0  ;;  %v1301_v25 = vpop.permute.xlu0 %1300  ;;  %v1859_v14 = vsub.f32 %v16406_v35, %v21193_v15  ;;  %v16418_v6 = vsub.f32 %v1498_v5, %v16412_v0  ;;  %1368 = vst.msk [vmem:[#allocation3 + $0xf8] sm:$0xff] %vm1336_vm6, %v1303_v44 }
 0x19b   : > { %1367 = vst.msk [vmem:[#allocation3 + $0xf0] sm:$0xff] %vm1336_vm6, %v1301_v25  ;;  %vm8235_vm6 = vcmask 1048320  }
 0x19c   : > { %v1860_v51 = vand.u32 4294901760, %v1859_v14  ;;  %v21196_v36 = vand.u32 4294901760, %v16418_v6 }
 0x19e   : > { %12870 = vmatprep.mubr.f32.mxu0 %v1860_v51  ;;  %v1869_v4 = vsub.f32 %v16418_v6, %v21196_v36 }
 0x1a0   : > { %v1870_v24 = vand.u32 4294901760, %v1869_v4 }
 0x1a1   : > { %v1400_v52 = vld [vmem:[#allocation3 + $0xf8] sm:$0xff] }
 0x1a2   : > { %12871 = vmatmul.mubr.f32.gmra.mrb[28].mxu0 %v1870_v24  ;;  %v1399_v27 = vld [vmem:[#allocation3 + $0xf0] sm:$0xff]  ;;  %v1504_v5 = vsel %vm1409_vm7, %v1400_v52, 0 }
 0x1a3   : > { %v1501_v15 = vsel %vm1409_vm7, %v1399_v27, 0  ;;  %v16430_v44 = vand.u32 4294901760, %v1504_v5  ;;  %vm9537_vm7 = vcmask 498688  }
 0x1a4   : > { %v16428_v35 = vand.u32 4294901760, %v1501_v15 }
 0x1a5   : > { %21616 = vst [vmem:[#allocation32_spill] sm:$0xff] %v16430_v44  ;;  %v16436_v14 = vsub.f32 %v1504_v5, %v16430_v44  ;;  %v21620_v5 = vld [vmem:[#allocation17_spill] sm:$0xff] }
 0x1a6   : > { %21615 = vst [vmem:[#allocation31_spill] sm:$0xff] %v16428_v35  ;;  %v16433_v25 = vsub.f32 %v1501_v15, %v16428_v35  ;;  %v21618_v15 = vld [vmem:[#allocation15_spill] sm:$0xff] }
 0x1a7   : > { %v21197_v24 = vand.u32 4294901760, %v16436_v14 }
 0x1a8   : > { %v21198_v51 = vand.u32 4294901760, %v16433_v25 }
 0x1a9   : > { %v1889_v52 = vsub.f32 %v16436_v14, %v21197_v24  ;;  %v21624_v24 = vld [vmem:[#allocation23_spill] sm:$0xff] }
 0x1aa   : > { %v1879_v27 = vsub.f32 %v16433_v25, %v21198_v51  ;;  %v21625_v51 = vld [vmem:[#allocation25_spill] sm:$0xff] }
 0x1ab   : > { %v1890_v36 = vand.u32 4294901760, %v1889_v52  ;;  %v21622_v52 = vld [vmem:[#allocation19_spill] sm:$0xff] }
 0x1ac   : > { %v1880_v4 = vand.u32 4294901760, %v1879_v27  ;;  %v21621_v27 = vld [vmem:[#allocation18_spill] sm:$0xff] }
 0x1ae   : > { %12873 = vmatprep.mubr.f32.mxu0 %v1880_v4  ;;  %v21623_v4 = vld [vmem:[#allocation21_spill] sm:$0xff] }
 0x1af   : > { %12874 = vmatmul.mubr.f32.gmra.mrb[30].mxu0 %v1890_v36  ;;  %v21619_v36 = vld [vmem:[#allocation16_spill] sm:$0xff] }
 0x1b0   : > { %12878 = vmatprep.mubr.f32.mxu0 %v15931_v16 }
 0x1b3   : > { %12879 = vmatmul.mubr.f32.vlgmr.msra.gmra.mrb[0].mxu0 %v15942_v26 }
 0x1b4   : > { %12881 = vmatprep.mubr.f32.mxu0 %v15969_v50  ;;  %12927 = vmatpush3.msra.mxu0 %v16154_v29  ;;  %v21617_v29 = vld [vmem:[#allocation14_spill] sm:$0xff] }
 0x1b5   : > { %12976 = vmatprep.subr.mxu0 %v15824_v47 }
 0x1b7   : > { %12882 = vmatmul.mubr.f32.gmra.mrb[2].mxu0 %v15980_v60 }
 0x1b8   : > { %12884 = vmatprep.mubr.f32.mxu0 %v16007_v20 }
 0x1bb   : > { %12885 = vmatmul.mubr.f32.gmra.mrb[4].mxu0 %v16018_v34 }
 0x1bc   : > { %12887 = vmatprep.mubr.f32.mxu0 %v16045_v63 }
 0x1bf   : > { %12888 = vmatmul.mubr.f32.gmra.mrb[6].mxu0 %v16056_v12 }
 0x1c0   : > { %12890 = vmatprep.mubr.f32.mxu0 %v16083_v48 }
 0x1c3   : > { %12891 = vmatmul.mubr.f32.gmra.mrb[8].mxu0 %v16094_v62 }
 0x1c4   : > { %12893 = vmatprep.mubr.f32.mxu0 %v16121_v39 }
 0x1c7   : > { %12894 = vmatmul.mubr.f32.gmra.mrb[10].mxu0 %v16132_v57 }
 0x1c8   : > { %12896 = vmatprep.mubr.f32.mxu0 %v16168_v45 }
 0x1cb   : > { %12897 = vmatmul.mubr.f32.gmra.mrb[12].mxu0 %v16179_v13 }
 0x1cc   : > { %12899 = vmatprep.mubr.f32.mxu0 %v16205_v17 }
 0x1cf   : > { %12900 = vmatmul.mubr.f32.gmra.mrb[14].mxu0 %v16216_v46 }
 0x1d0   : > { %12902 = vmatprep.mubr.f32.mxu0 %v16235_v43 }
 0x1d3   : > { %12903 = vmatmul.mubr.f32.gmra.mrb[16].mxu0 %v16244_v22 }
 0x1d4   : > { %12905 = vmatprep.mubr.f32.mxu0 %v16263_v38 }
 0x1d7   : > { %12906 = vmatmul.mubr.f32.gmra.mrb[18].mxu0 %v16272_v18 }
 0x1d8   : > { %12908 = vmatprep.mubr.f32.mxu0 %v16291_v23 }
 0x1db   : > { %12909 = vmatmul.mubr.f32.gmra.mrb[20].mxu0 %v16300_v1 }
 0x1dc   : > { %12911 = vmatprep.mubr.f32.mxu0 %v16319_v42 }
 0x1df   : > { %12912 = vmatmul.mubr.f32.gmra.mrb[22].mxu0 %v16328_v10 }
 0x1e0   : > { %12914 = vmatprep.mubr.f32.mxu0 %v16347_v56  ;;  %v21633_v56 = vand.u32 4294901760, %v16025_v41 }
 0x1e3   : > { %12915 = vmatmul.mubr.f32.gmra.mrb[24].mxu0 %v16356_v61  ;;  %v21632_v61 = vand.u32 4294901760, %v16010_v28 }
 0x1e4   : > { %12917 = vmatprep.mubr.f32.mxu0 %v16375_v11  ;;  %v21631_v11 = vand.u32 4294901760, %v15987_v3 }
 0x1e7   : > { %12918 = vmatmul.mubr.f32.gmra.mrb[26].mxu0 %v16384_v33  ;;  %v21630_v33 = vand.u32 4294901760, %v15972_v55 }
 0x1e8   : > { %12920 = vmatprep.mubr.f32.mxu0 %v16403_v59  ;;  %v21629_v59 = vand.u32 4294901760, %v15949_v32 }
 0x1eb   : > { %12921 = vmatmul.mubr.f32.gmra.mrb[28].mxu0 %v16412_v0  ;;  %v21628_v0 = vand.u32 4294901760, %v15934_v21 }
 0x1ec   : > { %12923 = vmatprep.mubr.f32.mxu0 %v16428_v35  ;;  %v21627_v35 = vld [vmem:[#allocation29_spill] sm:$0xff] }
 0x1ef   : > { %12924 = vmatmul.mubr.f32.gmra.mrb[30].mxu0 %v16430_v44  ;;  %v21626_v44 = vld [vmem:[#allocation27_spill] sm:$0xff] }
 0x1f0   : > { %12928 = vmatprep.mubr.f32.mxu0 %v15934_v21  ;;  %v21634_v21 = vand.u32 4294901760, %v16048_v7 }
 0x1f3   : > { %12929 = vmatmul.mubr.f32.vlgmr.msra.gmra.mrb[0].mxu0 %v15949_v32  ;;  %v21635_v32 = vand.u32 4294901760, %v16063_v19 }
 0x1f4   : > { %12931 = vmatprep.mubr.f32.mxu0 %v15972_v55  ;;  %12977 = vmatpush3.msra.mxu0 %v15824_v47  ;;  %v21636_v55 = vand.u32 4294901760, %v16086_v54 }
 0x1f5   : > { %13026 = vmatprep.subr.mxu0 %v16159_v37 }
 0x1f7   : > { %12932 = vmatmul.mubr.f32.gmra.mrb[2].mxu0 %v15987_v3  ;;  %v21638_v3 = vand.u32 4294901760, %v16124_v49 }
 0x1f8   : > { %12934 = vmatprep.mubr.f32.mxu0 %v16010_v28  ;;  %v21639_v28 = vand.u32 4294901760, %v16139_v8 }
 0x1fb   : > { %12935 = vmatmul.mubr.f32.gmra.mrb[4].mxu0 %v16025_v41  ;;  %v21640_v41 = vand.u32 4294901760, %v16171_v2 }
 0x1fc   : > { %12937 = vmatprep.mubr.f32.mxu0 %v16048_v7  ;;  %v21641_v7 = vand.u32 4294901760, %v16185_v30 }
 0x1ff   : > { %12938 = vmatmul.mubr.f32.gmra.mrb[6].mxu0 %v16063_v19  ;;  %v21642_v19 = vand.u32 4294901760, %v16208_v31 }
 0x200   : > { %12940 = vmatprep.mubr.f32.mxu0 %v16086_v54  ;;  %v21643_v54 = vand.u32 4294901760, %v16222_v53 }
 0x203   : > { %12941 = vmatmul.mubr.f32.gmra.mrb[8].mxu0 %v16101_v9 }
 0x204   : > { %12943 = vmatprep.mubr.f32.mxu0 %v16124_v49  ;;  %v21645_v49 = vand.u32 4294901760, %v16250_v40 }
 0x207   : > { %12944 = vmatmul.mubr.f32.gmra.mrb[10].mxu0 %v16139_v8  ;;  %v21646_v8 = vand.u32 4294901760, %v21617_v29 }
 0x208   : > { %12946 = vmatprep.mubr.f32.mxu0 %v16171_v2  ;;  %v21647_v2 = vand.u32 4294901760, %v21618_v15 }
 0x20b   : > { %12947 = vmatmul.mubr.f32.gmra.mrb[12].mxu0 %v16185_v30  ;;  %v21648_v30 = vand.u32 4294901760, %v21619_v36 }
 0x20c   : > { %12949 = vmatprep.mubr.f32.mxu0 %v16208_v31  ;;  %v21649_v31 = vand.u32 4294901760, %v21620_v5 }
 0x20f   : > { %12950 = vmatmul.mubr.f32.gmra.mrb[14].mxu0 %v16222_v53  ;;  %v21650_v53 = vand.u32 4294901760, %v21621_v27 }
 0x210   : > { %12952 = vmatprep.mubr.f32.mxu0 %v16238_v58 }
 0x213   : > { %12953 = vmatmul.mubr.f32.gmra.mrb[16].mxu0 %v16250_v40  ;;  %v21652_v40 = vand.u32 4294901760, %v21623_v4 }
 0x214   : > { %12955 = vmatprep.mubr.f32.mxu0 %v21617_v29  ;;  %v21659_v29 = vand.u32 4294901760, %v16436_v14 }
 0x217   : > { %12956 = vmatmul.mubr.f32.gmra.mrb[18].mxu0 %v21618_v15 }
 0x218   : > { %12958 = vmatprep.mubr.f32.mxu0 %v21619_v36 }
 0x21b   : > { %12959 = vmatmul.mubr.f32.gmra.mrb[20].mxu0 %v21620_v5 }
 0x21c   : > { %12961 = vmatprep.mubr.f32.mxu0 %v21621_v27  ;;  %v3489_v27 = vld [vmem:[%s21137_s9 + $0x40] sm:$0xff] }
 0x21f   : > { %12962 = vmatmul.mubr.f32.gmra.mrb[22].mxu0 %v21622_v52 }
 0x220   : > { %12964 = vmatprep.mubr.f32.mxu0 %v21623_v4 }
 0x223   : > { %12965 = vmatmul.mubr.f32.gmra.mrb[24].mxu0 %v21624_v24 }
 0x224   : > { %12967 = vmatprep.mubr.f32.mxu0 %v21625_v51 }
 0x227   : > { %12968 = vmatmul.mubr.f32.gmra.mrb[26].mxu0 %v21626_v44 }
 0x228   : > { %12970 = vmatprep.mubr.f32.mxu0 %v21627_v35 }
 0x22b   : > { %12971 = vmatmul.mubr.f32.gmra.mrb[28].mxu0 %v16418_v6 }
 0x22c   : > { %12973 = vmatprep.mubr.f32.mxu0 %v16433_v25 }
 0x22f   : > { %12974 = vmatmul.mubr.f32.gmra.mrb[30].mxu0 %v16436_v14  ;;  %v21665_v14 = vld [vmem:[#allocation30_spill] sm:$0xff] }
 0x230   : > { %12978 = vmatprep.mubr.f32.mxu0 %v21628_v0  ;;  %v21658_v0 = vand.u32 4294901760, %v16433_v25  ;;  %v21664_v25 = vld [vmem:[#allocation28_spill] sm:$0xff] }
 0x233   : > { %12979 = vmatmul.mubr.f32.vlgmr.msra.gmra.mrb[0].mxu0 %v21629_v59  ;;  %v21657_v59 = vand.u32 4294901760, %v16418_v6  ;;  %v21662_v6 = vld [vmem:[#allocation24_spill] sm:$0xff] }
 0x234   : > { %12981 = vmatprep.mubr.f32.mxu0 %v21630_v33  ;;  %13027 = vmatpush3.msra.mxu0 %v16159_v37  ;;  %v21637_v37 = vand.u32 4294901760, %v16101_v9  ;;  %v21644_v9 = vand.u32 4294901760, %v16238_v58  ;;  %v21651_v58 = vand.u32 4294901760, %v21622_v52  ;;  %v21656_v33 = vand.u32 4294901760, %v21627_v35  ;;  %v21661_v35 = vld [vmem:[#allocation22_spill] sm:$0xff] }
 0x235   : > { %13076 = vmatprep.subr.mxu0 %v15824_v47 }
 0x237   : > { %12982 = vmatmul.mubr.f32.gmra.mrb[2].mxu0 %v21631_v11  ;;  %v21655_v11 = vand.u32 4294901760, %v21626_v44  ;;  %v21663_v44 = vld [vmem:[#allocation26_spill] sm:$0xff] }
 0x238   : > { %12984 = vmatprep.mubr.f32.mxu0 %v21632_v61  ;;  %v21654_v61 = vand.u32 4294901760, %v21625_v51  ;;  %v21666_v51 = vld [vmem:[#allocation31_spill] sm:$0xff] }
 0x23b   : > { %12985 = vmatmul.mubr.f32.gmra.mrb[4].mxu0 %v21633_v56  ;;  %v21653_v56 = vand.u32 4294901760, %v21624_v24  ;;  %v21667_v24 = vld [vmem:[#allocation32_spill] sm:$0xff] }
 0x23c   : > { %12987 = vmatprep.mubr.f32.mxu0 %v21634_v21 }
 0x23f   : > { %12988 = vmatmul.mubr.f32.gmra.mrb[6].mxu0 %v21635_v32 }
 0x240   : > { %12990 = vmatprep.mubr.f32.mxu0 %v21636_v55 }
 0x243   : > { %12991 = vmatmul.mubr.f32.gmra.mrb[8].mxu0 %v21637_v37 }
 0x244   : > { %12993 = vmatprep.mubr.f32.mxu0 %v21638_v3  ;;  %v16722_v3 = vand.u32 4294901760, %v3489_v27 }
 0x246   : > { %21683 = vst [vmem:[#allocation28_spill] sm:$0xff] %v16722_v3 }
 0x247   : > { %12994 = vmatmul.mubr.f32.gmra.mrb[10].mxu0 %v21639_v28 }
 0x248   : > { %12996 = vmatprep.mubr.f32.mxu0 %v21640_v41 }
 0x24b   : > { %12997 = vmatmul.mubr.f32.gmra.mrb[12].mxu0 %v21641_v7 }
 0x24c   : > { %12999 = vmatprep.mubr.f32.mxu0 %v21642_v19 }
 0x24f   : > { %13000 = vmatmul.mubr.f32.gmra.mrb[14].mxu0 %v21643_v54  ;;  %v3492_v54 = vld [vmem:[%s21137_s9 + $0x58] sm:$0xff] }
 0x250   : > { %13002 = vmatprep.mubr.f32.mxu0 %v21644_v9  ;;  %v16735_v9 = vld [vmem:[%s21685_s2] ss:$0 sm:$0xff]  ;;  %s21086_s2 = scalar_lea.hbm %s21142_s14, %s11706_s27 }
 0x253   : > { %13003 = vmatmul.mubr.f32.gmra.mrb[16].mxu0 %v21645_v49 }
 0x254   : > { %13005 = vmatprep.mubr.f32.mxu0 %v21646_v8 }
 0x257   : > { %13006 = vmatmul.mubr.f32.gmra.mrb[18].mxu0 %v21647_v2 }
 0x258   : > { %13008 = vmatprep.mubr.f32.mxu0 %v21648_v30  ;;  %v3491_v30 = vld [vmem:[%s21137_s9 + $0x50] sm:$0xff] }
 0x25b   : > { %13009 = vmatmul.mubr.f32.gmra.mrb[20].mxu0 %v21649_v31 }
 0x25c   : > { %13011 = vmatprep.mubr.f32.mxu0 %v21650_v53  ;;  %v16751_v53 = vsub.f32 %v3489_v27, %v16722_v3 }
 0x25e   : > { %21687 = vst [vmem:[#allocation32_spill] sm:$0xff] %v16751_v53 }
 0x25f   : > { %13012 = vmatmul.mubr.f32.gmra.mrb[22].mxu0 %v21651_v58 }
 0x260   : > { %13014 = vmatprep.mubr.f32.mxu0 %v21652_v40 }
 0x263   : > { %13015 = vmatmul.mubr.f32.gmra.mrb[24].mxu0 %v21653_v56 }
 0x264   : > { %13017 = vmatprep.mubr.f32.mxu0 %v21654_v61 }
 0x267   : > { %13018 = vmatmul.mubr.f32.gmra.mrb[26].mxu0 %v21655_v11  ;;  %v3530_v11 = vsel %vm3513_vm8, %v3492_v54, 0 }
 0x268   : > { %13020 = vmatprep.mubr.f32.mxu0 %v21656_v33 }
 0x26b   : > { %13021 = vmatmul.mubr.f32.gmra.mrb[28].mxu0 %v21657_v59 }
 0x26c   : > { %13023 = vmatprep.mubr.f32.mxu0 %v21658_v0 }
 0x26f   : > { %13024 = vmatmul.mubr.f32.gmra.mrb[30].mxu0 %v21659_v29  ;;  %v16775_v29 = vand.u32 4294901760, %v3491_v30 }
 0x270   : > { %13028 = vmatprep.mubr.f32.mxu0 %v15931_v16 }
 0x271   : > { %21689 = vst [vmem:[#allocation34_spill] sm:$0xff] %v16775_v29 }
 0x273   : > { %13029 = vmatmul.mubr.f32.vlgmr.msra.gmra.mrb[0].mxu0 %v15942_v26 }
 0x274   : > { %13031 = vmatprep.mubr.f32.mxu0 %v15969_v50  ;;  %13077 = vmatpush3.msra.mxu0 %v15824_v47  ;;  %v21660_v47 = vld [vmem:[#allocation20_spill] sm:$0xff] }
 0x277   : > { %13032 = vmatmul.mubr.f32.gmra.mrb[2].mxu0 %v15980_v60 }
 0x278   : > { %13034 = vmatprep.mubr.f32.mxu0 %v16007_v20 }
 0x27b   : > { %13035 = vmatmul.mubr.f32.gmra.mrb[4].mxu0 %v16018_v34 }
 0x27c   : > { %13037 = vmatprep.mubr.f32.mxu0 %v16045_v63 }
 0x27f   : > { %13038 = vmatmul.mubr.f32.gmra.mrb[6].mxu0 %v16056_v12 }
 0x280   : > { %13040 = vmatprep.mubr.f32.mxu0 %v16083_v48 }
 0x283   : > { %13041 = vmatmul.mubr.f32.gmra.mrb[8].mxu0 %v16094_v62 }
 0x284   : > { %13043 = vmatprep.mubr.f32.mxu0 %v16121_v39 }
 0x287   : > { %13044 = vmatmul.mubr.f32.gmra.mrb[10].mxu0 %v16132_v57 }
 0x288   : > { %13046 = vmatprep.mubr.f32.mxu0 %v16168_v45 }
 0x28b   : > { %13047 = vmatmul.mubr.f32.gmra.mrb[12].mxu0 %v16179_v13 }
 0x28c   : > { %13049 = vmatprep.mubr.f32.mxu0 %v16205_v17 }
 0x28f   : > { %13050 = vmatmul.mubr.f32.gmra.mrb[14].mxu0 %v16216_v46 }
 0x290   : > { %13052 = vmatprep.mubr.f32.mxu0 %v16235_v43 }
 0x293   : > { %13053 = vmatmul.mubr.f32.gmra.mrb[16].mxu0 %v16244_v22 }
 0x294   : > { %13055 = vmatprep.mubr.f32.mxu0 %v16263_v38 }
 0x297   : > { %13056 = vmatmul.mubr.f32.gmra.mrb[18].mxu0 %v16272_v18 }
 0x298   : > { %13058 = vmatprep.mubr.f32.mxu0 %v16291_v23 }
 0x29b   : > { %13059 = vmatmul.mubr.f32.gmra.mrb[20].mxu0 %v16300_v1 }
 0x29c   : > { %13061 = vmatprep.mubr.f32.mxu0 %v16319_v42 }
 0x29f   : > { %13062 = vmatmul.mubr.f32.gmra.mrb[22].mxu0 %v16328_v10 }
 0x2a0   : > { %13064 = vmatprep.mubr.f32.mxu0 %v21660_v47 }
 0x2a3   : > { %13065 = vmatmul.mubr.f32.gmra.mrb[24].mxu0 %v21661_v35 }
 0x2a4   : > { %13067 = vmatprep.mubr.f32.mxu0 %v21662_v6 }
 0x2a7   : > { %13068 = vmatmul.mubr.f32.gmra.mrb[26].mxu0 %v21663_v44 }
 0x2a8   : > { %13070 = vmatprep.mubr.f32.mxu0 %v21664_v25 }
 0x2ab   : > { %13071 = vmatmul.mubr.f32.gmra.mrb[28].mxu0 %v21665_v14 }
 0x2ac   : > { %13073 = vmatprep.mubr.f32.mxu0 %v21666_v51 }
 0x2af   : > { %13074 = vmatmul.mubr.f32.gmra.mrb[30].mxu0 %v21667_v24 }
 0x2b0   : > { %13078 = vmatprep.mubr.f32.mxu0 %v15931_v16  ;;  %v3482_v16 = vld [vmem:[%s21137_s9 + $0x8] sm:$0xff] }
 0x2b3   : > { %13079 = vmatmul.mubr.f32.vlgmr.msra.gmra.mrb[0].mxu0 %v15942_v26  ;;  %v3515_v26 = vsel %vm3513_vm8, %v3482_v16, 0 }
 0x2b4   : > { %13081 = vmatprep.mubr.f32.mxu0 %v15969_v50  ;;  %v16649_v50 = vand.u32 4294901760, %v3515_v26 }
 0x2b6   : > { %21668 = vst [vmem:[#allocation14_spill] sm:$0xff] %v16649_v50 }
 0x2b7   : > { %13082 = vmatmul.mubr.f32.gmra.mrb[2].mxu0 %v15980_v60  ;;  %v16652_v60 = vsub.f32 %v3515_v26, %v16649_v50 }
 0x2b8   : > { %13084 = vmatprep.mubr.f32.mxu0 %v16007_v20 }
 0x2b9   : > { %21669 = vst [vmem:[#allocation15_spill] sm:$0xff] %v16652_v60  ;;  %v21224_v20 = vand.u32 4294901760, %v16652_v60 }
 0x2bb   : > { %13085 = vmatmul.mubr.f32.gmra.mrb[4].mxu0 %v16018_v34  ;;  %v3664_v34 = vsub.f32 %v16652_v60, %v21224_v20 }
 0x2bc   : > { %13087 = vmatprep.mubr.f32.mxu0 %v16045_v63 }
 0x2bd   : > { %v3665_v63 = vand.u32 4294901760, %v3664_v34 }
 0x2bf   : > { %13088 = vmatmul.mubr.f32.gmra.mrb[6].mxu0 %v16056_v12  ;;  %3666 = vmatprep.mubr.f32.mxu1 %v3665_v63  ;;  %v3484_v12 = vld [vmem:[%s21137_s9 + $0x18] sm:$0xff] }
 0x2c0   : > { %13090 = vmatprep.mubr.f32.mxu0 %v16083_v48  ;;  %v3481_v48 = vld [vmem:[%s21137_s9] sm:$0xff] }
 0x2c3   : > { %13091 = vmatmul.mubr.f32.gmra.mrb[8].mxu0 %v16094_v62  ;;  %v3486_v62 = vld [vmem:[%s21137_s9 + $0x28] sm:$0xff] }
 0x2c4   : > { %13093 = vmatprep.mubr.f32.mxu0 %v16121_v39  ;;  %v3518_v39 = vsel %vm3513_vm8, %v3484_v12, 0 }
 0x2c7   : > { %13094 = vmatmul.mubr.f32.gmra.mrb[10].mxu0 %v16132_v57  ;;  %v3483_v57 = vld [vmem:[%s21137_s9 + $0x10] sm:$0xff] }
 0x2c8   : > { %13096 = vmatprep.mubr.f32.mxu0 %v16168_v45  ;;  %v16671_v45 = vand.u32 4294901760, %v3481_v48 }
 0x2ca   : > { %21670 = vst [vmem:[#allocation16_spill] sm:$0xff] %v16671_v45 }
 0x2cb   : > { %13097 = vmatmul.mubr.f32.gmra.mrb[12].mxu0 %v16179_v13  ;;  %v3485_v13 = vld [vmem:[%s21137_s9 + $0x20] sm:$0xff] }
 0x2cc   : > { %13099 = vmatprep.mubr.f32.mxu0 %v16205_v17  ;;  %v3521_v17 = vsel %vm3513_vm8, %v3486_v62, 0 }
 0x2cf   : > { %13100 = vmatmul.mubr.f32.gmra.mrb[14].mxu0 %v16216_v46  ;;  %v16677_v46 = vand.u32 4294901760, %v3518_v39 }
 0x2d0   : > { %13102 = vmatprep.mubr.f32.mxu0 %v16235_v43  ;;  %v16679_v43 = vand.u32 4294901760, %v3483_v57 }
 0x2d1   : > { %21671 = vst [vmem:[#allocation17_spill] sm:$0xff] %v16677_v46  ;;  %v16701_v36 = vsub.f32 %v3518_v39, %v16677_v46 }
 0x2d2   : > { %21672 = vst [vmem:[#allocation18_spill] sm:$0xff] %v16679_v43  ;;  %v16704_v5 = vsub.f32 %v3483_v57, %v16679_v43 }
 0x2d3   : > { %13103 = vmatmul.mubr.f32.gmra.mrb[16].mxu0 %v16244_v22  ;;  %v3488_v22 = vld [vmem:[%s21137_s9 + $0x38] sm:$0xff]  ;;  %21677 = vst [vmem:[#allocation27_spill] sm:$0xff] %v16701_v36  ;;  %v21222_v28 = vand.u32 4294901760, %v16701_v36 }
 0x2d4   : > { %13105 = vmatprep.mubr.f32.mxu0 %v16263_v38  ;;  %v3487_v38 = vld [vmem:[%s21137_s9 + $0x30] sm:$0xff]  ;;  %21678 = vst [vmem:[#allocation29_spill] sm:$0xff] %v16704_v5  ;;  %v21221_v41 = vand.u32 4294901760, %v16704_v5 }
 0x2d5   : > { %v16698_v15 = vand.u32 4294901760, %v3487_v38  ;;  %v16756_v40 = vsub.f32 %v16701_v36, %v21222_v28 }
 0x2d6   : > { %v16761_v56 = vsub.f32 %v16704_v5, %v21221_v41 }
 0x2d7   : > { %13106 = vmatmul.mubr.f32.gmra.mrb[18].mxu0 %v16272_v18  ;;  %v16687_v18 = vand.u32 4294901760, %v3485_v13  ;;  %21676 = vst [vmem:[#allocation25_spill] sm:$0xff] %v16698_v15  ;;  %v16720_v37 = vsub.f32 %v3487_v38, %v16698_v15 }
 0x2d8   : > { %13108 = vmatprep.mubr.f32.mxu0 %v16291_v23  ;;  %v16690_v23 = vsub.f32 %v3481_v48, %v16671_v45 }
 0x2d9   : > { %21673 = vst [vmem:[#allocation19_spill] sm:$0xff] %v16687_v18  ;;  %v16710_v52 = vsub.f32 %v3485_v13, %v16687_v18  ;;  %21682 = vst [vmem:[#allocation26_spill] sm:$0xff] %v16720_v37  ;;  %v21216_v31 = vand.u32 4294901760, %v16720_v37  ;;  %v16802_v13 = vsub.f32 %v3491_v30, %v16775_v29 }
 0x2da   : > { %21674 = vst [vmem:[#allocation21_spill] sm:$0xff] %v16690_v23  ;;  %v21223_v21 = vand.u32 4294901760, %v16690_v23 }
 0x2db   : > { %13109 = vmatmul.mubr.f32.gmra.mrb[20].mxu0 %v16300_v1  ;;  %v16692_v1 = vand.u32 4294901760, %v3521_v17  ;;  %21679 = vst [vmem:[#allocation20_spill] sm:$0xff] %v16710_v52  ;;  %v21218_v19 = vand.u32 4294901760, %v16710_v52  ;;  %21692 = vst [vmem:[#allocation37_spill] sm:$0xff] %v16802_v13 }
 0x2dc   : > { %13111 = vmatprep.mubr.f32.mxu0 %v16319_v42  ;;  %v3490_v42 = vld [vmem:[%s21137_s9 + $0x48] sm:$0xff]  ;;  %v16740_v49 = vsub.f32 %v16690_v23, %v21223_v21  ;;  %v3497_v23 = vld [vmem:[%s21137_s9 + $0x80] sm:$0xff] }
 0x2dd   : > { %21675 = vst [vmem:[#allocation23_spill] sm:$0xff] %v16692_v1  ;;  %v3527_v4 = vsel %vm3513_vm8, %v3490_v42, 0  ;;  %v16715_v32 = vsub.f32 %v3521_v17, %v16692_v1  ;;  %v16773_v0 = vsub.f32 %v16710_v52, %v21218_v19  ;;  %v3494_v17 = vld [vmem:[%s21137_s9 + $0x68] sm:$0xff] }
 0x2de   : > { %v16726_v7 = vand.u32 4294901760, %v3527_v4 }
 0x2df   : > { %13112 = vmatmul.mubr.f32.gmra.mrb[22].mxu0 %v16328_v10  ;;  %v3524_v10 = vsel %vm3513_vm8, %v3488_v22, 0  ;;  %21680 = vst [vmem:[#allocation22_spill] sm:$0xff] %v16715_v32  ;;  %v21219_v8 = vand.u32 4294901760, %v16715_v32 }
 0x2e0   : > { %13114 = vmatprep.mubr.f32.mxu0 %v21660_v47  ;;  %v16717_v55 = vand.u32 4294901760, %v3524_v10  ;;  %21684 = vst [vmem:[#allocation30_spill] sm:$0xff] %v16726_v7  ;;  %v16764_v61 = vsub.f32 %v3527_v4, %v16726_v7 }
 0x2e2   : > { %21681 = vst [vmem:[#allocation24_spill] sm:$0xff] %v16717_v55  ;;  %v16744_v2 = vsub.f32 %v3524_v10, %v16717_v55  ;;  %21688 = vst [vmem:[#allocation33_spill] sm:$0xff] %v16764_v61  ;;  %v21220_v12 = vand.u32 4294901760, %v16764_v61 }
 0x2e3   : > { %13115 = vmatmul.mubr.f32.gmra.mrb[24].mxu0 %v21661_v35 }
 0x2e4   : > { %13117 = vmatprep.mubr.f32.mxu0 %v21662_v6  ;;  %21686 = vst [vmem:[#allocation31_spill] sm:$0xff] %v16744_v2  ;;  %v16782_v6 = vsub.f32 %v16715_v32, %v21219_v8 }
 0x2e7   : > { %13118 = vmatmul.mubr.f32.gmra.mrb[26].mxu0 %v21663_v44  ;;  %v21217_v44 = vand.u32 4294901760, %v16744_v2 }
 0x2e8   : > { %13120 = vmatprep.mubr.f32.mxu0 %v21664_v25 }
 0x2e9   : > { %v16812_v10 = vsub.f32 %v16744_v2, %v21217_v44  ;;  %v21225_v44 = vand.u32 4294901760, %v16802_v13 }
 0x2eb   : > { %13121 = vmatmul.mubr.f32.gmra.mrb[28].mxu0 %v21665_v14  ;;  %v16789_v14 = vsub.f32 %v16720_v37, %v21216_v31 }
 0x2ec   : > { %13123 = vmatprep.mubr.f32.mxu0 %v21666_v51  ;;  %v21215_v51 = vand.u32 4294901760, %v16751_v53 }
 0x2ed   : > { %21690 = vst [vmem:[#allocation35_spill] sm:$0xff] %v16789_v14 }
 0x2ee   : > { %v16819_v54 = vsub.f32 %v16751_v53, %v21215_v51 }
 0x2ef   : > { %13124 = vmatmul.mubr.f32.gmra.mrb[30].mxu0 %v21667_v24  ;;  %v16792_v24 = vand.u32 4294901760, %v3530_v11 }
 0x2f0   : > { %21693 = vst [vmem:[#allocation38_spill] sm:$0xff] %v16819_v54 }
 0x2f1   : > { %21691 = vst [vmem:[#allocation36_spill] sm:$0xff] %v16792_v24  ;;  %v16822_v30 = vsub.f32 %v3530_v11, %v16792_v24 }
 0x2f3   : > { %21694 = vst [vmem:[#allocation39_spill] sm:$0xff] %v16822_v30 }
 0x386   : > { %v13080_v58 = vpop.f32.mrb[0].mxu0 }
 0x387   : > { %v16768_v33 = vadd.f32 %v13080_v58, %v16735_v9  ;;  %v3099_v59 = vpop.f32.mrb[1].mxu0  ;;  %v3493_v58 = vld [vmem:[%s21137_s9 + $0x60] sm:$0xff] }
 0x388   : > { %v15035_v47 = vadd.f32 %v16735_v9, %v3099_v59  ;;  %v16842_v8 = vand.u32 4294901760, %v3493_v58 }
 0x389   : > { %v3290_v25 = vmax.f32 %v16768_v33, 0.0 }
 0x38a   : > { %v3289_v16 = vmax.f32 %v15035_v47, 0.0  ;;  %v13083_v26 = vpop.f32.mrb[2].mxu0  ;;  %21696 = vst [vmem:[#allocation41_spill] sm:$0xff] %v16842_v8 }
 0x38b   : > { %v3355_v48 = vrot.slane %v3290_v25, 1  ;;  %v16798_v62 = vadd.f32 %v13083_v26, %v16735_v9  ;;  %v3111_v39 = vpop.f32.mrb[3].mxu0  ;;  %v16831_v26 = vsub.f32 %v16764_v61, %v21220_v12 }
 0x38c   : > { %v3354_v22 = vrot.slane %v3289_v16, 1  ;;  %v15037_v38 = vadd.f32 %v16735_v9, %v3111_v39 }
 0x38d   : > { %v3292_v27 = vmax.f32 %v16798_v62, 0.0  ;;  %21695 = vst [vmem:[#allocation40_spill] sm:$0xff] %v16831_v26  ;;  %v3533_v62 = vsel %vm3513_vm8, %v3494_v17, 0  ;;  %v16860_v17 = vsub.f32 %v16802_v13, %v21225_v44 }
 0x38e   : > { %v3356_v33 = vsel %vm3353_vm9, %v3354_v22, %v3355_v48  ;;  %v3291_v59 = vmax.f32 %v15037_v38, 0.0  ;;  %v13086_v47 = vpop.f32.mrb[4].mxu0 }
 0x38f   : > { %v16834_v39 = vmax.f32 %v3289_v16, %v3356_v33  ;;  %v3359_v51 = vrot.slane %v3292_v27, 1  ;;  %v16837_v11 = vadd.f32 %v13086_v47, %v16735_v9  ;;  %v3123_v31 = vpop.f32.mrb[5].mxu0  ;;  %v21226_v16 = vand.u32 4294901760, %v16822_v30  ;;  %21698 = vst [vmem:[#allocation43_spill] sm:$0xff] %v16860_v17 }
 0x390   : > { %v3357_v19 = vrot.slane %v3291_v59, 1  ;;  %v15039_v22 = vadd.f32 %v16735_v9, %v3123_v31  ;;  %v16847_v33 = vand.u32 4294901760, %v3533_v62 }
 0x391   : > { %v3294_v12 = vmax.f32 %v16837_v11, 0.0  ;;  %v16876_v44 = vsub.f32 %v16822_v30, %v21226_v16 }
 0x392   : > { %21697 = vst [vmem:[#allocation42_spill] sm:$0xff] %v16847_v33  ;;  %v3358_v47 = vsel %vm3353_vm9, %v3355_v48, %v3357_v19  ;;  %v3360_v41 = vsel %vm3353_vm9, %v3357_v19, %v3359_v51  ;;  %v3293_v28 = vmax.f32 %v15039_v22, 0.0  ;;  %v13089_v21 = vpop.f32.mrb[6].mxu0  ;;  %v16866_v22 = vsub.f32 %v3493_v58, %v16842_v8 }
 0x393   : > { %v16852_v20 = vmax.f32 %v3291_v59, %v3360_v41  ;;  %v3363_v4 = vrot.slane %v3294_v12, 1  ;;  %v16855_v38 = vadd.f32 %v13089_v21, %v16735_v9  ;;  %v3135_v11 = vpop.f32.mrb[7].mxu0  ;;  %v16863_v19 = vmax.f32 %v3290_v25, %v3358_v47  ;;  %v3496_v41 = vld [vmem:[%s21137_s9 + $0x78] sm:$0xff]  ;;  %21700 = vst [vmem:[#allocation45_spill] sm:$0xff] %v16876_v44 }
 0x394   : > { %v3361_v57 = vrot.slane %v3293_v28, 1  ;;  %v15041_v48 = vadd.f32 %v16735_v9, %v3135_v11  ;;  %21699 = vst [vmem:[#allocation44_spill] sm:$0xff] %v16866_v22  ;;  %v16879_v11 = vsub.f32 %v3533_v62, %v16847_v33  ;;  %v3536_v62 = vsel %vm3513_vm8, %v3496_v41, 0 }
 0x395   : > { %v3296_v59 = vmax.f32 %v16855_v38, 0.0  ;;  %v21237_v42 = vand.u32 4294901760, %v16863_v19  ;;  %v3495_v38 = vld [vmem:[%s21137_s9 + $0x70] sm:$0xff] }
 0x396   : > { %21701 = vst [vmem:[#allocation46_spill] sm:$0xff] %v16879_v11  ;;  %v3362_v25 = vsel %vm3353_vm9, %v3359_v51, %v3361_v57  ;;  %v3364_v58 = vsel %vm3353_vm9, %v3361_v57, %v3363_v4  ;;  %v3295_v47 = vmax.f32 %v15041_v48, 0.0  ;;  %v13092_v31 = vpop.f32.mrb[8].mxu0  ;;  %v21702_v48 = vand.u32 4294901760, %v16834_v39 }
 0x397   : > { %v16887_v63 = vmax.f32 %v3293_v28, %v3364_v58  ;;  %v3367_v34 = vrot.slane %v3296_v59, 1  ;;  %v3147_v16 = vpop.f32.mrb[9].mxu0  ;;  %v16892_v51 = vadd.f32 %v13092_v31, %v16735_v9  ;;  %v16901_v28 = vmax.f32 %v3292_v27, %v3362_v25 }
 0x398   : > { %v3365_v21 = vrot.slane %v3295_v47, 1  ;;  %v15043_v57 = vadd.f32 %v16735_v9, %v3147_v16  ;;  %v16899_v13 = vpack.c.bf16 %v21237_v42, %v21702_v48  ;;  %v16905_v30 = vand.u32 4294901760, %v3495_v38 }
 0x399   : > { %v21240_v16 = vmax.f32 %v16892_v51, 0.0  ;;  %v16916_v42 = vand.u32 4294901760, %v3536_v62  ;;  %v21249_v35 = vand.u32 4294901760, %v16901_v28 }
 0x39a   : > { %21703 = vst [vmem:[#allocation47_spill] sm:$0xff] %v16899_v13  ;;  %21704 = vst [vmem:[#allocation48_spill] sm:$0xff] %v16905_v30  ;;  %v3366_v41 = vsel %vm3353_vm9, %v3363_v4, %v3365_v21  ;;  %v3368_v31 = vsel %vm3353_vm9, %v3365_v21, %v3367_v34  ;;  %v3297_v53 = vmax.f32 %v15043_v57, 0.0  ;;  %v13095_v61 = vpop.f32.mrb[10].mxu0 }
 0x39b   : > { %v16911_v48 = vmax.f32 %v3295_v47, %v3368_v31  ;;  %v16914_v27 = vadd.f32 %v13095_v61, %v16735_v9  ;;  %v3159_v25 = vpop.f32.mrb[11].mxu0  ;;  %21705 = vst [vmem:[#allocation49_spill] sm:$0xff] %v16916_v42  ;;  %v3371_v58 = vrot.slane %v21240_v16, 1  ;;  %v16923_v2 = vmax.f32 %v3294_v12, %v3366_v41 }
 0x39c   : > { %v3369_v4 = vrot.slane %v3297_v53, 1  ;;  %v15045_v21 = vadd.f32 %v16735_v9, %v3159_v25  ;;  %v21706_v61 = vand.u32 4294901760, %v16866_v22  ;;  %v21708_v25 = vand.u32 4294901760, %v16852_v20 }
 0x39d   : > { %v21710_v41 = vmax.f32 %v16914_v27, 0.0  ;;  %v21720_v3 = vand.u32 4294901760, %v16911_v48 }
 0x39e   : > { %v16929_v31 = vsub.f32 %v16866_v22, %v21706_v61  ;;  %v3370_v37 = vsel %vm3353_vm9, %v3367_v34, %v3369_v4  ;;  %v3372_v16 = vsel %vm3353_vm9, %v3369_v4, %v3371_v58  ;;  %v3299_v52 = vmax.f32 %v15045_v21, 0.0  ;;  %v13098_v32 = vpop.f32.mrb[12].mxu0 }
 0x39f   : > { %v16937_v57 = vpack.c.bf16 %v21249_v35, %v21708_v25  ;;  %v16939_v12 = vmax.f32 %v3297_v53, %v3372_v16  ;;  %v3375_v47 = vrot.slane %v21710_v41, 1  ;;  %v3171_v5 = vpop.f32.mrb[13].mxu0  ;;  %v21711_v61 = vand.u32 4294901760, %v16879_v11  ;;  %v3498_v16 = vld [vmem:[%s21137_s9 + $0x88] sm:$0xff] }
 0x3a0   : > { %21707 = vst [vmem:[#allocation50_spill] sm:$0xff] %v16929_v31  ;;  %v16949_v4 = vsub.f32 %v3495_v38, %v16905_v30  ;;  %v3373_v21 = vrot.slane %v3299_v52, 1  ;;  %v16952_v22 = vadd.f32 %v13098_v32, %v16735_v9  ;;  %v15047_v25 = vadd.f32 %v16735_v9, %v3171_v5 }
 0x3a1   : > { %21709 = vst [vmem:[#allocation51_spill] sm:$0xff] %v16937_v57  ;;  %v16946_v34 = vsub.f32 %v16879_v11, %v21711_v61  ;;  %v16956_v53 = vsub.f32 %v3536_v62, %v16916_v42  ;;  %v21267_v41 = vand.u32 4294901760, %v16887_v63  ;;  %v16963_v35 = vmax.f32 %v3296_v59, %v3370_v37 }
 0x3a2   : > { %21713 = vst [vmem:[#allocation53_spill] sm:$0xff] %v16949_v4  ;;  %v3374_v32 = vsel %vm3353_vm9, %v3371_v58, %v3373_v21  ;;  %v3376_v11 = vsel %vm3353_vm9, %v3373_v21, %v3375_v47  ;;  %v21262_v5 = vmax.f32 %v16952_v22, 0.0  ;;  %v3301_v62 = vmax.f32 %v15047_v25, 0.0  ;;  %v13101_v36 = vpop.f32.mrb[14].mxu0 }
 0x3a3   : > { %21712 = vst [vmem:[#allocation52_spill] sm:$0xff] %v16946_v34  ;;  %21714 = vst [vmem:[#allocation54_spill] sm:$0xff] %v16956_v53  ;;  %v16972_v60 = vmax.f32 %v3299_v52, %v3376_v11  ;;  %v16975_v61 = vadd.f32 %v13101_v36, %v16735_v9  ;;  %v3183_v37 = vpop.f32.mrb[15].mxu0  ;;  %v3539_v58 = vsel %vm3513_vm8, %v3498_v16, 0  ;;  %v21715_v30 = vand.u32 4294901760, %v16923_v2 }
 0x3a4   : > { %v3379_v21 = vrot.slane %v21262_v5, 1  ;;  %v3377_v38 = vrot.slane %v3301_v62, 1  ;;  %v15049_v25 = vadd.f32 %v16735_v9, %v3183_v37  ;;  %v16991_v42 = vand.u32 4294901760, %v3497_v23 }
 0x3a5   : > { %v16986_v52 = vpack.c.bf16 %v21715_v30, %v21267_v41  ;;  %v21278_v11 = vmax.f32 %v16975_v61, 0.0  ;;  %v3500_v30 = vld [vmem:[%s21137_s9 + $0x98] sm:$0xff]  ;;  %v21718_v41 = vand.u32 4294901760, %v16834_v39  ;;  %v21721_v7 = vand.u32 4294901760, %v16963_v35 }
 0x3a6   : > { %21717 = vst [vmem:[#allocation56_spill] sm:$0xff] %v16991_v42  ;;  %v3378_v16 = vsel %vm3353_vm9, %v3375_v47, %v3377_v38  ;;  %v3380_v5 = vsel %vm3353_vm9, %v3377_v38, %v3379_v21  ;;  %v3303_v8 = vmax.f32 %v15049_v25, 0.0  ;;  %v13104_v37 = vpop.f32.mrb[16].mxu0  ;;  %v17026_v38 = vand.u32 4294901760, %v3539_v58 }
 0x3a7   : > { %21716 = vst [vmem:[#allocation55_spill] sm:$0xff] %v16986_v52  ;;  %v17002_v36 = vsub.f32 %v16834_v39, %v21718_v41  ;;  %v17004_v59 = vmax.f32 %v3301_v62, %v3380_v5  ;;  %v3383_v47 = vrot.slane %v21278_v11, 1  ;;  %v3195_v29 = vpop.f32.mrb[17].mxu0  ;;  %v15050_v33 = vadd.f32 %v13104_v37, %v16735_v9 }
 0x3a8   : > { %v3381_v25 = vrot.slane %v3303_v8, 1  ;;  %v15051_v24 = vadd.f32 %v16735_v9, %v3195_v29  ;;  %v17015_v15 = vpack.c.bf16 %v21721_v7, %v21720_v3  ;;  %v21723_v39 = vmax.f32 %v16892_v51, 0.0  ;;  %21726 = vst [vmem:[#allocation60_spill] sm:$0xff] %v17026_v38 }
 0x3a9   : > { %21719 = vst [vmem:[#allocation57_spill] sm:$0xff] %v17002_v36  ;;  %v21724_v5 = vand.u32 4294901760, %v16949_v4  ;;  %v17029_v37 = vsel %vm3513_vm8, %v3500_v30, 0  ;;  %v3306_v3 = vmax.f32 %v15050_v33, 0.0  ;;  %v21729_v33 = vand.u32 4294901760, %v16852_v20 }
 0x3aa   : > { %21722 = vst [vmem:[#allocation58_spill] sm:$0xff] %v17015_v15  ;;  %v17019_v41 = vmax.f32 %v21723_v39, %v3374_v32  ;;  %21727 = vst [vmem:[#allocation61_spill] sm:$0xff] %v17029_v37  ;;  %v3382_v29 = vsel %vm3353_vm9, %v3379_v21, %v3381_v25  ;;  %v3384_v11 = vsel %vm3353_vm9, %v3381_v25, %v3383_v47  ;;  %v3305_v7 = vmax.f32 %v15051_v24, 0.0  ;;  %v13107_v55 = vpop.f32.mrb[18].mxu0 }
 0x3ab   : > { %v17024_v62 = vsub.f32 %v16949_v4, %v21724_v5  ;;  %v17035_v39 = vmax.f32 %v3303_v8, %v3384_v11  ;;  %v17038_v5 = vadd.f32 %v13107_v55, %v16735_v9  ;;  %v3207_v4 = vpop.f32.mrb[19].mxu0  ;;  %v3387_v18 = vrot.slane %v3306_v3, 1 }
 0x3ac   : > { %v3385_v30 = vrot.slane %v3305_v7, 1  ;;  %v15053_v1 = vadd.f32 %v16735_v9, %v3207_v4  ;;  %v17045_v24 = vsub.f32 %v16852_v20, %v21729_v33  ;;  %v21731_v8 = vmax.f32 %v16914_v27, 0.0 }
 0x3ad   : > { %21725 = vst [vmem:[#allocation59_spill] sm:$0xff] %v17024_v62  ;;  %21728 = vst [vmem:[#allocation62_spill] sm:$0xff] %v17035_v39  ;;  %v3308_v25 = vmax.f32 %v17038_v5, 0.0  ;;  %v17053_v55 = vsub.f32 %v3497_v23, %v16991_v42  ;;  %v21733_v43 = vand.u32 4294901760, %v16939_v12  ;;  %v21734_v20 = vand.u32 4294901760, %v17019_v41 }
 0x3ae   : > { %21730 = vst [vmem:[#allocation63_spill] sm:$0xff] %v17045_v24  ;;  %v17050_v11 = vmax.f32 %v21731_v8, %v3378_v16  ;;  %v3386_v51 = vsel %vm3353_vm9, %v3383_v47, %v3385_v30  ;;  %v3388_v4 = vsel %vm3353_vm9, %v3385_v30, %v3387_v18  ;;  %v3307_v32 = vmax.f32 %v15053_v1, 0.0  ;;  %v13110_v21 = vpop.f32.mrb[20].mxu0 }
 0x3af   : > { %21732 = vst [vmem:[#allocation64_spill] sm:$0xff] %v17053_v55  ;;  %v17061_v33 = vpack.c.bf16 %v21734_v20, %v21733_v43  ;;  %v17063_v5 = vmax.f32 %v3305_v7, %v3388_v4  ;;  %v3391_v27 = vrot.slane %v3308_v25, 1  ;;  %v3219_v16 = vpop.f32.mrb[21].mxu0  ;;  %v17066_v8 = vsub.f32 %v3539_v58, %v17026_v38 }
 0x3b0   : > { %v17069_v23 = vand.u32 4294901760, %v17029_v37  ;;  %v21738_v47 = vand.u32 4294901760, %v17002_v36  ;;  %v3389_v30 = vrot.slane %v3307_v32, 1  ;;  %v15054_v42 = vadd.f32 %v13110_v21, %v16735_v9 }
 0x3b1   : > { %21735 = vst [vmem:[#allocation65_spill] sm:$0xff] %v17061_v33  ;;  %21736 = vst [vmem:[#allocation66_spill] sm:$0xff] %v17066_v8  ;;  %v15055_v43 = vadd.f32 %v16735_v9, %v3219_v16  ;;  %v21739_v4 = vand.u32 4294901760, %v16863_v19  ;;  %v21740_v38 = vmax.f32 %v16952_v22, 0.0  ;;  %v21741_v7 = vand.u32 4294901760, %v16887_v63 }
 0x3b2   : > { %21737 = vst [vmem:[#allocation67_spill] sm:$0xff] %v17069_v23  ;;  %v17074_v1 = vsub.f32 %v17002_v36, %v21738_v47  ;;  %v3390_v47 = vsel %vm3353_vm9, %v3387_v18, %v3389_v30  ;;  %v3392_v45 = vsel %vm3353_vm9, %v3389_v30, %v3391_v27  ;;  %v3310_v21 = vmax.f32 %v15054_v42, 0.0  ;;  %v13113_v16 = vpop.f32.mrb[22].mxu0 }
 0x3b3   : > { %v17082_v58 = vsub.f32 %v16863_v19, %v21739_v4  ;;  %v17087_v46 = vmax.f32 %v21740_v38, %v3382_v29  ;;  %v3309_v36 = vmax.f32 %v15055_v43, 0.0  ;;  %v17094_v50 = vsub.f32 %v16887_v63, %v21741_v7  ;;  %v3231_v38 = vpop.f32.mrb[23].mxu0 }
 0x3b4   : > { %v21306_v19 = vand.u32 4294901760, %v16972_v60  ;;  %v17097_v4 = vmax.f32 %v3307_v32, %v3392_v45  ;;  %v17100_v22 = vadd.f32 %v13113_v16, %v16735_v9  ;;  %v3395_v29 = vrot.slane %v3310_v21, 1 }
 0x3b5   : > { %21742 = vst [vmem:[#allocation68_spill] sm:$0xff] %v17094_v50  ;;  %v3393_v18 = vrot.slane %v3309_v36, 1  ;;  %v15057_v30 = vadd.f32 %v16735_v9, %v3231_v38  ;;  %v17103_v42 = vmax.f32 %v3306_v3, %v3390_v47  ;;  %v21743_v43 = vand.u32 4294901760, %v17045_v24 }
 0x3b6   : > { %v3614_v63 = vand.u32 4294901760, %v17063_v5  ;;  %v3312_v45 = vmax.f32 %v17100_v22, 0.0  ;;  %v21744_v32 = vand.u32 4294901760, %v17050_v11  ;;  %v13116_v38 = vpop.f32.mrb[24].mxu0 }
 0x3b7   : > { %v17108_v20 = vsub.f32 %v17045_v24, %v21743_v43  ;;  %v3394_v16 = vsel %vm3353_vm9, %v3391_v27, %v3393_v18  ;;  %v3396_v3 = vsel %vm3353_vm9, %v3393_v18, %v3395_v29  ;;  %v3311_v47 = vmax.f32 %v15057_v30, 0.0  ;;  %v3243_v17 = vpop.f32.mrb[25].mxu0 }
 0x3b8   : > { %v17116_v7 = vpack.c.bf16 %v21744_v32, %v21306_v19  ;;  %v3617_v31 = vand.u32 4294901760, %v17103_v42  ;;  %v17122_v24 = vmax.f32 %v3309_v36, %v3396_v3  ;;  %v3399_v34 = vrot.slane %v3312_v45, 1 }
 0x3b9   : > { %v17125_v22 = vadd.f32 %v13116_v38, %v16735_v9  ;;  %v21746_v32 = vand.u32 4294901760, %v16911_v48  ;;  %v3397_v27 = vrot.slane %v3311_v47, 1  ;;  %v15059_v18 = vadd.f32 %v16735_v9, %v3243_v17 }
 0x3ba   : > { %21745 = vst [vmem:[#allocation69_spill] sm:$0xff] %v17116_v7  ;;  %v17133_v30 = vpack.c.bf16 %v3617_v31, %v3614_v63  ;;  %v17137_v3 = vmax.f32 %v3308_v25, %v3394_v16  ;;  %v21749_v17 = vmax.f32 %v16975_v61, 0.0  ;;  %v21750_v61 = vand.u32 4294901760, %v17094_v50 }
 0x3bb   : > { %v17130_v19 = vsub.f32 %v16911_v48, %v21746_v32  ;;  %v3314_v36 = vmax.f32 %v17125_v22, 0.0  ;;  %v3398_v43 = vsel %vm3353_vm9, %v3395_v29, %v3397_v27  ;;  %v3400_v54 = vsel %vm3353_vm9, %v3397_v27, %v3399_v34  ;;  %v13119_v48 = vpop.f32.mrb[26].mxu0 }
 0x3bc   : > { %21748 = vst [vmem:[#allocation71_spill] sm:$0xff] %v17133_v30  ;;  %v3313_v26 = vmax.f32 %v15059_v18, 0.0  ;;  %13931 = vmatprep.subr.bf16.mxu1 %v17133_v30  ;;  %v17145_v32 = vmax.f32 %v21749_v17, %v3386_v51  ;;  %v17148_v55 = vmax.f32 %v3311_v47, %v3400_v54  ;;  %v17151_v16 = vadd.f32 %v13119_v48, %v16735_v9  ;;  %v3255_v29 = vpop.f32.mrb[27].mxu0 }
 0x3bd   : > { %21747 = vst [vmem:[#allocation70_spill] sm:$0xff] %v17130_v19  ;;  %v3403_v25 = vrot.slane %v3314_v36, 1  ;;  %13933 = vmatpush3.bf16.msra.mxu1 %v16899_v13  ;;  %v15061_v27 = vadd.f32 %v16735_v9, %v3255_v29  ;;  %v17156_v38 = vmax.f32 %v3310_v21, %v3398_v43  ;;  %v17161_v51 = vsub.f32 %v17094_v50, %v21750_v61 }
 0x3be   : > { %v3401_v22 = vrot.slane %v3313_v26, 1  ;;  %v3316_v54 = vmax.f32 %v17151_v16, 0.0  ;;  %v21751_v47 = vand.u32 4294901760, %v16901_v28  ;;  %v21752_v17 = vand.u32 4294901760, %v17004_v59  ;;  %v13122_v30 = vpop.f32.mrb[28].mxu0 }
 0x3bf   : > { %v21753_v29 = vand.u32 4294901760, %v17087_v46  ;;  %v3315_v18 = vmax.f32 %v15061_v27, 0.0  ;;  %v21755_v61 = vand.u32 4294901760, %v17097_v4  ;;  %v21756_v16 = vand.u32 4294901760, %v17137_v3 }
 0x3c0   : > { %v17167_v48 = vsub.f32 %v16901_v28, %v21751_v47  ;;  %v3402_v21 = vsel %vm3353_vm9, %v3399_v34, %v3401_v22  ;;  %v3404_v43 = vsel %vm3353_vm9, %v3401_v22, %v3403_v25  ;;  %v15062_v34 = vadd.f32 %v13122_v30, %v16735_v9 }
 0x3c1   : > { %v17173_v44 = vpack.c.bf16 %v21753_v29, %v21752_v17  ;;  %v17181_v13 = vpack.c.bf16 %v21756_v16, %v21755_v61  ;;  %v17185_v50 = vmax.f32 %v3313_v26, %v3404_v43  ;;  %v3407_v17 = vrot.slane %v3316_v54, 1  ;;  %v3267_v29 = vpop.f32.mrb[29].mxu0 }
 0x3c2   : > { %v3405_v62 = vrot.slane %v3315_v18, 1  ;;  %v15063_v22 = vadd.f32 %v16735_v9, %v3267_v29  ;;  %v3629_v27 = vand.u32 4294901760, %v17156_v38  ;;  %v17192_v61 = vsub.f32 %v17063_v5, %v3614_v63  ;;  %v13125_v29 = vpop.f32.mrb[30].mxu0 }
 0x3c3   : > { %21754 = vst [vmem:[#allocation72_spill] sm:$0xff] %v17173_v44  ;;  %21757 = vst [vmem:[#allocation73_spill] sm:$0xff] %v17181_v13  ;;  %13935 = vmatprep.subr.bf16.mxu1 %v17181_v13  ;;  %v3626_v16 = vand.u32 4294901760, %v17122_v24  ;;  %v17196_v26 = vmax.f32 %v3312_v45, %v3402_v21  ;;  %v3318_v30 = vmax.f32 %v15062_v34, 0.0  ;;  %v3632_v14 = vand.u32 4294901760, %v17148_v55  ;;  %v3279_v45 = vpop.f32.mrb[31].mxu0 }
 0x3c4   : > { %13937 = vmatpush3.bf16.msra.mxu1 %v16937_v57  ;;  %v3406_v28 = vsel %vm3353_vm9, %v3403_v25, %v3405_v62  ;;  %v3408_v47 = vsel %vm3353_vm9, %v3405_v62, %v3407_v17  ;;  %v3317_v13 = vmax.f32 %v15063_v22, 0.0  ;;  %v17203_v5 = vsub.f32 %v17103_v42, %v3617_v31 }
 0x3c5   : > { %v17205_v63 = vmax.f32 %v3315_v18, %v3408_v47  ;;  %v17207_v37 = vpack.c.bf16 %v3629_v27, %v3626_v16  ;;  %v3411_v21 = vrot.slane %v3318_v30, 1  ;;  %v15064_v43 = vadd.f32 %v13125_v29, %v16735_v9 }
 0x3c6   : > { %v3409_v57 = vrot.slane %v3317_v13, 1  ;;  %v15065_v25 = vadd.f32 %v16735_v9, %v3279_v45  ;;  %v3635_v62 = vand.u32 4294901760, %v17196_v26  ;;  %v17213_v34 = vmax.f32 %v3314_v36, %v3406_v28 }
 0x3c7   : > { %21758 = vst [vmem:[#allocation74_spill] sm:$0xff] %v17207_v37  ;;  %13939 = vmatprep.subr.bf16.mxu1 %v17207_v37  ;;  %v21759_v31 = vand.u32 4294901760, %v17035_v39  ;;  %v21760_v42 = vand.u32 4294901760, %v17145_v32  ;;  %v3320_v23 = vmax.f32 %v15064_v43, 0.0  ;;  %v21762_v45 = vand.u32 4294901760, %v17130_v19 }
 0x3c8   : > { %v3410_v22 = vsel %vm3353_vm9, %v3407_v17, %v3409_v57  ;;  %v3412_v29 = vsel %vm3353_vm9, %v3409_v57, %v3411_v21  ;;  %13941 = vmatpush3.bf16.msra.mxu1 %v16986_v52  ;;  %v3319_v9 = vmax.f32 %v15065_v25, 0.0  ;;  %v3638_v28 = vand.u32 4294901760, %v17185_v50 }
 0x3c9   : > { %v17219_v18 = vpack.c.bf16 %v21760_v42, %v21759_v31  ;;  %v17228_v36 = vsub.f32 %v17130_v19, %v21762_v45  ;;  %v3477_v37 = vmax.f32 %v3317_v13, %v3412_v29  ;;  %v17231_v31 = vpack.c.bf16 %v3635_v62, %v3632_v14 }
 0x3ca   : > { %v3415_v42 = vrot.slane %v3320_v23, 1  ;;  %v3413_v47 = vrot.slane %v3319_v9, 1  ;;  %v3641_v17 = vand.u32 4294901760, %v17213_v34  ;;  %v17234_v39 = vmax.f32 %v3316_v54, %v3410_v22 }
 0x3cb   : > { %21761 = vst [vmem:[#allocation75_spill] sm:$0xff] %v17219_v18  ;;  %21763 = vst [vmem:[#allocation76_spill] sm:$0xff] %v17231_v31  ;;  %v21764_v57 = vand.u32 4294901760, %v16939_v12  ;;  %v21765_v25 = vand.u32 4294901760, %v17097_v4  ;;  %13943 = vmatprep.subr.bf16.mxu1 %v17231_v31  ;;  %v21766_v13 = vand.u32 4294901760, %v17192_v61  ;;  %v21768_v52 = vand.u32 4294901760, %v17137_v3 }
 0x3cc   : > { %v3480_v54 = vmax.f32 %v3320_v23, %v3415_v42  ;;  %v3414_v22 = vsel %vm3353_vm9, %v3411_v21, %v3413_v47  ;;  %v3416_v19 = vsel %vm3353_vm9, %v3413_v47, %v3415_v42  ;;  %13945 = vmatpush3.bf16.msra.mxu1 %v17015_v15 }
 0x3cd   : > { %v17239_v43 = vsub.f32 %v16939_v12, %v21764_v57  ;;  %v17244_v45 = vsub.f32 %v17097_v4, %v21765_v25  ;;  %v4018_v29 = vsub.f32 %v17192_v61, %v21766_v13  ;;  %v17254_v12 = vpack.c.bf16 %v3641_v17, %v3638_v28 }
 0x3ce   : > { %v17257_v4 = vsub.f32 %v17122_v24, %v3626_v16  ;;  %v3644_v57 = vand.u32 4294901760, %v17205_v63  ;;  %v17260_v25 = vmax.f32 %v3319_v9, %v3416_v19  ;;  %v3647_v13 = vand.u32 4294901760, %v17234_v39 }
 0x3cf   : > { %21767 = vst [vmem:[#allocation77_spill] sm:$0xff] %v17254_v12  ;;  %v17266_v23 = vsub.f32 %v17137_v3, %v21768_v52  ;;  %v17269_v21 = vsel %vm3353_vm9, %v3480_v54, 0  ;;  %13947 = vmatprep.subr.bf16.mxu1 %v17254_v12  ;;  %v3478_v47 = vmax.f32 %v3318_v30, %v3414_v22  ;;  %v21769_v24 = vand.u32 4294901760, %v17203_v5 }
 0x3d0   : > { %v17276_v19 = vsub.f32 %v17156_v38, %v3629_v27  ;;  %v3659_v9 = vand.u32 4294901760, %v17269_v21  ;;  %v21341_v42 = vand.u32 4294901760, %v17260_v25  ;;  %v17280_v15 = vpack.c.bf16 %v3647_v13, %v3644_v57  ;;  %13949 = vmatpush3.bf16.msra.mxu1 %v17061_v33 }
 0x3d1   : > { %v4025_v16 = vsub.f32 %v17203_v5, %v21769_v24  ;;  %v3650_v52 = vand.u32 4294901760, %v3477_v37  ;;  %v3653_v3 = vand.u32 4294901760, %v3478_v47  ;;  %v4019_v54 = vand.u32 4294901760, %v4018_v29 }
 0x3d2   : > { %21770 = vst [vmem:[#allocation78_spill] sm:$0xff] %v17280_v15  ;;  %13951 = vmatprep.subr.bf16.mxu1 %v17280_v15  ;;  %v17287_v38 = vpack.c.bf16 %v3659_v9, %v21341_v42  ;;  %v21342_v22 = vand.u32 4294901760, %v17244_v45  ;;  %v17292_v24 = vsub.f32 %v17148_v55, %v3632_v14  ;;  %v21772_v33 = vand.u32 4294901760, %v16923_v2 }
 0x3d3   : > { %v4026_v12 = vand.u32 4294901760, %v4025_v16  ;;  %v17299_v16 = vpack.c.bf16 %v3653_v3, %v3650_v52  ;;  %v17302_v15 = vsub.f32 %v17196_v26, %v3635_v62  ;;  %v21774_v42 = vand.u32 4294901760, %v16963_v35 }
 0x3d4   : > { %21771 = vst [vmem:[#allocation79_spill] sm:$0xff] %v17287_v38  ;;  %v17297_v29 = vsub.f32 %v16923_v2, %v21772_v33  ;;  %v4032_v14 = vsub.f32 %v17244_v45, %v21342_v22  ;;  %v21343_v55 = vand.u32 4294901760, %v17266_v23  ;;  %v17314_v2 = vsub.f32 %v17185_v50, %v3638_v28  ;;  %13953 = vmatpush3.bf16.msra.mxu1 %v17116_v7 }
 0x3d5   : > { %21773 = vst [vmem:[#allocation80_spill] sm:$0xff] %v17299_v16  ;;  %v13962_v30 = vpack.c.bf16 %v4026_v12, %v4019_v54  ;;  %v17307_v27 = vsub.f32 %v16963_v35, %v21774_v42  ;;  %v21775_v33 = vand.u32 4294901760, %v17019_v41  ;;  %v21346_v26 = vand.u32 4294901760, %v17257_v4  ;;  %13955 = vmatprep.subr.bf16.mxu1 %v17299_v16 }
 0x3d6   : > { %v21347_v35 = vand.u32 4294901760, %v17276_v19  ;;  %v17325_v62 = vsub.f32 %v17205_v63, %v3644_v57  ;;  %v17327_v42 = vsub.f32 %v3477_v37, %v3650_v52  ;;  %v21776_v50 = vand.u32 4294901760, %v17082_v58 }
 0x3d7   : > { %v17319_v12 = vsub.f32 %v17019_v41, %v21775_v33  ;;  %v4039_v41 = vsub.f32 %v17266_v23, %v21343_v55  ;;  %v4046_v33 = vsub.f32 %v17257_v4, %v21346_v26  ;;  %v21348_v63 = vand.u32 4294901760, %v17292_v24 }
 0x3d8   : > { %v3913_v28 = vsub.f32 %v17082_v58, %v21776_v50  ;;  %v4053_v37 = vsub.f32 %v17276_v19, %v21347_v35  ;;  %v17345_v57 = vsub.f32 %v17213_v34, %v3641_v17  ;;  %v4033_v52 = vand.u32 4294901760, %v4032_v14  ;;  %13957 = vmatpush3.bf16.msra.mxu1 %v17173_v44 }
 0x3d9   : > { %v4040_v50 = vand.u32 4294901760, %v4039_v41  ;;  %v21366_v22 = vand.u32 4294901760, %v17302_v15  ;;  %v4047_v55 = vand.u32 4294901760, %v4046_v33  ;;  %v4060_v26 = vsub.f32 %v17292_v24, %v21348_v63  ;;  %13959 = vmatprep.subr.bf16.mxu1 %v17287_v38 }
 0x3da   : > { %v4054_v54 = vand.u32 4294901760, %v4053_v37  ;;  %v17354_v35 = vsub.f32 %v17234_v39, %v3647_v13  ;;  %v3907_v34 = vand.u32 4294901760, %v17074_v1  ;;  %v3914_v41 = vand.u32 4294901760, %v3913_v28 }
 0x3db   : > { %v13966_v17 = vpack.c.bf16 %v4040_v50, %v4033_v52  ;;  %v4067_v14 = vsub.f32 %v17302_v15, %v21366_v22  ;;  %v21777_v33 = vand.u32 4294901760, %v17167_v48  ;;  %v21353_v63 = vand.u32 4294901760, %v17314_v2 }
 0x3dc   : > { %v13970_v16 = vpack.c.bf16 %v4054_v54, %v4047_v55  ;;  %v17365_v44 = vsub.f32 %v3478_v47, %v3653_v3  ;;  %v4061_v39 = vand.u32 4294901760, %v4060_v26  ;;  %v21354_v38 = vand.u32 4294901760, %v17345_v57  ;;  %13961 = vmatpush3.bf16.msra.mxu1 %v17219_v18 }
 0x3dd   : > { %v3927_v37 = vsub.f32 %v17167_v48, %v21777_v33  ;;  %v4068_v13 = vand.u32 4294901760, %v4067_v14  ;;  %v21778_v1 = vand.u32 4294901760, %v17297_v29  ;;  %v21356_v28 = vand.u32 4294901760, %v17307_v27  ;;  %13963 = vmatprep.subr.bf16.mxu1 %v13962_v30 }
 0x3de   : > { %v4074_v55 = vsub.f32 %v17314_v2, %v21353_v63  ;;  %v21365_v54 = vand.u32 4294901760, %v17325_v62  ;;  %v17378_v47 = vsub.f32 %v17269_v21, %v3659_v9  ;;  %v4081_v26 = vsub.f32 %v17345_v57, %v21354_v38 }
 0x3df   : > { %v3941_v52 = vsub.f32 %v17297_v29, %v21778_v1  ;;  %v13974_v3 = vpack.c.bf16 %v4068_v13, %v4061_v39  ;;  %v21362_v50 = vand.u32 4294901760, %v17354_v35  ;;  %v21779_v14 = vand.u32 4294901760, %v17260_v25 }
 0x3e0   : > { %v13964_v1 = vpack.c.bf16 %v3914_v41, %v3907_v34  ;;  %v3928_v63 = vand.u32 4294901760, %v3927_v37  ;;  %v4088_v21 = vsub.f32 %v17325_v62, %v21365_v54  ;;  %v21780_v9 = vand.u32 4294901760, %v16740_v49 }
 0x3e1   : > { %v17387_v33 = vsub.f32 %v17260_v25, %v21779_v14  ;;  %v4075_v30 = vand.u32 4294901760, %v4074_v55  ;;  %v4082_v39 = vand.u32 4294901760, %v4081_v26  ;;  %v4095_v13 = vsub.f32 %v17354_v35, %v21362_v50  ;;  %v21801_v50 = vld [vmem:[#allocation62_spill] sm:$0xff] }
 0x3e2   : > { %3672 = vmatmul.mubr.f32.vlgmr.msra.gmra.mrb[0].mxu1 %v21780_v9  ;;  %v21360_v38 = vand.u32 4294901760, %v17327_v42  ;;  %v21781_v25 = vand.u32 4294901760, %v16756_v40  ;;  %v3921_v34 = vand.u32 4294901760, %v17108_v20  ;;  %v3942_v41 = vand.u32 4294901760, %v3941_v52 }
 0x3e3   : > { %13965 = vmatpush3.bf16.msra.mxu1 %v13964_v1  ;;  %v3955_v49 = vsub.f32 %v17307_v27, %v21356_v28  ;;  %v21359_v37 = vand.u32 4294901760, %v17365_v44  ;;  %v13978_v55 = vpack.c.bf16 %v4082_v39, %v4075_v30  ;;  %v4089_v26 = vand.u32 4294901760, %v4088_v21 }
 0x3e4   : > { %3681 = vmatprep.mubr.f32.mxu1 %v21781_v25  ;;  %13967 = vmatprep.subr.bf16.mxu1 %v13966_v17  ;;  %v4096_v14 = vand.u32 4294901760, %v4095_v13  ;;  %v4102_v1 = vsub.f32 %v17327_v42, %v21360_v38  ;;  %v21782_v40 = vand.u32 4294901760, %v17050_v11  ;;  %v13968_v20 = vpack.c.bf16 %v3928_v63, %v3921_v34 }
 0x3e5   : > { %v21355_v52 = vand.u32 4294901760, %v17319_v12  ;;  %v4109_v25 = vsub.f32 %v17365_v44, %v21359_v37  ;;  %v21783_v17 = vand.u32 4294901760, %v16972_v60  ;;  %v21784_v30 = vand.u32 4294901760, %v16761_v56  ;;  %v21797_v37 = vld [vmem:[#allocation35_spill] sm:$0xff] }
 0x3e6   : > { %v17411_v9 = vsub.f32 %v17050_v11, %v21782_v40  ;;  %v3935_v39 = vand.u32 4294901760, %v17161_v51  ;;  %v17425_v13 = vpack.c.bf16 %v4096_v14, %v4089_v26  ;;  %v21358_v11 = vand.u32 4294901760, %v17387_v33  ;;  %v3499_v51 = vld [vmem:[%s21137_s9 + $0x90] sm:$0xff] }
 0x3e7   : > { %v17420_v21 = vsub.f32 %v16972_v60, %v21783_v17  ;;  %3687 = vmatmul.mubr.f32.gmra.mrb[2].mxu1 %v21784_v30  ;;  %v21785_v63 = vand.u32 4294901760, %v17087_v46  ;;  %v21786_v40 = vand.u32 4294901760, %v16782_v6  ;;  %v4103_v60 = vand.u32 4294901760, %v4102_v1 }
 0x3e8   : > { %13969 = vmatpush3.bf16.msra.mxu1 %v13968_v20  ;;  %v4110_v17 = vand.u32 4294901760, %v4109_v25  ;;  %v21357_v56 = vand.u32 4294901760, %v17378_v47  ;;  %v13972_v26 = vpack.c.bf16 %v3942_v41, %v3935_v39  ;;  %v3956_v14 = vand.u32 4294901760, %v3955_v49 }
 0x3e9   : > { %v17431_v34 = vsub.f32 %v17087_v46, %v21785_v63  ;;  %3696 = vmatprep.mubr.f32.mxu1 %v21786_v40  ;;  %13971 = vmatprep.subr.bf16.mxu1 %v13970_v16  ;;  %v4116_v46 = vsub.f32 %v17387_v33, %v21358_v11  ;;  %v3969_v6 = vsub.f32 %v17319_v12, %v21355_v52  ;;  %v21361_v1 = vand.u32 4294901760, %v17411_v9 }
 0x3ea   : > { %v17448_v25 = vpack.c.bf16 %v4110_v17, %v4103_v60  ;;  %v4123_v16 = vsub.f32 %v17378_v47, %v21357_v56  ;;  %v21787_v41 = vand.u32 4294901760, %v16773_v0  ;;  %v3949_v49 = vand.u32 4294901760, %v17228_v36 }
 0x3eb   : > { %v4117_v30 = vand.u32 4294901760, %v4116_v46  ;;  %v21788_v39 = vand.u32 4294901760, %v16956_v53  ;;  %v17461_v40 = vand.u32 4294901760, %v3499_v51  ;;  %v21790_v60 = vand.u32 4294901760, %v17239_v43 }
 0x3ec   : > { %3702 = vmatmul.mubr.f32.gmra.mrb[4].mxu1 %v21787_v41  ;;  %v21363_v52 = vand.u32 4294901760, %v17420_v21  ;;  %v21791_v28 = vand.u32 4294901760, %v17004_v59  ;;  %v21792_v36 = vand.u32 4294901760, %v16812_v10  ;;  %v4124_v46 = vand.u32 4294901760, %v4123_v16  ;;  %v3502_v41 = vld [vmem:[%s21137_s9 + $0xa8] sm:$0xff] }
 0x3ed   : > { %v17459_v63 = vsub.f32 %v16956_v53, %v21788_v39  ;;  %21789 = vst [vmem:[#allocation81_spill] sm:$0xff] %v17461_v40  ;;  %v3962_v17 = vsub.f32 %v17239_v43, %v21790_v60  ;;  %13973 = vmatpush3.bf16.msra.mxu1 %v13972_v26  ;;  %v21793_v39 = vand.u32 4294901760, %v17145_v32  ;;  %v13976_v20 = vpack.c.bf16 %v3956_v14, %v3949_v49  ;;  %v21799_v14 = vld [vmem:[#allocation59_spill] sm:$0xff] }
 0x3ee   : > { %v17470_v0 = vsub.f32 %v17004_v59, %v21791_v28  ;;  %3711 = vmatprep.mubr.f32.mxu1 %v21792_v36  ;;  %13975 = vmatprep.subr.bf16.mxu1 %v13974_v3  ;;  %v21364_v56 = vand.u32 4294901760, %v17066_v8  ;;  %v21794_v59 = vld [vmem:[#allocation67_spill] sm:$0xff]  ;;  %v21795_v28 = vld [vmem:[#allocation61_spill] sm:$0xff]  ;;  %v3970_v10 = vand.u32 4294901760, %v3969_v6  ;;  %v3983_v16 = vsub.f32 %v17411_v9, %v21361_v1 }
 0x3ef   : > { %v17480_v60 = vsub.f32 %v17145_v32, %v21793_v39  ;;  %v17485_v26 = vsub.f32 %v21795_v28, %v21794_v59  ;;  %v21367_v36 = vand.u32 4294901760, %v17431_v34  ;;  %v17491_v11 = vpack.c.bf16 %v4124_v46, %v4117_v30  ;;  %v21800_v39 = vld [vmem:[#allocation64_spill] sm:$0xff] }
 0x3f0   : > { %v21798_v32 = vand.u32 4294901760, %v21797_v37  ;;  %v21368_v38 = vand.u32 4294901760, %v21800_v39  ;;  %v3545_v28 = vsel %vm3513_vm8, %v3502_v41, 0  ;;  %v3976_v6 = vsub.f32 %v17420_v21, %v21363_v52  ;;  %v21803_v37 = vld [vmem:[#allocation40_spill] sm:$0xff] }
 0x3f1   : > { %21796 = vst [vmem:[#allocation61_spill] sm:$0xff] %v17485_v26  ;;  %v21369_v1 = vand.u32 4294901760, %v17470_v0  ;;  %v21802_v30 = vand.u32 4294901760, %v21801_v50  ;;  %13977 = vmatpush3.bf16.msra.mxu1 %v13976_v20  ;;  %v3963_v49 = vand.u32 4294901760, %v3962_v17  ;;  %v3501_v41 = vld [vmem:[%s21137_s9 + $0xa0] sm:$0xff]  ;;  %v17516_v52 = vsub.f32 %v17066_v8, %v21364_v56  ;;  %v3504_v20 = vld [vmem:[%s21137_s9 + $0xb8] sm:$0xff] }
 0x3f2   : > { %3717 = vmatmul.mubr.f32.gmra.mrb[6].mxu1 %v21798_v32  ;;  %v21804_v32 = vand.u32 4294901760, %v21803_v37  ;;  %13979 = vmatprep.subr.bf16.mxu1 %v13978_v55  ;;  %v3984_v37 = vand.u32 4294901760, %v3983_v16  ;;  %v3997_v55 = vsub.f32 %v17431_v34, %v21367_v36  ;;  %v21805_v56 = vld [vmem:[#allocation38_spill] sm:$0xff]  ;;  %v17538_v22 = vand.u32 4294901760, %v3545_v28 }
 0x3f3   : > { %v17506_v46 = vsub.f32 %v21801_v50, %v21802_v30  ;;  %v17520_v50 = vsub.f32 %v3499_v51, %v17461_v40  ;;  %v13980_v30 = vpack.c.bf16 %v3970_v10, %v3963_v49  ;;  %v21806_v54 = vand.u32 4294901760, %v21805_v56 }
 0x3f4   : > { %3726 = vmatprep.mubr.f32.mxu1 %v21804_v32  ;;  %v17536_v51 = vsub.f32 %v21800_v39, %v21368_v38  ;;  %21807 = vst [vmem:[#allocation35_spill] sm:$0xff] %v17538_v22  ;;  %v17540_v3 = vand.u32 4294901760, %v3501_v41  ;;  %v3990_v16 = vsub.f32 %v17470_v0, %v21369_v1  ;;  %v3977_v36 = vand.u32 4294901760, %v3976_v6 }
 0x3f5   : > { %13981 = vmatpush3.bf16.msra.mxu1 %v13980_v30  ;;  %v3548_v38 = vsel %vm3513_vm8, %v3504_v20, 0  ;;  %v3785_v17 = vand.u32 4294901760, %v17516_v52  ;;  %v21811_v32 = vand.u32 4294901760, %v17485_v26  ;;  %v21812_v6 = vand.u32 4294901760, %v17480_v60  ;;  %v3503_v52 = vld [vmem:[%s21137_s9 + $0xb0] sm:$0xff] }
 0x3f6   : > { %3732 = vmatmul.mubr.f32.gmra.mrb[8].mxu1 %v21806_v54  ;;  %21808 = vst [vmem:[#allocation59_spill] sm:$0xff] %v17540_v3  ;;  %v21809_v54 = vld [vmem:[#allocation45_spill] sm:$0xff]  ;;  %13983 = vmatprep.subr.bf16.mxu1 %v17425_v13  ;;  %v13984_v49 = vpack.c.bf16 %v3984_v37, %v3977_v36  ;;  %v17575_v36 = vsub.f32 %v3545_v28, %v17538_v22  ;;  %v17577_v37 = vand.u32 4294901760, %v3548_v38  ;;  %v21816_v30 = vand.u32 4294901760, %v17506_v46 }
 0x3f7   : > { %v21810_v56 = vand.u32 4294901760, %v21809_v54  ;;  %v17556_v10 = vsub.f32 %v17485_v26, %v21811_v32  ;;  %v3998_v54 = vand.u32 4294901760, %v3997_v55  ;;  %v4011_v20 = vsub.f32 %v17480_v60, %v21812_v6  ;;  %v3506_v13 = vld [vmem:[%s21137_s9 + $0xc8] sm:$0xff] }
 0x3f8   : > { %21815 = vst [vmem:[#allocation62_spill] sm:$0xff] %v17577_v37  ;;  %v4004_v26 = vsub.f32 %v17506_v46, %v21816_v30  ;;  %v21817_v32 = vld [vmem:[#allocation52_spill] sm:$0xff]  ;;  %v17589_v28 = vsub.f32 %v3501_v41, %v17540_v3  ;;  %v17594_v55 = vand.u32 4294901760, %v3503_v52  ;;  %v3551_v6 = vsel %vm3513_vm8, %v3506_v13, 0 }
 0x3f9   : > { %3741 = vmatprep.mubr.f32.mxu1 %v21810_v56  ;;  %v21813_v56 = vld [vmem:[#allocation43_spill] sm:$0xff]  ;;  %13985 = vmatpush3.bf16.msra.mxu1 %v13984_v49  ;;  %v21818_v39 = vand.u32 4294901760, %v21817_v32  ;;  %v21820_v8 = vand.u32 4294901760, %v17192_v61  ;;  %v21821_v49 = vand.u32 4294901760, %v17203_v5  ;;  %v21824_v41 = vand.u32 4294901760, %v17266_v23 }
 0x3fa   : > { %v21814_v1 = vand.u32 4294901760, %v21813_v56  ;;  %13987 = vmatprep.subr.bf16.mxu1 %v17448_v25  ;;  %21819 = vst [vmem:[#allocation40_spill] sm:$0xff] %v17594_v55  ;;  %v4012_v56 = vand.u32 4294901760, %v4011_v20  ;;  %v3508_v25 = vld [vmem:[%s21137_s9 + $0xd8] sm:$0xff]  ;;  %v21826_v13 = vand.u32 4294901760, %v17257_v4  ;;  %v21827_v18 = vand.u32 4294901760, %v17276_v19 }
 0x3fb   : > { %v17601_v30 = vpack.c.bf16 %v21821_v49, %v21820_v8  ;;  %v21829_v8 = vand.u32 4294901760, %v17292_v24  ;;  %v21830_v49 = vand.u32 4294901760, %v17302_v15  ;;  %v17628_v20 = vsub.f32 %v3548_v38, %v17577_v37  ;;  %v3505_v38 = vld [vmem:[%s21137_s9 + $0xc0] sm:$0xff] }
 0x3fc   : > { %3747 = vmatmul.mubr.f32.gmra.mrb[10].mxu1 %v21814_v1  ;;  %v3991_v1 = vand.u32 4294901760, %v3990_v16  ;;  %v17616_v53 = vpack.c.bf16 %v21827_v18, %v21826_v13  ;;  %v21838_v13 = vand.u32 4294901760, %v17325_v62 }
 0x3fd   : > { %3756 = vmatprep.mubr.f32.mxu1 %v21818_v39  ;;  %21822 = vst [vmem:[#allocation38_spill] sm:$0xff] %v17601_v30  ;;  %v21823_v39 = vand.u32 4294901760, %v17244_v45  ;;  %v17622_v30 = vpack.c.bf16 %v21830_v49, %v21829_v8  ;;  %v21841_v49 = vand.u32 4294901760, %v17459_v63  ;;  %v3554_v63 = vsel %vm3513_vm8, %v3508_v25, 0 }
 0x3fe   : > { %v13988_v32 = vpack.c.bf16 %v3998_v54, %v3991_v1  ;;  %21828 = vst [vmem:[#allocation43_spill] sm:$0xff] %v17616_v53  ;;  %v21835_v1 = vand.u32 4294901760, %v17314_v2  ;;  %v21839_v53 = vand.u32 4294901760, %v17354_v35  ;;  %v17677_v25 = vand.u32 4294901760, %v3505_v38 }
 0x3ff   : > { %v17607_v16 = vpack.c.bf16 %v21824_v41, %v21823_v39  ;;  %21831 = vst [vmem:[#allocation52_spill] sm:$0xff] %v17622_v30  ;;  %v21832_v39 = vld [vmem:[#allocation50_spill] sm:$0xff] }
 0x400   : > { %v21833_v41 = vand.u32 4294901760, %v21832_v39  ;;  %21834 = vst [vmem:[#allocation50_spill] sm:$0xff] %v17628_v20  ;;  %v17640_v8 = vpack.c.bf16 %v21839_v53, %v21838_v13  ;;  %13989 = vmatpush3.bf16.msra.mxu1 %v13988_v32  ;;  %v4005_v39 = vand.u32 4294901760, %v4004_v26  ;;  %v21846_v53 = vand.u32 4294901760, %v17387_v33  ;;  %21852 = vst [vmem:[#allocation88_spill] sm:$0xff] %v17677_v25 }
 0x401   : > { %21825 = vst [vmem:[#allocation45_spill] sm:$0xff] %v17607_v16  ;;  %v21836_v16 = vand.u32 4294901760, %v17345_v57  ;;  %v21847_v32 = vand.u32 4294901760, %v17378_v47  ;;  %13991 = vmatprep.subr.bf16.mxu1 %v17491_v11 }
 0x402   : > { %3762 = vmatmul.mubr.f32.gmra.mrb[12].mxu1 %v21833_v41  ;;  %21840 = vst [vmem:[#allocation83_spill] sm:$0xff] %v17640_v8  ;;  %v17644_v41 = vand.u32 4294901760, %v3551_v6  ;;  %v13992_v26 = vpack.c.bf16 %v4012_v56, %v4005_v39  ;;  %v17665_v8 = vsub.f32 %v3503_v52, %v17594_v55  ;;  %v3800_v52 = vand.u32 4294901760, %v17556_v10 }
 0x403   : > { %v17634_v18 = vpack.c.bf16 %v21836_v16, %v21835_v1  ;;  %3771 = vmatprep.mubr.f32.mxu1 %v21841_v49  ;;  %v21843_v16 = vand.u32 4294901760, %v17327_v42  ;;  %v21844_v1 = vand.u32 4294901760, %v17365_v44  ;;  %v17659_v13 = vpack.c.bf16 %v21847_v32, %v21846_v53 }
 0x404   : > { %21842 = vst [vmem:[#allocation84_spill] sm:$0xff] %v17644_v41  ;;  %21849 = vst [vmem:[#allocation87_spill] sm:$0xff] %v17665_v8  ;;  %v3791_v53 = vand.u32 4294901760, %v17536_v51  ;;  %v21851_v32 = vand.u32 4294901760, %v17520_v50  ;;  %13993 = vmatpush3.bf16.msra.mxu1 %v13992_v26  ;;  %v21853_v39 = vand.u32 4294901760, %v17575_v36  ;;  %v17686_v51 = vand.u32 4294901760, %v3554_v63 }
 0x405   : > { %21837 = vst [vmem:[#allocation82_spill] sm:$0xff] %v17634_v18  ;;  %v17653_v54 = vpack.c.bf16 %v21844_v1, %v21843_v16  ;;  %21848 = vst [vmem:[#allocation86_spill] sm:$0xff] %v17659_v13  ;;  %v3510_v16 = vld [vmem:[%s21137_s9 + $0xe8] sm:$0xff]  ;;  %v21850_v1 = vand.u32 4294901760, %v21799_v14  ;;  %v17684_v14 = vsub.f32 %v3551_v6, %v17644_v41  ;;  %v21857_v10 = vand.u32 4294901760, %v17589_v28  ;;  %v3512_v6 = vld [vmem:[%s21137_s9 + $0xf8] sm:$0xff] }
 0x406   : > { %v3805_v11 = vsub.f32 %v17520_v50, %v21851_v32  ;;  %v3814_v49 = vsub.f32 %v17575_v36, %v21853_v39  ;;  %21855 = vst [vmem:[#allocation90_spill] sm:$0xff] %v17686_v51  ;;  %v21856_v32 = vpack.c.bf16 %v17203_v5, %v17192_v61  ;;  %v21858_v13 = vand.u32 4294901760, %v17628_v20 }
 0x407   : > { %21845 = vst [vmem:[#allocation85_spill] sm:$0xff] %v17653_v54  ;;  %3777 = vmatmul.mubr.f32.gmra.mrb[14].mxu1 %v21850_v1  ;;  %21854 = vst [vmem:[#allocation89_spill] sm:$0xff] %v17684_v14  ;;  %v3507_v1 = vld [vmem:[%s21137_s9 + $0xd0] sm:$0xff]  ;;  %v3820_v26 = vsub.f32 %v17589_v28, %v21857_v10  ;;  %v17706_v61 = vsub.f32 %v3505_v38, %v17677_v25  ;;  %v17712_v10 = vsub.f32 %v3554_v63, %v17686_v51 }
 0x408   : > { %3786 = vmatprep.mubr.f32.mxu1 %v3785_v17  ;;  %13995 = vmatprep.subr.bf16.mxu1 %v21856_v32  ;;  %v3557_v17 = vsel %vm3513_vm8, %v3510_v16, 0  ;;  %v3806_v56 = vand.u32 4294901760, %v3805_v11  ;;  %v3829_v54 = vsub.f32 %v17628_v20, %v21858_v13  ;;  %v17708_v5 = vand.u32 4294901760, %v3507_v1 }
 0x409   : > { %21859 = vst [vmem:[#allocation91_spill] sm:$0xff] %v17706_v61  ;;  %v3815_v16 = vand.u32 4294901760, %v3814_v49  ;;  %v17714_v39 = vand.u32 4294901760, %v3557_v17  ;;  %v3560_v13 = vsel %vm3513_vm8, %v3512_v6, 0  ;;  %v3821_v11 = vand.u32 4294901760, %v3820_v26 }
 0x40a   : > { %21860 = vst [vmem:[#allocation92_spill] sm:$0xff] %v17708_v5  ;;  %v21862_v38 = vand.u32 4294901760, %v17665_v8  ;;  %v3830_v49 = vand.u32 4294901760, %v3829_v54  ;;  %v17725_v63 = vsub.f32 %v3507_v1, %v17708_v5  ;;  %v21865_v30 = vand.u32 4294901760, %v17684_v14  ;;  %v3511_v54 = vld [vmem:[%s21137_s9 + $0xf0] sm:$0xff] }
 0x40b   : > { %3792 = vmatmul.mubr.f32.gmra.mrb[16].mxu1 %v3791_v53  ;;  %21861 = vst [vmem:[#allocation93_spill] sm:$0xff] %v17714_v39  ;;  %v3509_v53 = vld [vmem:[%s21137_s9 + $0xe0] sm:$0xff]  ;;  %v17734_v6 = vsub.f32 %v3557_v17, %v17714_v39  ;;  %v17748_v26 = vand.u32 4294901760, %v3511_v54 }
 0x40c   : > { %3801 = vmatprep.mubr.f32.mxu1 %v3800_v52  ;;  %v3835_v18 = vsub.f32 %v17665_v8, %v21862_v38  ;;  %v21385_v52 = vand.u32 4294901760, %v17706_v61  ;;  %21863 = vst [vmem:[#allocation94_spill] sm:$0xff] %v17725_v63  ;;  %v17727_v32 = vand.u32 4294901760, %v3509_v53  ;;  %v3844_v20 = vsub.f32 %v17684_v14, %v21865_v30 }
 0x40d   : > { %v17736_v38 = vand.u32 4294901760, %v3560_v13  ;;  %21867 = vst [vmem:[#allocation97_spill] sm:$0xff] %v17748_v26  ;;  %v21868_v14 = vand.u32 4294901760, %v17712_v10 }
 0x40e   : > { %21864 = vst [vmem:[#allocation95_spill] sm:$0xff] %v17727_v32  ;;  %v3850_v1 = vsub.f32 %v17706_v61, %v21385_v52  ;;  %v17746_v30 = vsub.f32 %v3509_v53, %v17727_v32  ;;  %v3845_v17 = vand.u32 4294901760, %v3844_v20 }
 0x40f   : > { %3807 = vmatmul.mubr.f32.gmra.mrb[18].mxu1 %v3806_v56  ;;  %21866 = vst [vmem:[#allocation96_spill] sm:$0xff] %v17736_v38  ;;  %v3836_v56 = vand.u32 4294901760, %v3835_v18  ;;  %v3859_v8 = vsub.f32 %v17712_v10, %v21868_v14  ;;  %v21392_v18 = vand.u32 4294901760, %v17734_v6 }
 0x410   : > { %3816 = vmatprep.mubr.f32.mxu1 %v3815_v16  ;;  %v21388_v16 = vand.u32 4294901760, %v17725_v63  ;;  %v3851_v52 = vand.u32 4294901760, %v3850_v1  ;;  %v21391_v61 = vand.u32 4294901760, %v17746_v30 }
 0x411   : > { %v3860_v20 = vand.u32 4294901760, %v3859_v8  ;;  %v3874_v14 = vsub.f32 %v17734_v6, %v21392_v18  ;;  %v21871_v18 = vld [vmem:[#allocation16_spill] sm:$0xff] }
 0x412   : > { %v3865_v53 = vsub.f32 %v17725_v63, %v21388_v16  ;;  %v3880_v1 = vsub.f32 %v17746_v30, %v21391_v61  ;;  %v21869_v61 = vld [vmem:[#allocation14_spill] sm:$0xff] }
 0x413   : > { %3822 = vmatmul.mubr.f32.gmra.mrb[20].mxu1 %v3821_v11  ;;  %v17755_v11 = vsub.f32 %v3560_v13, %v17736_v38  ;;  %v3875_v63 = vand.u32 4294901760, %v3874_v14 }
 0x414   : > { %3831 = vmatprep.mubr.f32.mxu1 %v3830_v49  ;;  %v17762_v49 = vsub.f32 %v3511_v54, %v17748_v26  ;;  %v3881_v54 = vand.u32 4294901760, %v3880_v1  ;;  %v21873_v1 = vpack.c.bf16 %v17266_v23, %v17244_v45  ;;  %v21880_v45 = vld [vmem:[#allocation24_spill] sm:$0xff]  ;;  %v21881_v23 = vpack.c.bf16 %v17302_v15, %v17292_v24 }
 0x415   : > { %v21394_v13 = vand.u32 4294901760, %v17755_v11  ;;  %v21887_v15 = vld [vmem:[#allocation36_spill] sm:$0xff]  ;;  %v21888_v24 = vpack.c.bf16 %v17354_v35, %v17325_v62  ;;  %v21893_v35 = vld [vmem:[#allocation49_spill] sm:$0xff]  ;;  %v21894_v62 = vpack.c.bf16 %v17378_v47, %v17387_v33  ;;  %v21899_v47 = vld [vmem:[#allocation15_spill] sm:$0xff] }
 0x416   : > { %v21393_v16 = vand.u32 4294901760, %v17762_v49  ;;  %v21900_v33 = vld [vmem:[#allocation21_spill] sm:$0xff] }
 0x417   : > { %3837 = vmatmul.mubr.f32.gmra.mrb[22].mxu1 %v3836_v56  ;;  %v3866_v56 = vand.u32 4294901760, %v3865_v53  ;;  %v3889_v8 = vsub.f32 %v17755_v11, %v21394_v13  ;;  %v21883_v13 = vld [vmem:[#allocation25_spill] sm:$0xff] }
 0x418   : > { %3846 = vmatprep.mubr.f32.mxu1 %v3845_v17  ;;  %v3895_v17 = vsub.f32 %v17762_v49, %v21393_v16  ;;  %v21879_v16 = vld [vmem:[#allocation19_spill] sm:$0xff] }
 0x41a   : > { %v3896_v53 = vand.u32 4294901760, %v3895_v17  ;;  %v21876_v17 = vld [vmem:[#allocation23_spill] sm:$0xff] }
 0x41b   : > { %3852 = vmatmul.mubr.f32.gmra.mrb[24].mxu1 %v3851_v52  ;;  %v3890_v52 = vand.u32 4294901760, %v3889_v8 }
 0x41c   : > { %3861 = vmatprep.mubr.f32.mxu1 %v3860_v20  ;;  %v21870_v20 = vld [vmem:[#allocation57_spill] sm:$0xff] }
 0x41d   : > { %v13996_v14 = vpack.c.bf16 %v17082_v58, %v21870_v20 }
 0x41f   : > { %3867 = vmatmul.mubr.f32.gmra.mrb[26].mxu1 %v3866_v56  ;;  %v21872_v56 = vld [vmem:[#allocation17_spill] sm:$0xff] }
 0x420   : > { %3876 = vmatprep.mubr.f32.mxu1 %v3875_v63  ;;  %v21874_v63 = vld [vmem:[#allocation63_spill] sm:$0xff] }
 0x421   : > { %v14000_v8 = vpack.c.bf16 %v17167_v48, %v21874_v63 }
 0x423   : > { %3882 = vmatmul.mubr.f32.gmra.mrb[28].mxu1 %v3881_v54  ;;  %v21875_v54 = vld [vmem:[#allocation18_spill] sm:$0xff] }
 0x424   : > { %3891 = vmatprep.mubr.f32.mxu1 %v3890_v52  ;;  %v21877_v52 = vpack.c.bf16 %v17276_v19, %v17257_v4  ;;  %v21884_v4 = vld [vmem:[#allocation30_spill] sm:$0xff]  ;;  %v21885_v19 = vpack.c.bf16 %v17345_v57, %v17314_v2  ;;  %v21891_v57 = vpack.c.bf16 %v17365_v44, %v17327_v42  ;;  %v21896_v44 = vld [vmem:[#allocation60_spill] sm:$0xff]  ;;  %v21897_v42 = vld [vmem:[#allocation71_spill] sm:$0xff] }
 0x425   : > { %v21890_v2 = vld [vmem:[#allocation42_spill] sm:$0xff] }
 0x427   : > { %3897 = vmatmul.mubr.f32.gmra.mrb[30].mxu1 %v3896_v53  ;;  %v21878_v53 = vld [vmem:[#allocation68_spill] sm:$0xff] }
 0x428   : > { %4127 = vmatprep.mubr.f32.mxu1 %v21869_v61 }
 0x42b   : > { %4129 = vmatmul.mubr.f32.vlgmr.msra.gmra.mrb[32].mxu1 %v21871_v18 }
 0x42c   : > { %13997 = vmatpush3.bf16.msra.mxu1 %v13996_v14  ;;  %4134 = vmatprep.mubr.f32.mxu1 %v21872_v56  ;;  %v14004_v14 = vpack.c.bf16 %v17297_v29, %v21878_v53 }
 0x42d   : > { %13999 = vmatprep.subr.bf16.mxu1 %v21873_v1  ;;  %v21882_v1 = vld [vmem:[#allocation70_spill] sm:$0xff] }
 0x42f   : > { %4136 = vmatmul.mubr.f32.gmra.mrb[34].mxu1 %v21875_v54 }
 0x430   : > { %14001 = vmatpush3.bf16.msra.mxu1 %v14000_v8  ;;  %4141 = vmatprep.mubr.f32.mxu1 %v21876_v17  ;;  %v14008_v8 = vpack.c.bf16 %v17307_v27, %v21882_v1  ;;  %v21943_v17 = vand.u32 4294901760, %v21874_v63 }
 0x431   : > { %14003 = vmatprep.subr.bf16.mxu1 %v21877_v52  ;;  %v14012_v52 = vpack.c.bf16 %v17319_v12, %v17239_v43 }
 0x433   : > { %4143 = vmatmul.mubr.f32.gmra.mrb[36].mxu1 %v21879_v16 }
 0x434   : > { %14005 = vmatpush3.bf16.msra.mxu1 %v14004_v14  ;;  %4148 = vmatprep.mubr.f32.mxu1 %v21880_v45  ;;  %v21886_v14 = vld [vmem:[#allocation28_spill] sm:$0xff] }
 0x435   : > { %14007 = vmatprep.subr.bf16.mxu1 %v21881_v23  ;;  %v14016_v23 = vpack.c.bf16 %v17411_v9, %v17420_v21 }
 0x437   : > { %4150 = vmatmul.mubr.f32.gmra.mrb[38].mxu1 %v21883_v13  ;;  %v21938_v13 = vand.u32 4294901760, %v21870_v20 }
 0x438   : > { %14009 = vmatpush3.bf16.msra.mxu1 %v14008_v8  ;;  %4155 = vmatprep.mubr.f32.mxu1 %v21884_v4  ;;  %v21889_v8 = vld [vmem:[#allocation34_spill] sm:$0xff]  ;;  %v21931_v4 = vld [vmem:[#allocation61_spill] sm:$0xff] }
 0x439   : > { %14011 = vmatprep.subr.bf16.mxu1 %v21885_v19  ;;  %v14020_v19 = vpack.c.bf16 %v17431_v34, %v17470_v0 }
 0x43b   : > { %4157 = vmatmul.mubr.f32.gmra.mrb[40].mxu1 %v21886_v14  ;;  %v21927_v14 = vld [vmem:[#allocation75_spill] sm:$0xff] }
 0x43c   : > { %14013 = vmatpush3.bf16.msra.mxu1 %v14012_v52  ;;  %4162 = vmatprep.mubr.f32.mxu1 %v21887_v15  ;;  %v21892_v52 = vld [vmem:[#allocation41_spill] sm:$0xff]  ;;  %v21925_v15 = vld [vmem:[#allocation79_spill] sm:$0xff] }
 0x43d   : > { %14015 = vmatprep.subr.bf16.mxu1 %v21888_v24  ;;  %v14024_v24 = vpack.c.bf16 %v17480_v60, %v17506_v46 }
 0x43f   : > { %4164 = vmatmul.mubr.f32.gmra.mrb[42].mxu1 %v21889_v8  ;;  %v21924_v8 = vld [vmem:[#allocation54_spill] sm:$0xff] }
 0x440   : > { %14017 = vmatpush3.bf16.msra.mxu1 %v14016_v23  ;;  %4169 = vmatprep.mubr.f32.mxu1 %v21890_v2  ;;  %v21895_v23 = vld [vmem:[#allocation48_spill] sm:$0xff] }
 0x441   : > { %14019 = vmatprep.subr.bf16.mxu1 %v21891_v57  ;;  %v21898_v57 = vld [vmem:[#allocation56_spill] sm:$0xff] }
 0x442   : > { %v21923_v2 = vld [vmem:[#allocation72_spill] sm:$0xff] }
 0x443   : > { %4171 = vmatmul.mubr.f32.gmra.mrb[44].mxu1 %v21892_v52  ;;  %v21922_v52 = vld [vmem:[#allocation44_spill] sm:$0xff] }
 0x444   : > { %14021 = vmatpush3.bf16.msra.mxu1 %v14020_v19  ;;  %4176 = vmatprep.mubr.f32.mxu1 %v21893_v35  ;;  %v21901_v19 = vld [vmem:[#allocation47_spill] sm:$0xff]  ;;  %v21921_v35 = vld [vmem:[#allocation80_spill] sm:$0xff] }
 0x445   : > { %14023 = vmatprep.subr.bf16.mxu1 %v21894_v62  ;;  %v21902_v62 = vld [vmem:[#allocation27_spill] sm:$0xff] }
 0x446   : > { %v21941_v16 = vand.u32 4294901760, %v21902_v62 }
 0x447   : > { %4178 = vmatmul.mubr.f32.gmra.mrb[46].mxu1 %v21895_v23  ;;  %v21920_v23 = vld [vmem:[#allocation46_spill] sm:$0xff] }
 0x448   : > { %14025 = vmatpush3.bf16.msra.mxu1 %v14024_v24  ;;  %4183 = vmatprep.mubr.f32.mxu1 %v21896_v44  ;;  %v21903_v24 = vld [vmem:[#allocation73_spill] sm:$0xff] }
 0x449   : > { %14027 = vmatprep.subr.bf16.mxu1 %v21897_v42  ;;  %v21919_v44 = vld [vmem:[#allocation37_spill] sm:$0xff] }
 0x44b   : > { %4185 = vmatmul.mubr.f32.gmra.mrb[48].mxu1 %v21898_v57  ;;  %v21918_v57 = vld [vmem:[#allocation78_spill] sm:$0xff] }
 0x44c   : > { %4190 = vmatprep.mubr.f32.mxu1 %v21794_v59  ;;  %v21917_v59 = vld [vmem:[#allocation39_spill] sm:$0xff] }
 0x44f   : > { %4192 = vmatmul.mubr.f32.gmra.mrb[50].mxu1 %v17461_v40  ;;  %v21916_v40 = vld [vmem:[#allocation65_spill] sm:$0xff] }
 0x450   : > { %4197 = vmatprep.mubr.f32.mxu1 %v17538_v22  ;;  %v21915_v22 = vld [vmem:[#allocation32_spill] sm:$0xff] }
 0x453   : > { %4199 = vmatmul.mubr.f32.gmra.mrb[52].mxu1 %v17540_v3  ;;  %v21914_v3 = vld [vmem:[#allocation77_spill] sm:$0xff] }
 0x454   : > { %4204 = vmatprep.mubr.f32.mxu1 %v17577_v37  ;;  %v21913_v37 = vld [vmem:[#allocation33_spill] sm:$0xff] }
 0x457   : > { %4206 = vmatmul.mubr.f32.gmra.mrb[54].mxu1 %v17594_v55  ;;  %v21912_v55 = vld [vmem:[#allocation58_spill] sm:$0xff] }
 0x458   : > { %4211 = vmatprep.mubr.f32.mxu1 %v17644_v41  ;;  %v21911_v41 = vld [vmem:[#allocation26_spill] sm:$0xff] }
 0x459   : > { %v21955_v63 = vand.u32 4294901760, %v21911_v41 }
 0x45b   : > { %4213 = vmatmul.mubr.f32.gmra.mrb[56].mxu1 %v17677_v25  ;;  %v21910_v25 = vld [vmem:[#allocation31_spill] sm:$0xff] }
 0x45c   : > { %4218 = vmatprep.mubr.f32.mxu1 %v17686_v51  ;;  %v21904_v51 = vld [vmem:[#allocation29_spill] sm:$0xff] }
 0x45f   : > { %4220 = vmatmul.mubr.f32.gmra.mrb[58].mxu1 %v17708_v5  ;;  %v21905_v5 = vld [vmem:[#allocation51_spill] sm:$0xff] }
 0x460   : > { %4225 = vmatprep.mubr.f32.mxu1 %v17714_v39  ;;  %v21906_v39 = vld [vmem:[#allocation22_spill] sm:$0xff] }
 0x463   : > { %4227 = vmatmul.mubr.f32.gmra.mrb[60].mxu1 %v17727_v32  ;;  %v21907_v32 = vld [vmem:[#allocation74_spill] sm:$0xff] }
 0x464   : > { %4232 = vmatprep.mubr.f32.mxu1 %v17736_v38  ;;  %v21908_v38 = vld [vmem:[#allocation20_spill] sm:$0xff] }
 0x467   : > { %4234 = vmatmul.mubr.f32.gmra.mrb[62].mxu1 %v17748_v26  ;;  %v21909_v26 = vld [vmem:[#allocation55_spill] sm:$0xff] }
 0x468   : > { %4369 = vmatprep.mubr.f32.mxu1 %v21899_v47 }
 0x46b   : > { %4372 = vmatmul.mubr.f32.vlgmr.msra.gmra.mrb[64].mxu1 %v21900_v33 }
 0x46c   : > { %14029 = vmatpush3.bf16.msra.mxu1 %v21901_v19  ;;  %4378 = vmatprep.mubr.f32.mxu1 %v21902_v62 }
 0x46d   : > { %14031 = vmatprep.subr.bf16.mxu1 %v21903_v24 }
 0x46f   : > { %4381 = vmatmul.mubr.f32.gmra.mrb[66].mxu1 %v21904_v51 }
 0x470   : > { %14033 = vmatpush3.bf16.msra.mxu1 %v21905_v5  ;;  %4387 = vmatprep.mubr.f32.mxu1 %v21906_v39  ;;  %v21944_v5 = vand.u32 4294901760, %v17167_v48  ;;  %v21951_v48 = vand.u32 4294901760, %v21910_v25 }
 0x471   : > { %14035 = vmatprep.subr.bf16.mxu1 %v21907_v32  ;;  %v21942_v32 = vld [vmem:[#allocation45_spill] sm:$0xff] }
 0x473   : > { %4390 = vmatmul.mubr.f32.gmra.mrb[68].mxu1 %v21908_v38 }
 0x474   : > { %14037 = vmatpush3.bf16.msra.mxu1 %v21909_v26  ;;  %4396 = vmatprep.mubr.f32.mxu1 %v21910_v25  ;;  %v21940_v26 = vand.u32 4294901760, %v21900_v33  ;;  %v21959_v25 = vand.u32 4294901760, %v17319_v12  ;;  %v21964_v33 = vand.u32 4294901760, %v17411_v9 }
 0x475   : > { %14039 = vmatprep.subr.bf16.mxu1 %v17231_v31  ;;  %v21939_v31 = vand.u32 4294901760, %v17082_v58  ;;  %v21946_v58 = vand.u32 4294901760, %v21906_v39  ;;  %v21954_v39 = vand.u32 4294901760, %v17307_v27  ;;  %v21961_v27 = vand.u32 4294901760, %v21917_v59 }
 0x477   : > { %4399 = vmatmul.mubr.f32.gmra.mrb[70].mxu1 %v21911_v41  ;;  %v14060_v45 = vpack.c.bf16 %v21939_v31, %v21938_v13  ;;  %v21947_v31 = vld [vmem:[#allocation43_spill] sm:$0xff] }
 0x478   : > { %14041 = vmatpush3.bf16.msra.mxu1 %v21912_v55  ;;  %4405 = vmatprep.mubr.f32.mxu1 %v21913_v37  ;;  %v21937_v55 = vand.u32 4294901760, %v21899_v47  ;;  %v14064_v47 = vpack.c.bf16 %v21944_v5, %v21943_v17  ;;  %v21953_v5 = vand.u32 4294901760, %v21882_v1  ;;  %v21958_v17 = vand.u32 4294901760, %v17239_v43  ;;  %v21962_v41 = vld [vmem:[#allocation83_spill] sm:$0xff] }
 0x479   : > { %14043 = vmatprep.subr.bf16.mxu1 %v21914_v3  ;;  %v21929_v3 = vld [vmem:[#allocation38_spill] sm:$0xff]  ;;  %v21965_v43 = vand.u32 4294901760, %v21919_v44 }
 0x47a   : > { %v14072_v20 = vpack.c.bf16 %v21954_v39, %v21953_v5 }
 0x47b   : > { %4408 = vmatmul.mubr.f32.gmra.mrb[72].mxu1 %v21915_v22 }
 0x47c   : > { %14045 = vmatpush3.bf16.msra.mxu1 %v21916_v40  ;;  %4414 = vmatprep.mubr.f32.mxu1 %v21917_v59  ;;  %v21926_v40 = vld [vmem:[#allocation53_spill] sm:$0xff] }
 0x47d   : > { %14047 = vmatprep.subr.bf16.mxu1 %v21918_v57  ;;  %v21928_v57 = vld [vmem:[#allocation66_spill] sm:$0xff]  ;;  %v21967_v59 = vld [vmem:[#allocation85_spill] sm:$0xff] }
 0x47e   : > { %v21976_v5 = vand.u32 4294901760, %v21928_v57 }
 0x47f   : > { %4417 = vmatmul.mubr.f32.gmra.mrb[74].mxu1 %v21919_v44 }
 0x480   : > { %14049 = vmatpush3.bf16.msra.mxu1 %v17116_v7  ;;  %4423 = vmatprep.mubr.f32.mxu1 %v21920_v23  ;;  %v21930_v7 = vld [vmem:[#allocation64_spill] sm:$0xff] }
 0x481   : > { %14051 = vmatprep.subr.bf16.mxu1 %v21921_v35  ;;  %v21934_v35 = vld [vmem:[#allocation89_spill] sm:$0xff] }
 0x483   : > { %4426 = vmatmul.mubr.f32.gmra.mrb[76].mxu1 %v21922_v52 }
 0x484   : > { %14053 = vmatpush3.bf16.msra.mxu1 %v21923_v2  ;;  %4432 = vmatprep.mubr.f32.mxu1 %v21924_v8  ;;  %v21932_v2 = vld [vmem:[#allocation50_spill] sm:$0xff] }
 0x485   : > { %14055 = vmatprep.subr.bf16.mxu1 %v21925_v15  ;;  %v21933_v15 = vld [vmem:[#allocation87_spill] sm:$0xff] }
 0x487   : > { %4435 = vmatmul.mubr.f32.gmra.mrb[78].mxu1 %v21926_v40 }
 0x488   : > { %14057 = vmatpush3.bf16.msra.mxu1 %v21927_v14  ;;  %4441 = vmatprep.mubr.f32.mxu1 %v21928_v57  ;;  %v21935_v14 = vld [vmem:[#allocation91_spill] sm:$0xff]  ;;  %v21980_v57 = vand.u32 4294901760, %v17575_v36 }
 0x489   : > { %14059 = vmatprep.subr.bf16.mxu1 %v21929_v3  ;;  %v21936_v3 = vld [vmem:[#allocation94_spill] sm:$0xff] }
 0x48b   : > { %4444 = vmatmul.mubr.f32.gmra.mrb[80].mxu1 %v21930_v7 }
 0x48c   : > { %4450 = vmatprep.mubr.f32.mxu1 %v21931_v4 }
 0x48f   : > { %4453 = vmatmul.mubr.f32.gmra.mrb[82].mxu1 %v17520_v50 }
 0x490   : > { %4459 = vmatprep.mubr.f32.mxu1 %v17575_v36  ;;  %v21984_v36 = vand.u32 4294901760, %v21934_v35 }
 0x493   : > { %4462 = vmatmul.mubr.f32.gmra.mrb[84].mxu1 %v17589_v28 }
 0x494   : > { %4468 = vmatprep.mubr.f32.mxu1 %v21932_v2 }
 0x497   : > { %4471 = vmatmul.mubr.f32.gmra.mrb[86].mxu1 %v21933_v15 }
 0x498   : > { %4477 = vmatprep.mubr.f32.mxu1 %v21934_v35  ;;  %v21988_v35 = vand.u32 4294901760, %v17734_v6 }
 0x49b   : > { %4480 = vmatmul.mubr.f32.gmra.mrb[88].mxu1 %v21935_v14 }
 0x49c   : > { %4486 = vmatprep.mubr.f32.mxu1 %v17712_v10 }
 0x49f   : > { %4489 = vmatmul.mubr.f32.gmra.mrb[90].mxu1 %v21936_v3 }
 0x4a0   : > { %4495 = vmatprep.mubr.f32.mxu1 %v17734_v6 }
 0x4a3   : > { %4498 = vmatmul.mubr.f32.gmra.mrb[92].mxu1 %v17746_v30 }
 0x4a4   : > { %4504 = vmatprep.mubr.f32.mxu1 %v17755_v11 }
 0x4a7   : > { %4507 = vmatmul.mubr.f32.gmra.mrb[94].mxu1 %v17762_v49 }
 0x4a8   : > { %4611 = vmatprep.mubr.f32.mxu1 %v21937_v55  ;;  %v21945_v55 = vand.u32 4294901760, %v21904_v51  ;;  %v21952_v51 = vld [vmem:[#allocation52_spill] sm:$0xff] }
 0x4ab   : > { %4615 = vmatmul.mubr.f32.vlgmr.msra.gmra.mrb[96].mxu1 %v21940_v26  ;;  %v21948_v26 = vand.u32 4294901760, %v21878_v53  ;;  %v14076_v53 = vpack.c.bf16 %v21959_v25, %v21958_v17 }
 0x4ac   : > { %14061 = vmatpush3.bf16.msra.mxu1 %v14060_v45  ;;  %4622 = vmatprep.mubr.f32.mxu1 %v21941_v16  ;;  %v21949_v16 = vand.u32 4294901760, %v17297_v29  ;;  %v21956_v29 = vand.u32 4294901760, %v21913_v37  ;;  %v21960_v45 = vand.u32 4294901760, %v21915_v22  ;;  %v21963_v37 = vand.u32 4294901760, %v17420_v21 }
 0x4ad   : > { %14063 = vmatprep.subr.bf16.mxu1 %v21942_v32  ;;  %v21950_v32 = vand.u32 4294901760, %v21908_v38  ;;  %v21957_v38 = vld [vmem:[#allocation82_spill] sm:$0xff]  ;;  %v21966_v22 = vand.u32 4294901760, %v21920_v23  ;;  %v21969_v21 = vand.u32 4294901760, %v17431_v34 }
 0x4ae   : > { %v14068_v13 = vpack.c.bf16 %v21949_v16, %v21948_v26  ;;  %v14080_v62 = vpack.c.bf16 %v21964_v33, %v21963_v37  ;;  %v21970_v26 = vand.u32 4294901760, %v21922_v52  ;;  %v21971_v16 = vand.u32 4294901760, %v21924_v8  ;;  %v21972_v23 = vld [vmem:[#allocation86_spill] sm:$0xff] }
 0x4af   : > { %4626 = vmatmul.mubr.f32.gmra.mrb[98].mxu1 %v21945_v55 }
 0x4b0   : > { %14065 = vmatpush3.bf16.msra.mxu1 %v14064_v47  ;;  %4633 = vmatprep.mubr.f32.mxu1 %v21946_v58  ;;  %v21968_v58 = vand.u32 4294901760, %v17470_v0  ;;  %v21974_v0 = vand.u32 4294901760, %v17480_v60  ;;  %v21978_v60 = vand.u32 4294901760, %v21931_v4  ;;  %v21982_v4 = vand.u32 4294901760, %v21932_v2 }
 0x4b1   : > { %14067 = vmatprep.subr.bf16.mxu1 %v21947_v31  ;;  %v21986_v2 = vand.u32 4294901760, %v17712_v10  ;;  %v21990_v10 = vand.u32 4294901760, %v17755_v11 }
 0x4b2   : > { %v14084_v31 = vpack.c.bf16 %v21969_v21, %v21968_v58 }
 0x4b3   : > { %4637 = vmatmul.mubr.f32.gmra.mrb[100].mxu1 %v21950_v32  ;;  %v21973_v32 = vand.u32 4294901760, %v17506_v46 }
 0x4b4   : > { %14069 = vmatpush3.bf16.msra.mxu1 %v14068_v13  ;;  %4644 = vmatprep.mubr.f32.mxu1 %v21951_v48 }
 0x4b5   : > { %14071 = vmatprep.subr.bf16.mxu1 %v21952_v51  ;;  %v11940_v1 = vpop.f32.mrb[0].mxu1  ;;  %v14088_v48 = vpack.c.bf16 %v21974_v0, %v21973_v32  ;;  %v21975_v51 = vand.u32 4294901760, %v21926_v40  ;;  %v21995_v0 = vld [vmem:[#allocation19_spill] sm:$0xff] }
 0x4b6   : > { %v11941_v47 = vpop.f32.mrb[1].mxu1 }
 0x4b7   : > { %4648 = vmatmul.mubr.f32.gmra.mrb[102].mxu1 %v21955_v63  ;;  %v17949_v12 = vadd.f32 %v11941_v47, %v11940_v1 }
 0x4b8   : > { %14073 = vmatpush3.bf16.msra.mxu1 %v14072_v20  ;;  %4655 = vmatprep.mubr.f32.mxu1 %v21956_v29  ;;  %v21977_v20 = vand.u32 4294901760, %v21930_v7  ;;  %v21979_v29 = vand.u32 4294901760, %v17520_v50  ;;  %v21981_v7 = vand.u32 4294901760, %v17589_v28  ;;  %v21983_v50 = vand.u32 4294901760, %v21933_v15 }
 0x4b9   : > { %14075 = vmatprep.subr.bf16.mxu1 %v21957_v38  ;;  %v21985_v28 = vand.u32 4294901760, %v21935_v14  ;;  %v21987_v15 = vand.u32 4294901760, %v21936_v3  ;;  %v21989_v14 = vand.u32 4294901760, %v17746_v30  ;;  %v21991_v3 = vand.u32 4294901760, %v17762_v49 }
 0x4ba   : > { %v11943_v55 = vpop.f32.mrb[2].mxu1 }
 0x4bb   : > { %4659 = vmatmul.mubr.f32.gmra.mrb[104].mxu1 %v21960_v45  ;;  %v11944_v9 = vpop.f32.mrb[3].mxu1 }
 0x4bc   : > { %14077 = vmatpush3.bf16.msra.mxu1 %v14076_v53  ;;  %4666 = vmatprep.mubr.f32.mxu1 %v21961_v27  ;;  %v17960_v44 = vadd.f32 %v11944_v9, %v11943_v55 }
 0x4bd   : > { %14079 = vmatprep.subr.bf16.mxu1 %v21962_v41 }
 0x4bf   : > { %4670 = vmatmul.mubr.f32.gmra.mrb[106].mxu1 %v21965_v43  ;;  %v11946_v13 = vpop.f32.mrb[4].mxu1 }
 0x4c0   : > { %14081 = vmatpush3.bf16.msra.mxu1 %v14080_v62  ;;  %4677 = vmatprep.mubr.f32.mxu1 %v21966_v22  ;;  %v11947_v34 = vpop.f32.mrb[5].mxu1 }
 0x4c1   : > { %14083 = vmatprep.subr.bf16.mxu1 %v21967_v59  ;;  %v17971_v52 = vadd.f32 %v11947_v34, %v11946_v13  ;;  %v21998_v34 = vld [vmem:[#allocation76_spill] sm:$0xff] }
 0x4c3   : > { %4681 = vmatmul.mubr.f32.gmra.mrb[108].mxu1 %v21970_v26  ;;  %v21992_v26 = vld [vmem:[#allocation51_spill] sm:$0xff] }
 0x4c4   : > { %14085 = vmatpush3.bf16.msra.mxu1 %v14084_v31  ;;  %4688 = vmatprep.mubr.f32.mxu1 %v21971_v16  ;;  %v21993_v16 = vld [vmem:[#allocation23_spill] sm:$0xff] }
 0x4c5   : > { %14087 = vmatprep.subr.bf16.mxu1 %v21972_v23  ;;  %v11949_v8 = vpop.f32.mrb[6].mxu1  ;;  %v21994_v23 = vld [vmem:[#allocation74_spill] sm:$0xff] }
 0x4c6   : > { %v11950_v39 = vpop.f32.mrb[7].mxu1 }
 0x4c7   : > { %4692 = vmatmul.mubr.f32.gmra.mrb[110].mxu1 %v21975_v51  ;;  %v17978_v46 = vadd.f32 %v11950_v39, %v11949_v8  ;;  %v21999_v8 = vld [vmem:[#allocation25_spill] sm:$0xff] }
 0x4c8   : > { %14089 = vmatpush3.bf16.msra.mxu1 %v14088_v48  ;;  %4699 = vmatprep.mubr.f32.mxu1 %v21976_v5  ;;  %v21996_v48 = vld [vmem:[#allocation55_spill] sm:$0xff] }
 0x4c9   : > { %14091 = vmatprep.subr.bf16.mxu1 %v21897_v42  ;;  %v11952_v40 = vpop.f32.mrb[8].mxu1 }
 0x4ca   : > { %v11953_v63 = vpop.f32.mrb[9].mxu1 }
 0x4cb   : > { %4703 = vmatmul.mubr.f32.gmra.mrb[112].mxu1 %v21977_v20  ;;  %v17984_v38 = vadd.f32 %v11953_v63, %v11952_v40  ;;  %v22000_v20 = vld [vmem:[#allocation58_spill] sm:$0xff]  ;;  %v22002_v40 = vld [vmem:[#allocation77_spill] sm:$0xff] }
 0x4cc   : > { %4710 = vmatprep.mubr.f32.mxu1 %v21978_v60  ;;  %v22001_v60 = vld [vmem:[#allocation30_spill] sm:$0xff] }
 0x4cf   : > { %4714 = vmatmul.mubr.f32.gmra.mrb[114].mxu1 %v21979_v29  ;;  %v11955_v42 = vpop.f32.mrb[10].mxu1 }
 0x4d0   : > { %4721 = vmatprep.mubr.f32.mxu1 %v21980_v57  ;;  %v11956_v17 = vpop.f32.mrb[11].mxu1  ;;  %v22003_v57 = vld [vmem:[#allocation28_spill] sm:$0xff] }
 0x4d1   : > { %v17990_v25 = vadd.f32 %v11956_v17, %v11955_v42  ;;  %v22004_v17 = vld [vmem:[#allocation65_spill] sm:$0xff] }
 0x4d3   : > { %4725 = vmatmul.mubr.f32.gmra.mrb[116].mxu1 %v21981_v7  ;;  %v22005_v7 = vld [vmem:[#allocation36_spill] sm:$0xff] }
 0x4d4   : > { %4732 = vmatprep.mubr.f32.mxu1 %v21982_v4  ;;  %v22006_v4 = vld [vmem:[#allocation78_spill] sm:$0xff] }
 0x4d5   : > { %v11958_v53 = vpop.f32.mrb[12].mxu1 }
 0x4d6   : > { %v11959_v45 = vpop.f32.mrb[13].mxu1 }
 0x4d7   : > { %4736 = vmatmul.mubr.f32.gmra.mrb[118].mxu1 %v21983_v50  ;;  %v17996_v27 = vadd.f32 %v11959_v45, %v11958_v53  ;;  %v22007_v50 = vld [vmem:[#allocation34_spill] sm:$0xff] }
 0x4d8   : > { %4743 = vmatprep.mubr.f32.mxu1 %v21984_v36 }
 0x4da   : > { %v11961_v41 = vpop.f32.mrb[14].mxu1 }
 0x4db   : > { %v11962_v1 = vpop.f32.mrb[15].mxu1  ;;  %4747 = vmatmul.mubr.f32.gmra.mrb[120].mxu1 %v21985_v28  ;;  %v22010_v28 = vld [vmem:[#allocation80_spill] sm:$0xff] }
 0x4dc   : > { %v18002_v37 = vadd.f32 %v11962_v1, %v11961_v41  ;;  %4754 = vmatprep.mubr.f32.mxu1 %v21986_v2  ;;  %v22008_v41 = vld [vmem:[#allocation69_spill] sm:$0xff]  ;;  %v22009_v1 = vld [vmem:[#allocation42_spill] sm:$0xff] }
 0x4de   : > { %v11964_v33 = vpop.f32.mrb[16].mxu1 }
 0x4df   : > { %v11965_v62 = vpop.f32.mrb[17].mxu1  ;;  %4758 = vmatmul.mubr.f32.gmra.mrb[122].mxu1 %v21987_v15  ;;  %v22011_v15 = vld [vmem:[#allocation41_spill] sm:$0xff] }
 0x4e0   : > { %v18008_v47 = vadd.f32 %v11965_v62, %v11964_v33  ;;  %4765 = vmatprep.mubr.f32.mxu1 %v21988_v35 }
 0x4e2   : > { %v11967_v43 = vpop.f32.mrb[18].mxu1 }
 0x4e3   : > { %v11968_v22 = vpop.f32.mrb[19].mxu1  ;;  %4769 = vmatmul.mubr.f32.gmra.mrb[124].mxu1 %v21989_v14  ;;  %v22014_v14 = vld [vmem:[#allocation79_spill] sm:$0xff] }
 0x4e4   : > { %v18014_v59 = vadd.f32 %v11968_v22, %v11967_v43  ;;  %4776 = vmatprep.mubr.f32.mxu1 %v21990_v10  ;;  %v22012_v43 = vld [vmem:[#allocation72_spill] sm:$0xff]  ;;  %v22013_v22 = vld [vmem:[#allocation49_spill] sm:$0xff] }
 0x4e6   : > { %v11970_v55 = vpop.f32.mrb[20].mxu1 }
 0x4e7   : > { %v11971_v58 = vpop.f32.mrb[21].mxu1  ;;  %4780 = vmatmul.mubr.f32.gmra.mrb[126].mxu1 %v21991_v3  ;;  %v22015_v3 = vld [vmem:[#allocation48_spill] sm:$0xff] }
 0x4e8   : > { %v18020_v21 = vadd.f32 %v11971_v58, %v11970_v55  ;;  %4946 = vmatprep.mubr.f32.mxu1 %v21869_v61 }
 0x4ea   : > { %v11973_v6 = vpop.f32.mrb[22].mxu1 }
 0x4eb   : > { %v11974_v31 = vpop.f32.mrb[23].mxu1  ;;  %4948 = vmatmul.mubr.f32.vlgmr.msra.gmra.mrb[128].mxu1 %v21871_v18 }
 0x4ec   : > { %v18024_v30 = vadd.f32 %v11974_v31, %v11973_v6  ;;  %14093 = vmatpush3.bf16.msra.mxu1 %v21901_v19  ;;  %4953 = vmatprep.mubr.f32.mxu1 %v21872_v56  ;;  %v22016_v6 = vld [vmem:[#allocation75_spill] sm:$0xff]  ;;  %v22017_v31 = vld [vmem:[#allocation60_spill] sm:$0xff] }
 0x4ed   : > { %14095 = vmatprep.subr.bf16.mxu1 %v21903_v24  ;;  %v21997_v24 = vld [vmem:[#allocation24_spill] sm:$0xff] }
 0x4ee   : > { %v11976_v11 = vpop.f32.mrb[24].mxu1 }
 0x4ef   : > { %v11977_v9 = vpop.f32.mrb[25].mxu1  ;;  %4955 = vmatmul.mubr.f32.gmra.mrb[130].mxu1 %v21875_v54 }
 0x4f0   : > { %v18030_v49 = vadd.f32 %v11977_v9, %v11976_v11  ;;  %14097 = vmatpush3.bf16.msra.mxu1 %v21992_v26  ;;  %4960 = vmatprep.mubr.f32.mxu1 %v21993_v16 }
 0x4f1   : > { %14099 = vmatprep.subr.bf16.mxu1 %v21994_v23  ;;  %v22018_v23 = vld [vmem:[#allocation56_spill] sm:$0xff] }
 0x4f2   : > { %v11979_v13 = vpop.f32.mrb[26].mxu1 }
 0x4f3   : > { %v11980_v32 = vpop.f32.mrb[27].mxu1  ;;  %4962 = vmatmul.mubr.f32.gmra.mrb[132].mxu1 %v21995_v0 }
 0x4f4   : > { %v18036_v19 = vadd.f32 %v11980_v32, %v11979_v13  ;;  %14101 = vmatpush3.bf16.msra.mxu1 %v21996_v48  ;;  %4967 = vmatprep.mubr.f32.mxu1 %v21997_v24  ;;  %v22019_v32 = vld [vmem:[#allocation67_spill] sm:$0xff] }
 0x4f5   : > { %14103 = vmatprep.subr.bf16.mxu1 %v21998_v34 }
 0x4f6   : > { %v11982_v51 = vpop.f32.mrb[28].mxu1 }
 0x4f7   : > { %v11983_v5 = vpop.f32.mrb[29].mxu1  ;;  %4969 = vmatmul.mubr.f32.gmra.mrb[134].mxu1 %v21999_v8 }
 0x4f8   : > { %v18042_v39 = vadd.f32 %v11983_v5, %v11982_v51  ;;  %14105 = vmatpush3.bf16.msra.mxu1 %v22000_v20  ;;  %4974 = vmatprep.mubr.f32.mxu1 %v22001_v60  ;;  %v22020_v51 = vld [vmem:[#allocation81_spill] sm:$0xff]  ;;  %v22021_v20 = vld [vmem:[#allocation35_spill] sm:$0xff] }
 0x4f9   : > { %14107 = vmatprep.subr.bf16.mxu1 %v22002_v40 }
 0x4fa   : > { %v11985_v63 = vpop.f32.mrb[30].mxu1 }
 0x4fb   : > { %v11986_v29 = vpop.f32.mrb[31].mxu1  ;;  %4976 = vmatmul.mubr.f32.gmra.mrb[136].mxu1 %v22003_v57 }
 0x4fc   : > { %v18048_v42 = vadd.f32 %v11986_v29, %v11985_v63  ;;  %14109 = vmatpush3.bf16.msra.mxu1 %v22004_v17  ;;  %4981 = vmatprep.mubr.f32.mxu1 %v22005_v7  ;;  %v22022_v29 = vld [vmem:[#allocation59_spill] sm:$0xff] }
 0x4fd   : > { %14111 = vmatprep.subr.bf16.mxu1 %v22006_v4  ;;  %v22023_v4 = vld [vmem:[#allocation62_spill] sm:$0xff] }
 0x4fe   : > { %v12020_v53 = vpop.f32.mrb[32].mxu1 }
 0x4ff   : > { %v12021_v45 = vpop.f32.mrb[33].mxu1  ;;  %4983 = vmatmul.mubr.f32.gmra.mrb[138].mxu1 %v22007_v50 }
 0x500   : > { %v12022_v36 = vadd.f32 %v12021_v45, %v12020_v53  ;;  %14113 = vmatpush3.bf16.msra.mxu1 %v22008_v41  ;;  %4988 = vmatprep.mubr.f32.mxu1 %v22009_v1 }
 0x501   : > { %14115 = vmatprep.subr.bf16.mxu1 %v22010_v28  ;;  %v22025_v28 = vld [vmem:[#allocation84_spill] sm:$0xff] }
 0x502   : > { %v18058_v2 = vadd.f32 %v12022_v36, %v17949_v12  ;;  %v12023_v33 = vpop.f32.mrb[34].mxu1  ;;  %v22024_v36 = vld [vmem:[#allocation40_spill] sm:$0xff] }
 0x503   : > { %v12024_v62 = vpop.f32.mrb[35].mxu1  ;;  %4990 = vmatmul.mubr.f32.gmra.mrb[140].mxu1 %v22011_v15 }
 0x504   : > { %v12025_v35 = vadd.f32 %v12024_v62, %v12023_v33  ;;  %14117 = vmatpush3.bf16.msra.mxu1 %v22012_v43  ;;  %4995 = vmatprep.mubr.f32.mxu1 %v22013_v22 }
 0x505   : > { %14119 = vmatprep.subr.bf16.mxu1 %v22014_v14  ;;  %v22027_v14 = vld [vmem:[#allocation90_spill] sm:$0xff] }
 0x506   : > { %v18065_v10 = vadd.f32 %v12025_v35, %v17960_v44  ;;  %v12026_v55 = vpop.f32.mrb[36].mxu1  ;;  %v22026_v35 = vld [vmem:[#allocation88_spill] sm:$0xff] }
 0x507   : > { %v12027_v58 = vpop.f32.mrb[37].mxu1  ;;  %4997 = vmatmul.mubr.f32.gmra.mrb[142].mxu1 %v22015_v3 }
 0x508   : > { %v12028_v12 = vadd.f32 %v12027_v58, %v12026_v55  ;;  %14121 = vmatpush3.bf16.msra.mxu1 %v22016_v6  ;;  %5002 = vmatprep.mubr.f32.mxu1 %v22017_v31 }
 0x50a   : > { %v18071_v11 = vadd.f32 %v12028_v12, %v17971_v52  ;;  %v12029_v9 = vpop.f32.mrb[38].mxu1  ;;  %v22028_v12 = vld [vmem:[#allocation92_spill] sm:$0xff] }
 0x50b   : > { %v12030_v26 = vpop.f32.mrb[39].mxu1  ;;  %5004 = vmatmul.mubr.f32.gmra.mrb[144].mxu1 %v22018_v23 }
 0x50c   : > { %v12031_v13 = vadd.f32 %v12030_v26, %v12029_v9  ;;  %5009 = vmatprep.mubr.f32.mxu1 %v22019_v32  ;;  %v22029_v9 = vld [vmem:[#allocation93_spill] sm:$0xff] }
 0x50e   : > { %v18076_v44 = vadd.f32 %v12031_v13, %v17978_v46  ;;  %v12032_v48 = vpop.f32.mrb[40].mxu1 }
 0x50f   : > { %v12033_v34 = vpop.f32.mrb[41].mxu1  ;;  %5011 = vmatmul.mubr.f32.gmra.mrb[146].mxu1 %v22020_v51 }
 0x510   : > { %v12034_v5 = vadd.f32 %v12033_v34, %v12032_v48  ;;  %5016 = vmatprep.mubr.f32.mxu1 %v22021_v20  ;;  %v22030_v48 = vld [vmem:[#allocation95_spill] sm:$0xff] }
 0x512   : > { %v18081_v52 = vadd.f32 %v12034_v5, %v17984_v38  ;;  %v12035_v40 = vpop.f32.mrb[42].mxu1  ;;  %v22031_v5 = vld [vmem:[#allocation96_spill] sm:$0xff] }
 0x513   : > { %v12036_v63 = vpop.f32.mrb[43].mxu1  ;;  %5018 = vmatmul.mubr.f32.gmra.mrb[148].mxu1 %v22022_v29 }
 0x514   : > { %v12037_v17 = vadd.f32 %v12036_v63, %v12035_v40  ;;  %5023 = vmatprep.mubr.f32.mxu1 %v22023_v4 }
 0x516   : > { %v18086_v46 = vadd.f32 %v12037_v17, %v17990_v25  ;;  %v12038_v53 = vpop.f32.mrb[44].mxu1  ;;  %v22032_v17 = vld [vmem:[#allocation97_spill] sm:$0xff] }
 0x517   : > { %v12039_v45 = vpop.f32.mrb[45].mxu1  ;;  %5025 = vmatmul.mubr.f32.gmra.mrb[150].mxu1 %v22024_v36 }
 0x518   : > { %v12040_v41 = vadd.f32 %v12039_v45, %v12038_v53  ;;  %5030 = vmatprep.mubr.f32.mxu1 %v22025_v28 }
 0x51a   : > { %v18091_v38 = vadd.f32 %v12040_v41, %v17996_v27  ;;  %v12041_v33 = vpop.f32.mrb[46].mxu1 }
 0x51b   : > { %v12042_v62 = vpop.f32.mrb[47].mxu1  ;;  %5032 = vmatmul.mubr.f32.gmra.mrb[152].mxu1 %v22026_v35 }
 0x51c   : > { %v12043_v43 = vadd.f32 %v12042_v62, %v12041_v33  ;;  %5037 = vmatprep.mubr.f32.mxu1 %v22027_v14 }
 0x51e   : > { %v18096_v25 = vadd.f32 %v12043_v43, %v18002_v37  ;;  %v12044_v55 = vpop.f32.mrb[48].mxu1 }
 0x51f   : > { %v12045_v58 = vpop.f32.mrb[49].mxu1  ;;  %5039 = vmatmul.mubr.f32.gmra.mrb[154].mxu1 %v22028_v12 }
 0x520   : > { %v12046_v6 = vadd.f32 %v12045_v58, %v12044_v55  ;;  %5044 = vmatprep.mubr.f32.mxu1 %v22029_v9 }
 0x522   : > { %v18101_v27 = vadd.f32 %v12046_v6, %v18008_v47  ;;  %v12047_v26 = vpop.f32.mrb[50].mxu1 }
 0x523   : > { %v12048_v13 = vpop.f32.mrb[51].mxu1  ;;  %5046 = vmatmul.mubr.f32.gmra.mrb[156].mxu1 %v22030_v48 }
 0x524   : > { %v12049_v34 = vadd.f32 %v12048_v13, %v12047_v26  ;;  %5051 = vmatprep.mubr.f32.mxu1 %v22031_v5 }
 0x526   : > { %v18106_v37 = vadd.f32 %v12049_v34, %v18014_v59  ;;  %v12050_v40 = vpop.f32.mrb[52].mxu1 }
 0x527   : > { %v12051_v63 = vpop.f32.mrb[53].mxu1  ;;  %5053 = vmatmul.mubr.f32.gmra.mrb[158].mxu1 %v22032_v17 }
 0x528   : > { %v12052_v53 = vadd.f32 %v12051_v63, %v12050_v40  ;;  %5155 = vmatprep.mubr.f32.mxu1 %v21869_v61 }
 0x52a   : > { %v18111_v47 = vadd.f32 %v12052_v53, %v18020_v21  ;;  %v12053_v45 = vpop.f32.mrb[54].mxu1 }
 0x52b   : > { %v12054_v41 = vpop.f32.mrb[55].mxu1  ;;  %5157 = vmatmul.mubr.f32.vlgmr.msra.gmra.mrb[160].mxu1 %v21871_v18 }
 0x52c   : > { %v12055_v33 = vadd.f32 %v12054_v41, %v12053_v45  ;;  %5162 = vmatprep.mubr.f32.mxu1 %v21872_v56 }
 0x52e   : > { %v18116_v59 = vadd.f32 %v12055_v33, %v18024_v30  ;;  %v12056_v62 = vpop.f32.mrb[56].mxu1 }
 0x52f   : > { %v12057_v43 = vpop.f32.mrb[57].mxu1  ;;  %5164 = vmatmul.mubr.f32.gmra.mrb[162].mxu1 %v21875_v54 }
 0x530   : > { %v12058_v55 = vadd.f32 %v12057_v43, %v12056_v62  ;;  %5169 = vmatprep.mubr.f32.mxu1 %v21993_v16 }
 0x532   : > { %v18121_v61 = vadd.f32 %v12058_v55, %v18030_v49  ;;  %v12059_v21 = vpop.f32.mrb[58].mxu1 }
 0x533   : > { %v12060_v58 = vpop.f32.mrb[59].mxu1  ;;  %5171 = vmatmul.mubr.f32.gmra.mrb[164].mxu1 %v21995_v0 }
 0x534   : > { %v12061_v18 = vadd.f32 %v12060_v58, %v12059_v21  ;;  %5176 = vmatprep.mubr.f32.mxu1 %v21997_v24 }
 0x536   : > { %v18126_v56 = vadd.f32 %v12061_v18, %v18036_v19  ;;  %v12062_v30 = vpop.f32.mrb[60].mxu1 }
 0x537   : > { %v12063_v6 = vpop.f32.mrb[61].mxu1  ;;  %5178 = vmatmul.mubr.f32.gmra.mrb[166].mxu1 %v21999_v8 }
 0x538   : > { %v12064_v54 = vadd.f32 %v12063_v6, %v12062_v30  ;;  %5183 = vmatprep.mubr.f32.mxu1 %v22001_v60 }
 0x53a   : > { %v18131_v49 = vadd.f32 %v12064_v54, %v18042_v39  ;;  %v12065_v16 = vpop.f32.mrb[62].mxu1 }
 0x53b   : > { %v12066_v26 = vpop.f32.mrb[63].mxu1  ;;  %5185 = vmatmul.mubr.f32.gmra.mrb[168].mxu1 %v22003_v57 }
 0x53c   : > { %v12067_v0 = vadd.f32 %v12066_v26, %v12065_v16  ;;  %5190 = vmatprep.mubr.f32.mxu1 %v22005_v7 }
 0x53e   : > { %v18136_v19 = vadd.f32 %v12067_v0, %v18048_v42  ;;  %v12100_v24 = vpop.f32.mrb[64].mxu1 }
 0x53f   : > { %v12101_v13 = vpop.f32.mrb[65].mxu1  ;;  %5192 = vmatmul.mubr.f32.gmra.mrb[170].mxu1 %v22007_v50 }
 0x540   : > { %v12102_v8 = vadd.f32 %v12101_v13, %v12100_v24  ;;  %5197 = vmatprep.mubr.f32.mxu1 %v22009_v1 }
 0x542   : > { %v18141_v39 = vadd.f32 %v12102_v8, %v18058_v2  ;;  %v12103_v60 = vpop.f32.mrb[66].mxu1 }
 0x543   : > { %v12104_v34 = vpop.f32.mrb[67].mxu1  ;;  %5199 = vmatmul.mubr.f32.gmra.mrb[172].mxu1 %v22011_v15 }
 0x544   : > { %v12105_v57 = vadd.f32 %v12104_v34, %v12103_v60  ;;  %5204 = vmatprep.mubr.f32.mxu1 %v22013_v22 }
 0x546   : > { %v18146_v42 = vadd.f32 %v12105_v57, %v18065_v10  ;;  %v12106_v7 = vpop.f32.mrb[68].mxu1 }
 0x547   : > { %v12107_v40 = vpop.f32.mrb[69].mxu1  ;;  %5206 = vmatmul.mubr.f32.gmra.mrb[174].mxu1 %v22015_v3 }
 0x548   : > { %v12108_v50 = vadd.f32 %v12107_v40, %v12106_v7  ;;  %5211 = vmatprep.mubr.f32.mxu1 %v22017_v31 }
 0x54a   : > { %v18151_v1 = vadd.f32 %v12108_v50, %v18071_v11  ;;  %v12109_v2 = vpop.f32.mrb[70].mxu1 }
 0x54b   : > { %v12110_v63 = vpop.f32.mrb[71].mxu1  ;;  %5213 = vmatmul.mubr.f32.gmra.mrb[176].mxu1 %v22018_v23 }
 0x54c   : > { %v12111_v15 = vadd.f32 %v12110_v63, %v12109_v2  ;;  %5218 = vmatprep.mubr.f32.mxu1 %v22019_v32 }
 0x54e   : > { %v18156_v22 = vadd.f32 %v12111_v15, %v18076_v44  ;;  %v12112_v10 = vpop.f32.mrb[72].mxu1 }
 0x54f   : > { %v12113_v53 = vpop.f32.mrb[73].mxu1  ;;  %5220 = vmatmul.mubr.f32.gmra.mrb[178].mxu1 %v22020_v51 }
 0x550   : > { %v12114_v3 = vadd.f32 %v12113_v53, %v12112_v10  ;;  %5225 = vmatprep.mubr.f32.mxu1 %v22021_v20 }
 0x552   : > { %v18161_v31 = vadd.f32 %v12114_v3, %v18081_v52  ;;  %v12115_v11 = vpop.f32.mrb[74].mxu1 }
 0x553   : > { %v12116_v45 = vpop.f32.mrb[75].mxu1  ;;  %5227 = vmatmul.mubr.f32.gmra.mrb[180].mxu1 %v22022_v29 }
 0x554   : > { %v12117_v23 = vadd.f32 %v12116_v45, %v12115_v11  ;;  %5232 = vmatprep.mubr.f32.mxu1 %v22023_v4 }
 0x556   : > { %v18166_v32 = vadd.f32 %v12117_v23, %v18086_v46  ;;  %v12118_v44 = vpop.f32.mrb[76].mxu1 }
 0x557   : > { %v12119_v41 = vpop.f32.mrb[77].mxu1  ;;  %5234 = vmatmul.mubr.f32.gmra.mrb[182].mxu1 %v22024_v36 }
 0x558   : > { %v12120_v51 = vadd.f32 %v12119_v41, %v12118_v44  ;;  %5239 = vmatprep.mubr.f32.mxu1 %v22025_v28  ;;  %v22033_v44 = vmov 0.0  }
 0x559   : > { %5268 = vst.msk [vmem:[#allocation4] sm:$0x3] %vm5267_vm10, %v22033_v44  ;;  %5286 = vst.msk [vmem:[#allocation4 + $0x82] sm:$0x3] %vm5267_vm10, %v22033_v44  ;;  %vm10147_vm10 = vcmask 1048064  }
 0x55a   : > { %v18171_v20 = vadd.f32 %v12120_v51, %v18091_v38  ;;  %v12121_v52 = vpop.f32.mrb[78].mxu1 }
 0x55b   : > { %v12122_v33 = vpop.f32.mrb[79].mxu1  ;;  %5241 = vmatmul.mubr.f32.gmra.mrb[184].mxu1 %v22026_v35 }
 0x55c   : > { %v12123_v29 = vadd.f32 %v12122_v33, %v12121_v52  ;;  %5246 = vmatprep.mubr.f32.mxu1 %v22027_v14 }
 0x55e   : > { %v18176_v4 = vadd.f32 %v12123_v29, %v18096_v25  ;;  %v12124_v46 = vpop.f32.mrb[80].mxu1 }
 0x55f   : > { %v12125_v62 = vpop.f32.mrb[81].mxu1  ;;  %5248 = vmatmul.mubr.f32.gmra.mrb[186].mxu1 %v22028_v12 }
 0x560   : > { %v12126_v36 = vadd.f32 %v12125_v62, %v12124_v46  ;;  %5253 = vmatprep.mubr.f32.mxu1 %v22029_v9 }
 0x562   : > { %v18181_v28 = vadd.f32 %v12126_v36, %v18101_v27  ;;  %v12127_v38 = vpop.f32.mrb[82].mxu1 }
 0x563   : > { %v12128_v43 = vpop.f32.mrb[83].mxu1  ;;  %5255 = vmatmul.mubr.f32.gmra.mrb[188].mxu1 %v22030_v48 }
 0x564   : > { %v12129_v35 = vadd.f32 %v12128_v43, %v12127_v38  ;;  %5260 = vmatprep.mubr.f32.mxu1 %v22031_v5 }
 0x566   : > { %v18186_v14 = vadd.f32 %v12129_v35, %v18106_v37  ;;  %v12130_v25 = vpop.f32.mrb[84].mxu1 }
 0x567   : > { %v12131_v55 = vpop.f32.mrb[85].mxu1  ;;  %5262 = vmatmul.mubr.f32.gmra.mrb[190].mxu1 %v22032_v17 }
 0x568   : > { %v12132_v12 = vadd.f32 %v12131_v55, %v12130_v25 }
 0x56a   : > { %v18190_v9 = vadd.f32 %v12132_v12, %v18111_v47  ;;  %v12133_v27 = vpop.f32.mrb[86].mxu1 }
 0x56b   : > { %v12134_v21 = vpop.f32.mrb[87].mxu1 }
 0x56c   : > { %v12135_v58 = vadd.f32 %v12134_v21, %v12133_v27 }
 0x56e   : > { %v18193_v18 = vadd.f32 %v12135_v58, %v18116_v59  ;;  %v12136_v48 = vpop.f32.mrb[88].mxu1 }
 0x56f   : > { %v12137_v30 = vpop.f32.mrb[89].mxu1 }
 0x570   : > { %v12138_v5 = vadd.f32 %v12137_v30, %v12136_v48 }
 0x572   : > { %v18196_v37 = vadd.f32 %v12138_v5, %v18121_v61  ;;  %v12139_v6 = vpop.f32.mrb[90].mxu1 }
 0x573   : > { %v12140_v54 = vpop.f32.mrb[91].mxu1 }
 0x574   : > { %v12141_v16 = vadd.f32 %v12140_v54, %v12139_v6 }
 0x576   : > { %v18199_v17 = vadd.f32 %v12141_v16, %v18126_v56  ;;  %v12142_v47 = vpop.f32.mrb[92].mxu1 }
 0x577   : > { %v12143_v26 = vpop.f32.mrb[93].mxu1 }
 0x578   : > { %v12144_v0 = vadd.f32 %v12143_v26, %v12142_v47 }
 0x57a   : > { %v18202_v24 = vadd.f32 %v12144_v0, %v18131_v49  ;;  %v12145_v59 = vpop.f32.mrb[94].mxu1 }
 0x57b   : > { %v12146_v13 = vpop.f32.mrb[95].mxu1 }
 0x57c   : > { %v12147_v8 = vadd.f32 %v12146_v13, %v12145_v59 }
 0x57e   : > { %v18205_v60 = vadd.f32 %v12147_v8, %v18136_v19  ;;  %v12180_v61 = vpop.f32.mrb[96].mxu1 }
 0x57f   : > { %v12181_v34 = vpop.f32.mrb[97].mxu1 }
 0x580   : > { %v12182_v57 = vadd.f32 %v12181_v34, %v12180_v61 }
 0x582   : > { %v18208_v7 = vadd.f32 %v12182_v57, %v18141_v39  ;;  %v12183_v56 = vpop.f32.mrb[98].mxu1 }
 0x583   : > { %v12184_v40 = vpop.f32.mrb[99].mxu1 }
 0x584   : > { %v12185_v50 = vadd.f32 %v12184_v40, %v12183_v56 }
 0x586   : > { %v18211_v2 = vadd.f32 %v12185_v50, %v18146_v42  ;;  %v12186_v49 = vpop.f32.mrb[100].mxu1 }
 0x587   : > { %v12187_v63 = vpop.f32.mrb[101].mxu1 }
 0x588   : > { %v12188_v15 = vadd.f32 %v12187_v63, %v12186_v49 }
 0x58a   : > { %v18214_v10 = vadd.f32 %v12188_v15, %v18151_v1  ;;  %v12189_v19 = vpop.f32.mrb[102].mxu1 }
 0x58b   : > { %v12190_v53 = vpop.f32.mrb[103].mxu1 }
 0x58c   : > { %v12191_v3 = vadd.f32 %v12190_v53, %v12189_v19 }
 0x58e   : > { %v18217_v11 = vadd.f32 %v12191_v3, %v18156_v22  ;;  %v12192_v39 = vpop.f32.mrb[104].mxu1 }
 0x58f   : > { %v12193_v45 = vpop.f32.mrb[105].mxu1 }
 0x590   : > { %v12194_v23 = vadd.f32 %v12193_v45, %v12192_v39 }
 0x592   : > { %v18222_v42 = vadd.f32 %v12194_v23, %v18161_v31  ;;  %v12195_v41 = vpop.f32.mrb[106].mxu1 }
 0x593   : > { %v12196_v1 = vpop.f32.mrb[107].mxu1 }
 0x594   : > { %v12197_v51 = vadd.f32 %v12196_v1, %v12195_v41 }
 0x596   : > { %v18225_v52 = vadd.f32 %v12197_v51, %v18166_v32  ;;  %v12198_v33 = vpop.f32.mrb[108].mxu1 }
 0x597   : > { %v12199_v22 = vpop.f32.mrb[109].mxu1 }
 0x598   : > { %v12200_v29 = vadd.f32 %v12199_v22, %v12198_v33 }
 0x59a   : > { %v18228_v46 = vadd.f32 %v12200_v29, %v18171_v20  ;;  %v12201_v62 = vpop.f32.mrb[110].mxu1 }
 0x59b   : > { %v12202_v36 = vpop.f32.mrb[111].mxu1 }
 0x59c   : > { %v12203_v38 = vadd.f32 %v12202_v36, %v12201_v62 }
 0x59e   : > { %v18231_v43 = vadd.f32 %v12203_v38, %v18176_v4  ;;  %v12204_v31 = vpop.f32.mrb[112].mxu1 }
 0x59f   : > { %v12205_v35 = vpop.f32.mrb[113].mxu1 }
 0x5a0   : > { %v12206_v25 = vadd.f32 %v12205_v35, %v12204_v31 }
 0x5a2   : > { %v18234_v55 = vadd.f32 %v12206_v25, %v18181_v28  ;;  %v12207_v32 = vpop.f32.mrb[114].mxu1 }
 0x5a3   : > { %v12208_v12 = vpop.f32.mrb[115].mxu1 }
 0x5a4   : > { %v12209_v27 = vadd.f32 %v12208_v12, %v12207_v32 }
 0x5a6   : > { %v18237_v21 = vadd.f32 %v12209_v27, %v18186_v14  ;;  %v12210_v20 = vpop.f32.mrb[116].mxu1 }
 0x5a7   : > { %v12211_v58 = vpop.f32.mrb[117].mxu1 }
 0x5a8   : > { %v12212_v48 = vadd.f32 %v12211_v58, %v12210_v20 }
 0x5aa   : > { %v18240_v30 = vadd.f32 %v12212_v48, %v18190_v9  ;;  %v12213_v4 = vpop.f32.mrb[118].mxu1 }
 0x5ab   : > { %v12214_v5 = vpop.f32.mrb[119].mxu1 }
 0x5ac   : > { %v12215_v6 = vadd.f32 %v12214_v5, %v12213_v4 }
 0x5ae   : > { %v18243_v54 = vadd.f32 %v12215_v6, %v18193_v18  ;;  %v12216_v28 = vpop.f32.mrb[120].mxu1 }
 0x5af   : > { %v12217_v16 = vpop.f32.mrb[121].mxu1 }
 0x5b0   : > { %v12218_v47 = vadd.f32 %v12217_v16, %v12216_v28 }
 0x5b2   : > { %v18246_v26 = vadd.f32 %v12218_v47, %v18196_v37  ;;  %v12219_v14 = vpop.f32.mrb[122].mxu1 }
 0x5b3   : > { %v12220_v0 = vpop.f32.mrb[123].mxu1 }
 0x5b4   : > { %v12221_v59 = vadd.f32 %v12220_v0, %v12219_v14 }
 0x5b6   : > { %v18249_v13 = vadd.f32 %v12221_v59, %v18199_v17  ;;  %v12222_v9 = vpop.f32.mrb[124].mxu1 }
 0x5b7   : > { %v12223_v8 = vpop.f32.mrb[125].mxu1 }
 0x5b8   : > { %v12224_v61 = vadd.f32 %v12223_v8, %v12222_v9 }
 0x5ba   : > { %v18252_v34 = vadd.f32 %v12224_v61, %v18202_v24  ;;  %v12225_v18 = vpop.f32.mrb[126].mxu1 }
 0x5bb   : > { %v12226_v57 = vpop.f32.mrb[127].mxu1 }
 0x5bc   : > { %v12227_v56 = vadd.f32 %v12226_v57, %v12225_v18 }
 0x5be   : > { %v18255_v40 = vadd.f32 %v12227_v56, %v18205_v60  ;;  %v12260_v37 = vpop.f32.mrb[128].mxu1 }
 0x5bf   : > { %v12261_v50 = vpop.f32.mrb[129].mxu1 }
 0x5c0   : > { %v12262_v49 = vadd.f32 %v12261_v50, %v12260_v37 }
 0x5c2   : > { %v18258_v63 = vadd.f32 %v12262_v49, %v18208_v7  ;;  %v12263_v17 = vpop.f32.mrb[130].mxu1 }
 0x5c3   : > { %v12264_v15 = vpop.f32.mrb[131].mxu1 }
 0x5c4   : > { %v12265_v19 = vadd.f32 %v12264_v15, %v12263_v17 }
 0x5c6   : > { %v18261_v53 = vadd.f32 %v12265_v19, %v18211_v2  ;;  %v12266_v24 = vpop.f32.mrb[132].mxu1 }
 0x5c7   : > { %v12267_v3 = vpop.f32.mrb[133].mxu1 }
 0x5c8   : > { %v12268_v39 = vadd.f32 %v12267_v3, %v12266_v24 }
 0x5ca   : > { %v18264_v45 = vadd.f32 %v12268_v39, %v18214_v10  ;;  %v12269_v60 = vpop.f32.mrb[134].mxu1 }
 0x5cb   : > { %v12270_v23 = vpop.f32.mrb[135].mxu1 }
 0x5cc   : > { %v12271_v41 = vadd.f32 %v12270_v23, %v12269_v60 }
 0x5ce   : > { %v18267_v1 = vadd.f32 %v12271_v41, %v18217_v11  ;;  %v12272_v7 = vpop.f32.mrb[136].mxu1 }
 0x5cf   : > { %v12273_v51 = vpop.f32.mrb[137].mxu1 }
 0x5d0   : > { %v12274_v33 = vadd.f32 %v12273_v51, %v12272_v7 }
 0x5d2   : > { %v18270_v22 = vadd.f32 %v12274_v33, %v18222_v42  ;;  %v12275_v2 = vpop.f32.mrb[138].mxu1 }
 0x5d3   : > { %v12276_v29 = vpop.f32.mrb[139].mxu1 }
 0x5d4   : > { %v12277_v62 = vadd.f32 %v12276_v29, %v12275_v2 }
 0x5d6   : > { %v18273_v36 = vadd.f32 %v12277_v62, %v18225_v52  ;;  %v12278_v10 = vpop.f32.mrb[140].mxu1 }
 0x5d7   : > { %v12279_v38 = vpop.f32.mrb[141].mxu1 }
 0x5d8   : > { %v12280_v31 = vadd.f32 %v12279_v38, %v12278_v10 }
 0x5da   : > { %v18276_v35 = vadd.f32 %v12280_v31, %v18228_v46  ;;  %v12281_v11 = vpop.f32.mrb[142].mxu1 }
 0x5db   : > { %v12282_v25 = vpop.f32.mrb[143].mxu1 }
 0x5dc   : > { %v12283_v32 = vadd.f32 %v12282_v25, %v12281_v11 }
 0x5de   : > { %v18279_v12 = vadd.f32 %v12283_v32, %v18231_v43  ;;  %v12284_v42 = vpop.f32.mrb[144].mxu1 }
 0x5df   : > { %v12285_v27 = vpop.f32.mrb[145].mxu1 }
 0x5e0   : > { %v12286_v20 = vadd.f32 %v12285_v27, %v12284_v42 }
 0x5e2   : > { %v18282_v58 = vadd.f32 %v12286_v20, %v18234_v55  ;;  %v12287_v52 = vpop.f32.mrb[146].mxu1 }
 0x5e3   : > { %v12288_v48 = vpop.f32.mrb[147].mxu1 }
 0x5e4   : > { %v12289_v4 = vadd.f32 %v12288_v48, %v12287_v52  ;;  %v18345_v52 = vld [vmem:[%s21131_s3 + $0x18] sm:$0xff] }
 0x5e6   : > { %v18285_v5 = vadd.f32 %v12289_v4, %v18237_v21  ;;  %v12290_v46 = vpop.f32.mrb[148].mxu1 }
 0x5e7   : > { %v12291_v6 = vpop.f32.mrb[149].mxu1 }
 0x5e8   : > { %v12292_v28 = vadd.f32 %v12291_v6, %v12290_v46  ;;  %v5799_v6 = vand.u32 4294901760, %v18345_v52 }
 0x5ea   : > { %v18288_v16 = vadd.f32 %v12292_v28, %v18240_v30  ;;  %v12293_v43 = vpop.f32.mrb[150].mxu1 }
 0x5eb   : > { %v12294_v47 = vpop.f32.mrb[151].mxu1 }
 0x5ec   : > { %v12295_v14 = vadd.f32 %v12294_v47, %v12293_v43 }
 0x5ee   : > { %v18291_v0 = vadd.f32 %v12295_v14, %v18243_v54  ;;  %v12296_v55 = vpop.f32.mrb[152].mxu1 }
 0x5ef   : > { %v12297_v59 = vpop.f32.mrb[153].mxu1 }
 0x5f0   : > { %v12298_v9 = vadd.f32 %v12297_v59, %v12296_v55  ;;  %v18363_v59 = vld [vmem:[%s21131_s3 + $0x20] sm:$0xff] }
 0x5f2   : > { %v18294_v8 = vadd.f32 %v12298_v9, %v18246_v26  ;;  %v12299_v21 = vpop.f32.mrb[154].mxu1  ;;  %v18369_v9 = vld [vmem:[%s21131_s3 + $0x28] sm:$0xff] }
 0x5f3   : > { %v12300_v61 = vpop.f32.mrb[155].mxu1 }
 0x5f4   : > { %v12301_v18 = vadd.f32 %v12300_v61, %v12299_v21  ;;  %v5802_v21 = vand.u32 4294901760, %v18363_v59 }
 0x5f6   : > { %v18297_v57 = vadd.f32 %v12301_v18, %v18249_v13  ;;  %v12302_v30 = vpop.f32.mrb[156].mxu1 }
 0x5f7   : > { %v12303_v56 = vpop.f32.mrb[157].mxu1 }
 0x5f8   : > { %v12304_v37 = vadd.f32 %v12303_v56, %v12302_v30  ;;  %v5805_v30 = vand.u32 4294901760, %v18369_v9 }
 0x5fa   : > { %v18300_v50 = vadd.f32 %v12304_v37, %v18252_v34  ;;  %v12305_v54 = vpop.f32.mrb[158].mxu1 }
 0x5fb   : > { %v12306_v49 = vpop.f32.mrb[159].mxu1 }
 0x5fc   : > { %v12307_v17 = vadd.f32 %v12306_v49, %v12305_v54 }
 0x5fe   : > { %v18303_v15 = vadd.f32 %v12307_v17, %v18255_v40  ;;  %v12340_v26 = vpop.f32.mrb[160].mxu1 }
 0x5ff   : > { %v12341_v19 = vpop.f32.mrb[161].mxu1 }
 0x600   : > { %v12342_v24 = vadd.f32 %v12341_v19, %v12340_v26  ;;  %v18388_v26 = vld [vmem:[%s21131_s3 + $0x30] sm:$0xff]  ;;  %v18394_v19 = vld [vmem:[%s21131_s3 + $0x38] sm:$0xff] }
 0x602   : > { %v5159_v3 = vadd.f32 %v12342_v24, %v18258_v63  ;;  %v12343_v13 = vpop.f32.mrb[162].mxu1  ;;  %v5808_v24 = vand.u32 4294901760, %v18388_v26 }
 0x603   : > { %v12344_v39 = vpop.f32.mrb[163].mxu1 }
 0x604   : > { %5270 = vst.msk [vmem:[#allocation4 + $0x2] sm:$0xff] %vm5269_vm11, %v5159_v3  ;;  %v12345_v60 = vadd.f32 %v12344_v39, %v12343_v13  ;;  %v5811_v39 = vand.u32 4294901760, %v18394_v19 }
 0x606   : > { %v5166_v34 = vadd.f32 %v12345_v60, %v18261_v53  ;;  %v12346_v23 = vpop.f32.mrb[164].mxu1  ;;  %v18316_v53 = vld [vmem:[%s21131_s3] sm:$0xff] }
 0x607   : > { %v12347_v41 = vpop.f32.mrb[165].mxu1  ;;  %v5790_v62 = vand.u32 4294901760, %v18316_v53 }
 0x608   : > { %5271 = vst.msk [vmem:[#allocation4 + $0xa] sm:$0xff] %vm5269_vm11, %v5166_v34  ;;  %v12348_v7 = vadd.f32 %v12347_v41, %v12346_v23 }
 0x60a   : > { %v5173_v40 = vadd.f32 %v12348_v7, %v18264_v45  ;;  %v12349_v51 = vpop.f32.mrb[166].mxu1  ;;  %v18321_v45 = vld [vmem:[%s21131_s3 + $0x8] sm:$0xff]  ;;  %v18413_v7 = vld [vmem:[%s21131_s3 + $0x40] sm:$0xff] }
 0x60b   : > { %v12350_v33 = vpop.f32.mrb[167].mxu1  ;;  %v5319_v2 = vld [vmem:[#allocation4 + $0x1] sm:$0xff]  ;;  %v5793_v10 = vand.u32 4294901760, %v18321_v45 }
 0x60c   : > { %v5287_v29 = vld [vmem:[#allocation4] sm:$0xff]  ;;  %5272 = vst.msk [vmem:[#allocation4 + $0x12] sm:$0xff] %vm5269_vm11, %v5173_v40  ;;  %v12351_v63 = vadd.f32 %v12350_v33, %v12349_v51  ;;  %5351 = vrot.lane.b32.xlu0 %v5319_v2, %s15613_s0  ;;  %v5814_v51 = vand.u32 4294901760, %v18413_v7 }
 0x60d   : > { %5303 = vst.msk [vmem:[#allocation5] sm:$0xff] %vm5269_vm11, %v5287_v29  ;;  %v5416_v32 = vld [vmem:[#allocation4 + $0x2] sm:$0xff]  ;;  %v18330_v42 = vpack.c.bf16 %v5793_v10, %v5790_v62 }
 0x60e   : > { %v5180_v38 = vadd.f32 %v12351_v63, %v18267_v1  ;;  %v12352_v31 = vpop.f32.mrb[168].mxu1  ;;  %v18338_v1 = vld [vmem:[%s21131_s3 + $0x10] sm:$0xff]  ;;  %v18418_v40 = vld [vmem:[%s21131_s3 + $0x48] sm:$0xff] }
 0x60f   : > { %v12353_v11 = vpop.f32.mrb[169].mxu1  ;;  %v5320_v25 = vld [vmem:[#allocation4 + $0x9] sm:$0xff]  ;;  %14123 = vmatprep.subr.bf16.mxu0 %v18330_v42  ;;  %v5796_v48 = vand.u32 4294901760, %v18338_v1  ;;  %v5817_v33 = vand.u32 4294901760, %v18418_v40 }
 0x610   : > { %5273 = vst.msk [vmem:[#allocation4 + $0x1a] sm:$0xff] %vm5269_vm11, %v5180_v38  ;;  %v12354_v27 = vadd.f32 %v12353_v11, %v12352_v31  ;;  %5353 = vrot.lane.b32.xlu1 %v5320_v25, %s15613_s0  ;;  %5448 = vrot.lane.b32.xlu0 %v5416_v32, %s21487_s20  ;;  %v5288_v20 = vld [vmem:[#allocation4 + $0x8] sm:$0xff] }
 0x611   : > { %5304 = vst.msk [vmem:[#allocation5 + $0x8] sm:$0xff] %vm5269_vm11, %v5288_v20  ;;  %14125 = vmatpush3.bf16.msra.mxu0 %v18330_v42  ;;  %v5417_v43 = vld [vmem:[#allocation4 + $0xa] sm:$0xff]  ;;  %v18430_v25 = vpack.c.bf16 %v5817_v33, %v5814_v51 }
 0x612   : > { %v5187_v4 = vadd.f32 %v12354_v27, %v18270_v22  ;;  %v12355_v46 = vpop.f32.mrb[170].mxu1  ;;  %v5513_v47 = vld [vmem:[#allocation4 + $0x3] sm:$0xff]  ;;  %v18358_v22 = vpack.c.bf16 %v5799_v6, %v5796_v48 }
 0x613   : > { %v12356_v28 = vpop.f32.mrb[171].mxu1  ;;  %v5289_v55 = vld [vmem:[#allocation4 + $0x10] sm:$0xff]  ;;  %v5610_v54 = vld [vmem:[#allocation4 + $0x4] sm:$0xff] }
 0x614   : > { %5274 = vst.msk [vmem:[#allocation4 + $0x22] sm:$0xff] %vm5269_vm11, %v5187_v4  ;;  %v12357_v14 = vadd.f32 %v12356_v28, %v12355_v46  ;;  %5450 = vrot.lane.b32.xlu1 %v5417_v43, %s21487_s20  ;;  %5545 = vrot.lane.b32.xlu0 %v5513_v47, %s15615_s1  ;;  %5305 = vst.msk [vmem:[#allocation5 + $0x10] sm:$0xff] %vm5269_vm11, %v5289_v55  ;;  %v5514_v37 = vld [vmem:[#allocation4 + $0xb] sm:$0xff] }
 0x615   : > { %14127 = vmatprep.subr.bf16.mxu0 %v18358_v22  ;;  %v5321_v34 = vld [vmem:[#allocation4 + $0x11] sm:$0xff] }
 0x616   : > { %v5194_v61 = vadd.f32 %v12357_v14, %v18273_v36  ;;  %v12358_v18 = vpop.f32.mrb[172].mxu1  ;;  %14129 = vmatpush3.bf16.msra.mxu0 %v18358_v22  ;;  %v18383_v36 = vpack.c.bf16 %v5805_v30, %v5802_v21  ;;  %v5611_v23 = vld [vmem:[#allocation4 + $0xc] sm:$0xff] }
 0x617   : > { %v12359_v56 = vpop.f32.mrb[173].mxu1  ;;  %v5290_v17 = vld [vmem:[#allocation4 + $0x18] sm:$0xff] }
 0x618   : > { %5275 = vst.msk [vmem:[#allocation4 + $0x2a] sm:$0xff] %vm5269_vm11, %v5194_v61  ;;  %v12360_v49 = vadd.f32 %v12359_v56, %v12358_v18  ;;  %5547 = vrot.lane.b32.xlu1 %v5514_v37, %s15615_s1  ;;  %5642 = vrot.lane.b32.xlu0 %v5610_v54, %s21489_s25  ;;  %5306 = vst.msk [vmem:[#allocation5 + $0x18] sm:$0xff] %vm5269_vm11, %v5290_v17  ;;  %v5322_v31 = vld [vmem:[#allocation4 + $0x19] sm:$0xff] }
 0x619   : > { %14131 = vmatprep.subr.bf16.mxu0 %v18383_v36  ;;  %v5418_v11 = vld [vmem:[#allocation4 + $0x12] sm:$0xff]  ;;  %v5419_v46 = vld [vmem:[#allocation4 + $0x1a] sm:$0xff] }
 0x61a   : > { %v5201_v3 = vadd.f32 %v12360_v49, %v18276_v35  ;;  %v12361_v13 = vpop.f32.mrb[174].mxu1  ;;  %14133 = vmatpush3.bf16.msra.mxu0 %v18383_v36  ;;  %v18408_v35 = vpack.c.bf16 %v5811_v39, %v5808_v24  ;;  %v5515_v28 = vld [vmem:[#allocation4 + $0x13] sm:$0xff] }
 0x61b   : > { %v12362_v60 = vpop.f32.mrb[175].mxu1  ;;  %v5291_v2 = vld [vmem:[#allocation4 + $0x20] sm:$0xff]  ;;  %v5612_v18 = vld [vmem:[#allocation4 + $0x14] sm:$0xff] }
 0x61c   : > { %5276 = vst.msk [vmem:[#allocation4 + $0x32] sm:$0xff] %vm5269_vm11, %v5201_v3  ;;  %v12363_v41 = vadd.f32 %v12362_v60, %v12361_v13  ;;  %5355 = vrot.lane.b32.xlu1 %v5321_v34, %s15613_s0  ;;  %5644 = vrot.lane.b32.xlu0 %v5611_v23, %s21489_s25  ;;  %5307 = vst.msk [vmem:[#allocation5 + $0x20] sm:$0xff] %vm5269_vm11, %v5291_v2  ;;  %v5516_v61 = vld [vmem:[#allocation4 + $0x1b] sm:$0xff] }
 0x61d   : > { %14135 = vmatprep.subr.bf16.mxu0 %v18408_v35  ;;  %v5323_v3 = vld [vmem:[#allocation4 + $0x21] sm:$0xff] }
 0x61e   : > { %v5208_v29 = vadd.f32 %v12363_v41, %v18279_v12  ;;  %v12364_v63 = vpop.f32.mrb[176].mxu1  ;;  %14137 = vmatpush3.bf16.msra.mxu0 %v18408_v35 }
 0x61f   : > { %v12365_v38 = vpop.f32.mrb[177].mxu1  ;;  %v5292_v12 = vld [vmem:[#allocation4 + $0x28] sm:$0xff]  ;;  %14139 = vmatprep.subr.bf16.mxu0 %v18430_v25 }
 0x620   : > { %5277 = vst.msk [vmem:[#allocation4 + $0x3a] sm:$0xff] %vm5269_vm11, %v5208_v29  ;;  %v12366_v32 = vadd.f32 %v12365_v38, %v12364_v63  ;;  %5357 = vrot.lane.b32.xlu1 %v5322_v31, %s15613_s0  ;;  %5452 = vrot.lane.b32.xlu0 %v5418_v11, %s21487_s20  ;;  %5308 = vst.msk [vmem:[#allocation5 + $0x28] sm:$0xff] %vm5269_vm11, %v5292_v12  ;;  %v5324_v2 = vld [vmem:[#allocation4 + $0x29] sm:$0xff] }
 0x622   : > { %v5215_v27 = vadd.f32 %v12366_v32, %v18282_v58  ;;  %v12367_v20 = vpop.f32.mrb[178].mxu1  ;;  %14141 = vmatpush3.bf16.msra.mxu0 %v18430_v25  ;;  %v5421_v32 = vld [vmem:[#allocation4 + $0x2a] sm:$0xff] }
 0x623   : > { %v12368_v4 = vpop.f32.mrb[179].mxu1  ;;  %v5293_v47 = vld [vmem:[#allocation4 + $0x30] sm:$0xff] }
 0x624   : > { %5278 = vst.msk [vmem:[#allocation4 + $0x42] sm:$0xff] %vm5269_vm11, %v5215_v27  ;;  %v12369_v43 = vadd.f32 %v12368_v4, %v12367_v20  ;;  %5454 = vrot.lane.b32.xlu1 %v5419_v46, %s21487_s20  ;;  %5549 = vrot.lane.b32.xlu0 %v5515_v28, %s15615_s1  ;;  %5309 = vst.msk [vmem:[#allocation5 + $0x30] sm:$0xff] %vm5269_vm11, %v5293_v47  ;;  %v5518_v28 = vld [vmem:[#allocation4 + $0x2b] sm:$0xff] }
 0x626   : > { %v5222_v14 = vadd.f32 %v12369_v43, %v18285_v5  ;;  %v12370_v55 = vpop.f32.mrb[180].mxu1  ;;  %v5613_v5 = vld [vmem:[#allocation4 + $0x1c] sm:$0xff] }
 0x627   : > { %v12371_v58 = vpop.f32.mrb[181].mxu1  ;;  %v5294_v37 = vld [vmem:[#allocation4 + $0x38] sm:$0xff] }
 0x628   : > { %5279 = vst.msk [vmem:[#allocation4 + $0x4a] sm:$0xff] %vm5269_vm11, %v5222_v14  ;;  %v12372_v56 = vadd.f32 %v12371_v58, %v12370_v55  ;;  %5551 = vrot.lane.b32.xlu1 %v5516_v61, %s15615_s1  ;;  %5646 = vrot.lane.b32.xlu0 %v5612_v18, %s21489_s25  ;;  %5310 = vst.msk [vmem:[#allocation5 + $0x38] sm:$0xff] %vm5269_vm11, %v5294_v37  ;;  %v5325_v61 = vld [vmem:[#allocation4 + $0x31] sm:$0xff] }
 0x62a   : > { %v5229_v54 = vadd.f32 %v12372_v56, %v18288_v16  ;;  %v12373_v49 = vpop.f32.mrb[182].mxu1  ;;  %v5420_v16 = vld [vmem:[#allocation4 + $0x22] sm:$0xff] }
 0x62b   : > { %v12374_v17 = vpop.f32.mrb[183].mxu1  ;;  %v5295_v60 = vld [vmem:[#allocation4 + $0x40] sm:$0xff] }
 0x62c   : > { %5280 = vst.msk [vmem:[#allocation4 + $0x52] sm:$0xff] %vm5269_vm11, %v5229_v54  ;;  %v12375_v13 = vadd.f32 %v12374_v17, %v12373_v49  ;;  %5359 = vrot.lane.b32.xlu1 %v5323_v3, %s15613_s0  ;;  %5648 = vrot.lane.b32.xlu0 %v5613_v5, %s21489_s25  ;;  %5311 = vst.msk [vmem:[#allocation5 + $0x40] sm:$0xff] %vm5269_vm11, %v5295_v60  ;;  %v5326_v54 = vld [vmem:[#allocation4 + $0x39] sm:$0xff] }
 0x62d   : > { %v5422_v49 = vld [vmem:[#allocation4 + $0x32] sm:$0xff]  ;;  %v5423_v17 = vld [vmem:[#allocation4 + $0x3a] sm:$0xff] }
 0x62e   : > { %v5236_v34 = vadd.f32 %v12375_v13, %v18291_v0  ;;  %v12376_v23 = vpop.f32.mrb[184].mxu1  ;;  %v5517_v0 = vld [vmem:[#allocation4 + $0x23] sm:$0xff]  ;;  %v5519_v3 = vld [vmem:[#allocation4 + $0x33] sm:$0xff] }
 0x62f   : > { %v12377_v41 = vpop.f32.mrb[185].mxu1  ;;  %v5296_v63 = vld [vmem:[#allocation4 + $0x48] sm:$0xff]  ;;  %v5616_v13 = vld [vmem:[#allocation4 + $0x34] sm:$0xff] }
 0x630   : > { %5281 = vst.msk [vmem:[#allocation4 + $0x5a] sm:$0xff] %vm5269_vm11, %v5236_v34  ;;  %v12378_v29 = vadd.f32 %v12377_v41, %v12376_v23  ;;  %5361 = vrot.lane.b32.xlu1 %v5324_v2, %s15613_s0  ;;  %5456 = vrot.lane.b32.xlu0 %v5420_v16, %s21487_s20  ;;  %5312 = vst.msk [vmem:[#allocation5 + $0x48] sm:$0xff] %vm5269_vm11, %v5296_v63  ;;  %v5327_v34 = vld [vmem:[#allocation4 + $0x41] sm:$0xff]  ;;  %v5328_v41 = vld [vmem:[#allocation4 + $0x49] sm:$0xff] }
 0x631   : > { %v5617_v23 = vld [vmem:[#allocation4 + $0x3c] sm:$0xff]  ;;  %v5425_v16 = vld [vmem:[#allocation4 + $0x4a] sm:$0xff] }
 0x632   : > { %v5243_v38 = vadd.f32 %v12378_v29, %v18294_v8  ;;  %v12379_v31 = vpop.f32.mrb[186].mxu1  ;;  %v5614_v8 = vld [vmem:[#allocation4 + $0x24] sm:$0xff] }
 0x633   : > { %v12380_v11 = vpop.f32.mrb[187].mxu1  ;;  %v5297_v27 = vld [vmem:[#allocation4 + $0x50] sm:$0xff]  ;;  %v5424_v2 = vld [vmem:[#allocation4 + $0x42] sm:$0xff] }
 0x634   : > { %5282 = vst.msk [vmem:[#allocation4 + $0x62] sm:$0xff] %vm5269_vm11, %v5243_v38  ;;  %v12381_v12 = vadd.f32 %v12380_v11, %v12379_v31  ;;  %5458 = vrot.lane.b32.xlu1 %v5421_v32, %s21487_s20  ;;  %5553 = vrot.lane.b32.xlu0 %v5517_v0, %s15615_s1  ;;  %5313 = vst.msk [vmem:[#allocation5 + $0x50] sm:$0xff] %vm5269_vm11, %v5297_v27  ;;  %v5521_v29 = vld [vmem:[#allocation4 + $0x43] sm:$0xff]  ;;  %v5522_v63 = vld [vmem:[#allocation4 + $0x4b] sm:$0xff] }
 0x635   : > { %v5618_v38 = vld [vmem:[#allocation4 + $0x44] sm:$0xff]  ;;  %v5329_v31 = vld [vmem:[#allocation4 + $0x51] sm:$0xff] }
 0x636   : > { %v5250_v20 = vadd.f32 %v12381_v12, %v18297_v57  ;;  %v12382_v4 = vpop.f32.mrb[188].mxu1  ;;  %v5615_v57 = vld [vmem:[#allocation4 + $0x2c] sm:$0xff] }
 0x637   : > { %v12383_v46 = vpop.f32.mrb[189].mxu1  ;;  %v5298_v47 = vld [vmem:[#allocation4 + $0x58] sm:$0xff]  ;;  %v5619_v11 = vld [vmem:[#allocation4 + $0x4c] sm:$0xff] }
 0x638   : > { %5283 = vst.msk [vmem:[#allocation4 + $0x6a] sm:$0xff] %vm5269_vm11, %v5250_v20  ;;  %v12384_v43 = vadd.f32 %v12383_v46, %v12382_v4  ;;  %5555 = vrot.lane.b32.xlu1 %v5518_v28, %s15615_s1  ;;  %5650 = vrot.lane.b32.xlu0 %v5614_v8, %s21489_s25  ;;  %5314 = vst.msk [vmem:[#allocation5 + $0x58] sm:$0xff] %vm5269_vm11, %v5298_v47  ;;  %v5330_v32 = vld [vmem:[#allocation4 + $0x59] sm:$0xff] }
 0x639   : > { %v5426_v0 = vld [vmem:[#allocation4 + $0x52] sm:$0xff]  ;;  %v5427_v12 = vld [vmem:[#allocation4 + $0x5a] sm:$0xff] }
 0x63a   : > { %v5257_v14 = vadd.f32 %v12384_v43, %v18300_v50  ;;  %v12385_v55 = vpop.f32.mrb[190].mxu1  ;;  %v5523_v27 = vld [vmem:[#allocation4 + $0x53] sm:$0xff] }
 0x63b   : > { %v12386_v58 = vpop.f32.mrb[191].mxu1  ;;  %v5299_v56 = vld [vmem:[#allocation4 + $0x60] sm:$0xff]  ;;  %v5620_v4 = vld [vmem:[#allocation4 + $0x54] sm:$0xff] }
 0x63c   : > { %5284 = vst.msk [vmem:[#allocation4 + $0x72] sm:$0xff] %vm5269_vm11, %v5257_v14  ;;  %v12387_v18 = vadd.f32 %v12386_v58, %v12385_v55  ;;  %5363 = vrot.lane.b32.xlu1 %v5325_v61, %s15613_s0  ;;  %5652 = vrot.lane.b32.xlu0 %v5615_v57, %s21489_s25  ;;  %5315 = vst.msk [vmem:[#allocation5 + $0x60] sm:$0xff] %vm5269_vm11, %v5299_v56  ;;  %v5524_v20 = vld [vmem:[#allocation4 + $0x5b] sm:$0xff] }
 0x63d   : > { %v5331_v46 = vld [vmem:[#allocation4 + $0x61] sm:$0xff] }
 0x63e   : > { %v5264_v37 = vadd.f32 %v12387_v18, %v18303_v15  ;;  %v5520_v15 = vld [vmem:[#allocation4 + $0x3b] sm:$0xff] }
 0x63f   : > { %v5300_v50 = vld [vmem:[#allocation4 + $0x68] sm:$0xff]  ;;  %v5621_v28 = vld [vmem:[#allocation4 + $0x5c] sm:$0xff] }
 0x640   : > { %5285 = vst.msk [vmem:[#allocation4 + $0x7a] sm:$0xff] %vm5269_vm11, %v5264_v37  ;;  %5365 = vrot.lane.b32.xlu1 %v5326_v54, %s15613_s0  ;;  %5460 = vrot.lane.b32.xlu0 %v5422_v49, %s21487_s20  ;;  %5316 = vst.msk [vmem:[#allocation5 + $0x68] sm:$0xff] %vm5269_vm11, %v5300_v50  ;;  %v5332_v8 = vld [vmem:[#allocation4 + $0x69] sm:$0xff]  ;;  %v18516_v50 = vsub.f32 %v18316_v53, %v5790_v62 }
 0x641   : > { %v5428_v43 = vld [vmem:[#allocation4 + $0x62] sm:$0xff]  ;;  %v5429_v47 = vld [vmem:[#allocation4 + $0x6a] sm:$0xff] }
 0x642   : > { %v5525_v14 = vld [vmem:[#allocation4 + $0x63] sm:$0xff] }
 0x643   : > { %v5301_v5 = vld [vmem:[#allocation4 + $0x70] sm:$0xff]  ;;  %v5622_v58 = vld [vmem:[#allocation4 + $0x64] sm:$0xff] }
 0x644   : > { %5462 = vrot.lane.b32.xlu1 %v5423_v17, %s21487_s20  ;;  %5557 = vrot.lane.b32.xlu0 %v5519_v3, %s15615_s1  ;;  %5317 = vst.msk [vmem:[#allocation5 + $0x70] sm:$0xff] %vm5269_vm11, %v5301_v5  ;;  %v5526_v55 = vld [vmem:[#allocation4 + $0x6b] sm:$0xff]  ;;  %v18521_v17 = vsub.f32 %v18321_v45, %v5793_v10 }
 0x645   : > { %v5333_v61 = vld [vmem:[#allocation4 + $0x71] sm:$0xff] }
 0x646   : > { %v5623_v57 = vld [vmem:[#allocation4 + $0x6c] sm:$0xff]  ;;  %v6034_v53 = vand.u32 4294901760, %v18521_v17 }
 0x647   : > { %v5302_v60 = vld [vmem:[#allocation4 + $0x78] sm:$0xff] }
 0x648   : > { %5559 = vrot.lane.b32.xlu1 %v5520_v15, %s15615_s1  ;;  %5654 = vrot.lane.b32.xlu0 %v5616_v13, %s21489_s25  ;;  %5318 = vst.msk [vmem:[#allocation5 + $0x78] sm:$0xff] %vm5269_vm11, %v5302_v60  ;;  %v5334_v56 = vld [vmem:[#allocation4 + $0x79] sm:$0xff]  ;;  %v6027_v15 = vand.u32 4294901760, %v18516_v50  ;;  %v6035_v10 = vsub.f32 %v18521_v17, %v6034_v53  ;;  %vm15619_vm11 = vmmov 0  }
 0x649   : > { %v5430_v37 = vld [vmem:[#allocation4 + $0x72] sm:$0xff]  ;;  %v5431_v3 = vld [vmem:[#allocation4 + $0x7a] sm:$0xff] }
 0x64a   : > { %v5527_v5 = vld [vmem:[#allocation4 + $0x73] sm:$0xff]  ;;  %v6028_v45 = vsub.f32 %v18516_v50, %v6027_v15  ;;  %v5528_v60 = vld [vmem:[#allocation4 + $0x7b] sm:$0xff] }
 0x64c   : > { %5367 = vrot.lane.b32.xlu1 %v5327_v34, %s15613_s0  ;;  %5656 = vrot.lane.b32.xlu0 %v5617_v23, %s21489_s25  ;;  %v5624_v34 = vld [vmem:[#allocation4 + $0x74] sm:$0xff]  ;;  %v6029_v23 = vand.u32 4294901760, %v6028_v45 }
 0x650   : > { %5369 = vrot.lane.b32.xlu1 %v5328_v41, %s15613_s0  ;;  %5464 = vrot.lane.b32.xlu0 %v5424_v2, %s21487_s20  ;;  %v6036_v41 = vand.u32 4294901760, %v6035_v10 }
 0x654   : > { %5466 = vrot.lane.b32.xlu1 %v5425_v16, %s21487_s20  ;;  %5561 = vrot.lane.b32.xlu0 %v5521_v29, %s15615_s1  ;;  %v18539_v29 = vpack.c.bf16 %v6036_v41, %v6029_v23 }
 0x656   : > { %14143 = vmatprep.subr.bf16.mxu0 %v18539_v29 }
 0x658   : > { %5563 = vrot.lane.b32.xlu1 %v5522_v63, %s15615_s1  ;;  %5658 = vrot.lane.b32.xlu0 %v5618_v38, %s21489_s25  ;;  %v5625_v63 = vld [vmem:[#allocation4 + $0x7c] sm:$0xff] }
 0x65c   : > { %5371 = vrot.lane.b32.xlu1 %v5329_v31, %s15613_s0  ;;  %5660 = vrot.lane.b32.xlu0 %v5619_v11, %s21489_s25  ;;  %v18548_v11 = vsub.f32 %v18338_v1, %v5796_v48  ;;  %v18561_v1 = vsub.f32 %v18363_v59, %v5802_v21  ;;  %v18566_v48 = vsub.f32 %v18369_v9, %v5805_v30 }
 0x65e   : > { %v21437_v30 = vand.u32 4294901760, %v18561_v1 }
 0x660   : > { %5373 = vrot.lane.b32.xlu1 %v5330_v32, %s15613_s0  ;;  %5468 = vrot.lane.b32.xlu0 %v5426_v0, %s21487_s20  ;;  %v18555_v32 = vsub.f32 %v18345_v52, %v5799_v6 }
 0x662   : > { %v21442_v6 = vand.u32 4294901760, %v18555_v32 }
 0x664   : > { %5470 = vrot.lane.b32.xlu1 %v5427_v12, %s21487_s20  ;;  %5565 = vrot.lane.b32.xlu0 %v5523_v27, %s15615_s1 }
 0x668   : > { %5567 = vrot.lane.b32.xlu1 %v5524_v20, %s15615_s1  ;;  %5662 = vrot.lane.b32.xlu0 %v5620_v4, %s21489_s25  ;;  %v21443_v20 = vand.u32 4294901760, %v18548_v11 }
 0x66a   : > { %v6042_v9 = vsub.f32 %v18548_v11, %v21443_v20 }
 0x66c   : > { %5375 = vrot.lane.b32.xlu1 %v5331_v46, %s15613_s0  ;;  %5664 = vrot.lane.b32.xlu0 %v5621_v28, %s21489_s25 }
 0x670   : > { %5377 = vrot.lane.b32.xlu1 %v5332_v8, %s15613_s0  ;;  %5472 = vrot.lane.b32.xlu0 %v5428_v43, %s21487_s20  ;;  %v21436_v8 = vand.u32 4294901760, %v18566_v48 }
 0x674   : > { %5474 = vrot.lane.b32.xlu1 %v5429_v47, %s21487_s20  ;;  %5569 = vrot.lane.b32.xlu0 %v5525_v14, %s15615_s1  ;;  %v6049_v47 = vsub.f32 %v18555_v32, %v21442_v6  ;;  %v18591_v14 = vsub.f32 %v18388_v26, %v5808_v24  ;;  %v6056_v26 = vsub.f32 %v18561_v1, %v21437_v30  ;;  %v6043_v24 = vand.u32 4294901760, %v6042_v9 }
 0x678   : > { %5571 = vrot.lane.b32.xlu1 %v5526_v55, %s15615_s1  ;;  %5666 = vrot.lane.b32.xlu0 %v5622_v58, %s21489_s25  ;;  %v18596_v55 = vsub.f32 %v18394_v19, %v5811_v39  ;;  %v6063_v19 = vsub.f32 %v18566_v48, %v21436_v8  ;;  %v6050_v39 = vand.u32 4294901760, %v6049_v47  ;;  %v18658_v47 = vpack.c.bf16 %v18555_v32, %v18548_v11 }
 0x67a   : > { %v6064_v23 = vand.u32 4294901760, %v6063_v19 }
 0x67c   : > { %5379 = vrot.lane.b32.xlu1 %v5333_v61, %s15613_s0  ;;  %5668 = vrot.lane.b32.xlu0 %v5623_v57, %s21489_s25 }
 0x67e   : > { %v5352_v18 = vpop.permute.xlu0 %5351 }
 0x67f   : > { %5400 = vst.msk [vmem:[#allocation5] sm:$0xff] %vm5399_vm12, %v5352_v18 }
 0x680   : > { %5381 = vrot.lane.b32.xlu1 %v5334_v56, %s15613_s0  ;;  %5476 = vrot.lane.b32.xlu0 %v5430_v37, %s21487_s20  ;;  %s15618_s0 = smov 96  }
 0x682   : > { %v5354_v54 = vpop.permute.xlu1 %5353  ;;  %v5449_v49 = vpop.permute.xlu0 %5448 }
 0x683   : > { %5401 = vst.msk [vmem:[#allocation5 + $0x8] sm:$0xff] %vm5399_vm12, %v5354_v54  ;;  %v21431_v54 = vand.u32 4294901760, %v18591_v14 }
 0x684   : > { %5497 = vst.msk [vmem:[#allocation5] sm:$0xff] %vm5496_vm13, %v5449_v49  ;;  %5478 = vrot.lane.b32.xlu1 %v5431_v3, %s21487_s20  ;;  %5573 = vrot.lane.b32.xlu0 %v5527_v5, %s15615_s1  ;;  %v21430_v49 = vand.u32 4294901760, %v18596_v55  ;;  %s459_s20 = scalar_lea.vmem [#allocation10], %s458_s28 }
 0x686   : > { %v5451_v62 = vpop.permute.xlu1 %5450  ;;  %v5546_v13 = vpop.permute.xlu0 %5545 }
 0x687   : > { %5498 = vst.msk [vmem:[#allocation5 + $0x8] sm:$0xff] %vm5496_vm13, %v5451_v62  ;;  %v18621_v62 = vsub.f32 %v18413_v7, %v5814_v51  ;;  %v6070_v7 = vsub.f32 %v18591_v14, %v21431_v54 }
 0x688   : > { %5594 = vst.msk [vmem:[#allocation5] sm:$0xff] %vm5593_vm14, %v5546_v13  ;;  %5575 = vrot.lane.b32.xlu1 %v5528_v60, %s15615_s1  ;;  %5670 = vrot.lane.b32.xlu0 %v5624_v34, %s21489_s25  ;;  %v18626_v13 = vsub.f32 %v18418_v40, %v5817_v33  ;;  %v6057_v34 = vand.u32 4294901760, %v6056_v26  ;;  %v6077_v40 = vsub.f32 %v18596_v55, %v21430_v49  ;;  %s11629_s1 = scalar_lea.sflag [#allocation11], %s458_s28 }
 0x689   : > { %v14146_v33 = vpack.c.bf16 %v6050_v39, %v6043_v24  ;;  %v21425_v41 = vand.u32 4294901760, %v18621_v62 }
 0x68a   : > { %v5548_v2 = vpop.permute.xlu1 %5547  ;;  %v5643_v16 = vpop.permute.xlu0 %5642 }
 0x68b   : > { %5595 = vst.msk [vmem:[#allocation5 + $0x8] sm:$0xff] %vm5593_vm14, %v5548_v2  ;;  %v21424_v2 = vand.u32 4294901760, %v18626_v13 }
 0x68c   : > { %5691 = vst.msk [vmem:[#allocation5] sm:$0xff] %vm5690_vm15, %v5643_v16  ;;  %5672 = vrot.lane.b32.xlu1 %v5625_v63, %s21489_s25  ;;  %s11641_s25 = sshll.u32 %s459_s20, 4  ;;  %s21088_s25 = int_to_ptr.vmem [resolvable:$true] %s11641_s25 }
 0x68d   : > { %s15544_s22 = scalar_lea.vmem %s21088_s25, 16  ;;  %p15551_p0 = scmp.lt.s32.totalorder %s21088_s25, %s15549_s26 }
 0x68e   : > { %v5356_v38 = vpop.permute.xlu1 %5355  ;;  %v5645_v31 = vpop.permute.xlu0 %5644  ;;  %p15545_p11 = scmp.ne.s32.totalorder %s21088_s25, %s15544_s22 }
 0x68f   : > { %5402 = vst.msk [vmem:[#allocation5 + $0x10] sm:$0xff] %vm5399_vm12, %v5356_v38 }
 0x690   : > { %5692 = vst.msk [vmem:[#allocation5 + $0x8] sm:$0xff] %vm5690_vm15, %v5645_v31  ;;  %p15546_p12 = pnand %p15545_p11, %p15734_p5 }
 0x692   : > { %v5358_v0 = vpop.permute.xlu1 %5357  ;;  %v5453_v12 = vpop.permute.xlu0 %5452  ;;  %p15547_p13 = pneg %p15546_p12 }
 0x693   : > { %v5707_v27 = vld [vmem:[#allocation5] sm:$0xff]  ;;  %5403 = vst.msk [vmem:[#allocation5 + $0x18] sm:$0xff] %vm5399_vm12, %v5358_v0  ;;  %v6071_v0 = vand.u32 4294901760, %v6070_v7 }
 0x694   : > { %5499 = vst.msk [vmem:[#allocation5 + $0x10] sm:$0xff] %vm5496_vm13, %v5453_v12  ;;  %v5742_v52 = vsel %vm5740_vm0, %v5707_v27, 0  ;;  %v6078_v12 = vand.u32 4294901760, %v6077_v40 }
 0x695   : > { %v18572_v4 = vand.u32 4294901760, %v5742_v52 }
 0x696   : > { %v5455_v46 = vpop.permute.xlu1 %5454  ;;  %v5550_v28 = vpop.permute.xlu0 %5549 }
 0x697   : > { %v18575_v59 = vsub.f32 %v5742_v52, %v18572_v4  ;;  %v5708_v21 = vld [vmem:[#allocation5 + $0x8] sm:$0xff]  ;;  %5500 = vst.msk [vmem:[#allocation5 + $0x18] sm:$0xff] %vm5496_vm13, %v5455_v46  ;;  %v14150_v52 = vpack.c.bf16 %v6064_v23, %v6057_v34  ;;  %v6084_v46 = vsub.f32 %v18621_v62, %v21425_v41 }
 0x698   : > { %5596 = vst.msk [vmem:[#allocation5 + $0x10] sm:$0xff] %vm5593_vm14, %v5550_v28  ;;  %v5745_v43 = vsel %vm5740_vm0, %v5708_v21, 0  ;;  %v6091_v28 = vsub.f32 %v18626_v13, %v21424_v2 }
 0x699   : > { %v5866_v58 = vand.u32 4294901760, %v18575_v59  ;;  %v18599_v61 = vand.u32 4294901760, %v5745_v43  ;;  %v6085_v19 = vand.u32 4294901760, %v6084_v46 }
 0x69a   : > { %v5552_v57 = vpop.permute.xlu1 %5551  ;;  %v5647_v18 = vpop.permute.xlu0 %5646  ;;  %v6092_v24 = vand.u32 4294901760, %v6091_v28 }
 0x69b   : > { %v5867_v56 = vsub.f32 %v18575_v59, %v5866_v58  ;;  %v18605_v37 = vsub.f32 %v5745_v43, %v18599_v61  ;;  %5597 = vst.msk [vmem:[#allocation5 + $0x18] sm:$0xff] %vm5593_vm14, %v5552_v57 }
 0x69c   : > { %5693 = vst.msk [vmem:[#allocation5 + $0x10] sm:$0xff] %vm5690_vm15, %v5647_v18  ;;  %v14154_v18 = vpack.c.bf16 %v6078_v12, %v6071_v0  ;;  %v14158_v7 = vpack.c.bf16 %v6092_v24, %v6085_v19 }
 0x69d   : > { %v5868_v3 = vand.u32 4294901760, %v5867_v56  ;;  %v21440_v5 = vand.u32 4294901760, %v18605_v37 }
 0x69e   : > { %v5360_v45 = vpop.permute.xlu1 %5359  ;;  %v5649_v10 = vpop.permute.xlu0 %5648 }
 0x69f   : > { %13146 = vmatprep.mubr.f32.mxu0 %v5868_v3  ;;  %v5877_v60 = vsub.f32 %v18605_v37, %v21440_v5  ;;  %5404 = vst.msk [vmem:[#allocation5 + $0x20] sm:$0xff] %vm5399_vm12, %v5360_v45 }
 0x6a0   : > { %5694 = vst.msk [vmem:[#allocation5 + $0x18] sm:$0xff] %vm5690_vm15, %v5649_v10 }
 0x6a1   : > { %v5878_v51 = vand.u32 4294901760, %v5877_v60  ;;  %v18674_v60 = vpack.c.bf16 %v18566_v48, %v18561_v1 }
 0x6a2   : > { %v5362_v16 = vpop.permute.xlu1 %5361  ;;  %v5457_v63 = vpop.permute.xlu0 %5456 }
 0x6a3   : > { %13147 = vmatmul.mubr.f32.vlgmr.msra.gmra.mrb[32].mxu0 %v5878_v51  ;;  %v5709_v38 = vld [vmem:[#allocation5 + $0x10] sm:$0xff]  ;;  %5405 = vst.msk [vmem:[#allocation5 + $0x28] sm:$0xff] %vm5399_vm12, %v5362_v16  ;;  %v18684_v16 = vpack.c.bf16 %v18596_v55, %v18591_v14 }
 0x6a4   : > { %5501 = vst.msk [vmem:[#allocation5 + $0x20] sm:$0xff] %vm5496_vm13, %v5457_v63  ;;  %v5748_v31 = vsel %vm5740_vm0, %v5709_v38, 0  ;;  %14145 = vmatpush3.bf16.msra.mxu0 %v18539_v29  ;;  %v18690_v38 = vpack.c.bf16 %v18521_v17, %v18516_v50  ;;  %v22034_v50 = vand.u32 4294901760, %v18548_v11  ;;  %v22035_v17 = vand.u32 4294901760, %v18555_v32 }
 0x6a5   : > { %v18645_v27 = vand.u32 4294901760, %v5748_v31  ;;  %14147 = vmatprep.subr.bf16.mxu0 %v14146_v33  ;;  %v22042_v32 = vand.u32 4294901760, %v18591_v14 }
 0x6a6   : > { %v5459_v21 = vpop.permute.xlu1 %5458  ;;  %v5554_v9 = vpop.permute.xlu0 %5553 }
 0x6a7   : > { %v18654_v43 = vsub.f32 %v5748_v31, %v18645_v27  ;;  %v5710_v29 = vld [vmem:[#allocation5 + $0x18] sm:$0xff]  ;;  %5502 = vst.msk [vmem:[#allocation5 + $0x28] sm:$0xff] %vm5496_vm13, %v5459_v21 }
 0x6a8   : > { %5598 = vst.msk [vmem:[#allocation5 + $0x20] sm:$0xff] %vm5593_vm14, %v5554_v9  ;;  %v5751_v57 = vsel %vm5740_vm0, %v5710_v29, 0  ;;  %14149 = vmatpush3.bf16.msra.mxu0 %v14146_v33 }
 0x6a9   : > { %v21439_v56 = vand.u32 4294901760, %v18654_v43  ;;  %v18664_v26 = vand.u32 4294901760, %v5751_v57  ;;  %14151 = vmatprep.subr.bf16.mxu0 %v14150_v52 }
 0x6aa   : > { %v5556_v39 = vpop.permute.xlu1 %5555  ;;  %v5651_v3 = vpop.permute.xlu0 %5650 }
 0x6ab   : > { %v5887_v45 = vsub.f32 %v18654_v43, %v21439_v56  ;;  %v18670_v10 = vsub.f32 %v5751_v57, %v18664_v26  ;;  %5599 = vst.msk [vmem:[#allocation5 + $0x28] sm:$0xff] %vm5593_vm14, %v5556_v39 }
 0x6ac   : > { %5695 = vst.msk [vmem:[#allocation5 + $0x20] sm:$0xff] %vm5690_vm15, %v5651_v3  ;;  %14153 = vmatpush3.bf16.msra.mxu0 %v14150_v52  ;;  %v18694_v52 = vpack.c.bf16 %v18626_v13, %v18621_v62 }
 0x6ad   : > { %v5888_v34 = vand.u32 4294901760, %v5887_v45  ;;  %v21434_v23 = vand.u32 4294901760, %v18670_v10  ;;  %14155 = vmatprep.subr.bf16.mxu0 %v14154_v18 }
 0x6ae   : > { %v5364_v40 = vpop.permute.xlu1 %5363  ;;  %v5653_v51 = vpop.permute.xlu0 %5652 }
 0x6af   : > { %13149 = vmatprep.mubr.f32.mxu0 %v5888_v34  ;;  %v5897_v33 = vsub.f32 %v18670_v10, %v21434_v23  ;;  %5406 = vst.msk [vmem:[#allocation5 + $0x30] sm:$0xff] %vm5399_vm12, %v5364_v40 }
 0x6b0   : > { %5696 = vst.msk [vmem:[#allocation5 + $0x28] sm:$0xff] %vm5690_vm15, %v5653_v51  ;;  %14157 = vmatpush3.bf16.msra.mxu0 %v14154_v18 }
 0x6b1   : > { %v5898_v63 = vand.u32 4294901760, %v5897_v33  ;;  %14159 = vmatprep.subr.bf16.mxu0 %v14158_v7 }
 0x6b2   : > { %v5366_v31 = vpop.permute.xlu1 %5365  ;;  %v5461_v0 = vpop.permute.xlu0 %5460 }
 0x6b3   : > { %13150 = vmatmul.mubr.f32.gmra.mrb[34].mxu0 %v5898_v63  ;;  %v5711_v12 = vld [vmem:[#allocation5 + $0x20] sm:$0xff]  ;;  %5407 = vst.msk [vmem:[#allocation5 + $0x38] sm:$0xff] %vm5399_vm12, %v5366_v31 }
 0x6b4   : > { %5503 = vst.msk [vmem:[#allocation5 + $0x30] sm:$0xff] %vm5496_vm13, %v5461_v0  ;;  %v5754_v46 = vsel %vm5740_vm0, %v5711_v12, 0  ;;  %14161 = vmatpush3.bf16.msra.mxu0 %v14158_v7 }
 0x6b5   : > { %v18699_v28 = vand.u32 4294901760, %v5754_v46  ;;  %14163 = vmatprep.subr.bf16.mxu0 %v18690_v38 }
 0x6b6   : > { %v5463_v21 = vpop.permute.xlu1 %5462  ;;  %v5558_v9 = vpop.permute.xlu0 %5557 }
 0x6b7   : > { %v18703_v29 = vsub.f32 %v5754_v46, %v18699_v28  ;;  %v5712_v57 = vld [vmem:[#allocation5 + $0x28] sm:$0xff]  ;;  %5504 = vst.msk [vmem:[#allocation5 + $0x38] sm:$0xff] %vm5496_vm13, %v5463_v21 }
 0x6b8   : > { %5600 = vst.msk [vmem:[#allocation5 + $0x30] sm:$0xff] %vm5593_vm14, %v5558_v9  ;;  %v5757_v18 = vsel %vm5740_vm0, %v5712_v57, 0 }
 0x6b9   : > { %v21433_v19 = vand.u32 4294901760, %v18703_v29  ;;  %v18709_v24 = vand.u32 4294901760, %v5757_v18  ;;  %v22041_v11 = vand.u32 4294901760, %v18703_v29 }
 0x6ba   : > { %v5560_v39 = vpop.permute.xlu1 %5559  ;;  %v5655_v3 = vpop.permute.xlu0 %5654 }
 0x6bb   : > { %v5907_v45 = vsub.f32 %v18703_v29, %v21433_v19  ;;  %v18715_v34 = vsub.f32 %v5757_v18, %v18709_v24  ;;  %5601 = vst.msk [vmem:[#allocation5 + $0x38] sm:$0xff] %vm5593_vm14, %v5560_v39 }
 0x6bc   : > { %5697 = vst.msk [vmem:[#allocation5 + $0x30] sm:$0xff] %vm5690_vm15, %v5655_v3 }
 0x6bd   : > { %v5908_v7 = vand.u32 4294901760, %v5907_v45  ;;  %v21428_v40 = vand.u32 4294901760, %v18715_v34 }
 0x6be   : > { %v5368_v51 = vpop.permute.xlu1 %5367  ;;  %v5657_v33 = vpop.permute.xlu0 %5656 }
 0x6bf   : > { %13152 = vmatprep.mubr.f32.mxu0 %v5908_v7  ;;  %v5917_v63 = vsub.f32 %v18715_v34, %v21428_v40  ;;  %5408 = vst.msk [vmem:[#allocation5 + $0x40] sm:$0xff] %vm5399_vm12, %v5368_v51 }
 0x6c0   : > { %5698 = vst.msk [vmem:[#allocation5 + $0x38] sm:$0xff] %vm5690_vm15, %v5657_v33 }
 0x6c1   : > { %v5918_v31 = vand.u32 4294901760, %v5917_v63 }
 0x6c2   : > { %v5370_v0 = vpop.permute.xlu1 %5369  ;;  %v5465_v12 = vpop.permute.xlu0 %5464 }
 0x6c3   : > { %13153 = vmatmul.mubr.f32.gmra.mrb[36].mxu0 %v5918_v31  ;;  %v5713_v46 = vld [vmem:[#allocation5 + $0x30] sm:$0xff]  ;;  %5409 = vst.msk [vmem:[#allocation5 + $0x48] sm:$0xff] %vm5399_vm12, %v5370_v0 }
 0x6c4   : > { %5505 = vst.msk [vmem:[#allocation5 + $0x40] sm:$0xff] %vm5496_vm13, %v5465_v12  ;;  %v5760_v21 = vsel %vm5740_vm0, %v5713_v46, 0 }
 0x6c5   : > { %v18728_v9 = vand.u32 4294901760, %v5760_v21 }
 0x6c6   : > { %v5467_v57 = vpop.permute.xlu1 %5466  ;;  %v5562_v18 = vpop.permute.xlu0 %5561 }
 0x6c7   : > { %v18731_v39 = vsub.f32 %v5760_v21, %v18728_v9  ;;  %v5714_v3 = vld [vmem:[#allocation5 + $0x38] sm:$0xff]  ;;  %5506 = vst.msk [vmem:[#allocation5 + $0x48] sm:$0xff] %vm5496_vm13, %v5467_v57 }
 0x6c8   : > { %5602 = vst.msk [vmem:[#allocation5 + $0x40] sm:$0xff] %vm5593_vm14, %v5562_v18  ;;  %v5763_v45 = vsel %vm5740_vm0, %v5714_v3, 0 }
 0x6c9   : > { %v21427_v7 = vand.u32 4294901760, %v18731_v39  ;;  %v18737_v51 = vand.u32 4294901760, %v5763_v45 }
 0x6ca   : > { %v5564_v33 = vpop.permute.xlu1 %5563  ;;  %v5659_v63 = vpop.permute.xlu0 %5658 }
 0x6cb   : > { %v5927_v31 = vsub.f32 %v18731_v39, %v21427_v7  ;;  %v18743_v0 = vsub.f32 %v5763_v45, %v18737_v51  ;;  %5603 = vst.msk [vmem:[#allocation5 + $0x48] sm:$0xff] %vm5593_vm14, %v5564_v33 }
 0x6cc   : > { %5699 = vst.msk [vmem:[#allocation5 + $0x40] sm:$0xff] %vm5690_vm15, %v5659_v63 }
 0x6cd   : > { %v5928_v12 = vand.u32 4294901760, %v5927_v31  ;;  %v21426_v46 = vand.u32 4294901760, %v18743_v0 }
 0x6ce   : > { %v5372_v21 = vpop.permute.xlu1 %5371  ;;  %v5661_v57 = vpop.permute.xlu0 %5660 }
 0x6cf   : > { %13155 = vmatprep.mubr.f32.mxu0 %v5928_v12  ;;  %v5937_v18 = vsub.f32 %v18743_v0, %v21426_v46  ;;  %5410 = vst.msk [vmem:[#allocation5 + $0x50] sm:$0xff] %vm5399_vm12, %v5372_v21 }
 0x6d0   : > { %5700 = vst.msk [vmem:[#allocation5 + $0x48] sm:$0xff] %vm5690_vm15, %v5661_v57 }
 0x6d1   : > { %v5938_v3 = vand.u32 4294901760, %v5937_v18 }
 0x6d2   : > { %v5374_v45 = vpop.permute.xlu1 %5373  ;;  %v5469_v2 = vpop.permute.xlu0 %5468 }
 0x6d3   : > { %13156 = vmatmul.mubr.f32.gmra.mrb[38].mxu0 %v5938_v3  ;;  %v5715_v33 = vld [vmem:[#allocation5 + $0x40] sm:$0xff]  ;;  %5411 = vst.msk [vmem:[#allocation5 + $0x58] sm:$0xff] %vm5399_vm12, %v5374_v45 }
 0x6d4   : > { %5507 = vst.msk [vmem:[#allocation5 + $0x50] sm:$0xff] %vm5496_vm13, %v5469_v2  ;;  %v5766_v63 = vsel %vm5740_vm0, %v5715_v33, 0 }
 0x6d5   : > { %v18756_v31 = vand.u32 4294901760, %v5766_v63 }
 0x6d6   : > { %v5471_v12 = vpop.permute.xlu1 %5470  ;;  %v5566_v41 = vpop.permute.xlu0 %5565 }
 0x6d7   : > { %v18759_v46 = vsub.f32 %v5766_v63, %v18756_v31  ;;  %v5716_v21 = vld [vmem:[#allocation5 + $0x48] sm:$0xff]  ;;  %5508 = vst.msk [vmem:[#allocation5 + $0x58] sm:$0xff] %vm5496_vm13, %v5471_v12 }
 0x6d8   : > { %5604 = vst.msk [vmem:[#allocation5 + $0x50] sm:$0xff] %vm5593_vm14, %v5566_v41  ;;  %v5769_v57 = vsel %vm5740_vm0, %v5716_v21, 0 }
 0x6d9   : > { %v21429_v18 = vand.u32 4294901760, %v18759_v46  ;;  %v18765_v3 = vand.u32 4294901760, %v5769_v57  ;;  %v22049_v14 = vand.u32 4294901760, %v18759_v46 }
 0x6da   : > { %v5568_v2 = vpop.permute.xlu1 %5567  ;;  %v5663_v45 = vpop.permute.xlu0 %5662 }
 0x6db   : > { %v5947_v33 = vsub.f32 %v18759_v46, %v21429_v18  ;;  %v18771_v63 = vsub.f32 %v5769_v57, %v18765_v3  ;;  %5605 = vst.msk [vmem:[#allocation5 + $0x58] sm:$0xff] %vm5593_vm14, %v5568_v2 }
 0x6dc   : > { %5701 = vst.msk [vmem:[#allocation5 + $0x50] sm:$0xff] %vm5690_vm15, %v5663_v45 }
 0x6dd   : > { %v5948_v41 = vand.u32 4294901760, %v5947_v33  ;;  %v21432_v12 = vand.u32 4294901760, %v18771_v63 }
 0x6de   : > { %v5376_v21 = vpop.permute.xlu1 %5375  ;;  %v5665_v7 = vpop.permute.xlu0 %5664 }
 0x6df   : > { %13158 = vmatprep.mubr.f32.mxu0 %v5948_v41  ;;  %v5957_v40 = vsub.f32 %v18771_v63, %v21432_v12  ;;  %5412 = vst.msk [vmem:[#allocation5 + $0x60] sm:$0xff] %vm5399_vm12, %v5376_v21 }
 0x6e0   : > { %5702 = vst.msk [vmem:[#allocation5 + $0x58] sm:$0xff] %vm5690_vm15, %v5665_v7 }
 0x6e1   : > { %v5958_v57 = vand.u32 4294901760, %v5957_v40 }
 0x6e2   : > { %v5378_v18 = vpop.permute.xlu1 %5377  ;;  %v5473_v49 = vpop.permute.xlu0 %5472 }
 0x6e3   : > { %13159 = vmatmul.mubr.f32.gmra.mrb[40].mxu0 %v5958_v57  ;;  %v5717_v2 = vld [vmem:[#allocation5 + $0x50] sm:$0xff]  ;;  %5413 = vst.msk [vmem:[#allocation5 + $0x68] sm:$0xff] %vm5399_vm12, %v5378_v18 }
 0x6e4   : > { %5509 = vst.msk [vmem:[#allocation5 + $0x60] sm:$0xff] %vm5496_vm13, %v5473_v49  ;;  %v5772_v45 = vsel %vm5740_vm0, %v5717_v2, 0 }
 0x6e5   : > { %v18784_v33 = vand.u32 4294901760, %v5772_v45 }
 0x6e6   : > { %v5475_v41 = vpop.permute.xlu1 %5474  ;;  %v5570_v54 = vpop.permute.xlu0 %5569 }
 0x6e7   : > { %v18787_v12 = vsub.f32 %v5772_v45, %v18784_v33  ;;  %v5718_v21 = vld [vmem:[#allocation5 + $0x58] sm:$0xff]  ;;  %5510 = vst.msk [vmem:[#allocation5 + $0x68] sm:$0xff] %vm5496_vm13, %v5475_v41 }
 0x6e8   : > { %5606 = vst.msk [vmem:[#allocation5 + $0x60] sm:$0xff] %vm5593_vm14, %v5570_v54  ;;  %v5775_v40 = vsel %vm5740_vm0, %v5718_v21, 0 }
 0x6e9   : > { %v21435_v7 = vand.u32 4294901760, %v18787_v12  ;;  %v18793_v18 = vand.u32 4294901760, %v5775_v40 }
 0x6ea   : > { %v5572_v49 = vpop.permute.xlu1 %5571  ;;  %v5667_v57 = vpop.permute.xlu0 %5666 }
 0x6eb   : > { %v5967_v2 = vsub.f32 %v18787_v12, %v21435_v7  ;;  %v18799_v45 = vsub.f32 %v5775_v40, %v18793_v18  ;;  %5607 = vst.msk [vmem:[#allocation5 + $0x68] sm:$0xff] %vm5593_vm14, %v5572_v49 }
 0x6ec   : > { %5703 = vst.msk [vmem:[#allocation5 + $0x60] sm:$0xff] %vm5690_vm15, %v5667_v57 }
 0x6ed   : > { %v5968_v54 = vand.u32 4294901760, %v5967_v2  ;;  %v21438_v41 = vand.u32 4294901760, %v18799_v45 }
 0x6ee   : > { %v5380_v21 = vpop.permute.xlu1 %5379  ;;  %v5669_v19 = vpop.permute.xlu0 %5668 }
 0x6ef   : > { %13161 = vmatprep.mubr.f32.mxu0 %v5968_v54  ;;  %v5977_v23 = vsub.f32 %v18799_v45, %v21438_v41  ;;  %5414 = vst.msk [vmem:[#allocation5 + $0x70] sm:$0xff] %vm5399_vm12, %v5380_v21 }
 0x6f0   : > { %5704 = vst.msk [vmem:[#allocation5 + $0x68] sm:$0xff] %vm5690_vm15, %v5669_v19 }
 0x6f1   : > { %v5978_v40 = vand.u32 4294901760, %v5977_v23 }
 0x6f2   : > { %v5382_v7 = vpop.permute.xlu1 %5381  ;;  %v5477_v8 = vpop.permute.xlu0 %5476 }
 0x6f3   : > { %13162 = vmatmul.mubr.f32.gmra.mrb[42].mxu0 %v5978_v40  ;;  %v5719_v49 = vld [vmem:[#allocation5 + $0x60] sm:$0xff]  ;;  %5415 = vst.msk [vmem:[#allocation5 + $0x78] sm:$0xff] %vm5399_vm12, %v5382_v7  ;;  %vm11011_vm12 = vcmask 785408  }
 0x6f4   : > { %5511 = vst.msk [vmem:[#allocation5 + $0x70] sm:$0xff] %vm5496_vm13, %v5477_v8  ;;  %v5778_v57 = vsel %vm5740_vm0, %v5719_v49, 0 }
 0x6f5   : > { %v18812_v2 = vand.u32 4294901760, %v5778_v57 }
 0x6f6   : > { %v5479_v54 = vpop.permute.xlu1 %5478  ;;  %v5574_v30 = vpop.permute.xlu0 %5573 }
 0x6f7   : > { %v18815_v41 = vsub.f32 %v5778_v57, %v18812_v2  ;;  %v5720_v21 = vld [vmem:[#allocation5 + $0x68] sm:$0xff]  ;;  %5512 = vst.msk [vmem:[#allocation5 + $0x78] sm:$0xff] %vm5496_vm13, %v5479_v54  ;;  %vm11626_vm13 = vcmask 73728  }
 0x6f8   : > { %5608 = vst.msk [vmem:[#allocation5 + $0x70] sm:$0xff] %vm5593_vm14, %v5574_v30  ;;  %v5781_v23 = vsel %vm5740_vm0, %v5720_v21, 0 }
 0x6f9   : > { %v21441_v19 = vand.u32 4294901760, %v18815_v41  ;;  %v18821_v7 = vand.u32 4294901760, %v5781_v23 }
 0x6fa   : > { %v5576_v8 = vpop.permute.xlu1 %5575  ;;  %v5671_v40 = vpop.permute.xlu0 %5670 }
 0x6fb   : > { %v5987_v49 = vsub.f32 %v18815_v41, %v21441_v19  ;;  %v18827_v57 = vsub.f32 %v5781_v23, %v18821_v7  ;;  %5609 = vst.msk [vmem:[#allocation5 + $0x78] sm:$0xff] %vm5593_vm14, %v5576_v8 }
 0x6fc   : > { %5705 = vst.msk [vmem:[#allocation5 + $0x70] sm:$0xff] %vm5690_vm15, %v5671_v40 }
 0x6fd   : > { %v5988_v30 = vand.u32 4294901760, %v5987_v49  ;;  %v5996_v54 = vand.u32 4294901760, %v18827_v57 }
 0x6fe   : > { %v5673_v21 = vpop.permute.xlu1 %5672 }
 0x6ff   : > { %13164 = vmatprep.mubr.f32.mxu0 %v5988_v30  ;;  %v5997_v56 = vsub.f32 %v18827_v57, %v5996_v54  ;;  %5706 = vst.msk [vmem:[#allocation5 + $0x78] sm:$0xff] %vm5690_vm15, %v5673_v21 }
 0x701   : > { %v5998_v5 = vand.u32 4294901760, %v5997_v56 }
 0x703   : > { %13165 = vmatmul.mubr.f32.gmra.mrb[44].mxu0 %v5998_v5  ;;  %v5721_v19 = vld [vmem:[#allocation5 + $0x70] sm:$0xff] }
 0x704   : > { %v5784_v23 = vsel %vm5740_vm0, %v5721_v19, 0 }
 0x705   : > { %v18837_v6 = vand.u32 4294901760, %v5784_v23 }
 0x706   : > { %v5722_v40 = vld [vmem:[#allocation5 + $0x78] sm:$0xff] }
 0x707   : > { %v18840_v8 = vsub.f32 %v5784_v23, %v18837_v6  ;;  %v5787_v49 = vsel %vm5740_vm0, %v5722_v40, 0 }
 0x708   : > { %v18844_v20 = vand.u32 4294901760, %v5787_v49 }
 0x709   : > { %v6006_v30 = vand.u32 4294901760, %v18840_v8 }
 0x70a   : > { %v18850_v5 = vsub.f32 %v5787_v49, %v18844_v20  ;;  %v22048_v49 = vand.u32 4294901760, %v18743_v0 }
 0x70b   : > { %v6007_v56 = vsub.f32 %v18840_v8, %v6006_v30 }
 0x70c   : > { %v6016_v21 = vand.u32 4294901760, %v18850_v5 }
 0x70d   : > { %v6008_v19 = vand.u32 4294901760, %v6007_v56 }
 0x70e   : > { %v6017_v23 = vsub.f32 %v18850_v5, %v6016_v21 }
 0x70f   : > { %13167 = vmatprep.mubr.f32.mxu0 %v6008_v19 }
 0x710   : > { %v6018_v40 = vand.u32 4294901760, %v6017_v23 }
 0x712   : > { %13168 = vmatmul.mubr.f32.gmra.mrb[46].mxu0 %v6018_v40 }
 0x713   : > { %13190 = vmatprep.mubr.f32.mxu0 %v18572_v4 }
 0x716   : > { %13191 = vmatmul.mubr.f32.vlgmr.msra.gmra.mrb[32].mxu0 %v18599_v61 }
 0x717   : > { %13193 = vmatprep.mubr.f32.mxu0 %v18645_v27  ;;  %14165 = vmatpush3.bf16.msra.mxu0 %v18690_v38  ;;  %v22039_v38 = vand.u32 4294901760, %v18566_v48  ;;  %v22046_v48 = vand.u32 4294901760, %v18621_v62  ;;  %v22052_v62 = vand.u32 4294901760, %v18799_v45 }
 0x718   : > { %14167 = vmatprep.subr.bf16.mxu0 %v18658_v47 }
 0x71a   : > { %13194 = vmatmul.mubr.f32.gmra.mrb[34].mxu0 %v18664_v26 }
 0x71b   : > { %13196 = vmatprep.mubr.f32.mxu0 %v18699_v28  ;;  %14169 = vmatpush3.bf16.msra.mxu0 %v18658_v47  ;;  %v14202_v47 = vpack.c.bf16 %v6034_v53, %v6027_v15  ;;  %v14206_v15 = vpack.c.bf16 %v22035_v17, %v22034_v50  ;;  %v22036_v53 = vand.u32 4294901760, %v18605_v37 }
 0x71c   : > { %14171 = vmatprep.subr.bf16.mxu0 %v18674_v60 }
 0x71e   : > { %13197 = vmatmul.mubr.f32.gmra.mrb[36].mxu0 %v18709_v24 }
 0x71f   : > { %13199 = vmatprep.mubr.f32.mxu0 %v18728_v9  ;;  %14173 = vmatpush3.bf16.msra.mxu0 %v18674_v60  ;;  %v22037_v60 = vand.u32 4294901760, %v18654_v43 }
 0x720   : > { %14175 = vmatprep.subr.bf16.mxu0 %v18684_v16 }
 0x722   : > { %13200 = vmatmul.mubr.f32.gmra.mrb[38].mxu0 %v18737_v51 }
 0x723   : > { %13202 = vmatprep.mubr.f32.mxu0 %v18756_v31  ;;  %14177 = vmatpush3.bf16.msra.mxu0 %v18684_v16  ;;  %v22038_v16 = vand.u32 4294901760, %v18561_v1  ;;  %v22045_v1 = vand.u32 4294901760, %v18731_v39 }
 0x724   : > { %14179 = vmatprep.subr.bf16.mxu0 %v18694_v52 }
 0x726   : > { %13203 = vmatmul.mubr.f32.gmra.mrb[40].mxu0 %v18765_v3 }
 0x727   : > { %13205 = vmatprep.mubr.f32.mxu0 %v18784_v33  ;;  %14181 = vmatpush3.bf16.msra.mxu0 %v18694_v52  ;;  %v14210_v52 = vpack.c.bf16 %v22039_v38, %v22038_v16 }
 0x728   : > { %14183 = vmatprep.subr.bf16.mxu0 %v18330_v42 }
 0x72a   : > { %13206 = vmatmul.mubr.f32.gmra.mrb[42].mxu0 %v18793_v18 }
 0x72b   : > { %13208 = vmatprep.mubr.f32.mxu0 %v18812_v2 }
 0x72e   : > { %13209 = vmatmul.mubr.f32.gmra.mrb[44].mxu0 %v18821_v7 }
 0x72f   : > { %13211 = vmatprep.mubr.f32.mxu0 %v18837_v6 }
 0x732   : > { %13212 = vmatmul.mubr.f32.gmra.mrb[46].mxu0 %v18844_v20 }
 0x733   : > { %13234 = vmatprep.mubr.f32.mxu0 %v18575_v59  ;;  %v22040_v59 = vand.u32 4294901760, %v18670_v10 }
 0x736   : > { %13235 = vmatmul.mubr.f32.vlgmr.msra.gmra.mrb[32].mxu0 %v18605_v37 }
 0x737   : > { %13237 = vmatprep.mubr.f32.mxu0 %v18654_v43  ;;  %14185 = vmatpush3.bf16.msra.mxu0 %v18330_v42  ;;  %v22044_v43 = vand.u32 4294901760, %v18715_v34 }
 0x738   : > { %14187 = vmatprep.subr.bf16.mxu0 %v18358_v22 }
 0x73a   : > { %13238 = vmatmul.mubr.f32.gmra.mrb[34].mxu0 %v18670_v10  ;;  %v22047_v10 = vand.u32 4294901760, %v18626_v13  ;;  %v22053_v13 = vand.u32 4294901760, %v18815_v41 }
 0x73b   : > { %13240 = vmatprep.mubr.f32.mxu0 %v18703_v29  ;;  %14189 = vmatpush3.bf16.msra.mxu0 %v18358_v22 }
 0x73c   : > { %14191 = vmatprep.subr.bf16.mxu0 %v18383_v36  ;;  %v14218_v29 = vpack.c.bf16 %v22047_v10, %v22046_v48 }
 0x73e   : > { %13241 = vmatmul.mubr.f32.gmra.mrb[36].mxu0 %v18715_v34  ;;  %v22051_v34 = vand.u32 4294901760, %v18787_v12 }
 0x73f   : > { %13243 = vmatprep.mubr.f32.mxu0 %v18731_v39  ;;  %14193 = vmatpush3.bf16.msra.mxu0 %v18383_v36 }
 0x740   : > { %14195 = vmatprep.subr.bf16.mxu0 %v18408_v35 }
 0x742   : > { %13244 = vmatmul.mubr.f32.gmra.mrb[38].mxu0 %v18743_v0 }
 0x743   : > { %13246 = vmatprep.mubr.f32.mxu0 %v18759_v46  ;;  %14197 = vmatpush3.bf16.msra.mxu0 %v18408_v35  ;;  %v7097_v46 = vld [vmem:[%s21138_s10 + $0x28] sm:$0xff] }
 0x744   : > { %14199 = vmatprep.subr.bf16.mxu0 %v18430_v25 }
 0x746   : > { %13247 = vmatmul.mubr.f32.gmra.mrb[40].mxu0 %v18771_v63 }
 0x747   : > { %13249 = vmatprep.mubr.f32.mxu0 %v18787_v12  ;;  %14201 = vmatpush3.bf16.msra.mxu0 %v18430_v25  ;;  %v7116_v12 = vsel %vm3513_vm8, %v7097_v46, 0 }
 0x748   : > { %14203 = vmatprep.subr.bf16.mxu0 %v14202_v47 }
 0x74a   : > { %13250 = vmatmul.mubr.f32.gmra.mrb[42].mxu0 %v18799_v45 }
 0x74b   : > { %13252 = vmatprep.mubr.f32.mxu0 %v18815_v41 }
 0x74e   : > { %13253 = vmatmul.mubr.f32.gmra.mrb[44].mxu0 %v18827_v57  ;;  %v19060_v57 = vand.u32 4294901760, %v7116_v12 }
 0x74f   : > { %13255 = vmatprep.mubr.f32.mxu0 %v18840_v8  ;;  %v7099_v8 = vld [vmem:[%s21138_s10 + $0x38] sm:$0xff] }
 0x750   : > { %v7122_v50 = vsel %vm3513_vm8, %v7099_v8, 0 }
 0x752   : > { %13256 = vmatmul.mubr.f32.gmra.mrb[46].mxu0 %v18850_v5 }
 0x753   : > { %13278 = vmatprep.mubr.f32.mxu0 %v5866_v58  ;;  %v22043_v58 = vand.u32 4294901760, %v18596_v55  ;;  %v22050_v55 = vand.u32 4294901760, %v18771_v63 }
 0x755   : > { %v14214_v37 = vpack.c.bf16 %v22043_v58, %v22042_v32 }
 0x756   : > { %13279 = vmatmul.mubr.f32.vlgmr.msra.gmra.mrb[32].mxu0 %v22036_v53 }
 0x757   : > { %13281 = vmatprep.mubr.f32.mxu0 %v22037_v60  ;;  %14205 = vmatpush3.bf16.msra.mxu0 %v14202_v47  ;;  %v19082_v60 = vsub.f32 %v7116_v12, %v19060_v57 }
 0x758   : > { %14207 = vmatprep.subr.bf16.mxu0 %v14206_v15 }
 0x759   : > { %22059 = vst [vmem:[#allocation18_spill] sm:$0xff] %v19082_v60 }
 0x75a   : > { %13282 = vmatmul.mubr.f32.gmra.mrb[34].mxu0 %v22040_v59 }
 0x75b   : > { %13284 = vmatprep.mubr.f32.mxu0 %v22041_v11  ;;  %14209 = vmatpush3.bf16.msra.mxu0 %v14206_v15 }
 0x75c   : > { %14211 = vmatprep.subr.bf16.mxu0 %v14210_v52 }
 0x75e   : > { %13285 = vmatmul.mubr.f32.gmra.mrb[36].mxu0 %v22044_v43 }
 0x75f   : > { %13287 = vmatprep.mubr.f32.mxu0 %v22045_v1  ;;  %14213 = vmatpush3.bf16.msra.mxu0 %v14210_v52 }
 0x760   : > { %14215 = vmatprep.subr.bf16.mxu0 %v14214_v37 }
 0x762   : > { %13288 = vmatmul.mubr.f32.gmra.mrb[38].mxu0 %v22048_v49 }
 0x763   : > { %13290 = vmatprep.mubr.f32.mxu0 %v22049_v14  ;;  %14217 = vmatpush3.bf16.msra.mxu0 %v14214_v37  ;;  %v19096_v37 = vand.u32 4294901760, %v7122_v50 }
 0x764   : > { %14219 = vmatprep.subr.bf16.mxu0 %v14218_v29 }
 0x766   : > { %13291 = vmatmul.mubr.f32.gmra.mrb[40].mxu0 %v22050_v55  ;;  %v21445_v55 = vand.u32 4294901760, %v19082_v60 }
 0x767   : > { %13293 = vmatprep.mubr.f32.mxu0 %v22051_v34  ;;  %14221 = vmatpush3.bf16.msra.mxu0 %v14218_v29 }
 0x768   : > { %14223 = vmatprep.subr.bf16.mxu0 %v18330_v42 }
 0x76a   : > { %13294 = vmatmul.mubr.f32.gmra.mrb[42].mxu0 %v22052_v62 }
 0x76b   : > { %13296 = vmatprep.mubr.f32.mxu0 %v22053_v13 }
 0x76e   : > { %13297 = vmatmul.mubr.f32.gmra.mrb[44].mxu0 %v5996_v54 }
 0x76f   : > { %13299 = vmatprep.mubr.f32.mxu0 %v6006_v30 }
 0x772   : > { %13300 = vmatmul.mubr.f32.gmra.mrb[46].mxu0 %v6016_v21 }
 0x773   : > { %13322 = vmatprep.mubr.f32.mxu0 %v18572_v4 }
 0x776   : > { %13323 = vmatmul.mubr.f32.vlgmr.msra.gmra.mrb[32].mxu0 %v18599_v61 }
 0x777   : > { %13325 = vmatprep.mubr.f32.mxu0 %v18645_v27  ;;  %14225 = vmatpush3.bf16.msra.mxu0 %v18330_v42  ;;  %v7092_v42 = vld [vmem:[%s21138_s10] sm:$0xff] }
 0x778   : > { %14227 = vmatprep.subr.bf16.mxu0 %v18358_v22 }
 0x77a   : > { %13326 = vmatmul.mubr.f32.gmra.mrb[34].mxu0 %v18664_v26 }
 0x77b   : > { %13328 = vmatprep.mubr.f32.mxu0 %v18699_v28  ;;  %14229 = vmatpush3.bf16.msra.mxu0 %v18358_v22  ;;  %v7101_v22 = vsel %vm3513_vm8, %v7092_v42, 0 }
 0x77c   : > { %14231 = vmatprep.subr.bf16.mxu0 %v18383_v36 }
 0x77e   : > { %13329 = vmatmul.mubr.f32.gmra.mrb[36].mxu0 %v18709_v24 }
 0x77f   : > { %13331 = vmatprep.mubr.f32.mxu0 %v18728_v9  ;;  %14233 = vmatpush3.bf16.msra.mxu0 %v18383_v36  ;;  %v19005_v36 = vand.u32 4294901760, %v7101_v22 }
 0x780   : > { %14235 = vmatprep.subr.bf16.mxu0 %v18408_v35 }
 0x782   : > { %13332 = vmatmul.mubr.f32.gmra.mrb[38].mxu0 %v18737_v51 }
 0x783   : > { %13334 = vmatprep.mubr.f32.mxu0 %v18756_v31  ;;  %14237 = vmatpush3.bf16.msra.mxu0 %v18408_v35  ;;  %v19008_v35 = vsub.f32 %v7101_v22, %v19005_v36 }
 0x784   : > { %14239 = vmatprep.subr.bf16.mxu0 %v18430_v25 }
 0x785   : > { %22054 = vst [vmem:[#allocation14_spill] sm:$0xff] %v19008_v35 }
 0x786   : > { %13335 = vmatmul.mubr.f32.gmra.mrb[40].mxu0 %v18765_v3 }
 0x787   : > { %13337 = vmatprep.mubr.f32.mxu0 %v18784_v33  ;;  %14241 = vmatpush3.bf16.msra.mxu0 %v18430_v25  ;;  %v21450_v25 = vand.u32 4294901760, %v19008_v35 }
 0x78a   : > { %13338 = vmatmul.mubr.f32.gmra.mrb[42].mxu0 %v18793_v18 }
 0x78b   : > { %13340 = vmatprep.mubr.f32.mxu0 %v18812_v2 }
 0x78e   : > { %13341 = vmatmul.mubr.f32.gmra.mrb[44].mxu0 %v18821_v7 }
 0x78f   : > { %13343 = vmatprep.mubr.f32.mxu0 %v18837_v6 }
 0x792   : > { %13344 = vmatmul.mubr.f32.gmra.mrb[46].mxu0 %v18844_v20 }
 0x793   : > { %13366 = vmatprep.mubr.f32.mxu0 %v18572_v4  ;;  %v7211_v4 = vsub.f32 %v19008_v35, %v21450_v25 }
 0x796   : > { %13367 = vmatmul.mubr.f32.vlgmr.msra.gmra.mrb[32].mxu0 %v18599_v61  ;;  %v7094_v61 = vld [vmem:[%s21138_s10 + $0x10] sm:$0xff] }
 0x797   : > { %13369 = vmatprep.mubr.f32.mxu0 %v18645_v27  ;;  %v7095_v27 = vld [vmem:[%s21138_s10 + $0x18] sm:$0xff] }
 0x79a   : > { %13370 = vmatmul.mubr.f32.gmra.mrb[34].mxu0 %v18664_v26 }
 0x79b   : > { %13372 = vmatprep.mubr.f32.mxu0 %v18699_v28  ;;  %v7107_v28 = vsel %vm3513_vm8, %v7094_v61, 0  ;;  %v19110_v61 = vsub.f32 %v7122_v50, %v19096_v37 }
 0x79c   : > { %v19028_v39 = vand.u32 4294901760, %v7107_v28 }
 0x79e   : > { %13373 = vmatmul.mubr.f32.gmra.mrb[36].mxu0 %v18709_v24  ;;  %v7110_v24 = vsel %vm3513_vm8, %v7095_v27, 0  ;;  %v19043_v63 = vsub.f32 %v7107_v28, %v19028_v39 }
 0x79f   : > { %13375 = vmatprep.mubr.f32.mxu0 %v18728_v9  ;;  %v19033_v0 = vand.u32 4294901760, %v7110_v24 }
 0x7a0   : > { %22056 = vst [vmem:[#allocation16_spill] sm:$0xff] %v19043_v63  ;;  %v21448_v5 = vand.u32 4294901760, %v19043_v63 }
 0x7a1   : > { %v19055_v45 = vsub.f32 %v7110_v24, %v19033_v0 }
 0x7a2   : > { %13376 = vmatmul.mubr.f32.gmra.mrb[38].mxu0 %v18737_v51  ;;  %v7096_v51 = vld [vmem:[%s21138_s10 + $0x20] sm:$0xff]  ;;  %v19088_v59 = vsub.f32 %v19043_v63, %v21448_v5 }
 0x7a3   : > { %13378 = vmatprep.mubr.f32.mxu0 %v18756_v31  ;;  %22057 = vst [vmem:[#allocation17_spill] sm:$0xff] %v19055_v45  ;;  %v21447_v21 = vand.u32 4294901760, %v19055_v45 }
 0x7a5   : > { %v19094_v58 = vsub.f32 %v19055_v45, %v21447_v21 }
 0x7a6   : > { %13379 = vmatmul.mubr.f32.gmra.mrb[40].mxu0 %v18765_v3  ;;  %v7113_v3 = vsel %vm3513_vm8, %v7096_v51, 0 }
 0x7a7   : > { %13381 = vmatprep.mubr.f32.mxu0 %v18784_v33  ;;  %v7098_v33 = vld [vmem:[%s21138_s10 + $0x30] sm:$0xff]  ;;  %v19057_v41 = vand.u32 4294901760, %v7113_v3 }
 0x7a8   : > { %v7119_v54 = vsel %vm3513_vm8, %v7098_v33, 0  ;;  %v19123_v33 = vsub.f32 %v19082_v60, %v21445_v55 }
 0x7a9   : > { %v19071_v40 = vsub.f32 %v7113_v3, %v19057_v41  ;;  %v19073_v47 = vand.u32 4294901760, %v7119_v54 }
 0x7aa   : > { %13382 = vmatmul.mubr.f32.gmra.mrb[42].mxu0 %v18793_v18  ;;  %v19052_v18 = vld [vmem:[%s21132_s4] ss:$0 sm:$0xff] }
 0x7ab   : > { %13384 = vmatprep.mubr.f32.mxu0 %v18812_v2  ;;  %22058 = vst [vmem:[#allocation63_spill] sm:$0xff] %v19071_v40  ;;  %v21446_v1 = vand.u32 4294901760, %v19071_v40  ;;  %v19100_v48 = vsub.f32 %v7119_v54, %v19073_v47 }
 0x7ad   : > { %22060 = vst [vmem:[#allocation68_spill] sm:$0xff] %v19100_v48  ;;  %v19115_v28 = vsub.f32 %v19071_v40, %v21446_v1  ;;  %v21444_v24 = vand.u32 4294901760, %v19100_v48 }
 0x7ae   : > { %13385 = vmatmul.mubr.f32.gmra.mrb[44].mxu0 %v18821_v7 }
 0x7af   : > { %13387 = vmatprep.mubr.f32.mxu0 %v18837_v6  ;;  %v7212_v6 = vand.u32 4294901760, %v7211_v4 }
 0x7b1   : > { %13422 = vmatprep.mubr.f32.mxu1 %v7212_v6 }
 0x7b2   : > { %13388 = vmatmul.mubr.f32.gmra.mrb[46].mxu0 %v18844_v20  ;;  %v7093_v20 = vld [vmem:[%s21138_s10 + $0x8] sm:$0xff] }
 0x7b3   : > { %v7104_v26 = vsel %vm3513_vm8, %v7093_v20, 0  ;;  %vm9472_vm8 = vcmask 1045504  }
 0x7b4   : > { %v19026_v9 = vand.u32 4294901760, %v7104_v26 }
 0x7b6   : > { %v19039_v31 = vsub.f32 %v7104_v26, %v19026_v9 }
 0x7b8   : > { %22055 = vst [vmem:[#allocation57_spill] sm:$0xff] %v19039_v31  ;;  %v21449_v7 = vand.u32 4294901760, %v19039_v31 }
 0x7ba   : > { %v19079_v53 = vsub.f32 %v19039_v31, %v21449_v7 }
 0x869   : > { %v13368_v2 = vpop.f32.mrb[32].mxu0 }
 0x86a   : > { %v15066_v30 = vadd.f32 %v13368_v2, %v19052_v18  ;;  %v6903_v56 = vpop.f32.mrb[33].mxu0 }
 0x86b   : > { %v15067_v19 = vadd.f32 %v19052_v18, %v6903_v56 }
 0x86c   : > { %v6998_v23 = vmax.f32 %v15066_v30, 0.0 }
 0x86d   : > { %v6997_v17 = vmax.f32 %v15067_v19, 0.0  ;;  %v13371_v15 = vpop.f32.mrb[34].mxu0 }
 0x86e   : > { %v7030_v16 = vrot.slane %v6998_v23, 1  ;;  %v15068_v38 = vadd.f32 %v13371_v15, %v19052_v18  ;;  %v6915_v52 = vpop.f32.mrb[35].mxu0 }
 0x86f   : > { %v7029_v11 = vrot.slane %v6997_v17, 1  ;;  %v15069_v32 = vadd.f32 %v19052_v18, %v6915_v52 }
 0x870   : > { %v7000_v43 = vmax.f32 %v15068_v38, 0.0 }
 0x871   : > { %v7031_v10 = vsel %vm3353_vm9, %v7029_v11, %v7030_v16  ;;  %v6999_v29 = vmax.f32 %v15069_v32, 0.0  ;;  %v13374_v49 = vpop.f32.mrb[36].mxu0  ;;  %v19134_v11 = vsub.f32 %v19100_v48, %v21444_v24 }
 0x872   : > { %v7076_v34 = vmax.f32 %v6997_v17, %v7031_v10  ;;  %v7034_v62 = vrot.slane %v7000_v43, 1  ;;  %v15070_v13 = vadd.f32 %v13374_v49, %v19052_v18  ;;  %v6927_v42 = vpop.f32.mrb[37].mxu0 }
 0x873   : > { %v7032_v4 = vrot.slane %v6999_v29, 1  ;;  %v15071_v6 = vadd.f32 %v19052_v18, %v6927_v42 }
 0x874   : > { %v7128_v27 = vand.u32 4294901760, %v7076_v34  ;;  %v7002_v26 = vmax.f32 %v15070_v13, 0.0 }
 0x875   : > { %v7033_v51 = vsel %vm3353_vm9, %v7030_v16, %v7032_v4  ;;  %v7035_v46 = vsel %vm3353_vm9, %v7032_v4, %v7034_v62  ;;  %v7001_v3 = vmax.f32 %v15071_v6, 0.0  ;;  %v13377_v12 = vpop.f32.mrb[38].mxu0 }
 0x876   : > { %v19125_v2 = vsub.f32 %v7076_v34, %v7128_v27  ;;  %v7077_v54 = vmax.f32 %v6998_v23, %v7033_v51  ;;  %v7078_v8 = vmax.f32 %v6999_v29, %v7035_v46  ;;  %v7038_v30 = vrot.slane %v7002_v26, 1  ;;  %v6939_v56 = vpop.f32.mrb[39].mxu0 }
 0x877   : > { %v7036_v19 = vrot.slane %v7001_v3, 1  ;;  %v15072_v50 = vadd.f32 %v13377_v12, %v19052_v18  ;;  %v15073_v17 = vadd.f32 %v19052_v18, %v6939_v56 }
 0x878   : > { %v7131_v16 = vand.u32 4294901760, %v7077_v54  ;;  %v7134_v38 = vand.u32 4294901760, %v7078_v8  ;;  %v21452_v52 = vand.u32 4294901760, %v19125_v2 }
 0x879   : > { %v7037_v23 = vsel %vm3353_vm9, %v7034_v62, %v7036_v19  ;;  %v7039_v32 = vsel %vm3353_vm9, %v7036_v19, %v7038_v30  ;;  %v7004_v10 = vmax.f32 %v15072_v50, 0.0  ;;  %v7003_v29 = vmax.f32 %v15073_v17, 0.0  ;;  %v13380_v49 = vpop.f32.mrb[40].mxu0 }
 0x87a   : > { %v19138_v34 = vpack.c.bf16 %v7131_v16, %v7128_v27  ;;  %v19140_v13 = vsub.f32 %v7077_v54, %v7131_v16  ;;  %v19142_v42 = vsub.f32 %v7078_v8, %v7134_v38  ;;  %v7079_v4 = vmax.f32 %v7000_v43, %v7037_v23  ;;  %v6951_v6 = vpop.f32.mrb[41].mxu0 }
 0x87b   : > { %v7080_v51 = vmax.f32 %v7001_v3, %v7039_v32  ;;  %v7042_v46 = vrot.slane %v7004_v10, 1  ;;  %v7040_v12 = vrot.slane %v7003_v29, 1  ;;  %v15074_v56 = vadd.f32 %v13380_v49, %v19052_v18 }
 0x87c   : > { %22061 = vst [vmem:[#allocation70_spill] sm:$0xff] %v19138_v34  ;;  %v7137_v24 = vand.u32 4294901760, %v7079_v4  ;;  %v15075_v62 = vadd.f32 %v19052_v18, %v6951_v6  ;;  %14243 = vmatprep.subr.bf16.mxu1 %v19138_v34  ;;  %v19150_v27 = vsub.f32 %v19125_v2, %v21452_v52  ;;  %v21451_v54 = vand.u32 4294901760, %v19140_v13 }
 0x87d   : > { %v7140_v8 = vand.u32 4294901760, %v7080_v51  ;;  %v7041_v43 = vsel %vm3353_vm9, %v7038_v30, %v7040_v12  ;;  %v7043_v3 = vsel %vm3353_vm9, %v7040_v12, %v7042_v46  ;;  %v7006_v19 = vmax.f32 %v15074_v56, 0.0  ;;  %v13383_v50 = vpop.f32.mrb[42].mxu0  ;;  %14245 = vmatpush3.bf16.msra.mxu1 %v19138_v34 }
 0x87e   : > { %v19156_v17 = vpack.c.bf16 %v7137_v24, %v7134_v38  ;;  %v19158_v16 = vsub.f32 %v7079_v4, %v7137_v24  ;;  %v7081_v23 = vmax.f32 %v7002_v26, %v7041_v43  ;;  %v7082_v32 = vmax.f32 %v7003_v29, %v7043_v3  ;;  %v6963_v49 = vpop.f32.mrb[43].mxu0 }
 0x87f   : > { %v19160_v6 = vsub.f32 %v7080_v51, %v7140_v8  ;;  %v7046_v55 = vrot.slane %v7006_v19, 1  ;;  %v7005_v1 = vmax.f32 %v15075_v62, 0.0  ;;  %v15076_v21 = vadd.f32 %v13383_v50, %v19052_v18 }
 0x880   : > { %22062 = vst [vmem:[#allocation71_spill] sm:$0xff] %v19156_v17  ;;  %v7143_v30 = vand.u32 4294901760, %v7081_v23  ;;  %v7146_v5 = vand.u32 4294901760, %v7082_v32  ;;  %v15077_v12 = vadd.f32 %v19052_v18, %v6963_v49  ;;  %14247 = vmatprep.subr.bf16.mxu1 %v19156_v17  ;;  %v7293_v38 = vand.u32 4294901760, %v19150_v27 }
 0x881   : > { %v7044_v56 = vrot.slane %v7005_v1, 1  ;;  %v7008_v24 = vmax.f32 %v15076_v21, 0.0  ;;  %v13386_v4 = vpop.f32.mrb[44].mxu0  ;;  %14249 = vmatpush3.bf16.msra.mxu1 %v19156_v17  ;;  %v7299_v26 = vsub.f32 %v19140_v13, %v21451_v54  ;;  %v21453_v29 = vand.u32 4294901760, %v19142_v42 }
 0x882   : > { %v19171_v51 = vpack.c.bf16 %v7143_v30, %v7140_v8  ;;  %v19173_v62 = vsub.f32 %v7081_v23, %v7143_v30  ;;  %v19175_v43 = vsub.f32 %v7082_v32, %v7146_v5  ;;  %v7007_v3 = vmax.f32 %v15077_v12, 0.0  ;;  %v6975_v50 = vpop.f32.mrb[45].mxu0 }
 0x883   : > { %v7045_v27 = vsel %vm3353_vm9, %v7042_v46, %v7044_v56  ;;  %v7047_v21 = vsel %vm3353_vm9, %v7044_v56, %v7046_v55  ;;  %v7050_v49 = vrot.slane %v7008_v24, 1  ;;  %v19180_v7 = vadd.f32 %v13386_v4, %v19052_v18 }
 0x884   : > { %22063 = vst [vmem:[#allocation15_spill] sm:$0xff] %v19171_v51  ;;  %v7083_v25 = vmax.f32 %v7004_v10, %v7045_v27  ;;  %v7084_v15 = vmax.f32 %v7005_v1, %v7047_v21  ;;  %v7048_v20 = vrot.slane %v7007_v3, 1  ;;  %v15079_v8 = vadd.f32 %v19052_v18, %v6975_v50  ;;  %14251 = vmatprep.subr.bf16.mxu1 %v19171_v51 }
 0x885   : > { %v7010_v23 = vmax.f32 %v19180_v7, 0.0  ;;  %v13389_v32 = vpop.f32.mrb[46].mxu0  ;;  %14253 = vmatpush3.bf16.msra.mxu1 %v19171_v51  ;;  %v7300_v30 = vand.u32 4294901760, %v7299_v26  ;;  %v7306_v46 = vsub.f32 %v19142_v42, %v21453_v29  ;;  %v14306_v17 = vpack.c.bf16 %v19140_v13, %v19125_v2 }
 0x886   : > { %v7149_v56 = vand.u32 4294901760, %v7083_v25  ;;  %v7152_v10 = vand.u32 4294901760, %v7084_v15  ;;  %v7049_v1 = vsel %vm3353_vm9, %v7046_v55, %v7048_v20  ;;  %v7051_v4 = vsel %vm3353_vm9, %v7048_v20, %v7050_v49  ;;  %v6987_v50 = vpop.f32.mrb[47].mxu0 }
 0x887   : > { %v7085_v27 = vmax.f32 %v7006_v19, %v7049_v1  ;;  %v7086_v21 = vmax.f32 %v7007_v3, %v7051_v4  ;;  %v7054_v7 = vrot.slane %v7010_v23, 1  ;;  %v7009_v22 = vmax.f32 %v15079_v8, 0.0 }
 0x888   : > { %v19192_v54 = vpack.c.bf16 %v7149_v56, %v7146_v5  ;;  %v19194_v26 = vsub.f32 %v7083_v25, %v7149_v56  ;;  %v19196_v52 = vsub.f32 %v7084_v15, %v7152_v10  ;;  %v15080_v29 = vadd.f32 %v13389_v32, %v19052_v18 }
 0x889   : > { %v7155_v14 = vand.u32 4294901760, %v7085_v27  ;;  %v7158_v12 = vand.u32 4294901760, %v7086_v21  ;;  %v7052_v44 = vrot.slane %v7009_v22, 1  ;;  %v15081_v55 = vadd.f32 %v19052_v18, %v6987_v50 }
 0x88a   : > { %22064 = vst [vmem:[#allocation21_spill] sm:$0xff] %v19192_v54  ;;  %v7012_v48 = vmax.f32 %v15080_v29, 0.0  ;;  %14255 = vmatprep.subr.bf16.mxu1 %v19192_v54  ;;  %v19201_v20 = vpack.c.bf16 %v7300_v30, %v7293_v38  ;;  %v7307_v19 = vand.u32 4294901760, %v7306_v46  ;;  %v22065_v5 = vand.u32 4294901760, %v19158_v16 }
 0x88b   : > { %v19206_v3 = vpack.c.bf16 %v7155_v14, %v7152_v10  ;;  %v19208_v15 = vsub.f32 %v7085_v27, %v7155_v14  ;;  %v19210_v8 = vsub.f32 %v7086_v21, %v7158_v12  ;;  %v7053_v32 = vsel %vm3353_vm9, %v7050_v49, %v7052_v44  ;;  %14257 = vmatpush3.bf16.msra.mxu1 %v19192_v54 }
 0x88c   : > { %v7313_v25 = vsub.f32 %v19158_v16, %v22065_v5  ;;  %v7055_v18 = vsel %vm3353_vm9, %v7052_v44, %v7054_v7  ;;  %v7087_v29 = vmax.f32 %v7008_v24, %v7053_v32  ;;  %v7058_v38 = vrot.slane %v7012_v48, 1 }
 0x88d   : > { %22066 = vst [vmem:[#allocation47_spill] sm:$0xff] %v19206_v3  ;;  %v7011_v30 = vmax.f32 %v15081_v55, 0.0  ;;  %v7088_v46 = vmax.f32 %v7009_v22, %v7055_v18  ;;  %14259 = vmatprep.subr.bf16.mxu1 %v19206_v3  ;;  %v21457_v10 = vand.u32 4294901760, %v19160_v6  ;;  %v21458_v14 = vand.u32 4294901760, %v19173_v62 }
 0x88e   : > { %v7314_v56 = vand.u32 4294901760, %v7313_v25  ;;  %v7161_v1 = vand.u32 4294901760, %v7087_v29  ;;  %v7091_v4 = vmax.f32 %v7012_v48, %v7058_v38  ;;  %v14310_v63 = vpack.c.bf16 %v19158_v16, %v19142_v42 }
 0x88f   : > { %v7056_v50 = vrot.slane %v7011_v30, 1  ;;  %v7164_v27 = vand.u32 4294901760, %v7088_v46  ;;  %14261 = vmatpush3.bf16.msra.mxu1 %v19206_v3  ;;  %v7320_v22 = vsub.f32 %v19160_v6, %v21457_v10  ;;  %v7327_v24 = vsub.f32 %v19173_v62, %v21458_v14 }
 0x890   : > { %v19220_v44 = vpack.c.bf16 %v7314_v56, %v7307_v19  ;;  %v19228_v21 = vpack.c.bf16 %v7161_v1, %v7158_v12  ;;  %v19230_v55 = vsub.f32 %v7087_v29, %v7161_v1  ;;  %v7125_v48 = vsel %vm3353_vm9, %v7091_v4, 0 }
 0x891   : > { %v7057_v5 = vsel %vm3353_vm9, %v7054_v7, %v7056_v50  ;;  %v19234_v25 = vsub.f32 %v7088_v46, %v7164_v27  ;;  %v7173_v19 = vand.u32 4294901760, %v7125_v48  ;;  %v7059_v32 = vsel %vm3353_vm9, %v7056_v50, %v7058_v38 }
 0x892   : > { %22067 = vst [vmem:[#allocation27_spill] sm:$0xff] %v19228_v21  ;;  %v7089_v18 = vmax.f32 %v7010_v23, %v7057_v5  ;;  %v7090_v56 = vmax.f32 %v7011_v30, %v7059_v32  ;;  %14263 = vmatprep.subr.bf16.mxu1 %v19228_v21  ;;  %v7321_v10 = vand.u32 4294901760, %v7320_v22  ;;  %v7328_v49 = vand.u32 4294901760, %v7327_v24 }
 0x893   : > { %v22068_v12 = vand.u32 4294901760, %v19175_v43  ;;  %v19241_v1 = vsub.f32 %v7125_v48, %v7173_v19  ;;  %14265 = vmatpush3.bf16.msra.mxu1 %v19228_v21  ;;  %v7340_v7 = vand.u32 4294901760, %v19194_v26  ;;  %v7347_v46 = vand.u32 4294901760, %v19196_v52 }
 0x894   : > { %v7167_v4 = vand.u32 4294901760, %v7089_v18  ;;  %v7170_v38 = vand.u32 4294901760, %v7090_v56  ;;  %v19246_v23 = vpack.c.bf16 %v7328_v49, %v7321_v10  ;;  %v7354_v50 = vand.u32 4294901760, %v19208_v15 }
 0x895   : > { %v7334_v29 = vsub.f32 %v19175_v43, %v22068_v12  ;;  %v7341_v5 = vsub.f32 %v19194_v26, %v7340_v7  ;;  %v7348_v48 = vsub.f32 %v19196_v52, %v7347_v46  ;;  %v7361_v21 = vand.u32 4294901760, %v19210_v8 }
 0x896   : > { %v19249_v22 = vpack.c.bf16 %v7167_v4, %v7164_v27  ;;  %v7381_v24 = vsub.f32 %v7089_v18, %v7167_v4  ;;  %v19253_v32 = vpack.c.bf16 %v7173_v19, %v7170_v38  ;;  %v7388_v12 = vsub.f32 %v7090_v56, %v7170_v38 }
 0x897   : > { %v7335_v30 = vand.u32 4294901760, %v7334_v29  ;;  %v7355_v14 = vsub.f32 %v19208_v15, %v7354_v50  ;;  %v7342_v10 = vand.u32 4294901760, %v7341_v5  ;;  %v7349_v49 = vand.u32 4294901760, %v7348_v48 }
 0x898   : > { %22069 = vst [vmem:[#allocation73_spill] sm:$0xff] %v19249_v22  ;;  %22070 = vst [vmem:[#allocation29_spill] sm:$0xff] %v19253_v32  ;;  %14267 = vmatprep.subr.bf16.mxu1 %v19249_v22  ;;  %v7368_v29 = vand.u32 4294901760, %v19230_v55  ;;  %v7375_v27 = vand.u32 4294901760, %v19234_v25  ;;  %v7362_v4 = vsub.f32 %v19210_v8, %v7361_v21  ;;  %v7382_v19 = vand.u32 4294901760, %v7381_v24 }
 0x899   : > { %14269 = vmatpush3.bf16.msra.mxu1 %v19249_v22  ;;  %v7356_v18 = vand.u32 4294901760, %v7355_v14  ;;  %v7389_v3 = vand.u32 4294901760, %v7388_v12  ;;  %v14286_v56 = vpack.c.bf16 %v7342_v10, %v7335_v30  ;;  %v7396_v5 = vand.u32 4294901760, %v19241_v1 }
 0x89a   : > { %14271 = vmatprep.subr.bf16.mxu1 %v19253_v32  ;;  %v7369_v38 = vsub.f32 %v19230_v55, %v7368_v29  ;;  %v7376_v54 = vsub.f32 %v19234_v25, %v7375_v27  ;;  %v7363_v60 = vand.u32 4294901760, %v7362_v4  ;;  %v7383_v51 = vsub.f32 %v7381_v24, %v7382_v19 }
 0x89b   : > { %v14290_v48 = vpack.c.bf16 %v7356_v18, %v7349_v49  ;;  %v7390_v40 = vsub.f32 %v7388_v12, %v7389_v3  ;;  %v7397_v14 = vsub.f32 %v19241_v1, %v7396_v5  ;;  %v14314_v49 = vpack.c.bf16 %v19173_v62, %v19160_v6 }
 0x89c   : > { %v7370_v45 = vand.u32 4294901760, %v7369_v38  ;;  %v7377_v22 = vand.u32 4294901760, %v7376_v54  ;;  %v7384_v30 = vand.u32 4294901760, %v7383_v51  ;;  %v14318_v54 = vpack.c.bf16 %v19194_v26, %v19175_v43 }
 0x89d   : > { %14273 = vmatpush3.bf16.msra.mxu1 %v19253_v32  ;;  %v7391_v10 = vand.u32 4294901760, %v7390_v40  ;;  %v7398_v4 = vand.u32 4294901760, %v7397_v14  ;;  %v14322_v38 = vpack.c.bf16 %v19208_v15, %v19196_v52  ;;  %v14326_v40 = vpack.c.bf16 %v19230_v55, %v19210_v8 }
 0x89e   : > { %14275 = vmatprep.subr.bf16.mxu1 %v19201_v20  ;;  %v14294_v18 = vpack.c.bf16 %v7370_v45, %v7363_v60  ;;  %v14298_v31 = vpack.c.bf16 %v7384_v30, %v7377_v22  ;;  %v14330_v51 = vpack.c.bf16 %v7381_v24, %v19234_v25  ;;  %v14334_v32 = vpack.c.bf16 %v19241_v1, %v7388_v12  ;;  %v22095_v24 = vld [vmem:[#allocation27_spill] sm:$0xff] }
 0x89f   : > { %v22071_v34 = vand.u32 4294901760, %v19079_v53  ;;  %v14302_v35 = vpack.c.bf16 %v7398_v4, %v7391_v10  ;;  %v22072_v45 = vand.u32 4294901760, %v19125_v2  ;;  %v22073_v60 = vand.u32 4294901760, %v19140_v13  ;;  %v22097_v12 = vld [vmem:[#allocation29_spill] sm:$0xff]  ;;  %v8280_v30 = vld [vmem:[%s21133_s5 + $0x20] sm:$0xff] }
 0x8a0   : > { %v22074_v52 = vand.u32 4294901760, %v19142_v42  ;;  %v22075_v15 = vand.u32 4294901760, %v19158_v16  ;;  %v22076_v8 = vand.u32 4294901760, %v19160_v6  ;;  %v22077_v55 = vand.u32 4294901760, %v19173_v62  ;;  %v8281_v10 = vld [vmem:[%s21133_s5 + $0x28] sm:$0xff] }
 0x8a1   : > { %13423 = vmatmul.mubr.f32.vlgmr.msra.gmra.mrb[192].mxu1 %v22071_v34  ;;  %v19289_v26 = vpack.c.bf16 %v22073_v60, %v22072_v45  ;;  %v22078_v53 = vand.u32 4294901760, %v19088_v59  ;;  %v7252_v2 = vand.u32 4294901760, %v19115_v28  ;;  %v22079_v34 = vand.u32 4294901760, %v19175_v43 }
 0x8a2   : > { %v19295_v22 = vpack.c.bf16 %v22075_v15, %v22074_v52  ;;  %v19301_v25 = vpack.c.bf16 %v22077_v55, %v22076_v8  ;;  %14277 = vmatpush3.bf16.msra.mxu1 %v19201_v20  ;;  %v19311_v42 = vpack.c.bf16 %v7354_v50, %v7347_v46  ;;  %v19313_v16 = vpack.c.bf16 %v7368_v29, %v7361_v21  ;;  %v22092_v46 = vld [vmem:[#allocation21_spill] sm:$0xff]  ;;  %v22094_v50 = vld [vmem:[#allocation47_spill] sm:$0xff] }
 0x8a3   : > { %13425 = vmatprep.mubr.f32.mxu1 %v22078_v53  ;;  %v19309_v13 = vpack.c.bf16 %v7340_v7, %v22079_v34  ;;  %14279 = vmatprep.subr.bf16.mxu1 %v19220_v44  ;;  %v19316_v6 = vpack.c.bf16 %v7382_v19, %v7375_v27  ;;  %v19318_v62 = vpack.c.bf16 %v7396_v5, %v7389_v3  ;;  %v22080_v20 = vand.u32 4294901760, %v19094_v58  ;;  %v22085_v58 = vld [vmem:[#allocation16_spill] sm:$0xff]  ;;  %v22089_v3 = vld [vmem:[#allocation15_spill] sm:$0xff] }
 0x8a4   : > { %v7262_v59 = vand.u32 4294901760, %v19123_v33  ;;  %v22081_v28 = vand.u32 4294901760, %v19110_v61  ;;  %v7272_v21 = vand.u32 4294901760, %v19134_v11  ;;  %v22086_v33 = vld [vmem:[#allocation71_spill] sm:$0xff]  ;;  %v22087_v11 = vld [vmem:[#allocation17_spill] sm:$0xff]  ;;  %v22091_v7 = vld [vmem:[#allocation68_spill] sm:$0xff] }
 0x8a5   : > { %13426 = vmatmul.mubr.f32.gmra.mrb[194].mxu1 %v22080_v20  ;;  %v22099_v27 = vand.u32 4294901760, %v22085_v58  ;;  %v22100_v19 = vand.u32 4294901760, %v22087_v11  ;;  %v8343_v4 = vand.u32 4294901760, %v8281_v10 }
 0x8a6   : > { %v7281_v43 = vsub.f32 %v19110_v61, %v22081_v28  ;;  %14281 = vmatpush3.bf16.msra.mxu1 %v19220_v44  ;;  %13428 = vmatprep.mubr.f32.mxu1 %v7252_v2  ;;  %v22090_v44 = vld [vmem:[#allocation18_spill] sm:$0xff]  ;;  %v22104_v14 = vmov %v22081_v28 }
 0x8a7   : > { %14283 = vmatprep.subr.bf16.mxu1 %v19246_v23  ;;  %v22102_v5 = vand.u32 4294901760, %v22090_v44 }
 0x8a8   : > { %v7282_v1 = vand.u32 4294901760, %v7281_v43 }
 0x8a9   : > { %13429 = vmatmul.mubr.f32.gmra.mrb[196].mxu1 %v7262_v59 }
 0x8aa   : > { %14285 = vmatpush3.bf16.msra.mxu1 %v19246_v23  ;;  %13431 = vmatprep.mubr.f32.mxu1 %v7272_v21  ;;  %v8286_v21 = vld [vmem:[%s21133_s5 + $0x50] sm:$0xff] }
 0x8ab   : > { %14287 = vmatprep.subr.bf16.mxu1 %v14286_v56 }
 0x8ad   : > { %13432 = vmatmul.mubr.f32.gmra.mrb[198].mxu1 %v7282_v1  ;;  %v8287_v1 = vld [vmem:[%s21133_s5 + $0x58] sm:$0xff] }
 0x8ae   : > { %14289 = vmatpush3.bf16.msra.mxu1 %v14286_v56  ;;  %13466 = vmatprep.mubr.f32.mxu1 %v19005_v36 }
 0x8af   : > { %14291 = vmatprep.subr.bf16.mxu1 %v14290_v48 }
 0x8b2   : > { %14293 = vmatpush3.bf16.msra.mxu1 %v14290_v48  ;;  %v22103_v48 = vand.u32 4294901760, %v22091_v7 }
 0x8b3   : > { %14295 = vmatprep.subr.bf16.mxu1 %v14294_v18 }
 0x8b6   : > { %14297 = vmatpush3.bf16.msra.mxu1 %v14294_v18  ;;  %v8340_v18 = vand.u32 4294901760, %v8280_v30 }
 0x8b7   : > { %14299 = vmatprep.subr.bf16.mxu1 %v14298_v31 }
 0x8b8   : > { %v19463_v52 = vsub.f32 %v8280_v30, %v8340_v18  ;;  %v19476_v2 = vpack.c.bf16 %v8343_v4, %v8340_v18 }
 0x8ba   : > { %14301 = vmatpush3.bf16.msra.mxu1 %v14298_v31  ;;  %v22083_v31 = vld [vmem:[#allocation70_spill] sm:$0xff]  ;;  %22106 = vst [vmem:[#allocation22_spill] sm:$0xff] %v19476_v2 }
 0x8bb   : > { %14303 = vmatprep.subr.bf16.mxu1 %v14302_v35 }
 0x8be   : > { %14305 = vmatpush3.bf16.msra.mxu1 %v14302_v35  ;;  %v22082_v35 = vld [vmem:[#allocation14_spill] sm:$0xff] }
 0x8bf   : > { %14307 = vmatprep.subr.bf16.mxu1 %v14306_v17  ;;  %v22093_v23 = vand.u32 4294901760, %v22082_v35 }
 0x8c1   : > { %13467 = vmatmul.mubr.f32.vlgmr.msra.gmra.mrb[192].mxu1 %v19026_v9 }
 0x8c2   : > { %14309 = vmatpush3.bf16.msra.mxu1 %v14306_v17  ;;  %13469 = vmatprep.mubr.f32.mxu1 %v19028_v39  ;;  %v22088_v17 = vld [vmem:[#allocation63_spill] sm:$0xff] }
 0x8c3   : > { %14311 = vmatprep.subr.bf16.mxu1 %v14310_v63  ;;  %v22101_v56 = vand.u32 4294901760, %v22088_v17 }
 0x8c5   : > { %13470 = vmatmul.mubr.f32.gmra.mrb[194].mxu1 %v19033_v0 }
 0x8c6   : > { %14313 = vmatpush3.bf16.msra.mxu1 %v14310_v63  ;;  %13472 = vmatprep.mubr.f32.mxu1 %v19057_v41  ;;  %v22084_v63 = vld [vmem:[#allocation57_spill] sm:$0xff] }
 0x8c7   : > { %14315 = vmatprep.subr.bf16.mxu1 %v14314_v49  ;;  %v22098_v29 = vand.u32 4294901760, %v22084_v63 }
 0x8c9   : > { %13473 = vmatmul.mubr.f32.gmra.mrb[196].mxu1 %v19060_v57 }
 0x8ca   : > { %14317 = vmatpush3.bf16.msra.mxu1 %v14314_v49  ;;  %13475 = vmatprep.mubr.f32.mxu1 %v19073_v47 }
 0x8cb   : > { %14319 = vmatprep.subr.bf16.mxu1 %v14318_v54 }
 0x8cd   : > { %13476 = vmatmul.mubr.f32.gmra.mrb[198].mxu1 %v19096_v37 }
 0x8ce   : > { %14321 = vmatpush3.bf16.msra.mxu1 %v14318_v54  ;;  %13510 = vmatprep.mubr.f32.mxu1 %v22082_v35  ;;  %v8282_v54 = vld [vmem:[%s21133_s5 + $0x30] sm:$0xff]  ;;  %v8358_v35 = vand.u32 4294901760, %v8286_v21 }
 0x8cf   : > { %14323 = vmatprep.subr.bf16.mxu1 %v14322_v38  ;;  %v8346_v8 = vand.u32 4294901760, %v8282_v54 }
 0x8d2   : > { %14325 = vmatpush3.bf16.msra.mxu1 %v14322_v38  ;;  %v8283_v38 = vld [vmem:[%s21133_s5 + $0x38] sm:$0xff] }
 0x8d3   : > { %14327 = vmatprep.subr.bf16.mxu1 %v14326_v40  ;;  %v8349_v55 = vand.u32 4294901760, %v8283_v38 }
 0x8d5   : > { %v19473_v53 = vsub.f32 %v8283_v38, %v8349_v55  ;;  %v19480_v34 = vpack.c.bf16 %v8349_v55, %v8346_v8  ;;  %v8292_v55 = vld [vmem:[%s21133_s5 + $0x80] sm:$0xff] }
 0x8d6   : > { %14329 = vmatpush3.bf16.msra.mxu1 %v14326_v40 }
 0x8d7   : > { %14331 = vmatprep.subr.bf16.mxu1 %v14330_v51  ;;  %22107 = vst [vmem:[#allocation20_spill] sm:$0xff] %v19480_v34 }
 0x8da   : > { %14333 = vmatpush3.bf16.msra.mxu1 %v14330_v51 }
 0x8db   : > { %14335 = vmatprep.subr.bf16.mxu1 %v14334_v32 }
 0x8de   : > { %14337 = vmatpush3.bf16.msra.mxu1 %v14334_v32  ;;  %v22096_v32 = vld [vmem:[#allocation73_spill] sm:$0xff] }
 0x8df   : > { %14339 = vmatprep.subr.bf16.mxu1 %v22083_v31 }
 0x8e1   : > { %13511 = vmatmul.mubr.f32.vlgmr.msra.gmra.mrb[192].mxu1 %v22084_v63 }
 0x8e2   : > { %14341 = vmatpush3.bf16.msra.mxu1 %v22083_v31  ;;  %13513 = vmatprep.mubr.f32.mxu1 %v22085_v58 }
 0x8e3   : > { %14343 = vmatprep.subr.bf16.mxu1 %v22086_v33 }
 0x8e5   : > { %13514 = vmatmul.mubr.f32.gmra.mrb[194].mxu1 %v22087_v11 }
 0x8e6   : > { %14345 = vmatpush3.bf16.msra.mxu1 %v22086_v33  ;;  %13516 = vmatprep.mubr.f32.mxu1 %v22088_v17 }
 0x8e7   : > { %14347 = vmatprep.subr.bf16.mxu1 %v22089_v3 }
 0x8e9   : > { %13517 = vmatmul.mubr.f32.gmra.mrb[196].mxu1 %v22090_v44  ;;  %v8289_v44 = vld [vmem:[%s21133_s5 + $0x68] sm:$0xff] }
 0x8ea   : > { %14349 = vmatpush3.bf16.msra.mxu1 %v22089_v3  ;;  %13519 = vmatprep.mubr.f32.mxu1 %v22091_v7 }
 0x8eb   : > { %14351 = vmatprep.subr.bf16.mxu1 %v22092_v46 }
 0x8ed   : > { %13520 = vmatmul.mubr.f32.gmra.mrb[198].mxu1 %v19110_v61 }
 0x8ee   : > { %14353 = vmatpush3.bf16.msra.mxu1 %v22092_v46  ;;  %13554 = vmatprep.mubr.f32.mxu1 %v22093_v23 }
 0x8ef   : > { %14355 = vmatprep.subr.bf16.mxu1 %v22094_v50 }
 0x8f2   : > { %14357 = vmatpush3.bf16.msra.mxu1 %v22094_v50 }
 0x8f3   : > { %14359 = vmatprep.subr.bf16.mxu1 %v22095_v24 }
 0x8f6   : > { %14361 = vmatpush3.bf16.msra.mxu1 %v22095_v24 }
 0x8f7   : > { %14363 = vmatprep.subr.bf16.mxu1 %v22096_v32 }
 0x8fa   : > { %14365 = vmatpush3.bf16.msra.mxu1 %v22096_v32 }
 0x8fb   : > { %14367 = vmatprep.subr.bf16.mxu1 %v22097_v12 }
 0x8fe   : > { %14369 = vmatpush3.bf16.msra.mxu1 %v22097_v12 }
 0x8ff   : > { %14371 = vmatprep.subr.bf16.mxu1 %v19289_v26 }
 0x901   : > { %13555 = vmatmul.mubr.f32.vlgmr.msra.gmra.mrb[192].mxu1 %v22098_v29  ;;  %v8290_v29 = vld [vmem:[%s21133_s5 + $0x70] sm:$0xff] }
 0x902   : > { %14373 = vmatpush3.bf16.msra.mxu1 %v19289_v26  ;;  %13557 = vmatprep.mubr.f32.mxu1 %v22099_v27  ;;  %v8291_v27 = vld [vmem:[%s21133_s5 + $0x78] sm:$0xff] }
 0x903   : > { %14375 = vmatprep.subr.bf16.mxu1 %v19295_v22 }
 0x905   : > { %13558 = vmatmul.mubr.f32.gmra.mrb[194].mxu1 %v22100_v19 }
 0x906   : > { %14377 = vmatpush3.bf16.msra.mxu1 %v19295_v22  ;;  %13560 = vmatprep.mubr.f32.mxu1 %v22101_v56  ;;  %v19468_v22 = vsub.f32 %v8281_v10, %v8343_v4 }
 0x907   : > { %14379 = vmatprep.subr.bf16.mxu1 %v19301_v25 }
 0x909   : > { %13561 = vmatmul.mubr.f32.gmra.mrb[196].mxu1 %v22102_v5 }
 0x90a   : > { %14381 = vmatpush3.bf16.msra.mxu1 %v19301_v25  ;;  %13563 = vmatprep.mubr.f32.mxu1 %v22103_v48  ;;  %v19471_v25 = vsub.f32 %v8282_v54, %v8346_v8  ;;  %v8370_v48 = vand.u32 4294901760, %v8290_v29 }
 0x90b   : > { %14383 = vmatprep.subr.bf16.mxu1 %v19309_v13 }
 0x90d   : > { %13564 = vmatmul.mubr.f32.gmra.mrb[198].mxu1 %v22104_v14  ;;  %v8373_v14 = vand.u32 4294901760, %v8291_v27 }
 0x90e   : > { %14385 = vmatpush3.bf16.msra.mxu1 %v19309_v13  ;;  %13598 = vmatprep.mubr.f32.mxu1 %v19005_v36  ;;  %v8284_v13 = vld [vmem:[%s21133_s5 + $0x40] sm:$0xff] }
 0x90f   : > { %14387 = vmatprep.subr.bf16.mxu1 %v19311_v42 }
 0x912   : > { %14389 = vmatpush3.bf16.msra.mxu1 %v19311_v42  ;;  %v8285_v42 = vld [vmem:[%s21133_s5 + $0x48] sm:$0xff] }
 0x913   : > { %14391 = vmatprep.subr.bf16.mxu1 %v19313_v16 }
 0x916   : > { %14393 = vmatpush3.bf16.msra.mxu1 %v19313_v16  ;;  %v8352_v16 = vand.u32 4294901760, %v8284_v13 }
 0x917   : > { %14395 = vmatprep.subr.bf16.mxu1 %v19316_v6 }
 0x918   : > { %v19493_v20 = vsub.f32 %v8284_v13, %v8352_v16  ;;  %v8293_v13 = vld [vmem:[%s21133_s5 + $0x88] sm:$0xff] }
 0x91a   : > { %14397 = vmatpush3.bf16.msra.mxu1 %v19316_v6  ;;  %v8355_v6 = vand.u32 4294901760, %v8285_v42 }
 0x91b   : > { %14399 = vmatprep.subr.bf16.mxu1 %v19318_v62 }
 0x91c   : > { %v19495_v59 = vsub.f32 %v8285_v42, %v8355_v6 }
 0x91e   : > { %14401 = vmatpush3.bf16.msra.mxu1 %v19318_v62  ;;  %v19491_v62 = vpack.c.bf16 %v8355_v6, %v8352_v16 }
 0x91f   : > { %14403 = vmatprep.subr.bf16.mxu1 %v22083_v31 }
 0x920   : > { %22108 = vst [vmem:[#allocation31_spill] sm:$0xff] %v19491_v62 }
 0x921   : > { %13599 = vmatmul.mubr.f32.vlgmr.msra.gmra.mrb[192].mxu1 %v19026_v9 }
 0x922   : > { %14405 = vmatpush3.bf16.msra.mxu1 %v22083_v31  ;;  %13601 = vmatprep.mubr.f32.mxu1 %v19028_v39  ;;  %v8361_v31 = vand.u32 4294901760, %v8287_v1 }
 0x923   : > { %14407 = vmatprep.subr.bf16.mxu1 %v22086_v33 }
 0x924   : > { %v19507_v58 = vpack.c.bf16 %v8361_v31, %v8358_v35  ;;  %v19511_v11 = vsub.f32 %v8287_v1, %v8361_v31 }
 0x925   : > { %13602 = vmatmul.mubr.f32.gmra.mrb[194].mxu1 %v19033_v0 }
 0x926   : > { %14409 = vmatpush3.bf16.msra.mxu1 %v22086_v33  ;;  %13604 = vmatprep.mubr.f32.mxu1 %v19057_v41  ;;  %22109 = vst [vmem:[#allocation26_spill] sm:$0xff] %v19507_v58  ;;  %v19509_v33 = vsub.f32 %v8286_v21, %v8358_v35 }
 0x927   : > { %14411 = vmatprep.subr.bf16.mxu1 %v22089_v3 }
 0x929   : > { %13605 = vmatmul.mubr.f32.gmra.mrb[196].mxu1 %v19060_v57 }
 0x92a   : > { %14413 = vmatpush3.bf16.msra.mxu1 %v22089_v3  ;;  %13607 = vmatprep.mubr.f32.mxu1 %v19073_v47  ;;  %v8288_v3 = vld [vmem:[%s21133_s5 + $0x60] sm:$0xff] }
 0x92b   : > { %14415 = vmatprep.subr.bf16.mxu1 %v22092_v46  ;;  %v8364_v7 = vand.u32 4294901760, %v8288_v3 }
 0x92d   : > { %13608 = vmatmul.mubr.f32.gmra.mrb[198].mxu1 %v19096_v37 }
 0x92e   : > { %14417 = vmatpush3.bf16.msra.mxu1 %v22092_v46  ;;  %13642 = vmatprep.mubr.f32.mxu1 %v19005_v36  ;;  %v22105_v36 = vmov 0.0   ;;  %v8367_v46 = vand.u32 4294901760, %v8289_v44 }
 0x92f   : > { %14419 = vmatprep.subr.bf16.mxu1 %v22094_v50  ;;  %8080 = vst.msk [vmem:[#allocation6 + $0x42] sm:$0x3] %vm8069_vm1, %v22105_v36  ;;  %8070 = vst.msk [vmem:[#allocation6] sm:$0x3] %vm8069_vm1, %v22105_v36 }
 0x932   : > { %14421 = vmatpush3.bf16.msra.mxu1 %v22094_v50 }
 0x933   : > { %14423 = vmatprep.subr.bf16.mxu1 %v22095_v24 }
 0x936   : > { %14425 = vmatpush3.bf16.msra.mxu1 %v22095_v24  ;;  %v19523_v24 = vpack.c.bf16 %v8367_v46, %v8364_v7 }
 0x937   : > { %14427 = vmatprep.subr.bf16.mxu1 %v22096_v32 }
 0x938   : > { %22110 = vst [vmem:[#allocation33_spill] sm:$0xff] %v19523_v24 }
 0x93a   : > { %14429 = vmatpush3.bf16.msra.mxu1 %v22096_v32  ;;  %v19525_v32 = vsub.f32 %v8288_v3, %v8364_v7 }
 0x93b   : > { %14431 = vmatprep.subr.bf16.mxu1 %v22097_v12 }
 0x93e   : > { %14433 = vmatpush3.bf16.msra.mxu1 %v22097_v12  ;;  %v19527_v12 = vsub.f32 %v8289_v44, %v8367_v46 }
 0x941   : > { %13643 = vmatmul.mubr.f32.vlgmr.msra.gmra.mrb[192].mxu1 %v19026_v9  ;;  %v8276_v9 = vld [vmem:[%s21133_s5] sm:$0xff] }
 0x942   : > { %13645 = vmatprep.mubr.f32.mxu1 %v19028_v39  ;;  %v8277_v39 = vld [vmem:[%s21133_s5 + $0x8] sm:$0xff] }
 0x945   : > { %13646 = vmatmul.mubr.f32.gmra.mrb[194].mxu1 %v19033_v0  ;;  %v8278_v0 = vld [vmem:[%s21133_s5 + $0x10] sm:$0xff] }
 0x946   : > { %13648 = vmatprep.mubr.f32.mxu1 %v19057_v41  ;;  %v21512_v41 = vmov 0.0|0.0   ;;  %v8334_v61 = vand.u32 4294901760, %v8278_v0 }
 0x947   : > { %14434 = vmatprep.subr.bf16.mxu0 %v21512_v41 }
 0x948   : > { %v19459_v60 = vsub.f32 %v8278_v0, %v8334_v61  ;;  %v19543_v0 = vpack.c.bf16 %v8373_v14, %v8370_v48 }
 0x949   : > { %13649 = vmatmul.mubr.f32.gmra.mrb[196].mxu1 %v19060_v57  ;;  %v8328_v57 = vand.u32 4294901760, %v8276_v9 }
 0x94a   : > { %13651 = vmatprep.mubr.f32.mxu1 %v19073_v47  ;;  %v8331_v47 = vand.u32 4294901760, %v8277_v39  ;;  %22112 = vst [vmem:[#allocation32_spill] sm:$0xff] %v19543_v0 }
 0x94b   : > { %v19455_v51 = vsub.f32 %v8276_v9, %v8328_v57 }
 0x94c   : > { %v19453_v40 = vpack.c.bf16 %v8331_v47, %v8328_v57  ;;  %v19457_v45 = vsub.f32 %v8277_v39, %v8331_v47  ;;  %v19545_v57 = vsub.f32 %v8290_v29, %v8370_v48  ;;  %v19547_v47 = vsub.f32 %v8291_v27, %v8373_v14 }
 0x94d   : > { %13652 = vmatmul.mubr.f32.gmra.mrb[198].mxu1 %v19096_v37  ;;  %v8279_v37 = vld [vmem:[%s21133_s5 + $0x18] sm:$0xff] }
 0x94e   : > { %v8337_v49 = vand.u32 4294901760, %v8279_v37  ;;  %14436 = vmatpush1.bf16.msra.mxu0 %v19453_v40  ;;  %v21509_v48 = vand.u32 4294901760, %v19457_v45 }
 0x94f   : > { %14437 = vmatprep.subr.bf16.mxu0 %v21512_v41 }
 0x950   : > { %v19461_v26 = vsub.f32 %v8279_v37, %v8337_v49  ;;  %v19466_v15 = vpack.c.bf16 %v8337_v49, %v8334_v61 }
 0x952   : > { %14439 = vmatpush1.bf16.msra.mxu0 %v19466_v15 }
 0x953   : > { %14440 = vmatprep.subr.bf16.mxu0 %v21512_v41 }
 0x956   : > { %14442 = vmatpush1.bf16.msra.mxu0 %v19476_v2 }
 0x957   : > { %14443 = vmatprep.subr.bf16.mxu0 %v21512_v41 }
 0x95a   : > { %14445 = vmatpush1.bf16.msra.mxu0 %v19480_v34 }
 0x95b   : > { %14446 = vmatprep.subr.bf16.mxu0 %v21512_v41 }
 0x95e   : > { %14448 = vmatpush1.bf16.msra.mxu0 %v19491_v62 }
 0x95f   : > { %14449 = vmatprep.subr.bf16.mxu0 %v21512_v41 }
 0x962   : > { %14451 = vmatpush1.bf16.msra.mxu0 %v19507_v58  ;;  %v22117_v58 = vmov 0.0|0.0  }
 0x963   : > { %14452 = vmatprep.subr.bf16.mxu0 %v21512_v41 }
 0x966   : > { %14454 = vmatpush1.bf16.msra.mxu0 %v19523_v24 }
 0x967   : > { %14455 = vmatprep.subr.bf16.mxu0 %v21512_v41 }
 0x96a   : > { %14457 = vmatpush1.bf16.msra.mxu0 %v19543_v0 }
 0x96b   : > { %14458 = vmatprep.subr.bf16.mxu0 %v21512_v41 }
 0xa14   : > { %v13644_v28 = vpop.f32.mrb[192].mxu1 }
 0xa15   : > { %8073 = vst.msk [vmem:[#allocation6 + $0xa] sm:$0xff] %vm8071_vm3, %v13644_v28  ;;  %v8023_v43 = vpop.f32.mrb[193].mxu1  ;;  %v8376_v28 = vand.u32 4294901760, %v8292_v55 }
 0xa16   : > { %8072 = vst.msk [vmem:[#allocation6 + $0x2] sm:$0xff] %vm8071_vm3, %v8023_v43  ;;  %v8379_v43 = vand.u32 4294901760, %v8293_v13 }
 0xa17   : > { %v19575_v31 = vsub.f32 %v8292_v55, %v8376_v28 }
 0xa18   : > { %v13647_v63 = vpop.f32.mrb[194].mxu1  ;;  %v19573_v35 = vpack.c.bf16 %v8379_v43, %v8376_v28 }
 0xa19   : > { %8075 = vst.msk [vmem:[#allocation6 + $0x1a] sm:$0xff] %vm8071_vm3, %v13647_v63  ;;  %v8035_v17 = vpop.f32.mrb[195].mxu1  ;;  %v19577_v63 = vsub.f32 %v8293_v13, %v8379_v43 }
 0xa1a   : > { %8074 = vst.msk [vmem:[#allocation6 + $0x12] sm:$0xff] %vm8071_vm3, %v8035_v17  ;;  %22114 = vst [vmem:[#allocation39_spill] sm:$0xff] %v19573_v35  ;;  %v8294_v17 = vld [vmem:[%s21133_s5 + $0x90] sm:$0xff]  ;;  %14460 = vmatpush1.bf16.msra.mxu0 %v19573_v35 }
 0xa1b   : > { %v8382_v7 = vand.u32 4294901760, %v8294_v17  ;;  %14461 = vmatprep.subr.bf16.mxu0 %v21512_v41 }
 0xa1c   : > { %v13650_v23 = vpop.f32.mrb[196].mxu1  ;;  %v8147_v50 = vld [vmem:[#allocation6 + $0xa] sm:$0xff] }
 0xa1d   : > { %v8244_v19 = vld [vmem:[#allocation6 + $0x4] sm:$0xff]  ;;  %8077 = vst.msk [vmem:[#allocation6 + $0x2a] sm:$0xff] %vm8071_vm3, %v13650_v23  ;;  %8164 = vrot.lane.b32.xlu0 %v8147_v50, %s22111_s18  ;;  %v8047_v56 = vpop.f32.mrb[197].mxu1  ;;  %v19592_v27 = vsub.f32 %v8294_v17, %v8382_v7  ;;  %v21505_v17 = vand.u32 4294901760, %v19468_v22 }
 0xa1e   : > { %v8146_v5 = vld [vmem:[#allocation6 + $0x2] sm:$0xff]  ;;  %8252 = vst.msk [vmem:[#allocation7 + $0x8] sm:$0xff] %vm8071_vm3, %v8244_v19  ;;  %8076 = vst.msk [vmem:[#allocation6 + $0x22] sm:$0xff] %vm8071_vm3, %v8047_v56 }
 0xa1f   : > { %8162 = vrot.lane.b32.xlu1 %v8146_v5, %s22111_s18  ;;  %v8081_v9 = vld [vmem:[#allocation6] sm:$0xff]  ;;  %v8082_v39 = vld [vmem:[#allocation6 + $0x8] sm:$0xff]  ;;  %v21510_v5 = vand.u32 4294901760, %v19455_v51 }
 0xa20   : > { %8089 = vst.msk [vmem:[#allocation7] sm:$0xff] %vm8071_vm3, %v8081_v9  ;;  %v13653_v37 = vpop.f32.mrb[198].mxu1  ;;  %v8097_v61 = vld [vmem:[#allocation6 + $0x1] sm:$0xff]  ;;  %8090 = vst.msk [vmem:[#allocation7 + $0x10] sm:$0xff] %vm8071_vm3, %v8082_v39  ;;  %v8098_v18 = vld [vmem:[#allocation6 + $0x9] sm:$0xff] }
 0xa21   : > { %v8245_v30 = vld [vmem:[#allocation6 + $0xc] sm:$0xff]  ;;  %v8246_v10 = vld [vmem:[#allocation6 + $0x14] sm:$0xff]  ;;  %8079 = vst.msk [vmem:[#allocation6 + $0x3a] sm:$0xff] %vm8071_vm3, %v13653_v37  ;;  %8113 = vrot.lane.b32.xlu0 %v8097_v61, %s22113_s21  ;;  %v8059_v49 = vpop.f32.mrb[199].mxu1  ;;  %v8195_v4 = vld [vmem:[#allocation6 + $0x3] sm:$0xff] }
 0xa22   : > { %8253 = vst.msk [vmem:[#allocation7 + $0x18] sm:$0xff] %vm8071_vm3, %v8245_v30  ;;  %8254 = vst.msk [vmem:[#allocation7 + $0x28] sm:$0xff] %vm8071_vm3, %v8246_v10  ;;  %v8083_v54 = vld [vmem:[#allocation6 + $0x10] sm:$0xff]  ;;  %v8084_v38 = vld [vmem:[#allocation6 + $0x18] sm:$0xff]  ;;  %v8536_v10 = vsub.f32 %v19455_v51, %v21510_v5 }
 0xa23   : > { %8078 = vst.msk [vmem:[#allocation6 + $0x32] sm:$0xff] %vm8071_vm3, %v8059_v49  ;;  %8115 = vrot.lane.b32.xlu1 %v8098_v18, %s22113_s21  ;;  %v8196_v8 = vld [vmem:[#allocation6 + $0xb] sm:$0xff]  ;;  %8091 = vst.msk [vmem:[#allocation7 + $0x20] sm:$0xff] %vm8071_vm3, %v8083_v54  ;;  %v8149_v44 = vld [vmem:[#allocation6 + $0x1a] sm:$0xff]  ;;  %v8543_v49 = vsub.f32 %v19457_v45, %v21509_v48 }
 0xa24   : > { %8092 = vst.msk [vmem:[#allocation7 + $0x30] sm:$0xff] %vm8071_vm3, %v8084_v38  ;;  %v8148_v50 = vld [vmem:[#allocation6 + $0x12] sm:$0xff]  ;;  %v8295_v56 = vld [vmem:[%s21133_s5 + $0x98] sm:$0xff]  ;;  %v8537_v55 = vand.u32 4294901760, %v8536_v10  ;;  %v21503_v10 = vand.u32 4294901760, %v19473_v53 }
 0xa25   : > { %v8247_v42 = vld [vmem:[#allocation6 + $0x1c] sm:$0xff]  ;;  %v8248_v16 = vld [vmem:[#allocation6 + $0x24] sm:$0xff]  ;;  %8211 = vrot.lane.b32.xlu0 %v8195_v4, %s15618_s0  ;;  %v8261_v6 = vld [vmem:[#allocation7 + $0x8] sm:$0xff]  ;;  %v8385_v9 = vand.u32 4294901760, %v8295_v56  ;;  %v8544_v13 = vand.u32 4294901760, %v8543_v49 }
 0xa26   : > { %8255 = vst.msk [vmem:[#allocation7 + $0x38] sm:$0xff] %vm8071_vm3, %v8247_v42  ;;  %8256 = vst.msk [vmem:[#allocation7 + $0x48] sm:$0xff] %vm8071_vm3, %v8248_v16  ;;  %v8304_v21 = vsel %vm8071_vm3, %v8261_v6, 0  ;;  %v8099_v14 = vld [vmem:[#allocation6 + $0x11] sm:$0xff]  ;;  %v8085_v39 = vld [vmem:[#allocation6 + $0x20] sm:$0xff]  ;;  %v21508_v16 = vand.u32 4294901760, %v19459_v60 }
 0xa27   : > { %8213 = vrot.lane.b32.xlu1 %v8196_v8, %s15618_s0  ;;  %v19571_v1 = vand.u32 4294901760, %v8304_v21  ;;  %v8086_v37 = vld [vmem:[#allocation6 + $0x28] sm:$0xff]  ;;  %v8100_v61 = vld [vmem:[#allocation6 + $0x19] sm:$0xff]  ;;  %8093 = vst.msk [vmem:[#allocation7 + $0x40] sm:$0xff] %vm8071_vm3, %v8085_v39  ;;  %v19613_v54 = vpack.c.bf16 %v8385_v9, %v8382_v7  ;;  %v19615_v38 = vsub.f32 %v8295_v56, %v8385_v9  ;;  %v21507_v6 = vand.u32 4294901760, %v19461_v26 }
 0xa28   : > { %v8251_v3 = vld [vmem:[#allocation6 + $0x3c] sm:$0xff]  ;;  %8094 = vst.msk [vmem:[#allocation7 + $0x50] sm:$0xff] %vm8071_vm3, %v8086_v37  ;;  %v8197_v42 = vld [vmem:[#allocation6 + $0x13] sm:$0xff]  ;;  %v19623_v43 = vpack.c.bf16 %v8544_v13, %v8537_v55 }
 0xa29   : > { %8259 = vst.msk [vmem:[#allocation7 + $0x78] sm:$0xff] %vm8071_vm3, %v8251_v3  ;;  %8168 = vrot.lane.b32.xlu0 %v8149_v44, %s22111_s18  ;;  %v19585_v29 = vsub.f32 %v8304_v21, %v19571_v1  ;;  %22115 = vst [vmem:[#allocation37_spill] sm:$0xff] %v19613_v54  ;;  %14463 = vmatpush1.bf16.msra.mxu0 %v19613_v54  ;;  %v8198_v28 = vld [vmem:[#allocation6 + $0x1b] sm:$0xff]  ;;  %v21506_v21 = vand.u32 4294901760, %v19463_v52  ;;  %v8550_v3 = vsub.f32 %v19459_v60, %v21508_v16  ;;  %v8265_v48 = vld [vmem:[#allocation7 + $0x28] sm:$0xff] }
 0xa2a   : > { %v8249_v46 = vld [vmem:[#allocation6 + $0x2c] sm:$0xff]  ;;  %v8250_v23 = vld [vmem:[#allocation6 + $0x34] sm:$0xff]  ;;  %14464 = vmatprep.subr.bf16.mxu0 %v21512_v41  ;;  %v8557_v44 = vsub.f32 %v19461_v26, %v21507_v6  ;;  %v8101_v49 = vld [vmem:[#allocation6 + $0x21] sm:$0xff] }
 0xa2b   : > { %8257 = vst.msk [vmem:[#allocation7 + $0x58] sm:$0xff] %vm8071_vm3, %v8249_v46  ;;  %8258 = vst.msk [vmem:[#allocation7 + $0x68] sm:$0xff] %vm8071_vm3, %v8250_v23  ;;  %8166 = vrot.lane.b32.xlu1 %v8148_v50, %s22111_s18  ;;  %v21511_v19 = vand.u32 4294901760, %v19585_v29  ;;  %v8087_v18 = vld [vmem:[#allocation6 + $0x30] sm:$0xff]  ;;  %v8088_v4 = vld [vmem:[#allocation6 + $0x38] sm:$0xff]  ;;  %v8564_v7 = vsub.f32 %v19463_v52, %v21506_v21  ;;  %v8571_v46 = vsub.f32 %v19468_v22, %v21505_v17  ;;  %v8551_v50 = vand.u32 4294901760, %v8550_v3 }
 0xa2c   : > { %8095 = vst.msk [vmem:[#allocation7 + $0x60] sm:$0xff] %vm8071_vm3, %v8087_v18  ;;  %8096 = vst.msk [vmem:[#allocation7 + $0x70] sm:$0xff] %vm8071_vm3, %v8088_v4  ;;  %v8151_v23 = vld [vmem:[#allocation6 + $0x2a] sm:$0xff]  ;;  %v8558_v56 = vand.u32 4294901760, %v8557_v44  ;;  %v8263_v17 = vld [vmem:[#allocation7 + $0x18] sm:$0xff] }
 0xa2d   : > { %8117 = vrot.lane.b32.xlu0 %v8099_v14, %s22113_s21  ;;  %v8414_v30 = vsub.f32 %v19585_v29, %v21511_v19  ;;  %v8150_v14 = vld [vmem:[#allocation6 + $0x22] sm:$0xff]  ;;  %v8565_v9 = vand.u32 4294901760, %v8564_v7  ;;  %v8572_v39 = vand.u32 4294901760, %v8571_v46  ;;  %v8200_v44 = vld [vmem:[#allocation6 + $0x2b] sm:$0xff]  ;;  %v8307_v6 = vsel %vm8071_vm3, %v8263_v17, 0 }
 0xa2e   : > { %v19643_v37 = vpack.c.bf16 %v8558_v56, %v8551_v50  ;;  %v8102_v18 = vld [vmem:[#allocation6 + $0x29] sm:$0xff]  ;;  %v21491_v50 = vand.u32 4294901760, %v19509_v33  ;;  %v21494_v56 = vand.u32 4294901760, %v19511_v11  ;;  %v19754_v19 = vand.u32 4294901760, %v8307_v6 }
 0xa2f   : > { %8119 = vrot.lane.b32.xlu1 %v8100_v61, %s22113_s21  ;;  %v8415_v8 = vand.u32 4294901760, %v8414_v30  ;;  %v19645_v61 = vpack.c.bf16 %v8572_v39, %v8565_v9  ;;  %v21504_v30 = vand.u32 4294901760, %v19471_v25  ;;  %v8199_v3 = vld [vmem:[#allocation6 + $0x23] sm:$0xff] }
 0xa30   : > { %v8606_v39 = vsub.f32 %v19509_v33, %v21491_v50  ;;  %v8104_v50 = vld [vmem:[#allocation6 + $0x39] sm:$0xff] }
 0xa31   : > { %8416 = vmatprep.mubr.f32.mxu0 %v8415_v8  ;;  %8215 = vrot.lane.b32.xlu0 %v8197_v42, %s15618_s0  ;;  %v8578_v4 = vsub.f32 %v19471_v25, %v21504_v30  ;;  %v8585_v8 = vsub.f32 %v19473_v53, %v21503_v10  ;;  %v21502_v42 = vand.u32 4294901760, %v19493_v20 }
 0xa32   : > { %v8271_v0 = vld [vmem:[#allocation7 + $0x58] sm:$0xff] }
 0xa33   : > { %8217 = vrot.lane.b32.xlu1 %v8198_v28, %s15618_s0  ;;  %v8579_v55 = vand.u32 4294901760, %v8578_v4  ;;  %v8586_v13 = vand.u32 4294901760, %v8585_v8  ;;  %v21498_v28 = vand.u32 4294901760, %v19495_v59  ;;  %v8592_v46 = vsub.f32 %v19493_v20, %v21502_v42  ;;  %v8152_v4 = vld [vmem:[#allocation6 + $0x32] sm:$0xff] }
 0xa35   : > { %8172 = vrot.lane.b32.xlu0 %v8151_v23, %s22111_s18  ;;  %v19660_v7 = vpack.c.bf16 %v8586_v13, %v8579_v55  ;;  %v8599_v23 = vsub.f32 %v19495_v59, %v21498_v28  ;;  %v8607_v55 = vand.u32 4294901760, %v8606_v39 }
 0xa37   : > { %8170 = vrot.lane.b32.xlu1 %v8150_v14, %s22111_s18  ;;  %v8593_v14 = vand.u32 4294901760, %v8592_v46  ;;  %v8600_v9 = vand.u32 4294901760, %v8599_v23  ;;  %v8201_v46 = vld [vmem:[#allocation6 + $0x33] sm:$0xff] }
 0xa39   : > { %8121 = vrot.lane.b32.xlu0 %v8101_v49, %s22113_s21  ;;  %v8103_v49 = vld [vmem:[#allocation6 + $0x31] sm:$0xff]  ;;  %v19678_v8 = vpack.c.bf16 %v8600_v9, %v8593_v14 }
 0xa3b   : > { %8123 = vrot.lane.b32.xlu1 %v8102_v18, %s22113_s21  ;;  %v8613_v18 = vsub.f32 %v19511_v11, %v21494_v56  ;;  %v21499_v56 = vand.u32 4294901760, %v19577_v63 }
 0xa3d   : > { %8219 = vrot.lane.b32.xlu0 %v8199_v3, %s15618_s0  ;;  %v8614_v13 = vand.u32 4294901760, %v8613_v18  ;;  %v21492_v3 = vand.u32 4294901760, %v19525_v32  ;;  %v21495_v18 = vand.u32 4294901760, %v19545_v57 }
 0xa3f   : > { %8221 = vrot.lane.b32.xlu1 %v8200_v44, %s15618_s0  ;;  %v21493_v44 = vand.u32 4294901760, %v19527_v12  ;;  %v19683_v23 = vpack.c.bf16 %v8614_v13, %v8607_v55  ;;  %v8153_v55 = vld [vmem:[#allocation6 + $0x3a] sm:$0xff] }
 0xa40   : > { %v8202_v13 = vld [vmem:[#allocation6 + $0x3b] sm:$0xff] }
 0xa41   : > { %8125 = vrot.lane.b32.xlu0 %v8103_v49, %s22113_s21  ;;  %v8620_v49 = vsub.f32 %v19525_v32, %v21492_v3  ;;  %v8627_v14 = vsub.f32 %v19527_v12, %v21493_v44  ;;  %v8634_v3 = vsub.f32 %v19545_v57, %v21495_v18  ;;  %v21497_v44 = vand.u32 4294901760, %v19575_v31 }
 0xa43   : > { %8174 = vrot.lane.b32.xlu1 %v8152_v4, %s22111_s18  ;;  %v8621_v9 = vand.u32 4294901760, %v8620_v49  ;;  %v8628_v39 = vand.u32 4294901760, %v8627_v14  ;;  %v21496_v4 = vand.u32 4294901760, %v19547_v47  ;;  %v8635_v49 = vand.u32 4294901760, %v8634_v3 }
 0xa44   : > { %v21501_v3 = vand.u32 4294901760, %v19615_v38 }
 0xa45   : > { %8223 = vrot.lane.b32.xlu0 %v8201_v46, %s15618_s0  ;;  %v19696_v46 = vpack.c.bf16 %v8628_v39, %v8621_v9  ;;  %v8648_v9 = vsub.f32 %v19575_v31, %v21497_v44  ;;  %v8655_v39 = vsub.f32 %v19577_v63, %v21499_v56 }
 0xa47   : > { %8127 = vrot.lane.b32.xlu1 %v8104_v50, %s22113_s21  ;;  %v8641_v50 = vsub.f32 %v19547_v47, %v21496_v4  ;;  %v8649_v18 = vand.u32 4294901760, %v8648_v9  ;;  %v8656_v4 = vand.u32 4294901760, %v8655_v39  ;;  %s15550_s21 = scalar_lea.vmem %s15549_s26, 32 }
 0xa48   : > { %p15552_p1 = scmp.lt.s32.totalorder %s15550_s21, %s15544_s22 }
 0xa49   : > { %8176 = vrot.lane.b32.xlu0 %v8153_v55, %s22111_s18  ;;  %v8642_v14 = vand.u32 4294901760, %v8641_v50  ;;  %v19717_v50 = vpack.c.bf16 %v8656_v4, %v8649_v18  ;;  %v8269_v4 = vld [vmem:[#allocation7 + $0x48] sm:$0xff] }
 0xa4a   : > { %p15553_p2 = por %p15552_p1, %p15551_p0 }
 0xa4b   : > { %8225 = vrot.lane.b32.xlu1 %v8202_v13, %s15618_s0  ;;  %v19707_v55 = vpack.c.bf16 %v8642_v14, %v8635_v49  ;;  %v21500_v13 = vand.u32 4294901760, %v19592_v27  ;;  %v8669_v14 = vsub.f32 %v19615_v38, %v21501_v3 }
 0xa4c   : > { %p15554_p3 = pnand %p15553_p2, %p15547_p13 }
 0xa4d   : > { %v8662_v49 = vsub.f32 %v19592_v27, %v21500_v13  ;;  %v8670_v28 = vand.u32 4294901760, %v8669_v14 }
 0xa4f   : > { %v8663_v44 = vand.u32 4294901760, %v8662_v49 }
 0xa51   : > { %v19727_v39 = vpack.c.bf16 %v8670_v28, %v8663_v44  ;;  %v19758_v44 = vsub.f32 %v8307_v6, %v19754_v19 }
 0xa8f   : > { %v8165_v42 = vpop.permute.xlu0 %8164 }
 0xa91   : > { %v8163_v10 = vpop.permute.xlu1 %8162 }
 0xa93   : > { %v8114_v30 = vpop.permute.xlu0 %8113 }
 0xa94   : > { %8138 = vst.msk [vmem:[#allocation7] sm:$0xff] %vm8137_vm4, %v8114_v30  ;;  %v8310_v30 = vsel %vm8071_vm3, %v8265_v48, 0  ;;  %v21517_v48 = vand.u32 4294901760, %v19758_v44 }
 0xa95   : > { %v8116_v21 = vpop.permute.xlu1 %8115  ;;  %8187 = vst.msk [vmem:[#allocation7] sm:$0xff] %vm8186_vm5, %v8163_v10  ;;  %v19760_v10 = vand.u32 4294901760, %v8310_v30 }
 0xa96   : > { %8139 = vst.msk [vmem:[#allocation7 + $0x10] sm:$0xff] %vm8137_vm4, %v8116_v21 }
 0xa97   : > { %8188 = vst.msk [vmem:[#allocation7 + $0x10] sm:$0xff] %vm8186_vm5, %v8165_v42  ;;  %v8212_v16 = vpop.permute.xlu0 %8211  ;;  %v8267_v42 = vld [vmem:[#allocation7 + $0x38] sm:$0xff]  ;;  %v19771_v6 = vsub.f32 %v8310_v30, %v19760_v10 }
 0xa98   : > { %8236 = vst.msk [vmem:[#allocation7] sm:$0xff] %vm8235_vm6, %v8212_v16  ;;  %v8313_v13 = vsel %vm8071_vm3, %v8267_v42, 0  ;;  %v8316_v42 = vsel %vm8071_vm3, %v8269_v4, 0 }
 0xa99   : > { %v8214_v5 = vpop.permute.xlu1 %8213  ;;  %v19783_v9 = vand.u32 4294901760, %v8313_v13  ;;  %v21530_v30 = vand.u32 4294901760, %v19771_v6  ;;  %v19798_v54 = vand.u32 4294901760, %v8316_v42 }
 0xa9a   : > { %8237 = vst.msk [vmem:[#allocation7 + $0x10] sm:$0xff] %vm8235_vm6, %v8214_v5 }
 0xa9b   : > { %v8169_v3 = vpop.permute.xlu0 %8168  ;;  %v8444_v35 = vsub.f32 %v19771_v6, %v21530_v30  ;;  %v19804_v4 = vsub.f32 %v8313_v13, %v19783_v9  ;;  %v19812_v30 = vsub.f32 %v8316_v42, %v19798_v54 }
 0xa9d   : > { %v8167_v21 = vpop.permute.xlu1 %8166  ;;  %22116 = vst [vmem:[#allocation46_spill] sm:$0xff] %v19804_v4  ;;  %22118 = vst [vmem:[#allocation44_spill] sm:$0xff] %v19812_v30  ;;  %v22120_v34 = vand.u32 4294901760, %v19812_v30 }
 0xa9f   : > { %v8118_v17 = vpop.permute.xlu0 %8117  ;;  %v8260_v28 = vld [vmem:[#allocation7] sm:$0xff] }
 0xaa0   : > { %8140 = vst.msk [vmem:[#allocation7 + $0x20] sm:$0xff] %vm8137_vm4, %v8118_v17  ;;  %v19763_v14 = vand.u32 4294901760, %v8260_v28 }
 0xaa1   : > { %v8120_v16 = vpop.permute.xlu1 %8119  ;;  %v8262_v5 = vld [vmem:[#allocation7 + $0x10] sm:$0xff]  ;;  %8189 = vst.msk [vmem:[#allocation7 + $0x20] sm:$0xff] %vm8186_vm5, %v8167_v21 }
 0xaa2   : > { %8141 = vst.msk [vmem:[#allocation7 + $0x30] sm:$0xff] %vm8137_vm4, %v8120_v16  ;;  %v19768_v49 = vand.u32 4294901760, %v8262_v5  ;;  %v19776_v17 = vsub.f32 %v8260_v28, %v19763_v14 }
 0xaa3   : > { %8190 = vst.msk [vmem:[#allocation7 + $0x30] sm:$0xff] %vm8186_vm5, %v8169_v3  ;;  %v8216_v18 = vpop.permute.xlu0 %8215  ;;  %v8429_v3 = vsub.f32 %v19758_v44, %v21517_v48 }
 0xaa4   : > { %v19779_v21 = vsub.f32 %v8262_v5, %v19768_v49  ;;  %8238 = vst.msk [vmem:[#allocation7 + $0x20] sm:$0xff] %vm8235_vm6, %v8216_v18  ;;  %v21520_v56 = vand.u32 4294901760, %v19776_v17 }
 0xaa5   : > { %v8218_v16 = vpop.permute.xlu1 %8217  ;;  %v8430_v48 = vand.u32 4294901760, %v8429_v3 }
 0xaa6   : > { %8239 = vst.msk [vmem:[#allocation7 + $0x30] sm:$0xff] %vm8235_vm6, %v8218_v16  ;;  %v21523_v28 = vand.u32 4294901760, %v19779_v21  ;;  %v8420_v18 = vsub.f32 %v19776_v17, %v21520_v56 }
 0xaa7   : > { %v8173_v5 = vpop.permute.xlu0 %8172 }
 0xaa8   : > { %v8421_v36 = vand.u32 4294901760, %v8420_v18  ;;  %v8435_v16 = vsub.f32 %v19779_v21, %v21523_v28 }
 0xaa9   : > { %v8171_v41 = vpop.permute.xlu1 %8170 }
 0xaaa   : > { %8422 = vmatmul.mubr.f32.vlgmr.msra.gmra.mrb[48].mxu0 %v8421_v36  ;;  %v8436_v24 = vand.u32 4294901760, %v8435_v16  ;;  %v8445_v36 = vand.u32 4294901760, %v8444_v35  ;;  %v8273_v35 = vld [vmem:[#allocation7 + $0x68] sm:$0xff] }
 0xaab   : > { %8431 = vmatprep.mubr.f32.mxu0 %v8430_v48  ;;  %14466 = vmatpush1.bf16.msra.mxu0 %v19623_v43  ;;  %v8122_v56 = vpop.permute.xlu0 %8121  ;;  %v8264_v18 = vld [vmem:[#allocation7 + $0x20] sm:$0xff]  ;;  %v21531_v43 = vand.u32 4294901760, %v19804_v4  ;;  %v8319_v48 = vsel %vm8071_vm3, %v8271_v0, 0 }
 0xaac   : > { %8142 = vst.msk [vmem:[#allocation7 + $0x40] sm:$0xff] %vm8137_vm4, %v8122_v56  ;;  %14467 = vmatprep.subr.bf16.mxu0 %v22117_v58  ;;  %v19809_v3 = vand.u32 4294901760, %v8264_v18 }
 0xaad   : > { %v8124_v28 = vpop.permute.xlu1 %8123  ;;  %v8266_v62 = vld [vmem:[#allocation7 + $0x30] sm:$0xff]  ;;  %8191 = vst.msk [vmem:[#allocation7 + $0x40] sm:$0xff] %vm8186_vm5, %v8171_v41  ;;  %v8459_v0 = vsub.f32 %v19804_v4, %v21531_v43 }
 0xaae   : > { %8143 = vst.msk [vmem:[#allocation7 + $0x50] sm:$0xff] %vm8137_vm4, %v8124_v28  ;;  %v19817_v13 = vand.u32 4294901760, %v8266_v62  ;;  %8437 = vmatmul.mubr.f32.gmra.mrb[50].mxu0 %v8436_v24  ;;  %v19821_v56 = vsub.f32 %v8264_v18, %v19809_v3  ;;  %v8322_v18 = vsel %vm8071_vm3, %v8273_v35, 0 }
 0xaaf   : > { %8192 = vst.msk [vmem:[#allocation7 + $0x50] sm:$0xff] %vm8186_vm5, %v8173_v5  ;;  %8446 = vmatprep.mubr.f32.mxu0 %v8445_v36  ;;  %14469 = vmatpush1.bf16.msra.mxu0 %v19643_v37  ;;  %v8220_v42 = vpop.permute.xlu0 %8219  ;;  %v8460_v35 = vand.u32 4294901760, %v8459_v0  ;;  %v19856_v2 = vand.u32 4294901760, %v8322_v18 }
 0xab0   : > { %v19826_v41 = vsub.f32 %v8266_v62, %v19817_v13  ;;  %8240 = vst.msk [vmem:[#allocation7 + $0x40] sm:$0xff] %vm8235_vm6, %v8220_v42  ;;  %14470 = vmatprep.subr.bf16.mxu0 %v22117_v58  ;;  %v21534_v24 = vand.u32 4294901760, %v19821_v56  ;;  %v19837_v62 = vand.u32 4294901760, %v8319_v48  ;;  %v8275_v42 = vld [vmem:[#allocation7 + $0x78] sm:$0xff] }
 0xab1   : > { %v8222_v28 = vpop.permute.xlu1 %8221 }
 0xab2   : > { %22119 = vst [vmem:[#allocation54_spill] sm:$0xff] %v19826_v41  ;;  %8241 = vst.msk [vmem:[#allocation7 + $0x50] sm:$0xff] %vm8235_vm6, %v8222_v28  ;;  %v21537_v37 = vand.u32 4294901760, %v19826_v41  ;;  %v8450_v16 = vsub.f32 %v19821_v56, %v21534_v24  ;;  %v8474_v24 = vsub.f32 %v19812_v30, %v22120_v34 }
 0xab3   : > { %14472 = vmatpush1.bf16.msra.mxu0 %v19645_v61  ;;  %v8126_v36 = vpop.permute.xlu0 %8125  ;;  %v19854_v61 = vsub.f32 %v8319_v48, %v19837_v62 }
 0xab4   : > { %8144 = vst.msk [vmem:[#allocation7 + $0x60] sm:$0xff] %vm8137_vm4, %v8126_v36  ;;  %v8451_v5 = vand.u32 4294901760, %v8450_v16  ;;  %14473 = vmatprep.subr.bf16.mxu0 %v22117_v58  ;;  %v8465_v43 = vsub.f32 %v19826_v41, %v21537_v37  ;;  %v8325_v16 = vsel %vm8071_vm3, %v8275_v42, 0  ;;  %v8475_v0 = vand.u32 4294901760, %v8474_v24 }
 0xab5   : > { %v8175_v28 = vpop.permute.xlu1 %8174  ;;  %22121 = vst [vmem:[#allocation53_spill] sm:$0xff] %v19854_v61 }
 0xab6   : > { %8193 = vst.msk [vmem:[#allocation7 + $0x60] sm:$0xff] %vm8186_vm5, %v8175_v28  ;;  %8452 = vmatmul.mubr.f32.gmra.mrb[52].mxu0 %v8451_v5  ;;  %v8466_v34 = vand.u32 4294901760, %v8465_v43  ;;  %v21542_v5 = vand.u32 4294901760, %v19854_v61 }
 0xab7   : > { %8461 = vmatprep.mubr.f32.mxu0 %v8460_v35  ;;  %14475 = vmatpush1.bf16.msra.mxu0 %v19660_v7  ;;  %v8224_v36 = vpop.permute.xlu0 %8223  ;;  %v8268_v37 = vld [vmem:[#allocation7 + $0x40] sm:$0xff]  ;;  %v19869_v7 = vsub.f32 %v8322_v18, %v19856_v2  ;;  %v19871_v35 = vand.u32 4294901760, %v8325_v16 }
 0xab8   : > { %8242 = vst.msk [vmem:[#allocation7 + $0x60] sm:$0xff] %vm8235_vm6, %v8224_v36  ;;  %14476 = vmatprep.subr.bf16.mxu0 %v22117_v58  ;;  %v19862_v28 = vand.u32 4294901760, %v8268_v37 }
 0xab9   : > { %v8128_v41 = vpop.permute.xlu1 %8127  ;;  %v8270_v48 = vld [vmem:[#allocation7 + $0x50] sm:$0xff]  ;;  %22122 = vst [vmem:[#allocation66_spill] sm:$0xff] %v19869_v7  ;;  %22123 = vst [vmem:[#allocation38_spill] sm:$0xff] %v19871_v35 }
 0xaba   : > { %8145 = vst.msk [vmem:[#allocation7 + $0x70] sm:$0xff] %vm8137_vm4, %v8128_v41  ;;  %v19866_v42 = vand.u32 4294901760, %v8270_v48  ;;  %8467 = vmatmul.mubr.f32.gmra.mrb[54].mxu0 %v8466_v34  ;;  %v19874_v43 = vsub.f32 %v8268_v37, %v19862_v28  ;;  %v8489_v37 = vsub.f32 %v19854_v61, %v21542_v5 }
 0xabb   : > { %8476 = vmatprep.mubr.f32.mxu0 %v8475_v0  ;;  %14478 = vmatpush1.bf16.msra.mxu0 %v19678_v8  ;;  %v8177_v24 = vpop.permute.xlu0 %8176  ;;  %v19890_v0 = vsub.f32 %v8325_v16, %v19871_v35  ;;  %v22125_v16 = vand.u32 4294901760, %v19869_v7 }
 0xabc   : > { %v19878_v36 = vsub.f32 %v8270_v48, %v19866_v42  ;;  %8194 = vst.msk [vmem:[#allocation7 + $0x70] sm:$0xff] %vm8186_vm5, %v8177_v24  ;;  %14479 = vmatprep.subr.bf16.mxu0 %v22117_v58  ;;  %v21548_v18 = vand.u32 4294901760, %v19874_v43  ;;  %v8490_v8 = vand.u32 4294901760, %v8489_v37 }
 0xabd   : > { %v8226_v41 = vpop.permute.xlu1 %8225  ;;  %v8504_v61 = vsub.f32 %v19869_v7, %v22125_v16  ;;  %v21552_v4 = vand.u32 4294901760, %v19890_v0 }
 0xabe   : > { %8243 = vst.msk [vmem:[#allocation7 + $0x70] sm:$0xff] %vm8235_vm6, %v8226_v41  ;;  %v21547_v34 = vand.u32 4294901760, %v19878_v36  ;;  %v8480_v48 = vsub.f32 %v19874_v43, %v21548_v18 }
 0xabf   : > { %14481 = vmatpush1.bf16.msra.mxu0 %v19683_v23  ;;  %v8272_v24 = vld [vmem:[#allocation7 + $0x60] sm:$0xff]  ;;  %v8505_v37 = vand.u32 4294901760, %v8504_v61  ;;  %v8519_v16 = vsub.f32 %v19890_v0, %v21552_v4 }
 0xac0   : > { %v8481_v30 = vand.u32 4294901760, %v8480_v48  ;;  %14482 = vmatprep.subr.bf16.mxu0 %v22117_v58  ;;  %v8495_v41 = vsub.f32 %v19878_v36, %v21547_v34  ;;  %v19900_v5 = vand.u32 4294901760, %v8272_v24  ;;  %v22149_v4 = vld [vmem:[#allocation39_spill] sm:$0xff] }
 0xac1   : > { %v8520_v61 = vand.u32 4294901760, %v8519_v16  ;;  %v22132_v16 = vpack.c.bf16 %v19511_v11, %v19509_v33 }
 0xac2   : > { %22124 = vst [vmem:[#allocation64_spill] sm:$0xff] %v19900_v5  ;;  %8482 = vmatmul.mubr.f32.gmra.mrb[56].mxu0 %v8481_v30  ;;  %v19907_v23 = vsub.f32 %v8272_v24, %v19900_v5  ;;  %v8496_v48 = vand.u32 4294901760, %v8495_v41 }
 0xac3   : > { %8491 = vmatprep.mubr.f32.mxu0 %v8490_v8  ;;  %14484 = vmatpush1.bf16.msra.mxu0 %v19696_v46 }
 0xac4   : > { %14485 = vmatprep.subr.bf16.mxu0 %v22117_v58  ;;  %v21553_v34 = vand.u32 4294901760, %v19907_v23 }
 0xac5   : > { %v8274_v18 = vld [vmem:[#allocation7 + $0x70] sm:$0xff] }
 0xac6   : > { %v19915_v7 = vand.u32 4294901760, %v8274_v18  ;;  %8497 = vmatmul.mubr.f32.gmra.mrb[58].mxu0 %v8496_v48  ;;  %v8510_v30 = vsub.f32 %v19907_v23, %v21553_v34  ;;  %v22130_v48 = vpack.c.bf16 %v19473_v53, %v19471_v25  ;;  %v22150_v34 = vld [vmem:[#allocation37_spill] sm:$0xff] }
 0xac7   : > { %8506 = vmatprep.mubr.f32.mxu0 %v8505_v37  ;;  %14487 = vmatpush1.bf16.msra.mxu0 %v19707_v55  ;;  %v22131_v37 = vpack.c.bf16 %v19495_v59, %v19493_v20 }
 0xac8   : > { %22126 = vst [vmem:[#allocation61_spill] sm:$0xff] %v19915_v7  ;;  %v19922_v46 = vsub.f32 %v8274_v18, %v19915_v7  ;;  %v8511_v8 = vand.u32 4294901760, %v8510_v30  ;;  %14488 = vmatprep.subr.bf16.mxu0 %v22117_v58  ;;  %v22127_v18 = vpack.c.bf16 %v19457_v45, %v19455_v51  ;;  %v22133_v30 = vpack.c.bf16 %v19527_v12, %v19525_v32 }
 0xaca   : > { %v21551_v24 = vand.u32 4294901760, %v19922_v46  ;;  %8512 = vmatmul.mubr.f32.gmra.mrb[60].mxu0 %v8511_v8  ;;  %v22134_v8 = vpack.c.bf16 %v19547_v47, %v19545_v57 }
 0xacb   : > { %8521 = vmatprep.mubr.f32.mxu0 %v8520_v61  ;;  %14490 = vmatpush1.bf16.msra.mxu0 %v19717_v50  ;;  %v22128_v50 = vpack.c.bf16 %v19461_v26, %v19459_v60  ;;  %v22135_v61 = vpack.c.bf16 %v19577_v63, %v19575_v31 }
 0xacc   : > { %v8525_v41 = vsub.f32 %v19922_v46, %v21551_v24  ;;  %14491 = vmatprep.subr.bf16.mxu0 %v22117_v58  ;;  %v22148_v24 = vand.u32 4294901760, %v19585_v29 }
 0xace   : > { %v8526_v55 = vand.u32 4294901760, %v8525_v41  ;;  %v22136_v41 = vpack.c.bf16 %v19615_v38, %v19592_v27 }
 0xacf   : > { %14493 = vmatpush1.bf16.msra.mxu0 %v19727_v39  ;;  %v22129_v39 = vpack.c.bf16 %v19468_v22, %v19463_v52 }
 0xad0   : > { %8527 = vmatmul.mubr.f32.gmra.mrb[62].mxu0 %v8526_v55  ;;  %14494 = vmatprep.subr.bf16.mxu0 %v22117_v58  ;;  %v22137_v55 = vld [vmem:[#allocation46_spill] sm:$0xff] }
 0xad1   : > { %8697 = vmatprep.mubr.f32.mxu0 %v19571_v1 }
 0xad4   : > { %8699 = vmatmul.mubr.f32.vlgmr.msra.gmra.mrb[48].mxu0 %v19763_v14 }
 0xad5   : > { %14496 = vmatpush1.bf16.msra.mxu0 %v22127_v18  ;;  %8704 = vmatprep.mubr.f32.mxu0 %v19754_v19  ;;  %v22138_v18 = vld [vmem:[#allocation22_spill] sm:$0xff] }
 0xad6   : > { %14497 = vmatprep.subr.bf16.mxu0 %v22117_v58 }
 0xad8   : > { %8706 = vmatmul.mubr.f32.gmra.mrb[50].mxu0 %v19768_v49 }
 0xad9   : > { %14499 = vmatpush1.bf16.msra.mxu0 %v22128_v50  ;;  %8711 = vmatprep.mubr.f32.mxu0 %v19760_v10  ;;  %v22139_v50 = vld [vmem:[#allocation54_spill] sm:$0xff] }
 0xada   : > { %14500 = vmatprep.subr.bf16.mxu0 %v22117_v58 }
 0xadc   : > { %8713 = vmatmul.mubr.f32.gmra.mrb[52].mxu0 %v19809_v3 }
 0xadd   : > { %14502 = vmatpush1.bf16.msra.mxu0 %v22129_v39  ;;  %8718 = vmatprep.mubr.f32.mxu0 %v19783_v9  ;;  %v22140_v39 = vld [vmem:[#allocation44_spill] sm:$0xff] }
 0xade   : > { %14503 = vmatprep.subr.bf16.mxu0 %v22117_v58 }
 0xae0   : > { %8720 = vmatmul.mubr.f32.gmra.mrb[54].mxu0 %v19817_v13 }
 0xae1   : > { %14505 = vmatpush1.bf16.msra.mxu0 %v22130_v48  ;;  %8725 = vmatprep.mubr.f32.mxu0 %v19798_v54  ;;  %v22141_v48 = vld [vmem:[#allocation20_spill] sm:$0xff] }
 0xae2   : > { %14506 = vmatprep.subr.bf16.mxu0 %v22117_v58 }
 0xae4   : > { %8727 = vmatmul.mubr.f32.gmra.mrb[56].mxu0 %v19862_v28 }
 0xae5   : > { %14508 = vmatpush1.bf16.msra.mxu0 %v22131_v37  ;;  %8732 = vmatprep.mubr.f32.mxu0 %v19837_v62  ;;  %v22142_v37 = vld [vmem:[#allocation53_spill] sm:$0xff] }
 0xae6   : > { %14509 = vmatprep.subr.bf16.mxu0 %v22117_v58 }
 0xae8   : > { %8734 = vmatmul.mubr.f32.gmra.mrb[58].mxu0 %v19866_v42 }
 0xae9   : > { %14511 = vmatpush1.bf16.msra.mxu0 %v22132_v16  ;;  %8739 = vmatprep.mubr.f32.mxu0 %v19856_v2  ;;  %v22143_v16 = vld [vmem:[#allocation31_spill] sm:$0xff] }
 0xaea   : > { %14512 = vmatprep.subr.bf16.mxu0 %v22117_v58 }
 0xaec   : > { %8741 = vmatmul.mubr.f32.gmra.mrb[60].mxu0 %v19900_v5 }
 0xaed   : > { %14514 = vmatpush1.bf16.msra.mxu0 %v22133_v30  ;;  %8746 = vmatprep.mubr.f32.mxu0 %v19871_v35  ;;  %v22144_v30 = vld [vmem:[#allocation66_spill] sm:$0xff] }
 0xaee   : > { %14515 = vmatprep.subr.bf16.mxu0 %v22117_v58 }
 0xaf0   : > { %8748 = vmatmul.mubr.f32.gmra.mrb[62].mxu0 %v19915_v7  ;;  %v22151_v7 = vand.u32 4294901760, %v19455_v51  ;;  %v22157_v51 = vand.u32 4294901760, %v19779_v21 }
 0xaf1   : > { %14517 = vmatpush1.bf16.msra.mxu0 %v22134_v8  ;;  %8859 = vmatprep.mubr.f32.mxu0 %v19585_v29  ;;  %v22145_v8 = vld [vmem:[#allocation26_spill] sm:$0xff]  ;;  %v22154_v29 = vand.u32 4294901760, %v19758_v44 }
 0xaf2   : > { %14518 = vmatprep.subr.bf16.mxu0 %v22117_v58 }
 0xaf5   : > { %14520 = vmatpush1.bf16.msra.mxu0 %v22135_v61  ;;  %v22146_v61 = vld [vmem:[#allocation33_spill] sm:$0xff] }
 0xaf6   : > { %14521 = vmatprep.subr.bf16.mxu0 %v22117_v58 }
 0xaf9   : > { %14523 = vmatpush1.bf16.msra.mxu0 %v22136_v41  ;;  %v22147_v41 = vld [vmem:[#allocation32_spill] sm:$0xff] }
 0xafa   : > { %14524 = vmatprep.subr.bf16.mxu0 %v22117_v58 }
 0xafc   : > { %8862 = vmatmul.mubr.f32.vlgmr.msra.gmra.mrb[48].mxu0 %v19776_v17 }
 0xafd   : > { %8868 = vmatprep.mubr.f32.mxu0 %v19758_v44  ;;  %14526 = vmatpush1.bf16.msra.mxu0 %v19453_v40  ;;  %v22160_v44 = vand.u32 4294901760, %v19468_v22  ;;  %v22166_v22 = vand.u32 4294901760, %v22140_v39 }
 0xafe   : > { %14527 = vmatprep.subr.bf16.mxu0 %v22117_v58 }
 0xb00   : > { %8871 = vmatmul.mubr.f32.gmra.mrb[50].mxu0 %v19779_v21  ;;  %v22163_v21 = vand.u32 4294901760, %v19471_v25  ;;  %v22169_v25 = vand.u32 4294901760, %v19874_v43 }
 0xb01   : > { %8877 = vmatprep.mubr.f32.mxu0 %v19771_v6  ;;  %14529 = vmatpush1.bf16.msra.mxu0 %v19466_v15 }
 0xb02   : > { %14530 = vmatprep.subr.bf16.mxu0 %v22117_v58 }
 0xb04   : > { %8880 = vmatmul.mubr.f32.gmra.mrb[52].mxu0 %v19821_v56 }
 0xb05   : > { %8886 = vmatprep.mubr.f32.mxu0 %v22137_v55  ;;  %14532 = vmatpush1.bf16.msra.mxu0 %v22138_v18 }
 0xb06   : > { %14533 = vmatprep.subr.bf16.mxu0 %v22117_v58 }
 0xb08   : > { %8889 = vmatmul.mubr.f32.gmra.mrb[54].mxu0 %v22139_v50 }
 0xb09   : > { %8895 = vmatprep.mubr.f32.mxu0 %v22140_v39  ;;  %14535 = vmatpush1.bf16.msra.mxu0 %v22141_v48 }
 0xb0a   : > { %14536 = vmatprep.subr.bf16.mxu0 %v22117_v58 }
 0xb0c   : > { %8898 = vmatmul.mubr.f32.gmra.mrb[56].mxu0 %v19874_v43  ;;  %v22175_v43 = vand.u32 4294901760, %v19525_v32  ;;  %v22181_v32 = vand.u32 4294901760, %v19922_v46 }
 0xb0d   : > { %8904 = vmatprep.mubr.f32.mxu0 %v22142_v37  ;;  %14538 = vmatpush1.bf16.msra.mxu0 %v22143_v16 }
 0xb0e   : > { %14539 = vmatprep.subr.bf16.mxu0 %v22117_v58 }
 0xb10   : > { %8907 = vmatmul.mubr.f32.gmra.mrb[58].mxu0 %v19878_v36 }
 0xb11   : > { %8913 = vmatprep.mubr.f32.mxu0 %v22144_v30  ;;  %14541 = vmatpush1.bf16.msra.mxu0 %v22145_v8 }
 0xb12   : > { %14542 = vmatprep.subr.bf16.mxu0 %v22117_v58 }
 0xb14   : > { %8916 = vmatmul.mubr.f32.gmra.mrb[60].mxu0 %v19907_v23 }
 0xb15   : > { %8922 = vmatprep.mubr.f32.mxu0 %v19890_v0  ;;  %14544 = vmatpush1.bf16.msra.mxu0 %v22146_v61  ;;  %v22152_v61 = vand.u32 4294901760, %v19457_v45  ;;  %v22158_v45 = vand.u32 4294901760, %v19771_v6  ;;  %v22164_v6 = vand.u32 4294901760, %v19473_v53  ;;  %v22170_v53 = vand.u32 4294901760, %v22142_v37 }
 0xb16   : > { %14545 = vmatprep.subr.bf16.mxu0 %v22117_v58  ;;  %v22176_v37 = vand.u32 4294901760, %v19527_v12  ;;  %v22182_v12 = vand.u32 4294901760, %v19575_v31  ;;  %v22188_v31 = vld [vmem:[#allocation33_spill] sm:$0xff] }
 0xb17   : > { %v14555_v35 = vpack.c.bf16 %v22152_v61, %v22151_v7 }
 0xb18   : > { %8925 = vmatmul.mubr.f32.gmra.mrb[62].mxu0 %v19922_v46  ;;  %v14573_v61 = vpack.c.bf16 %v22176_v37, %v22175_v43 }
 0xb19   : > { %14547 = vmatpush1.bf16.msra.mxu0 %v22147_v41  ;;  %9017 = vmatprep.mubr.f32.mxu0 %v22148_v24  ;;  %v22153_v41 = vand.u32 4294901760, %v19776_v17  ;;  %v22155_v24 = vand.u32 4294901760, %v19459_v60  ;;  %v22159_v17 = vand.u32 4294901760, %v19463_v52  ;;  %v22161_v60 = vand.u32 4294901760, %v19821_v56 }
 0xb1a   : > { %14548 = vmatprep.subr.bf16.mxu0 %v22117_v58  ;;  %v22165_v52 = vand.u32 4294901760, %v22139_v50  ;;  %v22167_v56 = vand.u32 4294901760, %v19493_v20  ;;  %v22172_v50 = vand.u32 4294901760, %v19511_v11  ;;  %v22173_v20 = vand.u32 4294901760, %v19878_v36 }
 0xb1b   : > { %v14561_v7 = vpack.c.bf16 %v22160_v44, %v22159_v17  ;;  %v22178_v11 = vand.u32 4294901760, %v19890_v0  ;;  %v22179_v36 = vand.u32 4294901760, %v19545_v57  ;;  %v22184_v57 = vand.u32 4294901760, %v19592_v27  ;;  %v22190_v27 = vld [vmem:[#allocation32_spill] sm:$0xff] }
 0xb1d   : > { %14550 = vmatpush1.bf16.msra.mxu0 %v22149_v4  ;;  %v22156_v4 = vand.u32 4294901760, %v19461_v26  ;;  %v22162_v26 = vand.u32 4294901760, %v22137_v55  ;;  %v22171_v55 = vand.u32 4294901760, %v19509_v33  ;;  %v22177_v33 = vand.u32 4294901760, %v19907_v23 }
 0xb1e   : > { %14551 = vmatprep.subr.bf16.mxu0 %v22117_v58  ;;  %v22183_v23 = vand.u32 4294901760, %v19577_v63  ;;  %v22189_v63 = vld [vmem:[#allocation61_spill] sm:$0xff] }
 0xb1f   : > { %v14558_v5 = vpack.c.bf16 %v22156_v4, %v22155_v24  ;;  %v14564_v4 = vpack.c.bf16 %v22164_v6, %v22163_v21  ;;  %v14570_v39 = vpack.c.bf16 %v22172_v50, %v22171_v55 }
 0xb20   : > { %v14579_v0 = vpack.c.bf16 %v22183_v23, %v22182_v12 }
 0xb21   : > { %14553 = vmatpush1.bf16.msra.mxu0 %v22150_v34 }
 0xb22   : > { %14554 = vmatprep.subr.bf16.mxu0 %v22117_v58 }
 0xb24   : > { %9021 = vmatmul.mubr.f32.vlgmr.msra.gmra.mrb[48].mxu0 %v22153_v41 }
 0xb25   : > { %9028 = vmatprep.mubr.f32.mxu0 %v22154_v29  ;;  %14556 = vmatpush1.bf16.msra.mxu0 %v14555_v35 }
 0xb26   : > { %14557 = vmatprep.subr.bf16.mxu0 %v22117_v58 }
 0xb28   : > { %9032 = vmatmul.mubr.f32.gmra.mrb[50].mxu0 %v22157_v51 }
 0xb29   : > { %9039 = vmatprep.mubr.f32.mxu0 %v22158_v45  ;;  %14559 = vmatpush1.bf16.msra.mxu0 %v14558_v5  ;;  %v22168_v5 = vand.u32 4294901760, %v19495_v59  ;;  %v22174_v59 = vand.u32 4294901760, %v22144_v30  ;;  %v22180_v30 = vand.u32 4294901760, %v19547_v47  ;;  %v22185_v47 = vand.u32 4294901760, %v19615_v38  ;;  %v22191_v38 = vld [vmem:[#allocation39_spill] sm:$0xff] }
 0xb2a   : > { %14560 = vmatprep.subr.bf16.mxu0 %v22117_v58 }
 0xb2b   : > { %v14567_v35 = vpack.c.bf16 %v22168_v5, %v22167_v56  ;;  %v14576_v41 = vpack.c.bf16 %v22180_v30, %v22179_v36  ;;  %v14582_v29 = vpack.c.bf16 %v22185_v47, %v22184_v57 }
 0xb2c   : > { %9043 = vmatmul.mubr.f32.gmra.mrb[52].mxu0 %v22161_v60 }
 0xb2d   : > { %9050 = vmatprep.mubr.f32.mxu0 %v22162_v26  ;;  %14562 = vmatpush1.bf16.msra.mxu0 %v14561_v7 }
 0xb2e   : > { %14563 = vmatprep.subr.bf16.mxu0 %v22117_v58 }
 0xb30   : > { %9054 = vmatmul.mubr.f32.gmra.mrb[54].mxu0 %v22165_v52 }
 0xb31   : > { %9061 = vmatprep.mubr.f32.mxu0 %v22166_v22  ;;  %14565 = vmatpush1.bf16.msra.mxu0 %v14564_v4 }
 0xb32   : > { %14566 = vmatprep.subr.bf16.mxu0 %v22117_v58 }
 0xb34   : > { %9065 = vmatmul.mubr.f32.gmra.mrb[56].mxu0 %v22169_v25 }
 0xb35   : > { %9072 = vmatprep.mubr.f32.mxu0 %v22170_v53  ;;  %14568 = vmatpush1.bf16.msra.mxu0 %v14567_v35  ;;  %v9536_v53 = vld [vmem:[%s21139_s11 + $0x8] sm:$0xff] }
 0xb36   : > { %14569 = vmatprep.subr.bf16.mxu0 %v22117_v58 }
 0xb38   : > { %9076 = vmatmul.mubr.f32.gmra.mrb[58].mxu0 %v22173_v20 }
 0xb39   : > { %9083 = vmatprep.mubr.f32.mxu0 %v22174_v59  ;;  %14571 = vmatpush1.bf16.msra.mxu0 %v14570_v39 }
 0xb3a   : > { %14572 = vmatprep.subr.bf16.mxu0 %v22117_v58 }
 0xb3c   : > { %9087 = vmatmul.mubr.f32.gmra.mrb[60].mxu0 %v22177_v33  ;;  %v9542_v33 = vsel %vm9537_vm7, %v9536_v53, 0 }
 0xb3d   : > { %9094 = vmatprep.mubr.f32.mxu0 %v22178_v11  ;;  %14574 = vmatpush1.bf16.msra.mxu0 %v14573_v61 }
 0xb3e   : > { %14575 = vmatprep.subr.bf16.mxu0 %v22117_v58 }
 0xb40   : > { %9098 = vmatmul.mubr.f32.gmra.mrb[62].mxu0 %v22181_v32 }
 0xb41   : > { %14577 = vmatpush1.bf16.msra.mxu0 %v14576_v41  ;;  %9228 = vmatprep.mubr.f32.mxu0 %v19571_v1 }
 0xb42   : > { %14578 = vmatprep.subr.bf16.mxu0 %v22117_v58 }
 0xb45   : > { %14580 = vmatpush1.bf16.msra.mxu0 %v14579_v0 }
 0xb46   : > { %14581 = vmatprep.subr.bf16.mxu0 %v22117_v58 }
 0xb49   : > { %14583 = vmatpush1.bf16.msra.mxu0 %v14582_v29 }
 0xb4a   : > { %14584 = vmatprep.subr.bf16.mxu0 %v22117_v58 }
 0xb4c   : > { %9230 = vmatmul.mubr.f32.vlgmr.msra.gmra.mrb[48].mxu0 %v19763_v14 }
 0xb4d   : > { %9235 = vmatprep.mubr.f32.mxu0 %v19754_v19  ;;  %14586 = vmatpush1.bf16.msra.mxu0 %v19453_v40  ;;  %v22186_v40 = vld [vmem:[#allocation64_spill] sm:$0xff] }
 0xb4e   : > { %14587 = vmatprep.subr.bf16.mxu0 %v22117_v58 }
 0xb50   : > { %9237 = vmatmul.mubr.f32.gmra.mrb[50].mxu0 %v19768_v49 }
 0xb51   : > { %9242 = vmatprep.mubr.f32.mxu0 %v19760_v10  ;;  %14589 = vmatpush1.bf16.msra.mxu0 %v19466_v15  ;;  %v22187_v15 = vld [vmem:[#allocation38_spill] sm:$0xff] }
 0xb52   : > { %14590 = vmatprep.subr.bf16.mxu0 %v22117_v58 }
 0xb54   : > { %9244 = vmatmul.mubr.f32.gmra.mrb[52].mxu0 %v19809_v3 }
 0xb55   : > { %9249 = vmatprep.mubr.f32.mxu0 %v19783_v9  ;;  %14592 = vmatpush1.bf16.msra.mxu0 %v22138_v18 }
 0xb56   : > { %14593 = vmatprep.subr.bf16.mxu0 %v22117_v58 }
 0xb58   : > { %9251 = vmatmul.mubr.f32.gmra.mrb[54].mxu0 %v19817_v13 }
 0xb59   : > { %9256 = vmatprep.mubr.f32.mxu0 %v19798_v54  ;;  %14595 = vmatpush1.bf16.msra.mxu0 %v22141_v48 }
 0xb5a   : > { %14596 = vmatprep.subr.bf16.mxu0 %v22117_v58 }
 0xb5c   : > { %9258 = vmatmul.mubr.f32.gmra.mrb[56].mxu0 %v19862_v28 }
 0xb5d   : > { %9263 = vmatprep.mubr.f32.mxu0 %v19837_v62  ;;  %14598 = vmatpush1.bf16.msra.mxu0 %v22143_v16 }
 0xb5e   : > { %14599 = vmatprep.subr.bf16.mxu0 %v22117_v58 }
 0xb60   : > { %9265 = vmatmul.mubr.f32.gmra.mrb[58].mxu0 %v19866_v42 }
 0xb61   : > { %9270 = vmatprep.mubr.f32.mxu0 %v19856_v2  ;;  %14601 = vmatpush1.bf16.msra.mxu0 %v22145_v8 }
 0xb62   : > { %14602 = vmatprep.subr.bf16.mxu0 %v22117_v58 }
 0xb64   : > { %9272 = vmatmul.mubr.f32.gmra.mrb[60].mxu0 %v22186_v40 }
 0xb65   : > { %9277 = vmatprep.mubr.f32.mxu0 %v22187_v15  ;;  %14604 = vmatpush1.bf16.msra.mxu0 %v22188_v31 }
 0xb66   : > { %14605 = vmatprep.subr.bf16.mxu0 %v22117_v58 }
 0xb68   : > { %9279 = vmatmul.mubr.f32.gmra.mrb[62].mxu0 %v22189_v63 }
 0xb69   : > { %14607 = vmatpush1.bf16.msra.mxu0 %v22190_v27  ;;  %9369 = vmatprep.mubr.f32.mxu0 %v19571_v1  ;;  %v9535_v1 = vld [vmem:[%s21139_s11] sm:$0xff]  ;;  %v20197_v27 = vand.u32 4294901760, %v9542_v33 }
 0xb6a   : > { %14608 = vmatprep.subr.bf16.mxu0 %v22117_v58 }
 0xb6d   : > { %14610 = vmatpush1.bf16.msra.mxu0 %v22191_v38 }
 0xb6e   : > { %14611 = vmatprep.subr.bf16.mxu0 %v22117_v58 }
 0xb71   : > { %14613 = vmatpush1.bf16.msra.mxu0 %v22150_v34 }
 0xb74   : > { %9371 = vmatmul.mubr.f32.vlgmr.msra.gmra.mrb[48].mxu0 %v19763_v14 }
 0xb75   : > { %9376 = vmatprep.mubr.f32.mxu0 %v19754_v19  ;;  %v9539_v19 = vsel %vm9537_vm7, %v9535_v1, 0 }
 0xb78   : > { %9378 = vmatmul.mubr.f32.gmra.mrb[50].mxu0 %v19768_v49 }
 0xb79   : > { %9383 = vmatprep.mubr.f32.mxu0 %v19760_v10  ;;  %v20175_v10 = vld [vmem:[%s21134_s6] ss:$0 sm:$0xff] }
 0xb7c   : > { %9385 = vmatmul.mubr.f32.gmra.mrb[52].mxu0 %v19809_v3 }
 0xb7d   : > { %9390 = vmatprep.mubr.f32.mxu0 %v19783_v9 }
 0xb80   : > { %9392 = vmatmul.mubr.f32.gmra.mrb[54].mxu0 %v19817_v13 }
 0xb81   : > { %9397 = vmatprep.mubr.f32.mxu0 %v19798_v54  ;;  %v20162_v54 = vand.u32 4294901760, %v9539_v19 }
 0xb83   : > { %13689 = vmatprep.mubr.f32.mxu1 %v20162_v54  ;;  %v20166_v9 = vsub.f32 %v9539_v19, %v20162_v54 }
 0xb84   : > { %9399 = vmatmul.mubr.f32.gmra.mrb[56].mxu0 %v19862_v28 }
 0xb85   : > { %9404 = vmatprep.mubr.f32.mxu0 %v19837_v62 }
 0xb88   : > { %9406 = vmatmul.mubr.f32.gmra.mrb[58].mxu0 %v19866_v42 }
 0xb89   : > { %9411 = vmatprep.mubr.f32.mxu0 %v19856_v2  ;;  %v9622_v2 = vand.u32 4294901760, %v20166_v9 }
 0xb8b   : > { %v9623_v49 = vsub.f32 %v20166_v9, %v9622_v2 }
 0xb8c   : > { %9413 = vmatmul.mubr.f32.gmra.mrb[60].mxu0 %v22186_v40 }
 0xb8d   : > { %9418 = vmatprep.mubr.f32.mxu0 %v22187_v15  ;;  %v9624_v14 = vand.u32 4294901760, %v9623_v49 }
 0xb90   : > { %9420 = vmatmul.mubr.f32.gmra.mrb[62].mxu0 %v22189_v63 }
 0xb91   : > { %13670 = vmatprep.mubr.f32.mxu0 %v9624_v14 }
 0xc47   : > { %v9372_v3 = vpop.f32.mrb[48].mxu0 }
 0xc48   : > { %v15082_v13 = vadd.f32 %v20175_v10, %v9372_v3  ;;  %v9374_v62 = vpop.f32.mrb[49].mxu0 }
 0xc4a   : > { %v9425_v28 = vmax.f32 %v15082_v13, 0.0 }
 0xc4b   : > { %v9379_v42 = vpop.f32.mrb[50].mxu0 }
 0xc4c   : > { %v15083_v34 = vadd.f32 %v20175_v10, %v9379_v42  ;;  %v9381_v46 = vpop.f32.mrb[51].mxu0  ;;  %v9441_v48 = vrot.slane %v9425_v28, 1  ;;  %v9473_v16 = vrot.slane %v9425_v28, 2  ;;  %v9504_v8 = vrot.slane %v9425_v28, 3 }
 0xc4e   : > { %v9426_v18 = vmax.f32 %v15083_v34, 0.0 }
 0xc4f   : > { %v9386_v24 = vpop.f32.mrb[52].mxu0 }
 0xc50   : > { %v9442_v51 = vrot.slane %v9426_v18, 1  ;;  %v9474_v45 = vrot.slane %v9426_v18, 2  ;;  %v9505_v17 = vrot.slane %v9426_v18, 3  ;;  %v15084_v44 = vadd.f32 %v20175_v10, %v9386_v24  ;;  %v9388_v7 = vpop.f32.mrb[53].mxu0 }
 0xc52   : > { %v9443_v60 = vsel %vm3353_vm9, %v9441_v48, %v9442_v51  ;;  %v9475_v26 = vsel %vm9472_vm8, %v9473_v16, %v9474_v45  ;;  %v9506_v21 = vsel %vm1506_vm2, %v9504_v8, %v9505_v17  ;;  %v9427_v6 = vmax.f32 %v15084_v44, 0.0 }
 0xc53   : > { %v9464_v4 = vmax.f32 %v9425_v28, %v9443_v60  ;;  %v9393_v52 = vpop.f32.mrb[54].mxu0  ;;  %v20202_v28 = vsub.f32 %v9542_v33, %v20197_v27 }
 0xc54   : > { %v9444_v22 = vrot.slane %v9427_v6, 1  ;;  %v9476_v56 = vrot.slane %v9427_v6, 2  ;;  %v9507_v5 = vrot.slane %v9427_v6, 3  ;;  %v15085_v35 = vadd.f32 %v20175_v10, %v9393_v52  ;;  %v9395_v25 = vpop.f32.mrb[55].mxu0 }
 0xc55   : > { %v9496_v55 = vmax.f32 %v9464_v4, %v9475_v26 }
 0xc56   : > { %v9445_v50 = vsel %vm3353_vm9, %v9442_v51, %v9444_v22  ;;  %v9477_v39 = vsel %vm9472_vm8, %v9474_v45, %v9476_v56  ;;  %v9508_v20 = vsel %vm1506_vm2, %v9505_v17, %v9507_v5  ;;  %v9428_v59 = vmax.f32 %v15085_v35, 0.0 }
 0xc57   : > { %v9527_v43 = vmax.f32 %v9496_v55, %v9506_v21  ;;  %v9465_v37 = vmax.f32 %v9426_v18, %v9445_v50  ;;  %v9400_v61 = vpop.f32.mrb[56].mxu0 }
 0xc58   : > { %v9446_v11 = vrot.slane %v9428_v59, 1  ;;  %v9478_v36 = vrot.slane %v9428_v59, 2  ;;  %v9509_v30 = vrot.slane %v9428_v59, 3  ;;  %v15086_v41 = vadd.f32 %v20175_v10, %v9400_v61  ;;  %v9402_v32 = vpop.f32.mrb[57].mxu0 }
 0xc59   : > { %v9548_v12 = vand.u32 4294901760, %v9527_v43  ;;  %v9497_v23 = vmax.f32 %v9465_v37, %v9477_v39 }
 0xc5a   : > { %v9447_v0 = vsel %vm3353_vm9, %v9444_v22, %v9446_v11  ;;  %v9479_v57 = vsel %vm9472_vm8, %v9476_v56, %v9478_v36  ;;  %v9510_v47 = vsel %vm1506_vm2, %v9507_v5, %v9509_v30  ;;  %v9429_v29 = vmax.f32 %v15086_v41, 0.0 }
 0xc5b   : > { %v9528_v40 = vmax.f32 %v9497_v23, %v9508_v20  ;;  %v9466_v15 = vmax.f32 %v9427_v6, %v9447_v0  ;;  %v9407_v31 = vpop.f32.mrb[58].mxu0  ;;  %v20195_v63 = vsub.f32 %v9527_v43, %v9548_v12 }
 0xc5c   : > { %v9448_v38 = vrot.slane %v9429_v29, 1  ;;  %v9480_v1 = vrot.slane %v9429_v29, 2  ;;  %v9511_v19 = vrot.slane %v9429_v29, 3  ;;  %v15087_v49 = vadd.f32 %v20175_v10, %v9407_v31  ;;  %v9409_v14 = vpop.f32.mrb[59].mxu0 }
 0xc5d   : > { %v9551_v3 = vand.u32 4294901760, %v9528_v40  ;;  %v9498_v13 = vmax.f32 %v9466_v15, %v9479_v57  ;;  %v9643_v62 = vand.u32 4294901760, %v20195_v63 }
 0xc5e   : > { %v9449_v42 = vsel %vm3353_vm9, %v9446_v11, %v9448_v38  ;;  %v9481_v34 = vsel %vm9472_vm8, %v9478_v36, %v9480_v1  ;;  %v9512_v46 = vsel %vm1506_vm2, %v9509_v30, %v9511_v19  ;;  %v9430_v18 = vmax.f32 %v15087_v49, 0.0 }
 0xc5f   : > { %v9529_v48 = vmax.f32 %v9498_v13, %v9510_v47  ;;  %v9467_v16 = vmax.f32 %v9428_v59, %v9449_v42  ;;  %v9414_v8 = vpop.f32.mrb[60].mxu0  ;;  %v20207_v24 = vpack.c.bf16 %v9551_v3, %v9548_v12  ;;  %v9644_v51 = vsub.f32 %v20195_v63, %v9643_v62 }
 0xc60   : > { %v9450_v45 = vrot.slane %v9430_v18, 1  ;;  %v9482_v17 = vrot.slane %v9430_v18, 2  ;;  %v9513_v44 = vrot.slane %v9430_v18, 3  ;;  %v15088_v7 = vadd.f32 %v20175_v10, %v9414_v8  ;;  %v9416_v60 = vpop.f32.mrb[61].mxu0 }
 0xc61   : > { %v9554_v26 = vand.u32 4294901760, %v9529_v48  ;;  %v9499_v21 = vmax.f32 %v9467_v16, %v9481_v34  ;;  %14615 = vmatprep.subr.bf16.mxu0 %v20207_v24  ;;  %v9645_v6 = vand.u32 4294901760, %v9644_v51  ;;  %v9649_v4 = vsub.f32 %v9528_v40, %v9551_v3 }
 0xc62   : > { %v9451_v52 = vsel %vm3353_vm9, %v9448_v38, %v9450_v45  ;;  %v9483_v22 = vsel %vm9472_vm8, %v9480_v1, %v9482_v17  ;;  %v9514_v56 = vsel %vm1506_vm2, %v9511_v19, %v9513_v44  ;;  %v9431_v5 = vmax.f32 %v15088_v7, 0.0  ;;  %14617 = vmatpush3.bf16.msra.mxu0 %v20207_v24 }
 0xc63   : > { %v9530_v35 = vmax.f32 %v9499_v21, %v9512_v46  ;;  %v9468_v25 = vmax.f32 %v9429_v29, %v9451_v52  ;;  %v9421_v53 = vpop.f32.mrb[62].mxu0  ;;  %v9650_v55 = vand.u32 4294901760, %v9649_v4  ;;  %v9656_v50 = vsub.f32 %v9529_v48, %v9554_v26 }
 0xc64   : > { %v9452_v39 = vrot.slane %v9431_v5, 1  ;;  %v9484_v20 = vrot.slane %v9431_v5, 2  ;;  %v9515_v59 = vrot.slane %v9431_v5, 3  ;;  %v15089_v43 = vadd.f32 %v20175_v10, %v9421_v53  ;;  %v9423_v37 = vpop.f32.mrb[63].mxu0 }
 0xc65   : > { %v9557_v61 = vand.u32 4294901760, %v9530_v35  ;;  %v9500_v33 = vmax.f32 %v9468_v25, %v9483_v22  ;;  %v9651_v11 = vsub.f32 %v9649_v4, %v9650_v55  ;;  %v9657_v36 = vand.u32 4294901760, %v9656_v50 }
 0xc66   : > { %v9453_v30 = vsel %vm3353_vm9, %v9450_v45, %v9452_v39  ;;  %v9485_v41 = vsel %vm9472_vm8, %v9482_v17, %v9484_v20  ;;  %v9516_v32 = vsel %vm1506_vm2, %v9513_v44, %v9515_v59  ;;  %v9432_v12 = vmax.f32 %v15089_v43, 0.0 }
 0xc67   : > { %v9531_v23 = vmax.f32 %v9500_v33, %v9514_v56  ;;  %v9469_v0 = vmax.f32 %v9430_v18, %v9453_v30  ;;  %v20222_v57 = vpack.c.bf16 %v9557_v61, %v9554_v26  ;;  %v9652_v47 = vand.u32 4294901760, %v9651_v11 }
 0xc68   : > { %v9454_v29 = vrot.slane %v9432_v12, 1  ;;  %v9486_v40 = vrot.slane %v9432_v12, 2  ;;  %v9517_v10 = vrot.slane %v9432_v12, 3  ;;  %v9658_v15 = vsub.f32 %v9656_v50, %v9657_v36 }
 0xc69   : > { %v9560_v31 = vand.u32 4294901760, %v9531_v23  ;;  %v9501_v38 = vmax.f32 %v9469_v0, %v9485_v41  ;;  %14619 = vmatprep.subr.bf16.mxu0 %v20222_v57  ;;  %v14630_v1 = vpack.c.bf16 %v9652_v47, %v9645_v6  ;;  %v9663_v19 = vsub.f32 %v9530_v35, %v9557_v61 }
 0xc6a   : > { %v9455_v49 = vsel %vm3353_vm9, %v9452_v39, %v9454_v29  ;;  %v9471_v14 = vmax.f32 %v9432_v12, %v9454_v29  ;;  %v9487_v3 = vsel %vm9472_vm8, %v9484_v20, %v9486_v40  ;;  %v9518_v13 = vsel %vm1506_vm2, %v9515_v59, %v9517_v10  ;;  %14621 = vmatpush3.bf16.msra.mxu0 %v20222_v57 }
 0xc6b   : > { %v9532_v42 = vmax.f32 %v9501_v38, %v9516_v32  ;;  %v9470_v34 = vmax.f32 %v9431_v5, %v9455_v49  ;;  %14631 = vmatprep.subr.bf16.mxu1 %v14630_v1  ;;  %v9664_v46 = vand.u32 4294901760, %v9663_v19  ;;  %v9632_v18 = vand.u32 4294901760, %v20202_v28  ;;  %v10164_v49 = vld [vmem:[%s21135_s7 + $0x30] sm:$0xff] }
 0xc6c   : > { %v9503_v48 = vmax.f32 %v9471_v14, %v9486_v40  ;;  %14633 = vmatpush3.bf16.msra.mxu1 %v14630_v1  ;;  %v9670_v16 = vsub.f32 %v9531_v23, %v9560_v31  ;;  %v14646_v8 = vpack.c.bf16 %v9649_v4, %v20195_v63  ;;  %v14650_v51 = vpack.c.bf16 %v9663_v19, %v9656_v50  ;;  %v10165_v14 = vld [vmem:[%s21135_s7 + $0x38] sm:$0xff] }
 0xc6d   : > { %v9563_v45 = vand.u32 4294901760, %v9532_v42  ;;  %v9502_v17 = vmax.f32 %v9470_v34, %v9487_v3  ;;  %v9665_v44 = vsub.f32 %v9663_v19, %v9664_v46  ;;  %v20233_v7 = vpack.c.bf16 %v9650_v55, %v9643_v62  ;;  %v10166_v3 = vld [vmem:[%s21135_s7 + $0x40] sm:$0xff] }
 0xc6e   : > { %v9534_v60 = vmax.f32 %v9503_v48, %v9517_v10  ;;  %v9659_v26 = vand.u32 4294901760, %v9658_v15  ;;  %v9671_v21 = vand.u32 4294901760, %v9670_v16  ;;  %v20235_v6 = vpack.c.bf16 %v9664_v46, %v9657_v36  ;;  %v10162_v15 = vld [vmem:[%s21135_s7 + $0x20] sm:$0xff]  ;;  %v10168_v48 = vld [vmem:[%s21135_s7 + $0x50] sm:$0xff] }
 0xc6f   : > { %v9533_v52 = vmax.f32 %v9502_v17, %v9518_v13  ;;  %v20237_v22 = vpack.c.bf16 %v9563_v45, %v9560_v31  ;;  %v9666_v56 = vand.u32 4294901760, %v9665_v44  ;;  %v9677_v5 = vsub.f32 %v9532_v42, %v9563_v45  ;;  %v10163_v31 = vld [vmem:[%s21135_s7 + $0x28] sm:$0xff]  ;;  %v10170_v17 = vld [vmem:[%s21135_s7 + $0x60] sm:$0xff] }
 0xc70   : > { %v9545_v4 = vsel %vm1506_vm2, %v9534_v60, 0  ;;  %v9672_v35 = vsub.f32 %v9670_v16, %v9671_v21  ;;  %v9633_v25 = vsub.f32 %v20202_v28, %v9632_v18  ;;  %vm10127_vm2 = vcmask 516096  }
 0xc71   : > { %v9566_v63 = vand.u32 4294901760, %v9533_v52  ;;  %v9569_v62 = vand.u32 4294901760, %v9545_v4  ;;  %14623 = vmatprep.subr.bf16.mxu0 %v20237_v22  ;;  %v14634_v53 = vpack.c.bf16 %v9666_v56, %v9659_v26  ;;  %v9678_v55 = vand.u32 4294901760, %v9677_v5  ;;  %v10172_v56 = vld [vmem:[%s21135_s7 + $0x70] sm:$0xff] }
 0xc72   : > { %14625 = vmatpush3.bf16.msra.mxu0 %v20237_v22  ;;  %v14654_v50 = vpack.c.bf16 %v9677_v5, %v9670_v16  ;;  %v9673_v37 = vand.u32 4294901760, %v9672_v35  ;;  %v9634_v61 = vand.u32 4294901760, %v9633_v25  ;;  %v10208_v1 = vand.u32 4294901760, %v10162_v15  ;;  %v10169_v16 = vld [vmem:[%s21135_s7 + $0x58] sm:$0xff] }
 0xc73   : > { %v20245_v39 = vpack.c.bf16 %v9569_v62, %v9566_v63  ;;  %14635 = vmatprep.subr.bf16.mxu1 %v14634_v53  ;;  %v9679_v20 = vsub.f32 %v9677_v5, %v9678_v55  ;;  %v9684_v59 = vsub.f32 %v9533_v52, %v9566_v63  ;;  %v9691_v43 = vsub.f32 %v9545_v4, %v9569_v62  ;;  %v10173_v63 = vld [vmem:[%s21135_s7 + $0x78] sm:$0xff] }
 0xc74   : > { %14637 = vmatpush3.bf16.msra.mxu1 %v14634_v53  ;;  %v14686_v33 = vpack.c.bf16 %v9678_v55, %v9671_v21  ;;  %v10211_v19 = vand.u32 4294901760, %v10163_v31  ;;  %v20332_v45 = vsub.f32 %v10162_v15, %v10208_v1  ;;  %v10217_v60 = vand.u32 4294901760, %v10165_v14 }
 0xc75   : > { %14627 = vmatprep.subr.bf16.mxu0 %v20245_v39  ;;  %v9680_v11 = vand.u32 4294901760, %v9679_v20  ;;  %v9685_v36 = vand.u32 4294901760, %v9684_v59  ;;  %v9692_v30 = vand.u32 4294901760, %v9691_v43  ;;  %v14658_v41 = vpack.c.bf16 %v9691_v43, %v9684_v59 }
 0xc76   : > { %14629 = vmatpush3.bf16.msra.mxu0 %v20245_v39  ;;  %v20338_v44 = vsub.f32 %v10163_v31, %v10211_v19  ;;  %v10220_v26 = vand.u32 4294901760, %v10166_v3  ;;  %v10229_v52 = vand.u32 4294901760, %v10169_v16  ;;  %v20349_v4 = vsub.f32 %v10165_v14, %v10217_v60  ;;  %v10179_v31 = vld [vmem:[%s21135_s7 + $0xa8] sm:$0xff] }
 0xc77   : > { %v14638_v32 = vpack.c.bf16 %v9680_v11, %v9673_v37  ;;  %v9686_v12 = vsub.f32 %v9684_v59, %v9685_v36  ;;  %v9693_v23 = vsub.f32 %v9691_v43, %v9692_v30  ;;  %v14690_v0 = vpack.c.bf16 %v9692_v30, %v9685_v36  ;;  %14926 = vmatprep.subr.bf16.mxu0 %v22117_v58 }
 0xc78   : > { %v20351_v35 = vsub.f32 %v10166_v3, %v10220_v26  ;;  %v10232_v25 = vand.u32 4294901760, %v10170_v17  ;;  %v20356_v62 = vpack.c.bf16 %v10211_v19, %v10208_v1  ;;  %v10238_v59 = vand.u32 4294901760, %v10172_v56  ;;  %v10180_v1 = vld [vmem:[%s21135_s7 + $0xb0] sm:$0xff]  ;;  %v10181_v19 = vld [vmem:[%s21135_s7 + $0xb8] sm:$0xff] }
 0xc79   : > { %14639 = vmatprep.subr.bf16.mxu1 %v14638_v32  ;;  %v9687_v47 = vand.u32 4294901760, %v9686_v12  ;;  %v9694_v29 = vand.u32 4294901760, %v9693_v23  ;;  %13671 = vmatmul.mubr.f32.vlgmr.msra.gmra.mrb[64].mxu0 %v9634_v61  ;;  %v10241_v43 = vand.u32 4294901760, %v10173_v63  ;;  %vm10129_vm9 = vcmask 523264  }
 0xc7a   : > { %14641 = vmatpush3.bf16.msra.mxu1 %v14638_v32  ;;  %v20365_v20 = vsub.f32 %v10170_v17, %v10232_v25  ;;  %v20370_v61 = vsub.f32 %v10172_v56, %v10238_v59  ;;  %v10259_v17 = vand.u32 4294901760, %v10179_v31 }
 0xc7b   : > { %v14642_v40 = vpack.c.bf16 %v9694_v29, %v9687_v47  ;;  %v20391_v23 = vpack.c.bf16 %v10241_v43, %v10238_v59  ;;  %v10175_v47 = vld [vmem:[%s21135_s7 + $0x88] sm:$0xff]  ;;  %v10176_v29 = vld [vmem:[%s21135_s7 + $0x90] sm:$0xff] }
 0xc7d   : > { %14643 = vmatprep.subr.bf16.mxu1 %v14642_v40 }
 0xc7e   : > { %14645 = vmatpush3.bf16.msra.mxu1 %v14642_v40 }
 0xc7f   : > { %14647 = vmatprep.subr.bf16.mxu1 %v14646_v8 }
 0xc81   : > { %13690 = vmatmul.mubr.f32.vlgmr.msra.gmra.mrb[200].mxu1 %v20197_v27 }
 0xc82   : > { %14649 = vmatpush3.bf16.msra.mxu1 %v14646_v8  ;;  %13708 = vmatprep.mubr.f32.mxu1 %v20166_v9  ;;  %v22192_v9 = vmov 0.0  }
 0xc83   : > { %14651 = vmatprep.subr.bf16.mxu1 %v14650_v51  ;;  %10132 = vst.msk [vmem:[#allocation8 + $0x11] sm:$0x1] %vm10127_vm2, %v22192_v9  ;;  %10128 = vst.msk [vmem:[#allocation8] sm:$0x1] %vm10127_vm2, %v22192_v9 }
 0xc86   : > { %14653 = vmatpush3.bf16.msra.mxu1 %v14650_v51 }
 0xc87   : > { %14655 = vmatprep.subr.bf16.mxu1 %v14654_v50 }
 0xc8a   : > { %14657 = vmatpush3.bf16.msra.mxu1 %v14654_v50  ;;  %v20363_v50 = vsub.f32 %v10169_v16, %v10229_v52 }
 0xc8b   : > { %14659 = vmatprep.subr.bf16.mxu1 %v14658_v41 }
 0xc8e   : > { %14661 = vmatpush3.bf16.msra.mxu1 %v14658_v41 }
 0xc8f   : > { %14663 = vmatprep.subr.bf16.mxu1 %v20207_v24 }
 0xc91   : > { %13709 = vmatmul.mubr.f32.vlgmr.msra.gmra.mrb[200].mxu1 %v20202_v28  ;;  %v10160_v28 = vld [vmem:[%s21135_s7 + $0x10] sm:$0xff] }
 0xc92   : > { %14665 = vmatpush3.bf16.msra.mxu1 %v20207_v24  ;;  %13727 = vmatprep.mubr.f32.mxu1 %v9622_v2  ;;  %v10159_v2 = vld [vmem:[%s21135_s7 + $0x8] sm:$0xff]  ;;  %v10202_v10 = vand.u32 4294901760, %v10160_v28 }
 0xc93   : > { %14667 = vmatprep.subr.bf16.mxu1 %v20222_v57 }
 0xc94   : > { %v20317_v46 = vsub.f32 %v10160_v28, %v10202_v10  ;;  %v10177_v28 = vld [vmem:[%s21135_s7 + $0x98] sm:$0xff] }
 0xc95   : > { %v10253_v15 = vand.u32 4294901760, %v10177_v28 }
 0xc96   : > { %14669 = vmatpush3.bf16.msra.mxu1 %v20222_v57 }
 0xc97   : > { %14671 = vmatprep.subr.bf16.mxu1 %v20237_v22  ;;  %v20429_v16 = vsub.f32 %v10177_v28, %v10253_v15 }
 0xc9a   : > { %14673 = vmatpush3.bf16.msra.mxu1 %v20237_v22 }
 0xc9b   : > { %14675 = vmatprep.subr.bf16.mxu1 %v20245_v39 }
 0xc9e   : > { %14677 = vmatpush3.bf16.msra.mxu1 %v20245_v39 }
 0xc9f   : > { %14679 = vmatprep.subr.bf16.mxu1 %v20233_v7 }
 0xca1   : > { %13728 = vmatmul.mubr.f32.vlgmr.msra.gmra.mrb[200].mxu1 %v9632_v18  ;;  %v10167_v18 = vld [vmem:[%s21135_s7 + $0x48] sm:$0xff] }
 0xca2   : > { %14681 = vmatpush3.bf16.msra.mxu1 %v20233_v7  ;;  %13746 = vmatprep.mubr.f32.mxu1 %v20162_v54  ;;  %v10214_v7 = vand.u32 4294901760, %v10164_v49  ;;  %v10223_v21 = vand.u32 4294901760, %v10167_v18 }
 0xca3   : > { %14683 = vmatprep.subr.bf16.mxu1 %v20235_v6 }
 0xca4   : > { %v20347_v5 = vsub.f32 %v10164_v49, %v10214_v7  ;;  %v20358_v53 = vsub.f32 %v10167_v18, %v10223_v21  ;;  %v20375_v11 = vpack.c.bf16 %v10217_v60, %v10214_v7  ;;  %v20379_v36 = vpack.c.bf16 %v10223_v21, %v10220_v26 }
 0xca5   : > { %v10262_v26 = vand.u32 4294901760, %v10180_v1  ;;  %v10265_v21 = vand.u32 4294901760, %v10181_v19 }
 0xca6   : > { %14685 = vmatpush3.bf16.msra.mxu1 %v20235_v6  ;;  %v10226_v6 = vand.u32 4294901760, %v10168_v48 }
 0xca7   : > { %14687 = vmatprep.subr.bf16.mxu1 %v14686_v33 }
 0xca8   : > { %v20360_v55 = vsub.f32 %v10168_v48, %v10226_v6  ;;  %v20383_v30 = vpack.c.bf16 %v10229_v52, %v10226_v6  ;;  %v20438_v6 = vsub.f32 %v10179_v31, %v10259_v17  ;;  %v20440_v52 = vsub.f32 %v10180_v1, %v10262_v26 }
 0xca9   : > { %v21570_v1 = vand.u32 4294901760, %v20332_v45 }
 0xcaa   : > { %14689 = vmatpush3.bf16.msra.mxu1 %v14686_v33  ;;  %v20372_v33 = vsub.f32 %v10173_v63, %v10241_v43 }
 0xcab   : > { %14691 = vmatprep.subr.bf16.mxu1 %v14690_v0 }
 0xcae   : > { %14693 = vmatpush3.bf16.msra.mxu1 %v14690_v0  ;;  %v10174_v0 = vld [vmem:[%s21135_s7 + $0x80] sm:$0xff] }
 0xcaf   : > { %14695 = vmatprep.subr.bf16.mxu1 %v20207_v24 }
 0xcb1   : > { %13747 = vmatmul.mubr.f32.vlgmr.msra.gmra.mrb[200].mxu1 %v20197_v27 }
 0xcb2   : > { %14697 = vmatpush3.bf16.msra.mxu1 %v20207_v24  ;;  %13765 = vmatprep.mubr.f32.mxu1 %v20162_v54  ;;  %v10158_v54 = vld [vmem:[%s21135_s7] sm:$0xff] }
 0xcb3   : > { %14699 = vmatprep.subr.bf16.mxu1 %v20222_v57  ;;  %v10196_v24 = vand.u32 4294901760, %v10158_v54 }
 0xcb5   : > { %v20313_v42 = vsub.f32 %v10158_v54, %v10196_v24  ;;  %v10244_v54 = vand.u32 4294901760, %v10174_v0 }
 0xcb6   : > { %14701 = vmatpush3.bf16.msra.mxu1 %v20222_v57  ;;  %v10199_v57 = vand.u32 4294901760, %v10159_v2 }
 0xcb7   : > { %14703 = vmatprep.subr.bf16.mxu1 %v20237_v22  ;;  %v20422_v3 = vsub.f32 %v10174_v0, %v10244_v54  ;;  %v21580_v0 = vand.u32 4294901760, %v20313_v42 }
 0xcb8   : > { %v20311_v13 = vpack.c.bf16 %v10199_v57, %v10196_v24  ;;  %v20315_v34 = vsub.f32 %v10159_v2, %v10199_v57  ;;  %v10247_v2 = vand.u32 4294901760, %v10175_v47  ;;  %v10250_v24 = vand.u32 4294901760, %v10176_v29  ;;  %v10178_v57 = vld [vmem:[%s21135_s7 + $0xa0] sm:$0xff] }
 0xcba   : > { %14705 = vmatpush3.bf16.msra.mxu1 %v20237_v22  ;;  %v10171_v22 = vld [vmem:[%s21135_s7 + $0x68] sm:$0xff]  ;;  %v20420_v14 = vpack.c.bf16 %v10247_v2, %v10244_v54  ;;  %v20424_v18 = vsub.f32 %v10175_v47, %v10247_v2  ;;  %v20427_v48 = vsub.f32 %v10176_v29, %v10250_v24  ;;  %v20433_v7 = vpack.c.bf16 %v10253_v15, %v10250_v24 }
 0xcbb   : > { %14707 = vmatprep.subr.bf16.mxu1 %v20245_v39  ;;  %v21579_v47 = vand.u32 4294901760, %v20315_v34 }
 0xcbd   : > { %v10325_v54 = vsub.f32 %v20315_v34, %v21579_v47 }
 0xcbe   : > { %14709 = vmatpush3.bf16.msra.mxu1 %v20245_v39  ;;  %v10235_v39 = vand.u32 4294901760, %v10171_v22 }
 0xcbf   : > { %14710 = vmatprep.subr.bf16.mxu1 %v22117_v58 }
 0xcc0   : > { %v20368_v37 = vsub.f32 %v10171_v22, %v10235_v39  ;;  %v20387_v32 = vpack.c.bf16 %v10235_v39, %v10232_v25  ;;  %v20442_v22 = vsub.f32 %v10181_v19, %v10265_v21 }
 0xcc1   : > { %13766 = vmatmul.mubr.f32.vlgmr.msra.gmra.mrb[200].mxu1 %v20197_v27  ;;  %v10161_v27 = vld [vmem:[%s21135_s7 + $0x18] sm:$0xff] }
 0xcc2   : > { %v10205_v38 = vand.u32 4294901760, %v10161_v27  ;;  %14712 = vmatpush1.bf16.msra.mxu1 %v20311_v13 }
 0xcc3   : > { %14713 = vmatprep.subr.bf16.mxu1 %v22117_v58 }
 0xcc4   : > { %v20328_v8 = vpack.c.bf16 %v10205_v38, %v10202_v10  ;;  %v20330_v51 = vsub.f32 %v10161_v27, %v10205_v38  ;;  %v10256_v38 = vand.u32 4294901760, %v10178_v57 }
 0xcc6   : > { %14715 = vmatpush1.bf16.msra.mxu1 %v20328_v8  ;;  %v20435_v60 = vsub.f32 %v10178_v57, %v10256_v38  ;;  %v20445_v56 = vpack.c.bf16 %v10259_v17, %v10256_v38  ;;  %v10326_v57 = vand.u32 4294901760, %v10325_v54 }
 0xcc7   : > { %14716 = vmatprep.subr.bf16.mxu1 %v22117_v58 }
 0xcc8   : > { %22193 = vst [vmem:[#allocation50_spill] sm:$0xff] %v20445_v56 }
 0xcca   : > { %14718 = vmatpush1.bf16.msra.mxu1 %v20356_v62 }
 0xccb   : > { %14719 = vmatprep.subr.bf16.mxu1 %v22117_v58 }
 0xcce   : > { %14721 = vmatpush1.bf16.msra.mxu1 %v20375_v11 }
 0xccf   : > { %14722 = vmatprep.subr.bf16.mxu1 %v22117_v58 }
 0xcd2   : > { %14724 = vmatpush1.bf16.msra.mxu1 %v20379_v36 }
 0xcd3   : > { %14725 = vmatprep.subr.bf16.mxu1 %v22117_v58 }
 0xcd6   : > { %14727 = vmatpush1.bf16.msra.mxu1 %v20383_v30 }
 0xcd7   : > { %14728 = vmatprep.subr.bf16.mxu1 %v22117_v58 }
 0xcda   : > { %14730 = vmatpush1.bf16.msra.mxu1 %v20387_v32 }
 0xcdb   : > { %14731 = vmatprep.subr.bf16.mxu1 %v22117_v58 }
 0xcde   : > { %14733 = vmatpush1.bf16.msra.mxu1 %v20391_v23 }
 0xcdf   : > { %14734 = vmatprep.subr.bf16.mxu1 %v22117_v58 }
 0xce2   : > { %14736 = vmatpush1.bf16.msra.mxu1 %v20420_v14 }
 0xce3   : > { %14737 = vmatprep.subr.bf16.mxu1 %v22117_v58 }
 0xce6   : > { %14739 = vmatpush1.bf16.msra.mxu1 %v20433_v7 }
 0xce7   : > { %14740 = vmatprep.subr.bf16.mxu1 %v22117_v58 }
 0xcea   : > { %14742 = vmatpush1.bf16.msra.mxu1 %v20445_v56 }
 0xceb   : > { %14743 = vmatprep.subr.bf16.mxu1 %v22117_v58 }
 0xd4c   : > { %v13672_v41 = vpop.f32.mrb[64].mxu0 }
 0xd4d   : > { %v9626_v12 = vpop.f32.mrb[65].mxu0 }
 0xd94   : > { %v13767_v40 = vpop.f32.mrb[200].mxu1 }
 0xd95   : > { %v15090_v27 = vadd.f32 %v13767_v40, %v13672_v41  ;;  %v10117_v10 = vpop.f32.mrb[201].mxu1  ;;  %v10318_v40 = vsub.f32 %v20313_v42, %v21580_v0 }
 0xd96   : > { %v15091_v49 = vadd.f32 %v10117_v10, %v9626_v12  ;;  %v20454_v12 = vpack.c.bf16 %v10265_v21, %v10262_v26  ;;  %v21573_v10 = vand.u32 4294901760, %v20330_v51  ;;  %v10346_v21 = vsub.f32 %v20332_v45, %v21570_v1 }
 0xd97   : > { %10131 = vst.msk [vmem:[#allocation8 + $0x9] sm:$0xff] %vm10129_vm9, %v15090_v27  ;;  %v10319_v24 = vand.u32 4294901760, %v10318_v40  ;;  %v21576_v27 = vand.u32 4294901760, %v20317_v46 }
 0xd98   : > { %10130 = vst.msk [vmem:[#allocation8 + $0x1] sm:$0xff] %vm10129_vm9, %v15091_v49  ;;  %22194 = vst [vmem:[#allocation87_spill] sm:$0xff] %v20454_v12  ;;  %14745 = vmatpush1.bf16.msra.mxu1 %v20454_v12  ;;  %v10339_v19 = vsub.f32 %v20330_v51, %v21573_v10  ;;  %v21567_v49 = vand.u32 4294901760, %v20338_v44 }
 0xd99   : > { %14746 = vmatprep.subr.bf16.mxu1 %v22117_v58  ;;  %v20476_v31 = vpack.c.bf16 %v10326_v57, %v10319_v24  ;;  %v10332_v38 = vsub.f32 %v20317_v46, %v21576_v27 }
 0xd9b   : > { %v10333_v26 = vand.u32 4294901760, %v10332_v38 }
 0xd9e   : > { %v10151_v25 = vld [vmem:[#allocation8 + $0xa] sm:$0xff] }
 0xd9f   : > { %v10138_v63 = vld [vmem:[#allocation8 + $0x9] sm:$0xff]  ;;  %10153 = vst.msk [vmem:[#allocation9 + $0x18] sm:$0xff] %vm10129_vm9, %v10151_v25  ;;  %v10137_v59 = vld [vmem:[#allocation8 + $0x1] sm:$0xff]  ;;  %v10340_v25 = vand.u32 4294901760, %v10339_v19 }
 0xda0   : > { %v10150_v39 = vld [vmem:[#allocation8 + $0x2] sm:$0xff]  ;;  %10143 = vrot.lane.b32.xlu1 %v10138_v63, %s22111_s18  ;;  %10141 = vrot.lane.b32.xlu0 %v10137_v59, %s22111_s18  ;;  %v10353_v63 = vsub.f32 %v20338_v44, %v21567_v49  ;;  %v10347_v59 = vand.u32 4294901760, %v10346_v21  ;;  %v21561_v21 = vand.u32 4294901760, %v20351_v35 }
 0xda1   : > { %v10134_v43 = vld [vmem:[#allocation8 + $0x8] sm:$0xff]  ;;  %10152 = vst.msk [vmem:[#allocation9 + $0x8] sm:$0xff] %vm10129_vm9, %v10150_v39  ;;  %v10133_v41 = vld [vmem:[#allocation8] sm:$0xff] }
 0xda2   : > { %10136 = vst.msk [vmem:[#allocation9 + $0x10] sm:$0xff] %vm10129_vm9, %v10134_v43  ;;  %10135 = vst.msk [vmem:[#allocation9] sm:$0xff] %vm10129_vm9, %v10133_v41  ;;  %v21564_v43 = vand.u32 4294901760, %v20347_v5  ;;  %v21560_v41 = vand.u32 4294901760, %v20349_v4  ;;  %v10354_v40 = vand.u32 4294901760, %v10353_v63  ;;  %v10374_v63 = vsub.f32 %v20351_v35, %v21561_v21 }
 0xda4   : > { %v10367_v24 = vsub.f32 %v20349_v4, %v21560_v41  ;;  %v20506_v57 = vpack.c.bf16 %v10354_v40, %v10347_v59  ;;  %v10375_v41 = vand.u32 4294901760, %v10374_v63  ;;  %v21563_v40 = vand.u32 4294901760, %v20360_v55 }
 0xda5   : > { %v21568_v63 = vand.u32 4294901760, %v20368_v37 }
 0xda6   : > { %v10368_v19 = vand.u32 4294901760, %v10367_v24  ;;  %v10388_v24 = vsub.f32 %v20360_v55, %v21563_v40 }
 0xda8   : > { %v10155_v29 = vld [vmem:[#allocation9 + $0x8] sm:$0xff] }
 0xda9   : > { %v10190_v2 = vsel %vm10129_vm9, %v10155_v29, 0  ;;  %v20498_v29 = vpack.c.bf16 %v10340_v25, %v10333_v26  ;;  %v21562_v26 = vand.u32 4294901760, %v20358_v53 }
 0xdaa   : > { %v20469_v28 = vand.u32 4294901760, %v10190_v2 }
 0xdac   : > { %v20474_v15 = vsub.f32 %v10190_v2, %v20469_v28  ;;  %v10360_v2 = vsub.f32 %v20347_v5, %v21564_v43 }
 0xdae   : > { %v21584_v17 = vand.u32 4294901760, %v20474_v15  ;;  %v10361_v38 = vand.u32 4294901760, %v10360_v2 }
 0xdb0   : > { %v10286_v39 = vsub.f32 %v20474_v15, %v21584_v17  ;;  %v20510_v25 = vpack.c.bf16 %v10368_v19, %v10361_v38  ;;  %v10389_v19 = vand.u32 4294901760, %v10388_v24  ;;  %v21571_v24 = vand.u32 4294901760, %v20372_v33 }
 0xdb2   : > { %v10287_v54 = vand.u32 4294901760, %v10286_v39  ;;  %v10381_v39 = vsub.f32 %v20358_v53, %v21562_v26  ;;  %v21566_v26 = vand.u32 4294901760, %v20365_v20 }
 0xdb4   : > { %10288 = vmatprep.mubr.f32.mxu1 %v10287_v54  ;;  %v10382_v59 = vand.u32 4294901760, %v10381_v39  ;;  %v21565_v54 = vand.u32 4294901760, %v20363_v50 }
 0xdb6   : > { %v20520_v2 = vpack.c.bf16 %v10382_v59, %v10375_v41  ;;  %v10395_v38 = vsub.f32 %v20363_v50, %v21565_v54  ;;  %v10402_v41 = vsub.f32 %v20365_v20, %v21566_v26  ;;  %v10409_v59 = vsub.f32 %v20368_v37, %v21568_v63 }
 0xdb7   : > { %v21569_v54 = vand.u32 4294901760, %v20370_v61  ;;  %v21572_v63 = vand.u32 4294901760, %v20422_v3 }
 0xdb8   : > { %v10396_v21 = vand.u32 4294901760, %v10395_v38  ;;  %v10403_v40 = vand.u32 4294901760, %v10402_v41  ;;  %v10410_v43 = vand.u32 4294901760, %v10409_v59  ;;  %v21574_v41 = vand.u32 4294901760, %v20424_v18 }
 0xdba   : > { %v20530_v39 = vpack.c.bf16 %v10396_v21, %v10389_v19  ;;  %v20540_v38 = vpack.c.bf16 %v10410_v43, %v10403_v40  ;;  %v10416_v21 = vsub.f32 %v20370_v61, %v21569_v54  ;;  %v10423_v19 = vsub.f32 %v20372_v33, %v21571_v24 }
 0xdbb   : > { %v10430_v43 = vsub.f32 %v20422_v3, %v21572_v63  ;;  %v10437_v40 = vsub.f32 %v20424_v18, %v21574_v41  ;;  %v21575_v24 = vand.u32 4294901760, %v20427_v48  ;;  %v21578_v41 = vand.u32 4294901760, %v20435_v60 }
 0xdbc   : > { %v10417_v26 = vand.u32 4294901760, %v10416_v21  ;;  %v10424_v49 = vand.u32 4294901760, %v10423_v19  ;;  %v21577_v21 = vand.u32 4294901760, %v20429_v16 }
 0xdbd   : > { %v10431_v54 = vand.u32 4294901760, %v10430_v43  ;;  %v10438_v1 = vand.u32 4294901760, %v10437_v40  ;;  %v21583_v43 = vand.u32 4294901760, %v20438_v6 }
 0xdbe   : > { %v20550_v59 = vpack.c.bf16 %v10424_v49, %v10417_v26  ;;  %v10444_v49 = vsub.f32 %v20427_v48, %v21575_v24  ;;  %v10451_v26 = vsub.f32 %v20429_v16, %v21577_v21  ;;  %v21581_v21 = vand.u32 4294901760, %v20440_v52 }
 0xdbf   : > { %v20560_v19 = vpack.c.bf16 %v10438_v1, %v10431_v54  ;;  %v10458_v1 = vsub.f32 %v20435_v60, %v21578_v41  ;;  %v10465_v54 = vsub.f32 %v20438_v6, %v21583_v43 }
 0xdc0   : > { %v10445_v63 = vand.u32 4294901760, %v10444_v49  ;;  %v10452_v10 = vand.u32 4294901760, %v10451_v26  ;;  %v21582_v49 = vand.u32 4294901760, %v20442_v22 }
 0xdc1   : > { %v10459_v24 = vand.u32 4294901760, %v10458_v1  ;;  %v10466_v27 = vand.u32 4294901760, %v10465_v54 }
 0xdc2   : > { %v20570_v40 = vpack.c.bf16 %v10452_v10, %v10445_v63  ;;  %v10472_v10 = vsub.f32 %v20440_v52, %v21581_v21  ;;  %v10479_v63 = vsub.f32 %v20442_v22, %v21582_v49  ;;  %v10157_v21 = vld [vmem:[#allocation9 + $0x18] sm:$0xff] }
 0xdc3   : > { %v20580_v26 = vpack.c.bf16 %v10466_v27, %v10459_v24 }
 0xdc4   : > { %v10473_v41 = vand.u32 4294901760, %v10472_v10  ;;  %v10480_v47 = vand.u32 4294901760, %v10479_v63 }
 0xdc6   : > { %v14780_v0 = vpack.c.bf16 %v10480_v47, %v10473_v41  ;;  %v10193_v47 = vsel %vm10129_vm9, %v10157_v21, 0 }
 0xdc7   : > { %v20613_v41 = vand.u32 4294901760, %v10193_v47 }
 0xdc9   : > { %v20616_v63 = vsub.f32 %v10193_v47, %v20613_v41 }
 0xdcb   : > { %v10300_v17 = vand.u32 4294901760, %v20616_v63 }
 0xdcd   : > { %v10301_v47 = vsub.f32 %v20616_v63, %v10300_v17 }
 0xdcf   : > { %v10302_v56 = vand.u32 4294901760, %v10301_v47  ;;  %v22211_v47 = vand.u32 4294901760, %v20315_v34 }
 0xe12   : > { %v10144_v10 = vpop.permute.xlu1 %10143  ;;  %v10142_v24 = vpop.permute.xlu0 %10141 }
 0xe13   : > { %10149 = vst.msk [vmem:[#allocation9 + $0x10] sm:$0xff] %vm10147_vm10, %v10144_v10  ;;  %10148 = vst.msk [vmem:[#allocation9] sm:$0xff] %vm10147_vm10, %v10142_v24 }
 0xe1a   : > { %v10156_v49 = vld [vmem:[#allocation9 + $0x10] sm:$0xff]  ;;  %v10154_v27 = vld [vmem:[#allocation9] sm:$0xff] }
 0xe1b   : > { %v20618_v54 = vand.u32 4294901760, %v10156_v49  ;;  %v20620_v43 = vand.u32 4294901760, %v10154_v27 }
 0xe1d   : > { %v20624_v1 = vsub.f32 %v10156_v49, %v20618_v54  ;;  %v20627_v21 = vsub.f32 %v10154_v27, %v20620_v43 }
 0xe1f   : > { %v10291_v24 = vand.u32 4294901760, %v20627_v21  ;;  %v10306_v10 = vand.u32 4294901760, %v20624_v1 }
 0xe21   : > { %v10292_v9 = vsub.f32 %v20627_v21, %v10291_v24  ;;  %v10307_v49 = vsub.f32 %v20624_v1, %v10306_v10 }
 0xe23   : > { %v10293_v12 = vand.u32 4294901760, %v10292_v9  ;;  %v10308_v27 = vand.u32 4294901760, %v10307_v49  ;;  %v22195_v9 = vpack.c.bf16 %v20315_v34, %v20313_v42  ;;  %v22215_v34 = vand.u32 4294901760, %v20338_v44 }
 0xe25   : > { %10294 = vmatmul.mubr.f32.vlgmr.msra.gmra.mrb[202].mxu1 %v10293_v12  ;;  %v22197_v12 = vpack.c.bf16 %v20338_v44, %v20332_v45  ;;  %v22221_v44 = vand.u32 4294901760, %v20363_v50 }
 0xe26   : > { %14748 = vmatpush1.bf16.msra.mxu1 %v20476_v31  ;;  %10303 = vmatprep.mubr.f32.mxu1 %v10302_v56  ;;  %v22196_v56 = vpack.c.bf16 %v20330_v51, %v20317_v46  ;;  %v22199_v31 = vpack.c.bf16 %v20358_v53, %v20351_v35 }
 0xe27   : > { %14749 = vmatprep.subr.bf16.mxu1 %v22117_v58 }
 0xe29   : > { %10309 = vmatmul.mubr.f32.gmra.mrb[204].mxu1 %v10308_v27  ;;  %v22212_v27 = vand.u32 4294901760, %v20317_v46  ;;  %v22216_v46 = vand.u32 4294901760, %v20347_v5 }
 0xe2a   : > { %14751 = vmatpush1.bf16.msra.mxu1 %v20498_v29  ;;  %10499 = vmatprep.mubr.f32.mxu1 %v20469_v28  ;;  %v22200_v29 = vpack.c.bf16 %v20363_v50, %v20360_v55  ;;  %v22227_v50 = vand.u32 4294901760, %v20424_v18 }
 0xe2b   : > { %14752 = vmatprep.subr.bf16.mxu1 %v22117_v58 }
 0xe2e   : > { %14754 = vmatpush1.bf16.msra.mxu1 %v20506_v57  ;;  %v22201_v57 = vpack.c.bf16 %v20368_v37, %v20365_v20 }
 0xe2f   : > { %14755 = vmatprep.subr.bf16.mxu1 %v22117_v58 }
 0xe32   : > { %14757 = vmatpush1.bf16.msra.mxu1 %v20510_v25  ;;  %v22202_v25 = vpack.c.bf16 %v20372_v33, %v20370_v61 }
 0xe33   : > { %14758 = vmatprep.subr.bf16.mxu1 %v22117_v58 }
 0xe36   : > { %14760 = vmatpush1.bf16.msra.mxu1 %v20520_v2  ;;  %v22203_v2 = vpack.c.bf16 %v20424_v18, %v20422_v3  ;;  %v22233_v18 = vand.u32 4294901760, %v20442_v22 }
 0xe37   : > { %14761 = vmatprep.subr.bf16.mxu1 %v22117_v58 }
 0xe3a   : > { %14763 = vmatpush1.bf16.msra.mxu1 %v20530_v39  ;;  %v22204_v39 = vpack.c.bf16 %v20429_v16, %v20427_v48 }
 0xe3b   : > { %14764 = vmatprep.subr.bf16.mxu1 %v22117_v58 }
 0xe3e   : > { %14766 = vmatpush1.bf16.msra.mxu1 %v20540_v38  ;;  %v22205_v38 = vpack.c.bf16 %v20438_v6, %v20435_v60 }
 0xe3f   : > { %14767 = vmatprep.subr.bf16.mxu1 %v22117_v58 }
 0xe42   : > { %14769 = vmatpush1.bf16.msra.mxu1 %v20550_v59  ;;  %v22206_v59 = vpack.c.bf16 %v20442_v22, %v20440_v52  ;;  %v11029_v22 = vld [vmem:[%s21140_s12 + $0x40] sm:$0xff] }
 0xe43   : > { %14770 = vmatprep.subr.bf16.mxu1 %v22117_v58 }
 0xe46   : > { %14772 = vmatpush1.bf16.msra.mxu1 %v20560_v19  ;;  %v22207_v19 = vand.u32 4294901760, %v20474_v15 }
 0xe47   : > { %14773 = vmatprep.subr.bf16.mxu1 %v22117_v58 }
 0xe4a   : > { %14775 = vmatpush1.bf16.msra.mxu1 %v20570_v40  ;;  %v22209_v40 = vld [vmem:[#allocation87_spill] sm:$0xff] }
 0xe4b   : > { %14776 = vmatprep.subr.bf16.mxu1 %v22117_v58 }
 0xe4e   : > { %14778 = vmatpush1.bf16.msra.mxu1 %v20580_v26  ;;  %v22210_v26 = vand.u32 4294901760, %v20313_v42  ;;  %v22214_v42 = vand.u32 4294901760, %v20332_v45  ;;  %v22220_v45 = vand.u32 4294901760, %v20360_v55  ;;  %v22226_v55 = vand.u32 4294901760, %v20422_v3 }
 0xe4f   : > { %14779 = vmatprep.subr.bf16.mxu1 %v22117_v58  ;;  %v22232_v3 = vand.u32 4294901760, %v20440_v52  ;;  %v11028_v52 = vld [vmem:[%s21140_s12 + $0x38] sm:$0xff] }
 0xe50   : > { %v14855_v49 = vpack.c.bf16 %v22211_v47, %v22210_v26  ;;  %v11059_v47 = vand.u32 4294901760, %v11028_v52 }
 0xe52   : > { %14781 = vmatpush1.bf16.msra.mxu1 %v14780_v0  ;;  %v22198_v0 = vpack.c.bf16 %v20349_v4, %v20347_v5  ;;  %v22222_v5 = vand.u32 4294901760, %v20365_v20  ;;  %v22228_v20 = vand.u32 4294901760, %v20427_v48  ;;  %v22234_v48 = vmov 0.0  }
 0xe53   : > { %14782 = vmatprep.subr.bf16.mxu1 %v22117_v58  ;;  %13792 = vmatprep.mubr.msk.f32.mxu0 %vm15619_vm11, %v22234_v48 }
 0xe55   : > { %10501 = vmatmul.mubr.f32.vlgmr.msra.gmra.mrb[202].mxu1 %v20620_v43 }
 0xe56   : > { %10506 = vmatprep.mubr.f32.mxu1 %v20613_v41  ;;  %14784 = vmatpush1.bf16.msra.mxu1 %v22195_v9  ;;  %v22213_v9 = vand.u32 4294901760, %v20330_v51  ;;  %v22217_v51 = vand.u32 4294901760, %v20349_v4  ;;  %v22223_v4 = vand.u32 4294901760, %v20368_v37  ;;  %v22229_v37 = vand.u32 4294901760, %v20429_v16 }
 0xe57   : > { %14785 = vmatprep.subr.bf16.mxu1 %v22117_v58 }
 0xe59   : > { %10508 = vmatmul.mubr.f32.gmra.mrb[204].mxu1 %v20618_v54 }
 0xe5a   : > { %14787 = vmatpush1.bf16.msra.mxu1 %v22196_v56  ;;  %10627 = vmatprep.mubr.f32.mxu1 %v20474_v15  ;;  %v22208_v15 = vld [vmem:[#allocation50_spill] sm:$0xff]  ;;  %v14858_v56 = vpack.c.bf16 %v22213_v9, %v22212_v27 }
 0xe5b   : > { %14788 = vmatprep.subr.bf16.mxu1 %v22117_v58 }
 0xe5e   : > { %14790 = vmatpush1.bf16.msra.mxu1 %v22197_v12  ;;  %v14873_v12 = vpack.c.bf16 %v22223_v4, %v22222_v5 }
 0xe5f   : > { %14791 = vmatprep.subr.bf16.mxu1 %v22117_v58 }
 0xe62   : > { %14793 = vmatpush1.bf16.msra.mxu1 %v22198_v0 }
 0xe63   : > { %14794 = vmatprep.subr.bf16.mxu1 %v22117_v58 }
 0xe66   : > { %14796 = vmatpush1.bf16.msra.mxu1 %v22199_v31  ;;  %v14879_v31 = vpack.c.bf16 %v22227_v50, %v22226_v55 }
 0xe67   : > { %14797 = vmatprep.subr.bf16.mxu1 %v22117_v58 }
 0xe6a   : > { %14799 = vmatpush1.bf16.msra.mxu1 %v22200_v29  ;;  %v14882_v29 = vpack.c.bf16 %v22229_v37, %v22228_v20 }
 0xe6b   : > { %14800 = vmatprep.subr.bf16.mxu1 %v22117_v58 }
 0xe6e   : > { %14802 = vmatpush1.bf16.msra.mxu1 %v22201_v57 }
 0xe6f   : > { %14803 = vmatprep.subr.bf16.mxu1 %v22117_v58 }
 0xe72   : > { %14805 = vmatpush1.bf16.msra.mxu1 %v22202_v25  ;;  %v14888_v25 = vpack.c.bf16 %v22233_v18, %v22232_v3 }
 0xe73   : > { %14806 = vmatprep.subr.bf16.mxu1 %v22117_v58 }
 0xe76   : > { %14808 = vmatpush1.bf16.msra.mxu1 %v22203_v2  ;;  %v11030_v2 = vld [vmem:[%s21140_s12 + $0x48] sm:$0xff] }
 0xe77   : > { %14809 = vmatprep.subr.bf16.mxu1 %v22117_v58  ;;  %v11065_v27 = vand.u32 4294901760, %v11030_v2 }
 0xe7a   : > { %14811 = vmatpush1.bf16.msra.mxu1 %v22204_v39  ;;  %v11031_v39 = vld [vmem:[%s21140_s12 + $0x50] sm:$0xff] }
 0xe7b   : > { %14812 = vmatprep.subr.bf16.mxu1 %v22117_v58  ;;  %v11068_v9 = vand.u32 4294901760, %v11031_v39 }
 0xe7e   : > { %14814 = vmatpush1.bf16.msra.mxu1 %v22205_v38 }
 0xe7f   : > { %14815 = vmatprep.subr.bf16.mxu1 %v22117_v58 }
 0xe82   : > { %14817 = vmatpush1.bf16.msra.mxu1 %v22206_v59 }
 0xe83   : > { %14818 = vmatprep.subr.bf16.mxu1 %v22117_v58 }
 0xe85   : > { %10630 = vmatmul.mubr.f32.vlgmr.msra.gmra.mrb[202].mxu1 %v20627_v21  ;;  %v22219_v21 = vand.u32 4294901760, %v20358_v53  ;;  %v22225_v53 = vand.u32 4294901760, %v20372_v33  ;;  %v22231_v33 = vand.u32 4294901760, %v20438_v6  ;;  %v11027_v6 = vld [vmem:[%s21140_s12 + $0x30] sm:$0xff] }
 0xe86   : > { %10636 = vmatprep.mubr.f32.mxu1 %v20616_v63  ;;  %14820 = vmatpush1.bf16.msra.mxu1 %v20311_v13  ;;  %v14861_v63 = vpack.c.bf16 %v22215_v34, %v22214_v42  ;;  %v11056_v26 = vand.u32 4294901760, %v11027_v6  ;;  %v20900_v42 = vsub.f32 %v11028_v52, %v11059_v47 }
 0xe87   : > { %14821 = vmatprep.subr.bf16.mxu1 %v22117_v58 }
 0xe88   : > { %v20925_v4 = vpack.c.bf16 %v11059_v47, %v11056_v26 }
 0xe89   : > { %10639 = vmatmul.mubr.f32.gmra.mrb[204].mxu1 %v20624_v1  ;;  %v22218_v1 = vand.u32 4294901760, %v20351_v35  ;;  %v22224_v35 = vand.u32 4294901760, %v20370_v61  ;;  %v22230_v61 = vand.u32 4294901760, %v20435_v60 }
 0xe8a   : > { %14823 = vmatpush1.bf16.msra.mxu1 %v20328_v8  ;;  %10735 = vmatprep.mubr.f32.mxu1 %v22207_v19 }
 0xe8b   : > { %14824 = vmatprep.subr.bf16.mxu1 %v22117_v58  ;;  %v14876_v0 = vpack.c.bf16 %v22225_v53, %v22224_v35  ;;  %v14885_v57 = vpack.c.bf16 %v22231_v33, %v22230_v61 }
 0xe8e   : > { %14826 = vmatpush1.bf16.msra.mxu1 %v20356_v62 }
 0xe8f   : > { %14827 = vmatprep.subr.bf16.mxu1 %v22117_v58 }
 0xe92   : > { %14829 = vmatpush1.bf16.msra.mxu1 %v20375_v11 }
 0xe93   : > { %14830 = vmatprep.subr.bf16.mxu1 %v22117_v58 }
 0xe96   : > { %14832 = vmatpush1.bf16.msra.mxu1 %v20379_v36 }
 0xe97   : > { %14833 = vmatprep.subr.bf16.mxu1 %v22117_v58 }
 0xe9a   : > { %14835 = vmatpush1.bf16.msra.mxu1 %v20383_v30 }
 0xe9b   : > { %14836 = vmatprep.subr.bf16.mxu1 %v22117_v58 }
 0xe9e   : > { %14838 = vmatpush1.bf16.msra.mxu1 %v20387_v32 }
 0xe9f   : > { %14839 = vmatprep.subr.bf16.mxu1 %v22117_v58 }
 0xea2   : > { %14841 = vmatpush1.bf16.msra.mxu1 %v20391_v23 }
 0xea3   : > { %14842 = vmatprep.subr.bf16.mxu1 %v22117_v58 }
 0xea6   : > { %14844 = vmatpush1.bf16.msra.mxu1 %v20420_v14 }
 0xea7   : > { %14845 = vmatprep.subr.bf16.mxu1 %v22117_v58 }
 0xeaa   : > { %14847 = vmatpush1.bf16.msra.mxu1 %v20433_v7 }
 0xeab   : > { %14848 = vmatprep.subr.bf16.mxu1 %v22117_v58 }
 0xeae   : > { %14850 = vmatpush1.bf16.msra.mxu1 %v22208_v15 }
 0xeaf   : > { %14851 = vmatprep.subr.bf16.mxu1 %v22117_v58 }
 0xeb2   : > { %14853 = vmatpush1.bf16.msra.mxu1 %v22209_v40 }
 0xeb3   : > { %14854 = vmatprep.subr.bf16.mxu1 %v22117_v58 }
 0xeb5   : > { %10739 = vmatmul.mubr.f32.vlgmr.msra.gmra.mrb[202].mxu1 %v10291_v24  ;;  %v14867_v24 = vpack.c.bf16 %v22219_v21, %v22218_v1 }
 0xeb6   : > { %10746 = vmatprep.mubr.f32.mxu1 %v10300_v17  ;;  %14856 = vmatpush1.bf16.msra.mxu1 %v14855_v49  ;;  %v14864_v17 = vpack.c.bf16 %v22217_v51, %v22216_v46  ;;  %v11062_v49 = vand.u32 4294901760, %v11029_v22  ;;  %v20904_v46 = vsub.f32 %v11030_v2, %v11065_v27  ;;  %v20906_v51 = vsub.f32 %v11031_v39, %v11068_v9 }
 0xeb7   : > { %14857 = vmatprep.subr.bf16.mxu1 %v22117_v58 }
 0xeb8   : > { %v20902_v34 = vsub.f32 %v11029_v22, %v11062_v49  ;;  %v20938_v37 = vpack.c.bf16 %v11065_v27, %v11062_v49  ;;  %v11197_v22 = vand.u32 4294901760, %v20906_v51 }
 0xeb9   : > { %10750 = vmatmul.mubr.f32.gmra.mrb[204].mxu1 %v10306_v10  ;;  %v14870_v10 = vpack.c.bf16 %v22221_v44, %v22220_v45 }
 0xeba   : > { %14859 = vmatpush1.bf16.msra.mxu1 %v14858_v56  ;;  %10892 = vmatprep.mubr.f32.mxu1 %v20469_v28  ;;  %v20898_v56 = vsub.f32 %v11027_v6, %v11056_v26 }
 0xebb   : > { %14860 = vmatprep.subr.bf16.mxu1 %v22117_v58 }
 0xebc   : > { %v11169_v18 = vand.u32 4294901760, %v20898_v56 }
 0xebe   : > { %14862 = vmatpush1.bf16.msra.mxu1 %v14861_v63 }
 0xebf   : > { %14863 = vmatprep.subr.bf16.mxu1 %v22117_v58 }
 0xec2   : > { %14865 = vmatpush1.bf16.msra.mxu1 %v14864_v17 }
 0xec3   : > { %14866 = vmatprep.subr.bf16.mxu1 %v22117_v58 }
 0xec6   : > { %14868 = vmatpush1.bf16.msra.mxu1 %v14867_v24 }
 0xec7   : > { %14869 = vmatprep.subr.bf16.mxu1 %v22117_v58 }
 0xeca   : > { %14871 = vmatpush1.bf16.msra.mxu1 %v14870_v10 }
 0xecb   : > { %14872 = vmatprep.subr.bf16.mxu1 %v22117_v58 }
 0xece   : > { %14874 = vmatpush1.bf16.msra.mxu1 %v14873_v12 }
 0xecf   : > { %14875 = vmatprep.subr.bf16.mxu1 %v22117_v58 }
 0xed2   : > { %14877 = vmatpush1.bf16.msra.mxu1 %v14876_v0 }
 0xed3   : > { %14878 = vmatprep.subr.bf16.mxu1 %v22117_v58 }
 0xed6   : > { %14880 = vmatpush1.bf16.msra.mxu1 %v14879_v31 }
 0xed7   : > { %14881 = vmatprep.subr.bf16.mxu1 %v22117_v58 }
 0xeda   : > { %14883 = vmatpush1.bf16.msra.mxu1 %v14882_v29 }
 0xedb   : > { %14884 = vmatprep.subr.bf16.mxu1 %v22117_v58 }
 0xede   : > { %14886 = vmatpush1.bf16.msra.mxu1 %v14885_v57 }
 0xedf   : > { %14887 = vmatprep.subr.bf16.mxu1 %v22117_v58 }
 0xee2   : > { %14889 = vmatpush1.bf16.msra.mxu1 %v14888_v25  ;;  %v11176_v25 = vand.u32 4294901760, %v20900_v42 }
 0xee3   : > { %14890 = vmatprep.subr.bf16.mxu1 %v22117_v58 }
 0xee5   : > { %10894 = vmatmul.mubr.f32.vlgmr.msra.gmra.mrb[202].mxu1 %v20620_v43 }
 0xee6   : > { %10899 = vmatprep.mubr.f32.mxu1 %v20613_v41  ;;  %14892 = vmatpush1.bf16.msra.mxu1 %v20311_v13  ;;  %v11021_v13 = vld [vmem:[%s21140_s12] sm:$0xff] }
 0xee7   : > { %14893 = vmatprep.subr.bf16.mxu1 %v22117_v58 }
 0xee9   : > { %10901 = vmatmul.mubr.f32.gmra.mrb[204].mxu1 %v20618_v54 }
 0xeea   : > { %14895 = vmatpush1.bf16.msra.mxu1 %v20328_v8  ;;  %10995 = vmatprep.mubr.f32.mxu1 %v20469_v28  ;;  %v11022_v8 = vld [vmem:[%s21140_s12 + $0x8] sm:$0xff] }
 0xeeb   : > { %14896 = vmatprep.subr.bf16.mxu1 %v22117_v58 }
 0xeee   : > { %14898 = vmatpush1.bf16.msra.mxu1 %v20356_v62  ;;  %v11023_v62 = vld [vmem:[%s21140_s12 + $0x10] sm:$0xff] }
 0xeef   : > { %14899 = vmatprep.subr.bf16.mxu1 %v22117_v58 }
 0xef2   : > { %14901 = vmatpush1.bf16.msra.mxu1 %v20375_v11  ;;  %v11038_v11 = vand.u32 4294901760, %v11021_v13 }
 0xef3   : > { %14902 = vmatprep.subr.bf16.mxu1 %v22117_v58 }
 0xef6   : > { %14904 = vmatpush1.bf16.msra.mxu1 %v20379_v36  ;;  %v11041_v36 = vand.u32 4294901760, %v11022_v8 }
 0xef7   : > { %14905 = vmatprep.subr.bf16.mxu1 %v22117_v58 }
 0xef8   : > { %v20871_v28 = vpack.c.bf16 %v11041_v36, %v11038_v11 }
 0xefa   : > { %14907 = vmatpush1.bf16.msra.mxu1 %v20383_v30  ;;  %v11024_v30 = vld [vmem:[%s21140_s12 + $0x18] sm:$0xff]  ;;  %14928 = vmatpush3.bf16.msra.mxu0 %v20871_v28 }
 0xefb   : > { %14908 = vmatprep.subr.bf16.mxu1 %v22117_v58  ;;  %v11047_v16 = vand.u32 4294901760, %v11024_v30  ;;  %14929 = vmatprep.subr.bf16.mxu0 %v22117_v58 }
 0xefd   : > { %v20887_v59 = vsub.f32 %v11024_v30, %v11047_v16 }
 0xefe   : > { %14910 = vmatpush1.bf16.msra.mxu1 %v20387_v32  ;;  %v11044_v32 = vand.u32 4294901760, %v11023_v62 }
 0xeff   : > { %14911 = vmatprep.subr.bf16.mxu1 %v22117_v58  ;;  %v11148_v5 = vand.u32 4294901760, %v20887_v59 }
 0xf00   : > { %v20885_v38 = vpack.c.bf16 %v11047_v16, %v11044_v32 }
 0xf01   : > { %v11149_v0 = vsub.f32 %v20887_v59, %v11148_v5 }
 0xf02   : > { %14913 = vmatpush1.bf16.msra.mxu1 %v20391_v23  ;;  %v11025_v23 = vld [vmem:[%s21140_s12 + $0x20] sm:$0xff]  ;;  %14931 = vmatpush3.bf16.msra.mxu0 %v20885_v38 }
 0xf03   : > { %14914 = vmatprep.subr.bf16.mxu1 %v22117_v58  ;;  %14932 = vmatprep.subr.bf16.mxu0 %v22117_v58  ;;  %v11150_v31 = vand.u32 4294901760, %v11149_v0 }
 0xf06   : > { %14916 = vmatpush1.bf16.msra.mxu1 %v20420_v14  ;;  %v11026_v14 = vld [vmem:[%s21140_s12 + $0x28] sm:$0xff] }
 0xf07   : > { %14917 = vmatprep.subr.bf16.mxu1 %v22117_v58  ;;  %v11053_v60 = vand.u32 4294901760, %v11026_v14 }
 0xf0a   : > { %14919 = vmatpush1.bf16.msra.mxu1 %v20433_v7  ;;  %v11050_v7 = vand.u32 4294901760, %v11025_v23 }
 0xf0b   : > { %14920 = vmatprep.subr.bf16.mxu1 %v22117_v58 }
 0xf0c   : > { %v20889_v19 = vsub.f32 %v11025_v23, %v11050_v7  ;;  %v20909_v17 = vpack.c.bf16 %v11053_v60, %v11050_v7  ;;  %v11183_v23 = vand.u32 4294901760, %v20902_v34 }
 0xf0e   : > { %14922 = vmatpush1.bf16.msra.mxu1 %v22208_v15  ;;  %v11032_v15 = vld [vmem:[%s21140_s12 + $0x58] sm:$0xff]  ;;  %14934 = vmatpush3.bf16.msra.mxu0 %v20909_v17  ;;  %v11155_v20 = vand.u32 4294901760, %v20889_v19  ;;  %v11184_v7 = vsub.f32 %v20902_v34, %v11183_v23 }
 0xf0f   : > { %14923 = vmatprep.subr.bf16.mxu1 %v22117_v58  ;;  %v11071_v63 = vand.u32 4294901760, %v11032_v15  ;;  %14935 = vmatprep.subr.bf16.mxu0 %v22117_v58 }
 0xf10   : > { %v11156_v33 = vsub.f32 %v20889_v19, %v11155_v20  ;;  %v11185_v6 = vand.u32 4294901760, %v11184_v7 }
 0xf11   : > { %v20911_v1 = vsub.f32 %v11032_v15, %v11071_v63  ;;  %v11198_v15 = vsub.f32 %v20906_v51, %v11197_v22 }
 0xf12   : > { %14925 = vmatpush1.bf16.msra.mxu1 %v22209_v40  ;;  %v20895_v40 = vsub.f32 %v11026_v14, %v11053_v60  ;;  %14937 = vmatpush3.bf16.msra.mxu0 %v20925_v4  ;;  %v11157_v3 = vand.u32 4294901760, %v11156_v33  ;;  %v11190_v14 = vand.u32 4294901760, %v20904_v46 }
 0xf13   : > { %14938 = vmatprep.subr.bf16.mxu0 %v22117_v58  ;;  %v11204_v2 = vand.u32 4294901760, %v20911_v1  ;;  %v11199_v47 = vand.u32 4294901760, %v11198_v15 }
 0xf14   : > { %v11162_v29 = vand.u32 4294901760, %v20895_v40  ;;  %v11191_v60 = vsub.f32 %v20904_v46, %v11190_v14 }
 0xf15   : > { %10997 = vmatmul.mubr.f32.vlgmr.msra.gmra.mrb[202].mxu1 %v20620_v43  ;;  %v20873_v43 = vsub.f32 %v11021_v13, %v11038_v11  ;;  %v20953_v13 = vpack.c.bf16 %v11071_v63, %v11068_v9  ;;  %v11177_v11 = vsub.f32 %v20900_v42, %v11176_v25  ;;  %v11205_v26 = vsub.f32 %v20911_v1, %v11204_v2 }
 0xf16   : > { %11002 = vmatprep.mubr.f32.mxu1 %v20613_v41  ;;  %v20877_v41 = vsub.f32 %v11023_v62, %v11044_v32  ;;  %v11163_v57 = vsub.f32 %v20895_v40, %v11162_v29  ;;  %14940 = vmatpush3.bf16.msra.mxu0 %v20938_v37  ;;  %v11170_v62 = vsub.f32 %v20898_v56, %v11169_v18  ;;  %v11192_v52 = vand.u32 4294901760, %v11191_v60 }
 0xf17   : > { %v11127_v21 = vand.u32 4294901760, %v20873_v43  ;;  %14941 = vmatprep.subr.bf16.mxu0 %v22117_v58  ;;  %v11178_v32 = vand.u32 4294901760, %v11177_v11  ;;  %v11206_v49 = vand.u32 4294901760, %v11205_v26 }
 0xf18   : > { %v11141_v10 = vand.u32 4294901760, %v20877_v41  ;;  %v11171_v30 = vand.u32 4294901760, %v11170_v62  ;;  %v14957_v39 = vpack.c.bf16 %v11192_v52, %v11185_v6  ;;  %v14966_v63 = vpack.c.bf16 %v20887_v59, %v20877_v41 }
 0xf19   : > { %11004 = vmatmul.mubr.f32.gmra.mrb[204].mxu1 %v20618_v54  ;;  %v20875_v54 = vsub.f32 %v11022_v8, %v11041_v36  ;;  %v11128_v45 = vsub.f32 %v20873_v43, %v11127_v21  ;;  %v11164_v8 = vand.u32 4294901760, %v11163_v57  ;;  %v14960_v27 = vpack.c.bf16 %v11206_v49, %v11199_v47 }
 0xf1a   : > { %v11142_v53 = vsub.f32 %v20877_v41, %v11141_v10  ;;  %14943 = vmatpush3.bf16.msra.mxu0 %v20953_v13  ;;  %v14954_v16 = vpack.c.bf16 %v11178_v32, %v11171_v30  ;;  %v15011_v41 = vpack.c.bf16 %v11190_v14, %v11183_v23  ;;  %v15014_v59 = vpack.c.bf16 %v11204_v2, %v11197_v22 }
 0xf1b   : > { %v11134_v24 = vand.u32 4294901760, %v20875_v54  ;;  %v11129_v12 = vand.u32 4294901760, %v11128_v45  ;;  %v14951_v36 = vpack.c.bf16 %v11164_v8, %v11157_v3  ;;  %14944 = vmatprep.subr.bf16.mxu0 %v22117_v58  ;;  %v14963_v9 = vpack.c.bf16 %v20875_v54, %v20873_v43 }
 0xf1c   : > { %v11143_v50 = vand.u32 4294901760, %v11142_v53  ;;  %v14969_v45 = vpack.c.bf16 %v20895_v40, %v20889_v19  ;;  %v11705_v53 = vld [vmem:[%s21136_s8] ss:$0 sm:$0xff]  ;;  %v15005_v43 = vpack.c.bf16 %v11162_v29, %v11155_v20 }
 0xf1d   : > { %v11135_v44 = vsub.f32 %v20875_v54, %v11134_v24  ;;  %v15008_v54 = vpack.c.bf16 %v11176_v25, %v11169_v18 }
 0xf1e   : > { %v20942_v61 = vpack.c.bf16 %v11150_v31, %v11143_v50 }
 0xf1f   : > { %v11136_v35 = vand.u32 4294901760, %v11135_v44  ;;  %v14972_v44 = vpack.c.bf16 %v20900_v42, %v20898_v56 }
 0xf21   : > { %v20934_v55 = vpack.c.bf16 %v11136_v35, %v11129_v12  ;;  %v14975_v12 = vpack.c.bf16 %v20904_v46, %v20902_v34  ;;  %v14978_v35 = vpack.c.bf16 %v20911_v1, %v20906_v51 }
 0xfe8   : > { %v10998_v0 = vpop.f32.mrb[202].mxu1 }
 0xfe9   : > { %v15092_v50 = vadd.f32 %v11705_v53, %v10998_v0  ;;  %v11000_v31 = vpop.f32.mrb[203].mxu1 }
 0xfeb   : > { %v11009_v57 = vmax.f32 %v15092_v50, 0.0 }
 0xfec   : > { %v11005_v33 = vpop.f32.mrb[204].mxu1 }
 0xfed   : > { %v15093_v3 = vadd.f32 %v11705_v53, %v11005_v33  ;;  %v11007_v8 = vpop.f32.mrb[205].mxu1  ;;  %v11012_v11 = vsel %vm11011_vm12, %v11009_v57, -inf }
 0xfef   : > { %v11010_v62 = vmax.f32 %v15093_v3, 0.0 }
 0xff1   : > { %v11013_v30 = vsel %vm11011_vm12, %v11010_v62, -inf }
 0xff2   : > { %v11014_v32 = vmax.f32 %v11012_v11, %v11013_v30 }
 0xff4   : > { %v11015_v7 = vrot.slane %v11014_v32, 4 }
 0xff6   : > { %v11016_v60 = vmax.f32 %v11014_v32, %v11015_v7 }
 0xff8   : > { %v11017_v6 = vrot.slane %v11016_v60, 2 }
 0xffa   : > { %v11018_v52 = vmax.f32 %v11016_v60, %v11017_v6 }
 0xffc   : > { %v11019_v15 = vrot.slane %v11018_v52, 1 }
 0xffe   : > { %v11020_v26 = vmax.f32 %v11018_v52, %v11019_v15 }
0x1000   : > { %v11035_v47 = vsel %vm11011_vm12, %v11020_v26, 0 }
0x1001   : > { %v20995_v49 = vand.u32 4294901760, %v11035_v47 }
0x1003   : > { %v11115_v0 = vsub.f32 %v11035_v47, %v20995_v49 }
0x1005   : > { %v11116_v31 = vand.u32 4294901760, %v11115_v0 }
0x1007   : > { %v11117_v50 = vsub.f32 %v11115_v0, %v11116_v31 }
0x1009   : > { %v11118_v53 = vand.u32 4294901760, %v11117_v50 }
0x100b   : > { %13793 = vmatmul.mubr.f32.vlgmr.msra.gmra.mrb[66].mxu0 %v11118_v53 }
0x100c   : > { %14946 = vmatpush3.bf16.msra.mxu0 %v20934_v55  ;;  %13819 = vmatprep.mubr.msk.f32.mxu0 %vm15619_vm11, %v22234_v48  ;;  %v14999_v55 = vpack.c.bf16 %v11134_v24, %v11127_v21 }
0x100d   : > { %14947 = vmatprep.subr.bf16.mxu0 %v22117_v58 }
0x1010   : > { %14949 = vmatpush3.bf16.msra.mxu0 %v20942_v61  ;;  %v15002_v61 = vpack.c.bf16 %v11148_v5, %v11141_v10 }
0x1011   : > { %14950 = vmatprep.subr.bf16.mxu0 %v22117_v58 }
0x1014   : > { %14952 = vmatpush3.bf16.msra.mxu0 %v14951_v36 }
0x1015   : > { %14953 = vmatprep.subr.bf16.mxu0 %v22117_v58 }
0x1018   : > { %14955 = vmatpush3.bf16.msra.mxu0 %v14954_v16 }
0x1019   : > { %14956 = vmatprep.subr.bf16.mxu0 %v22117_v58 }
0x101c   : > { %14958 = vmatpush3.bf16.msra.mxu0 %v14957_v39 }
0x101d   : > { %14959 = vmatprep.subr.bf16.mxu0 %v22117_v58 }
0x1020   : > { %14961 = vmatpush3.bf16.msra.mxu0 %v14960_v27 }
0x1021   : > { %14962 = vmatprep.subr.bf16.mxu0 %v22117_v58 }
0x1023   : > { %13820 = vmatmul.mubr.f32.vlgmr.msra.gmra.mrb[66].mxu0 %v20995_v49 }
0x1024   : > { %14964 = vmatpush3.bf16.msra.mxu0 %v14963_v9  ;;  %13846 = vmatprep.mubr.msk.f32.mxu0 %vm15619_vm11, %v22234_v48 }
0x1025   : > { %14965 = vmatprep.subr.bf16.mxu0 %v22117_v58 }
0x1028   : > { %14967 = vmatpush3.bf16.msra.mxu0 %v14966_v63 }
0x1029   : > { %14968 = vmatprep.subr.bf16.mxu0 %v22117_v58 }
0x102c   : > { %14970 = vmatpush3.bf16.msra.mxu0 %v14969_v45 }
0x102d   : > { %14971 = vmatprep.subr.bf16.mxu0 %v22117_v58 }
0x1030   : > { %14973 = vmatpush3.bf16.msra.mxu0 %v14972_v44 }
0x1031   : > { %14974 = vmatprep.subr.bf16.mxu0 %v22117_v58 }
0x1034   : > { %14976 = vmatpush3.bf16.msra.mxu0 %v14975_v12 }
0x1035   : > { %14977 = vmatprep.subr.bf16.mxu0 %v22117_v58 }
0x1038   : > { %14979 = vmatpush3.bf16.msra.mxu0 %v14978_v35 }
0x1039   : > { %14980 = vmatprep.subr.bf16.mxu0 %v22117_v58 }
0x103b   : > { %13847 = vmatmul.mubr.f32.vlgmr.msra.gmra.mrb[66].mxu0 %v11115_v0 }
0x103c   : > { %14982 = vmatpush3.bf16.msra.mxu0 %v20871_v28  ;;  %13873 = vmatprep.mubr.msk.f32.mxu0 %vm15619_vm11, %v22234_v48 }
0x103d   : > { %14983 = vmatprep.subr.bf16.mxu0 %v22117_v58 }
0x1040   : > { %14985 = vmatpush3.bf16.msra.mxu0 %v20885_v38 }
0x1041   : > { %14986 = vmatprep.subr.bf16.mxu0 %v22117_v58 }
0x1044   : > { %14988 = vmatpush3.bf16.msra.mxu0 %v20909_v17 }
0x1045   : > { %14989 = vmatprep.subr.bf16.mxu0 %v22117_v58 }
0x1048   : > { %14991 = vmatpush3.bf16.msra.mxu0 %v20925_v4 }
0x1049   : > { %14992 = vmatprep.subr.bf16.mxu0 %v22117_v58 }
0x104c   : > { %14994 = vmatpush3.bf16.msra.mxu0 %v20938_v37 }
0x104d   : > { %14995 = vmatprep.subr.bf16.mxu0 %v22117_v58 }
0x1050   : > { %14997 = vmatpush3.bf16.msra.mxu0 %v20953_v13 }
0x1051   : > { %14998 = vmatprep.subr.bf16.mxu0 %v22117_v58 }
0x1053   : > { %13874 = vmatmul.mubr.f32.vlgmr.msra.gmra.mrb[66].mxu0 %v11116_v31 }
0x1054   : > { %15000 = vmatpush3.bf16.msra.mxu0 %v14999_v55  ;;  %13900 = vmatprep.mubr.msk.f32.mxu0 %vm15619_vm11, %v22234_v48 }
0x1055   : > { %15001 = vmatprep.subr.bf16.mxu0 %v22117_v58 }
0x1058   : > { %15003 = vmatpush3.bf16.msra.mxu0 %v15002_v61 }
0x1059   : > { %15004 = vmatprep.subr.bf16.mxu0 %v22117_v58 }
0x105c   : > { %15006 = vmatpush3.bf16.msra.mxu0 %v15005_v43 }
0x105d   : > { %15007 = vmatprep.subr.bf16.mxu0 %v22117_v58 }
0x1060   : > { %15009 = vmatpush3.bf16.msra.mxu0 %v15008_v54 }
0x1061   : > { %15010 = vmatprep.subr.bf16.mxu0 %v22117_v58 }
0x1064   : > { %15012 = vmatpush3.bf16.msra.mxu0 %v15011_v41 }
0x1065   : > { %15013 = vmatprep.subr.bf16.mxu0 %v22117_v58 }
0x1068   : > { %15015 = vmatpush3.bf16.msra.mxu0 %v15014_v59 }
0x1069   : > { %15016 = vmatprep.subr.bf16.mxu0 %v22117_v58 }
0x106b   : > { %13901 = vmatmul.mubr.f32.vlgmr.msra.gmra.mrb[66].mxu0 %v20995_v49 }
0x106c   : > { %15018 = vmatpush3.bf16.msra.mxu0 %v20871_v28  ;;  %13927 = vmatprep.mubr.msk.f32.mxu0 %vm15619_vm11, %v22234_v48  ;;  %v11033_v48 = vld [vmem:[%s21141_s13] sm:$0x1] }
0x106d   : > { %15019 = vmatprep.subr.bf16.mxu0 %v22117_v58 }
0x1070   : > { %15021 = vmatpush3.bf16.msra.mxu0 %v20885_v38 }
0x1071   : > { %15022 = vmatprep.subr.bf16.mxu0 %v22117_v58 }
0x1074   : > { %15024 = vmatpush3.bf16.msra.mxu0 %v20909_v17 }
0x1075   : > { %15025 = vmatprep.subr.bf16.mxu0 %v22117_v58 }
0x1078   : > { %15027 = vmatpush3.bf16.msra.mxu0 %v20925_v4 }
0x1079   : > { %15028 = vmatprep.subr.bf16.mxu0 %v22117_v58 }
0x107c   : > { %15030 = vmatpush3.bf16.msra.mxu0 %v20938_v37 }
0x107d   : > { %15031 = vmatprep.subr.bf16.mxu0 %v22117_v58 }
0x1080   : > { %15033 = vmatpush3.bf16.msra.mxu0 %v20953_v13 }
0x1083   : > { %13928 = vmatmul.mubr.f32.vlgmr.msra.gmra.mrb[66].mxu0 %v20995_v49 }
0x1156   : > { %v11622_v28 = vpop.f32.mrb[66].mxu0 }
0x1157   : > { %v15094_v38 = vadd.f32 %v11622_v28, %v11033_v48  ;;  %v13929_v19 = vpop.f32.mrb[67].mxu0 }
0x1159   : > { %11627 = vst.msk [vmem:[%s459_s20] sm:$0x1] %vm11626_vm13, %v15094_v38 }
0x115a   : > { %15557 = shalt.err (!%p15554_p3)
}
0x115b   : > { %s15558_s28 = scalar_lea.hbm %s21086_s2, 16  ;;  %s15562_s0 = scalar_lea.hbm %s21142_s14, 32 }
0x115c   : > { %p15559_p4 = scmp.ne.s32.totalorder %s21086_s2, %s15558_s28  ;;  %p15563_p9 = scmp.lt.u32.totalorder %s21086_s2, %s21142_s14 }
0x115d   : > { %p15564_p10 = scmp.lt.u32.totalorder %s15562_s0, %s15558_s28  ;;  %p15566_p12 = scmp.lt.u32.totalorder %s15558_s28, %s21086_s2 }
0x115e   : > { %p15560_p7 = pnand %p15559_p4, %p15734_p5 }
0x115f   : > { %p15565_p11 = por %p15564_p10, %p15563_p9 }
0x1160   : > { %p15561_p8 = pneg %p15560_p7 }
0x1161   : > { %p15567_p13 = por %p15566_p12, %p15565_p11 }
0x1163   : > { %p15568_p0 = pnand %p15567_p13, %p15561_p8 }
0x1165   : > { %15571 = shalt.err (!%p15568_p0)
}
0x1166   : > { %15493 = dma.vmem_to_hbm [thread:$0]  (%p15734_p5), %s21088_s25, 16, %s21086_s2, %s11629_s1  }
0x1167 PF: > { %p15499_p1 = scmp.ge.s32.totalorder %s15606_s16, 2  ;;  %s11653_s22 = sand.u32 1, %s15594_s29  }
0x1168   : > { %s11654_s26 = scalar_lea.sflag [#allocation11], %s11653_s22 }
0x1169   : > { %p15496_p2 = pnand %p15499_p1, %p15738_p6 }
0x116b   : > { %15589 = dma.done.wait (!%p15496_p2), %s11654_s26, 16  }
0x116c   : > { %15591 = vsyncadd (!%p15496_p2), %s11654_s26, 4294967280  ;;  %s22235_s21 = sld [smem:[#allocation13_spill]]  ;;  %p24_p3 = scmp.ge.s32.totalorder %s15721_s19, 4  }
0x116d   : > { %s22236_s29 = smov %s15598_s30  ;;  %s22237_s30 = smov %s15602_s15 }
0x116e   : > { %s22239_s16 = smov %s15721_s19  ;;  %26 = sbr.rel (!%p24_p3) target bundleno = 7 (0x7), region = 111 }
0x1172   : > { %s22238_s15 = smov %s22235_s21 }
0x1175   :  { %11658 = vsyncpa [#allocation11], 1 }
0x1176   :  { %11660 = vsyncpa [#allocation11 + $0x1], 1 }

</bundles_post_ra>
